<compile_context>
chip_gen: v6e
topology: v6e:2x2x1
jax: 0.10.0
libtpu: 0.0.40
codegen_flags: <defaults>
</compile_context>

<pallas_src>
from functools import partial
from math import ceil

import jax
import jax.numpy as jnp
from jax.experimental import pallas as pl
from jax.experimental.pallas import tpu as pltpu

# torch-style padding helper used by the Encoder definition.
pad_fn = lambda i, o, k, s: int(ceil((s * (o - 1) - i + k) / s))

_VMEM_LIMIT = 32 * 1024 * 1024  # safe on v7x (64 MiB physical) and v5e/v6e


# ---------------------------------------------------------------------------
# Pallas kernels
# ---------------------------------------------------------------------------
def _mm_bias_act_kernel(p_ref, w_ref, b_ref, o_ref, *, act):
    """(TM, K) @ (K, N) + bias, then optional activation.  f32 accumulation."""
    acc = jnp.dot(p_ref[...], w_ref[...], preferred_element_type=jnp.float32)
    acc = acc + b_ref[...]
    if act == "relu":
        acc = jnp.maximum(acc, 0.0)
    elif act == "sigmoid":
        acc = jax.nn.sigmoid(acc)
    o_ref[...] = acc.astype(o_ref.dtype)


def _dense_dense_kernel(x_ref, we_ref, be_ref, wd_ref, bd_ref, g_ref):
    """Fused encoder Linear + decoder Linear.

    x_ref is the NHWC-flattened (B, 2048) feature map; the packed dense weights
    already contain the torch.flatten(NCHW) permutation, so both matmuls are
    plain contractions and the latent (B, I) stays in VMEM.
    """
    h = jnp.dot(x_ref[...], we_ref[...], preferred_element_type=jnp.float32)
    h = h + be_ref[...]                                           # (B, I) f32
    g = jnp.dot(h.astype(jnp.bfloat16), wd_ref[...],
                preferred_element_type=jnp.float32)
    g = g + bd_ref[...]                                           # (B, 2048) f32
    g_ref[...] = g.astype(g_ref.dtype)


# ---------------------------------------------------------------------------
# pallas_call wrappers
# ---------------------------------------------------------------------------
def _pick_tile_m(m, target=512):
    """Largest multiple-of-8 divisor of m that is <= target (else the full m)."""
    if m <= target:
        return m
    for t in range(target, 0, -8):
        if m % t == 0:
            return t
    return m


def matmul_bias_act(patches, w, b, act, out_dtype=jnp.bfloat16):
    """Tiled (M, K) @ (K, N) + bias + activation on the MXU."""
    M, K = patches.shape
    N = w.shape[1]
    tm = _pick_tile_m(M)
    return pl.pallas_call(
        partial(_mm_bias_act_kernel, act=act),
        out_shape=jax.ShapeDtypeStruct((M, N), out_dtype),
        grid=(M // tm,),
        in_specs=[
            pl.BlockSpec((tm, K), lambda i: (i, 0)),
            pl.BlockSpec((K, N), lambda i: (0, 0)),
            pl.BlockSpec((1, N), lambda i: (0, 0)),
        ],
        out_specs=pl.BlockSpec((tm, N), lambda i: (i, 0)),
        compiler_params=pltpu.CompilerParams(
            dimension_semantics=("parallel",),
            vmem_limit_bytes=_VMEM_LIMIT),
    )(patches, w, b)


def encoder_decoder_dense(feat, pk):
    """Encoder Linear(2048 -> I) + decoder Linear(I -> 2048), fused in one kernel."""
    B = feat.shape[0]
    D = pk["dec_w"].shape[1]
    full2d = lambda shape: pl.BlockSpec(shape, lambda i: (0, 0))
    return pl.pallas_call(
        _dense_dense_kernel,
        out_shape=jax.ShapeDtypeStruct((B, D), jnp.bfloat16),
        grid=(1,),
        in_specs=[full2d(feat.shape), full2d(pk["enc_w"].shape),
                  full2d(pk["enc_b"].shape), full2d(pk["dec_w"].shape),
                  full2d(pk["dec_b"].shape)],
        out_specs=full2d((B, D)),
        compiler_params=pltpu.CompilerParams(
            dimension_semantics=("arbitrary",),
            vmem_limit_bytes=_VMEM_LIMIT),
    )(feat, pk["enc_w"], pk["enc_b"], pk["dec_w"], pk["dec_b"])


# ---------------------------------------------------------------------------
# XLA-side patch extraction (im2col) — kept outside the kernels
# ---------------------------------------------------------------------------
def _patches_conv_s2(x_nhwc, pad):
    """im2col for 3x3 stride-2 conv.  Rows (b, ho, wo); K ordered (di, dj, ci)."""
    B, H, W, C = x_nhwc.shape
    Ho = (H + 2 * pad - 3) // 2 + 1
    Wo = (W + 2 * pad - 3) // 2 + 1
    xp = jnp.pad(x_nhwc, ((0, 0), (pad, pad), (pad, pad), (0, 0)))
    taps = [xp[:, di:di + 2 * Ho:2, dj:dj + 2 * Wo:2, :]
            for di in range(3) for dj in range(3)]
    p = jnp.stack(taps, axis=3)                        # (B, Ho, Wo, 9, C)
    return p.reshape(B * Ho * Wo, 9 * C), (Ho, Wo)


def _patches_conv_s1(x_nhwc):
    """im2col for a 3x3 stride-1 pad-1 conv."""
    B, H, W, C = x_nhwc.shape
    xp = jnp.pad(x_nhwc, ((0, 0), (1, 1), (1, 1), (0, 0)))
    taps = [xp[:, di:di + H, dj:dj + W, :] for di in range(3) for dj in range(3)]
    return jnp.stack(taps, axis=3).reshape(B * H * W, 9 * C)


def _patches_convT_s2(x_nhwc):
    """ConvTranspose2d(k=3, s=2, p=1, output_padding=1) rewritten as a stride-1
    3x3 conv over the zero-upsampled input (kernel flip folded into the packed
    weight).  Output spatial size is exactly (2H, 2W)."""
    B, H, W, C = x_nhwc.shape
    up = jnp.zeros((B, 2 * H, 2 * W, C), x_nhwc.dtype)
    up = up.at[:, ::2, ::2, :].set(x_nhwc)
    xp = jnp.pad(up, ((0, 0), (1, 1), (1, 1), (0, 0)))     # (B, 2H+2, 2W+2, C)
    Ho, Wo = 2 * H, 2 * W
    taps = [xp[:, di:di + Ho, dj:dj + Wo, :] for di in range(3) for dj in range(3)]
    p = jnp.stack(taps, axis=3)
    return p.reshape(B * Ho * Wo, 9 * C), (Ho, Wo)


# ---------------------------------------------------------------------------
# Parameters: PyTorch layouts -> one-time packing to matmul layouts
# ---------------------------------------------------------------------------
def init_raw_params(key, intermediate_size):
    """Torch layouts: Conv2d (O,I,kh,kw), ConvTranspose2d (I,O,kh,kw), Linear (out,in)."""
    ks = jax.random.split(key, 18)
    D = 4 * 4 * 128
    s = lambda fan_in: 1.0 / jnp.sqrt(jnp.float32(fan_in))
    n = jax.random.normal
    return {
        "conv1_w": n(ks[0], (32, 1, 3, 3), jnp.float32) * s(1 * 9),
        "conv1_b": n(ks[1], (32,), jnp.float32) * 0.01,
        "conv2_w": n(ks[2], (64, 32, 3, 3), jnp.float32) * s(32 * 9),
        "conv2_b": n(ks[3], (64,), jnp.float32) * 0.01,
        "conv3_w": n(ks[4], (128, 64, 3, 3), jnp.float32) * s(64 * 9),
        "conv3_b": n(ks[5], (128,), jnp.float32) * 0.01,
        "enc_w": n(ks[6], (intermediate_size, D), jnp.float32) * s(D),
        "enc_b": n(ks[7], (intermediate_size,), jnp.float32) * 0.01,
        "dec_w": n(ks[8], (D, intermediate_size), jnp.float32) * s(intermediate_size),
        "dec_b": n(ks[9], (D,), jnp.float32) * 0.01,
        "deconv1_w": n(ks[10], (128, 128, 3, 3), jnp.float32) * s(128 * 9),
        "deconv1_b": n(ks[11], (128,), jnp.float32) * 0.01,
        "deconv2_w": n(ks[12], (128, 64, 3, 3), jnp.float32) * s(128 * 9),
        "deconv2_b": n(ks[13], (64,), jnp.float32) * 0.01,
        "deconv3_w": n(ks[14], (64, 32, 3, 3), jnp.float32) * s(64 * 9),
        "deconv3_b": n(ks[15], (32,), jnp.float32) * 0.01,
        "out_w": n(ks[16], (1, 32, 3, 3), jnp.float32) * s(32 * 9),
        "out_b": n(ks[17], (1,), jnp.float32) * 0.01,
    }


def pack_params(raw):
    """One-time packing: bf16 matmul weights, (1, N) f32 biases, permutations folded."""
    bf16, f32 = jnp.bfloat16, jnp.float32

    def conv_w(w):            # (Cout, Cin, 3, 3) -> (9*Cin, Cout), K order (di, dj, ci)
        co, ci, kh, kw = w.shape
        return jnp.transpose(w, (2, 3, 1, 0)).reshape(kh * kw * ci, co).astype(bf16)

    def convT_w(w):           # (Cin, Cout, 3, 3) -> spatial flip -> (9*Cin, Cout)
        ci, co, kh, kw = w.shape
        wf = w[:, :, ::-1, ::-1]
        return jnp.transpose(wf, (2, 3, 0, 1)).reshape(kh * kw * ci, co).astype(bf16)

    def bias(b):
        return b.reshape(1, -1).astype(f32)

    # Fold torch.flatten(NCHW) ordering (c*16 + s) into the dense weights so the
    # kernels operate directly on the NHWC-flattened (s*128 + c) feature vector.
    sp = jnp.arange(16)
    ch = jnp.arange(128)
    perm = (ch[None, :] * 16 + sp[:, None]).reshape(-1)   # perm[s*128+c] = c*16+s

    return {
        "c1_w": conv_w(raw["conv1_w"]), "c1_b": bias(raw["conv1_b"]),
        "c2_w": conv_w(raw["conv2_w"]), "c2_b": bias(raw["conv2_b"]),
        "c3_w": conv_w(raw["conv3_w"]), "c3_b": bias(raw["conv3_b"]),
        "enc_w": raw["enc_w"].T[perm, :].astype(bf16),     # (2048, I)
        "enc_b": bias(raw["enc_b"]),
        "dec_w": raw["dec_w"].T[:, perm].astype(bf16),     # (I, 2048)
        "dec_b": raw["dec_b"][perm].reshape(1, -1).astype(f32),
        "d1_w": convT_w(raw["deconv1_w"]), "d1_b": bias(raw["deconv1_b"]),
        "d2_w": convT_w(raw["deconv2_w"]), "d2_b": bias(raw["deconv2_b"]),
        "d3_w": convT_w(raw["deconv3_w"]), "d3_b": bias(raw["deconv3_b"]),
        "out_w": conv_w(raw["out_w"]), "out_b": bias(raw["out_b"]),
    }


# ---------------------------------------------------------------------------
# Forward pass (matches Autoencoder.forward)
# ---------------------------------------------------------------------------
def autoencoder_forward(pk, x_nchw):
    B = x_nchw.shape[0]
    p1 = pad_fn(32, 16, 3, 2)   # = 1
    p2 = pad_fn(16, 8, 3, 2)    # = 1
    p3 = pad_fn(8, 4, 3, 2)     # = 1

    x = jnp.transpose(x_nchw, (0, 2, 3, 1)).astype(jnp.bfloat16)   # NHWC (B,32,32,1)

    # ----- Encoder convs -----
    p, (ho, wo) = _patches_conv_s2(x, p1)
    x = matmul_bias_act(p, pk["c1_w"], pk["c1_b"], "relu").reshape(B, ho, wo, 32)
    p, (ho, wo) = _patches_conv_s2(x, p2)
    x = matmul_bias_act(p, pk["c2_w"], pk["c2_b"], "relu").reshape(B, ho, wo, 64)
    p, (ho, wo) = _patches_conv_s2(x, p3)
    x = matmul_bias_act(p, pk["c3_w"], pk["c3_b"], "relu").reshape(B, ho, wo, 128)

    # ----- flatten + encoder dense + decoder dense (one fused kernel) -----
    feat = x.reshape(B, ho * wo * 128)          # NHWC flatten: index s*128 + c
    g = encoder_decoder_dense(feat, pk)         # (B, 2048), NHWC flatten order
    x = g.reshape(B, 4, 4, 128)                 # decoder feature map

    # ----- Decoder transposed convs -----
    p, (ho, wo) = _patches_convT_s2(x)
    x = matmul_bias_act(p, pk["d1_w"], pk["d1_b"], "relu").reshape(B, ho, wo, 128)
    p, (ho, wo) = _patches_convT_s2(x)
    x = matmul_bias_act(p, pk["d2_w"], pk["d2_b"], "relu").reshape(B, ho, wo, 64)
    p, (ho, wo) = _patches_convT_s2(x)
    x = matmul_bias_act(p, pk["d3_w"], pk["d3_b"], "relu").reshape(B, ho, wo, 32)

    # ----- Final 3x3 conv + sigmoid -----
    p = _patches_conv_s1(x)
    y = matmul_bias_act(p, pk["out_w"], pk["out_b"], "sigmoid",
                        out_dtype=jnp.float32)                     # (B*32*32, 1)
    return jnp.transpose(y.reshape(B, 32, 32, 1), (0, 3, 1, 2))    # NCHW (B,1,32,32)


if __name__ == "__main__":
    intermediate_size = 32
    batch = 2

    key = jax.random.PRNGKey(0)
    k_param, k_x = jax.random.split(key)

    raw = init_raw_params(k_param, intermediate_size)
    packed = pack_params(raw)            # one-time weight packing (not per forward)

    x = jax.random.normal(k_x, (batch, 1, 32, 32), jnp.float32)

    fwd = jax.jit(autoencoder_forward)
    y = fwd(packed, x)
    jax.block_until_ready(y)

    assert y.shape == (batch, 1, 32, 32)
    assert bool(jnp.isfinite(y).all())
    assert bool(((y >= 0.0) & (y <= 1.0)).all())
    print("KERNEL_OK")
</pallas_src>

<mosaic_0001>
module attributes {stable_mosaic.version = 11 : i64} {
  func.func @_mm_bias_act_kernel(%arg0: i32, %arg1: memref<512x9xbf16, #tpu.memory_space<vmem>>, %arg2: memref<9x32xbf16, #tpu.memory_space<vmem>>, %arg3: memref<1x32xf32, #tpu.memory_space<vmem>>, %arg4: memref<512x32xbf16, #tpu.memory_space<vmem>>) attributes {dimension_semantics = [#tpu.dimension_semantics<parallel>], iteration_bounds = array<i64: 1>, scalar_prefetch = 0 : i64, scratch_operands = 0 : i64, tpu.core_type = #tpu.core_type<tc>, window_params = [{transform_indices = @transform_0, window_bounds = array<i64: 512, 9>}, {pipeline_mode = #tpu.pipeline_mode<synchronous>, transform_indices = @transform_1, window_bounds = array<i64: 9, 32>}, {pipeline_mode = #tpu.pipeline_mode<synchronous>, transform_indices = @transform_2, window_bounds = array<i64: 1, 32>}, {transform_indices = @transform_3, window_bounds = array<i64: 512, 32>}]} {
    %c0 = arith.constant 0 : index
    %c0_0 = arith.constant 0 : index
    %0 = vector.load %arg1[%c0, %c0_0] : memref<512x9xbf16, #tpu.memory_space<vmem>>, vector<512x9xbf16>
    %c0_1 = arith.constant 0 : index
    %c0_2 = arith.constant 0 : index
    %1 = vector.load %arg2[%c0_1, %c0_2] : memref<9x32xbf16, #tpu.memory_space<vmem>>, vector<9x32xbf16>
    %cst = arith.constant dense<0.000000e+00> : vector<512x32xf32>
    %2 = tpu.matmul %0, %1, %cst {dimension_numbers = #tpu.dot_dimension_numbers<[1], [0], [0], [1], [0, 0, 1, 1], [], []>} : vector<512x9xbf16>, vector<9x32xbf16>, vector<512x32xf32> -> vector<512x32xf32>
    %c0_3 = arith.constant 0 : index
    %c0_4 = arith.constant 0 : index
    %3 = vector.load %arg3[%c0_3, %c0_4] : memref<1x32xf32, #tpu.memory_space<vmem>>, vector<1x32xf32>
    %4 = vector.broadcast %3 : vector<1x32xf32> to vector<512x32xf32>
    %5 = arith.addf %2, %4 : vector<512x32xf32>
    %cst_5 = arith.constant 0.000000e+00 : f32
    %6 = vector.broadcast %cst_5 : f32 to vector<512x32xf32>
    %7 = arith.maximumf %5, %6 : vector<512x32xf32>
    %8 = arith.truncf %7 : vector<512x32xf32> to vector<512x32xbf16>
    %c0_6 = arith.constant 0 : index
    %c0_7 = arith.constant 0 : index
    %9 = vector.load %arg4[%c0_6, %c0_7] : memref<512x32xbf16, #tpu.memory_space<vmem>>, vector<512x32xbf16>
    tpu.vector_store %arg4[%c0_6, %c0_7], %8 {strides = array<i32>} : memref<512x32xbf16, #tpu.memory_space<vmem>>, vector<512x32xbf16>,
    return
  }
  func.func @transform_0(%arg0: i32) -> (i32, i32) {
    %c0_i32 = arith.constant 0 : i32
    %c0_i32_0 = arith.constant 0 : i32
    return %arg0, %c0_i32 : i32, i32
  }
  func.func @transform_1(%arg0: i32) -> (i32, i32) {
    %c0_i32 = arith.constant 0 : i32
    %c0_i32_0 = arith.constant 0 : i32
    %c0_i32_1 = arith.constant 0 : i32
    return %c0_i32, %c0_i32_0 : i32, i32
  }
  func.func @transform_2(%arg0: i32) -> (i32, i32) {
    %c0_i32 = arith.constant 0 : i32
    %c0_i32_0 = arith.constant 0 : i32
    %c0_i32_1 = arith.constant 0 : i32
    return %c0_i32, %c0_i32_0 : i32, i32
  }
  func.func @transform_3(%arg0: i32) -> (i32, i32) {
    %c0_i32 = arith.constant 0 : i32
    %c0_i32_0 = arith.constant 0 : i32
    return %arg0, %c0_i32 : i32, i32
  }
}

module attributes {stable_mosaic.version = 11 : i64} {
  func.func @_mm_bias_act_kernel(%arg0: i32, %arg1: memref<128x288xbf16, #tpu.memory_space<vmem>>, %arg2: memref<288x64xbf16, #tpu.memory_space<vmem>>, %arg3: memref<1x64xf32, #tpu.memory_space<vmem>>, %arg4: memref<128x64xbf16, #tpu.memory_space<vmem>>) attributes {dimension_semantics = [#tpu.dimension_semantics<parallel>], iteration_bounds = array<i64: 1>, scalar_prefetch = 0 : i64, scratch_operands = 0 : i64, tpu.core_type = #tpu.core_type<tc>, window_params = [{transform_indices = @transform_0, window_bounds = array<i64: 128, 288>}, {pipeline_mode = #tpu.pipeline_mode<synchronous>, transform_indices = @transform_1, window_bounds = array<i64: 288, 64>}, {pipeline_mode = #tpu.pipeline_mode<synchronous>, transform_indices = @transform_2, window_bounds = array<i64: 1, 64>}, {transform_indices = @transform_3, window_bounds = array<i64: 128, 64>}]} {
    %c0 = arith.constant 0 : index
    %c0_0 = arith.constant 0 : index
    %0 = vector.load %arg1[%c0, %c0_0] : memref<128x288xbf16, #tpu.memory_space<vmem>>, vector<128x288xbf16>
    %c0_1 = arith.constant 0 : index
    %c0_2 = arith.constant 0 : index
    %1 = vector.load %arg2[%c0_1, %c0_2] : memref<288x64xbf16, #tpu.memory_space<vmem>>, vector<288x64xbf16>
    %cst = arith.constant dense<0.000000e+00> : vector<128x64xf32>
    %2 = tpu.matmul %0, %1, %cst {dimension_numbers = #tpu.dot_dimension_numbers<[1], [0], [0], [1], [0, 0, 1, 1], [], []>} : vector<128x288xbf16>, vector<288x64xbf16>, vector<128x64xf32> -> vector<128x64xf32>
    %c0_3 = arith.constant 0 : index
    %c0_4 = arith.constant 0 : index
    %3 = vector.load %arg3[%c0_3, %c0_4] : memref<1x64xf32, #tpu.memory_space<vmem>>, vector<1x64xf32>
    %4 = vector.broadcast %3 : vector<1x64xf32> to vector<128x64xf32>
    %5 = arith.addf %2, %4 : vector<128x64xf32>
    %cst_5 = arith.constant 0.000000e+00 : f32
    %6 = vector.broadcast %cst_5 : f32 to vector<128x64xf32>
    %7 = arith.maximumf %5, %6 : vector<128x64xf32>
    %8 = arith.truncf %7 : vector<128x64xf32> to vector<128x64xbf16>
    %c0_6 = arith.constant 0 : index
    %c0_7 = arith.constant 0 : index
    %9 = vector.load %arg4[%c0_6, %c0_7] : memref<128x64xbf16, #tpu.memory_space<vmem>>, vector<128x64xbf16>
    tpu.vector_store %arg4[%c0_6, %c0_7], %8 {strides = array<i32>} : memref<128x64xbf16, #tpu.memory_space<vmem>>, vector<128x64xbf16>,
    return
  }
  func.func @transform_0(%arg0: i32) -> (i32, i32) {
    %c0_i32 = arith.constant 0 : i32
    %c0_i32_0 = arith.constant 0 : i32
    return %arg0, %c0_i32 : i32, i32
  }
  func.func @transform_1(%arg0: i32) -> (i32, i32) {
    %c0_i32 = arith.constant 0 : i32
    %c0_i32_0 = arith.constant 0 : i32
    %c0_i32_1 = arith.constant 0 : i32
    return %c0_i32, %c0_i32_0 : i32, i32
  }
  func.func @transform_2(%arg0: i32) -> (i32, i32) {
    %c0_i32 = arith.constant 0 : i32
    %c0_i32_0 = arith.constant 0 : i32
    %c0_i32_1 = arith.constant 0 : i32
    return %c0_i32, %c0_i32_0 : i32, i32
  }
  func.func @transform_3(%arg0: i32) -> (i32, i32) {
    %c0_i32 = arith.constant 0 : i32
    %c0_i32_0 = arith.constant 0 : i32
    return %arg0, %c0_i32 : i32, i32
  }
}

module attributes {stable_mosaic.version = 11 : i64} {
  func.func @_mm_bias_act_kernel(%arg0: i32, %arg1: memref<32x576xbf16, #tpu.memory_space<vmem>>, %arg2: memref<576x128xbf16, #tpu.memory_space<vmem>>, %arg3: memref<1x128xf32, #tpu.memory_space<vmem>>, %arg4: memref<32x128xbf16, #tpu.memory_space<vmem>>) attributes {dimension_semantics = [#tpu.dimension_semantics<parallel>], iteration_bounds = array<i64: 1>, scalar_prefetch = 0 : i64, scratch_operands = 0 : i64, tpu.core_type = #tpu.core_type<tc>, window_params = [{transform_indices = @transform_0, window_bounds = array<i64: 32, 576>}, {pipeline_mode = #tpu.pipeline_mode<synchronous>, transform_indices = @transform_1, window_bounds = array<i64: 576, 128>}, {pipeline_mode = #tpu.pipeline_mode<synchronous>, transform_indices = @transform_2, window_bounds = array<i64: 1, 128>}, {transform_indices = @transform_3, window_bounds = array<i64: 32, 128>}]} {
    %c0 = arith.constant 0 : index
    %c0_0 = arith.constant 0 : index
    %0 = vector.load %arg1[%c0, %c0_0] : memref<32x576xbf16, #tpu.memory_space<vmem>>, vector<32x576xbf16>
    %c0_1 = arith.constant 0 : index
    %c0_2 = arith.constant 0 : index
    %1 = vector.load %arg2[%c0_1, %c0_2] : memref<576x128xbf16, #tpu.memory_space<vmem>>, vector<576x128xbf16>
    %cst = arith.constant dense<0.000000e+00> : vector<32x128xf32>
    %2 = tpu.matmul %0, %1, %cst {dimension_numbers = #tpu.dot_dimension_numbers<[1], [0], [0], [1], [0, 0, 1, 1], [], []>} : vector<32x576xbf16>, vector<576x128xbf16>, vector<32x128xf32> -> vector<32x128xf32>
    %c0_3 = arith.constant 0 : index
    %c0_4 = arith.constant 0 : index
    %3 = vector.load %arg3[%c0_3, %c0_4] : memref<1x128xf32, #tpu.memory_space<vmem>>, vector<1x128xf32>
    %4 = vector.broadcast %3 : vector<1x128xf32> to vector<32x128xf32>
    %5 = arith.addf %2, %4 : vector<32x128xf32>
    %cst_5 = arith.constant 0.000000e+00 : f32
    %6 = vector.broadcast %cst_5 : f32 to vector<32x128xf32>
    %7 = arith.maximumf %5, %6 : vector<32x128xf32>
    %8 = arith.truncf %7 : vector<32x128xf32> to vector<32x128xbf16>
    %c0_6 = arith.constant 0 : index
    %c0_7 = arith.constant 0 : index
    %9 = vector.load %arg4[%c0_6, %c0_7] : memref<32x128xbf16, #tpu.memory_space<vmem>>, vector<32x128xbf16>
    tpu.vector_store %arg4[%c0_6, %c0_7], %8 {strides = array<i32>} : memref<32x128xbf16, #tpu.memory_space<vmem>>, vector<32x128xbf16>,
    return
  }
  func.func @transform_0(%arg0: i32) -> (i32, i32) {
    %c0_i32 = arith.constant 0 : i32
    %c0_i32_0 = arith.constant 0 : i32
    return %arg0, %c0_i32 : i32, i32
  }
  func.func @transform_1(%arg0: i32) -> (i32, i32) {
    %c0_i32 = arith.constant 0 : i32
    %c0_i32_0 = arith.constant 0 : i32
    %c0_i32_1 = arith.constant 0 : i32
    return %c0_i32, %c0_i32_0 : i32, i32
  }
  func.func @transform_2(%arg0: i32) -> (i32, i32) {
    %c0_i32 = arith.constant 0 : i32
    %c0_i32_0 = arith.constant 0 : i32
    %c0_i32_1 = arith.constant 0 : i32
    return %c0_i32, %c0_i32_0 : i32, i32
  }
  func.func @transform_3(%arg0: i32) -> (i32, i32) {
    %c0_i32 = arith.constant 0 : i32
    %c0_i32_0 = arith.constant 0 : i32
    return %arg0, %c0_i32 : i32, i32
  }
}

module attributes {stable_mosaic.version = 11 : i64} {
  func.func @_dense_dense_kernel(%arg0: i32, %arg1: memref<2x2048xbf16, #tpu.memory_space<vmem>>, %arg2: memref<2048x32xbf16, #tpu.memory_space<vmem>>, %arg3: memref<1x32xf32, #tpu.memory_space<vmem>>, %arg4: memref<32x2048xbf16, #tpu.memory_space<vmem>>, %arg5: memref<1x2048xf32, #tpu.memory_space<vmem>>, %arg6: memref<2x2048xbf16, #tpu.memory_space<vmem>>) attributes {dimension_semantics = [#tpu.dimension_semantics<arbitrary>], iteration_bounds = array<i64: 1>, scalar_prefetch = 0 : i64, scratch_operands = 0 : i64, tpu.core_type = #tpu.core_type<tc>, window_params = [{pipeline_mode = #tpu.pipeline_mode<synchronous>, transform_indices = @transform_0, window_bounds = array<i64: 2, 2048>}, {pipeline_mode = #tpu.pipeline_mode<synchronous>, transform_indices = @transform_1, window_bounds = array<i64: 2048, 32>}, {pipeline_mode = #tpu.pipeline_mode<synchronous>, transform_indices = @transform_2, window_bounds = array<i64: 1, 32>}, {pipeline_mode = #tpu.pipeline_mode<synchronous>, transform_indices = @transform_3, window_bounds = array<i64: 32, 2048>}, {pipeline_mode = #tpu.pipeline_mode<synchronous>, transform_indices = @transform_4, window_bounds = array<i64: 1, 2048>}, {pipeline_mode = #tpu.pipeline_mode<synchronous>, transform_indices = @transform_5, window_bounds = array<i64: 2, 2048>}]} {
    %c0 = arith.constant 0 : index
    %c0_0 = arith.constant 0 : index
    %0 = vector.load %arg1[%c0, %c0_0] : memref<2x2048xbf16, #tpu.memory_space<vmem>>, vector<2x2048xbf16>
    %c0_1 = arith.constant 0 : index
    %c0_2 = arith.constant 0 : index
    %1 = vector.load %arg2[%c0_1, %c0_2] : memref<2048x32xbf16, #tpu.memory_space<vmem>>, vector<2048x32xbf16>
    %cst = arith.constant dense<0.000000e+00> : vector<2x32xf32>
    %2 = tpu.matmul %0, %1, %cst {dimension_numbers = #tpu.dot_dimension_numbers<[1], [0], [0], [1], [0, 0, 1, 1], [], []>} : vector<2x2048xbf16>, vector<2048x32xbf16>, vector<2x32xf32> -> vector<2x32xf32>
    %c0_3 = arith.constant 0 : index
    %c0_4 = arith.constant 0 : index
    %3 = vector.load %arg3[%c0_3, %c0_4] : memref<1x32xf32, #tpu.memory_space<vmem>>, vector<1x32xf32>
    %4 = vector.broadcast %3 : vector<1x32xf32> to vector<2x32xf32>
    %5 = arith.addf %2, %4 : vector<2x32xf32>
    %6 = arith.truncf %5 : vector<2x32xf32> to vector<2x32xbf16>
    %c0_5 = arith.constant 0 : index
    %c0_6 = arith.constant 0 : index
    %7 = vector.load %arg4[%c0_5, %c0_6] : memref<32x2048xbf16, #tpu.memory_space<vmem>>, vector<32x2048xbf16>
    %cst_7 = arith.constant dense<0.000000e+00> : vector<2x2048xf32>
    %8 = tpu.matmul %6, %7, %cst_7 {dimension_numbers = #tpu.dot_dimension_numbers<[1], [0], [0], [1], [0, 0, 1, 1], [], []>} : vector<2x32xbf16>, vector<32x2048xbf16>, vector<2x2048xf32> -> vector<2x2048xf32>
    %c0_8 = arith.constant 0 : index
    %c0_9 = arith.constant 0 : index
    %9 = vector.load %arg5[%c0_8, %c0_9] : memref<1x2048xf32, #tpu.memory_space<vmem>>, vector<1x2048xf32>
    %10 = vector.broadcast %9 : vector<1x2048xf32> to vector<2x2048xf32>
    %11 = arith.addf %8, %10 : vector<2x2048xf32>
    %12 = arith.truncf %11 : vector<2x2048xf32> to vector<2x2048xbf16>
    %c0_10 = arith.constant 0 : index
    %c0_11 = arith.constant 0 : index
    %13 = vector.load %arg6[%c0_10, %c0_11] : memref<2x2048xbf16, #tpu.memory_space<vmem>>, vector<2x2048xbf16>
    tpu.vector_store %arg6[%c0_10, %c0_11], %12 {strides = array<i32>} : memref<2x2048xbf16, #tpu.memory_space<vmem>>, vector<2x2048xbf16>,
    return
  }
  func.func @transform_0(%arg0: i32) -> (i32, i32) {
    %c0_i32 = arith.constant 0 : i32
    %c0_i32_0 = arith.constant 0 : i32
    %c0_i32_1 = arith.constant 0 : i32
    return %c0_i32, %c0_i32_0 : i32, i32
  }
  func.func @transform_1(%arg0: i32) -> (i32, i32) {
    %c0_i32 = arith.constant 0 : i32
    %c0_i32_0 = arith.constant 0 : i32
    %c0_i32_1 = arith.constant 0 : i32
    return %c0_i32, %c0_i32_0 : i32, i32
  }
  func.func @transform_2(%arg0: i32) -> (i32, i32) {
    %c0_i32 = arith.constant 0 : i32
    %c0_i32_0 = arith.constant 0 : i32
    %c0_i32_1 = arith.constant 0 : i32
    return %c0_i32, %c0_i32_0 : i32, i32
  }
  func.func @transform_3(%arg0: i32) -> (i32, i32) {
    %c0_i32 = arith.constant 0 : i32
    %c0_i32_0 = arith.constant 0 : i32
    %c0_i32_1 = arith.constant 0 : i32
    return %c0_i32, %c0_i32_0 : i32, i32
  }
  func.func @transform_4(%arg0: i32) -> (i32, i32) {
    %c0_i32 = arith.constant 0 : i32
    %c0_i32_0 = arith.constant 0 : i32
    %c0_i32_1 = arith.constant 0 : i32
    return %c0_i32, %c0_i32_0 : i32, i32
  }
  func.func @transform_5(%arg0: i32) -> (i32, i32) {
    %c0_i32 = arith.constant 0 : i32
    %c0_i32_0 = arith.constant 0 : i32
    %c0_i32_1 = arith.constant 0 : i32
    return %c0_i32, %c0_i32_0 : i32, i32
  }
}

module attributes {stable_mosaic.version = 11 : i64} {
  func.func @_mm_bias_act_kernel(%arg0: i32, %arg1: memref<128x1152xbf16, #tpu.memory_space<vmem>>, %arg2: memref<1152x128xbf16, #tpu.memory_space<vmem>>, %arg3: memref<1x128xf32, #tpu.memory_space<vmem>>, %arg4: memref<128x128xbf16, #tpu.memory_space<vmem>>) attributes {dimension_semantics = [#tpu.dimension_semantics<parallel>], iteration_bounds = array<i64: 1>, scalar_prefetch = 0 : i64, scratch_operands = 0 : i64, tpu.core_type = #tpu.core_type<tc>, window_params = [{transform_indices = @transform_0, window_bounds = array<i64: 128, 1152>}, {pipeline_mode = #tpu.pipeline_mode<synchronous>, transform_indices = @transform_1, window_bounds = array<i64: 1152, 128>}, {pipeline_mode = #tpu.pipeline_mode<synchronous>, transform_indices = @transform_2, window_bounds = array<i64: 1, 128>}, {transform_indices = @transform_3, window_bounds = array<i64: 128, 128>}]} {
    %c0 = arith.constant 0 : index
    %c0_0 = arith.constant 0 : index
    %0 = vector.load %arg1[%c0, %c0_0] : memref<128x1152xbf16, #tpu.memory_space<vmem>>, vector<128x1152xbf16>
    %c0_1 = arith.constant 0 : index
    %c0_2 = arith.constant 0 : index
    %1 = vector.load %arg2[%c0_1, %c0_2] : memref<1152x128xbf16, #tpu.memory_space<vmem>>, vector<1152x128xbf16>
    %cst = arith.constant dense<0.000000e+00> : vector<128x128xf32>
    %2 = tpu.matmul %0, %1, %cst {dimension_numbers = #tpu.dot_dimension_numbers<[1], [0], [0], [1], [0, 0, 1, 1], [], []>} : vector<128x1152xbf16>, vector<1152x128xbf16>, vector<128x128xf32> -> vector<128x128xf32>
    %c0_3 = arith.constant 0 : index
    %c0_4 = arith.constant 0 : index
    %3 = vector.load %arg3[%c0_3, %c0_4] : memref<1x128xf32, #tpu.memory_space<vmem>>, vector<1x128xf32>
    %4 = vector.broadcast %3 : vector<1x128xf32> to vector<128x128xf32>
    %5 = arith.addf %2, %4 : vector<128x128xf32>
    %cst_5 = arith.constant 0.000000e+00 : f32
    %6 = vector.broadcast %cst_5 : f32 to vector<128x128xf32>
    %7 = arith.maximumf %5, %6 : vector<128x128xf32>
    %8 = arith.truncf %7 : vector<128x128xf32> to vector<128x128xbf16>
    %c0_6 = arith.constant 0 : index
    %c0_7 = arith.constant 0 : index
    %9 = vector.load %arg4[%c0_6, %c0_7] : memref<128x128xbf16, #tpu.memory_space<vmem>>, vector<128x128xbf16>
    tpu.vector_store %arg4[%c0_6, %c0_7], %8 {strides = array<i32>} : memref<128x128xbf16, #tpu.memory_space<vmem>>, vector<128x128xbf16>,
    return
  }
  func.func @transform_0(%arg0: i32) -> (i32, i32) {
    %c0_i32 = arith.constant 0 : i32
    %c0_i32_0 = arith.constant 0 : i32
    return %arg0, %c0_i32 : i32, i32
  }
  func.func @transform_1(%arg0: i32) -> (i32, i32) {
    %c0_i32 = arith.constant 0 : i32
    %c0_i32_0 = arith.constant 0 : i32
    %c0_i32_1 = arith.constant 0 : i32
    return %c0_i32, %c0_i32_0 : i32, i32
  }
  func.func @transform_2(%arg0: i32) -> (i32, i32) {
    %c0_i32 = arith.constant 0 : i32
    %c0_i32_0 = arith.constant 0 : i32
    %c0_i32_1 = arith.constant 0 : i32
    return %c0_i32, %c0_i32_0 : i32, i32
  }
  func.func @transform_3(%arg0: i32) -> (i32, i32) {
    %c0_i32 = arith.constant 0 : i32
    %c0_i32_0 = arith.constant 0 : i32
    return %arg0, %c0_i32 : i32, i32
  }
}

module attributes {stable_mosaic.version = 11 : i64} {
  func.func @_mm_bias_act_kernel(%arg0: i32, %arg1: memref<512x1152xbf16, #tpu.memory_space<vmem>>, %arg2: memref<1152x64xbf16, #tpu.memory_space<vmem>>, %arg3: memref<1x64xf32, #tpu.memory_space<vmem>>, %arg4: memref<512x64xbf16, #tpu.memory_space<vmem>>) attributes {dimension_semantics = [#tpu.dimension_semantics<parallel>], iteration_bounds = array<i64: 1>, scalar_prefetch = 0 : i64, scratch_operands = 0 : i64, tpu.core_type = #tpu.core_type<tc>, window_params = [{transform_indices = @transform_0, window_bounds = array<i64: 512, 1152>}, {pipeline_mode = #tpu.pipeline_mode<synchronous>, transform_indices = @transform_1, window_bounds = array<i64: 1152, 64>}, {pipeline_mode = #tpu.pipeline_mode<synchronous>, transform_indices = @transform_2, window_bounds = array<i64: 1, 64>}, {transform_indices = @transform_3, window_bounds = array<i64: 512, 64>}]} {
    %c0 = arith.constant 0 : index
    %c0_0 = arith.constant 0 : index
    %0 = vector.load %arg1[%c0, %c0_0] : memref<512x1152xbf16, #tpu.memory_space<vmem>>, vector<512x1152xbf16>
    %c0_1 = arith.constant 0 : index
    %c0_2 = arith.constant 0 : index
    %1 = vector.load %arg2[%c0_1, %c0_2] : memref<1152x64xbf16, #tpu.memory_space<vmem>>, vector<1152x64xbf16>
    %cst = arith.constant dense<0.000000e+00> : vector<512x64xf32>
    %2 = tpu.matmul %0, %1, %cst {dimension_numbers = #tpu.dot_dimension_numbers<[1], [0], [0], [1], [0, 0, 1, 1], [], []>} : vector<512x1152xbf16>, vector<1152x64xbf16>, vector<512x64xf32> -> vector<512x64xf32>
    %c0_3 = arith.constant 0 : index
    %c0_4 = arith.constant 0 : index
    %3 = vector.load %arg3[%c0_3, %c0_4] : memref<1x64xf32, #tpu.memory_space<vmem>>, vector<1x64xf32>
    %4 = vector.broadcast %3 : vector<1x64xf32> to vector<512x64xf32>
    %5 = arith.addf %2, %4 : vector<512x64xf32>
    %cst_5 = arith.constant 0.000000e+00 : f32
    %6 = vector.broadcast %cst_5 : f32 to vector<512x64xf32>
    %7 = arith.maximumf %5, %6 : vector<512x64xf32>
    %8 = arith.truncf %7 : vector<512x64xf32> to vector<512x64xbf16>
    %c0_6 = arith.constant 0 : index
    %c0_7 = arith.constant 0 : index
    %9 = vector.load %arg4[%c0_6, %c0_7] : memref<512x64xbf16, #tpu.memory_space<vmem>>, vector<512x64xbf16>
    tpu.vector_store %arg4[%c0_6, %c0_7], %8 {strides = array<i32>} : memref<512x64xbf16, #tpu.memory_space<vmem>>, vector<512x64xbf16>,
    return
  }
  func.func @transform_0(%arg0: i32) -> (i32, i32) {
    %c0_i32 = arith.constant 0 : i32
    %c0_i32_0 = arith.constant 0 : i32
    return %arg0, %c0_i32 : i32, i32
  }
  func.func @transform_1(%arg0: i32) -> (i32, i32) {
    %c0_i32 = arith.constant 0 : i32
    %c0_i32_0 = arith.constant 0 : i32
    %c0_i32_1 = arith.constant 0 : i32
    return %c0_i32, %c0_i32_0 : i32, i32
  }
  func.func @transform_2(%arg0: i32) -> (i32, i32) {
    %c0_i32 = arith.constant 0 : i32
    %c0_i32_0 = arith.constant 0 : i32
    %c0_i32_1 = arith.constant 0 : i32
    return %c0_i32, %c0_i32_0 : i32, i32
  }
  func.func @transform_3(%arg0: i32) -> (i32, i32) {
    %c0_i32 = arith.constant 0 : i32
    %c0_i32_0 = arith.constant 0 : i32
    return %arg0, %c0_i32 : i32, i32
  }
}

module attributes {stable_mosaic.version = 11 : i64} {
  func.func @_mm_bias_act_kernel(%arg0: i32, %arg1: memref<512x576xbf16, #tpu.memory_space<vmem>>, %arg2: memref<576x32xbf16, #tpu.memory_space<vmem>>, %arg3: memref<1x32xf32, #tpu.memory_space<vmem>>, %arg4: memref<512x32xbf16, #tpu.memory_space<vmem>>) attributes {dimension_semantics = [#tpu.dimension_semantics<parallel>], iteration_bounds = array<i64: 4>, scalar_prefetch = 0 : i64, scratch_operands = 0 : i64, tpu.core_type = #tpu.core_type<tc>, window_params = [{transform_indices = @transform_0, window_bounds = array<i64: 512, 576>}, {pipeline_mode = #tpu.pipeline_mode<synchronous>, transform_indices = @transform_1, window_bounds = array<i64: 576, 32>}, {pipeline_mode = #tpu.pipeline_mode<synchronous>, transform_indices = @transform_2, window_bounds = array<i64: 1, 32>}, {transform_indices = @transform_3, window_bounds = array<i64: 512, 32>}]} {
    %c0 = arith.constant 0 : index
    %c0_0 = arith.constant 0 : index
    %0 = vector.load %arg1[%c0, %c0_0] : memref<512x576xbf16, #tpu.memory_space<vmem>>, vector<512x576xbf16>
    %c0_1 = arith.constant 0 : index
    %c0_2 = arith.constant 0 : index
    %1 = vector.load %arg2[%c0_1, %c0_2] : memref<576x32xbf16, #tpu.memory_space<vmem>>, vector<576x32xbf16>
    %cst = arith.constant dense<0.000000e+00> : vector<512x32xf32>
    %2 = tpu.matmul %0, %1, %cst {dimension_numbers = #tpu.dot_dimension_numbers<[1], [0], [0], [1], [0, 0, 1, 1], [], []>} : vector<512x576xbf16>, vector<576x32xbf16>, vector<512x32xf32> -> vector<512x32xf32>
    %c0_3 = arith.constant 0 : index
    %c0_4 = arith.constant 0 : index
    %3 = vector.load %arg3[%c0_3, %c0_4] : memref<1x32xf32, #tpu.memory_space<vmem>>, vector<1x32xf32>
    %4 = vector.broadcast %3 : vector<1x32xf32> to vector<512x32xf32>
    %5 = arith.addf %2, %4 : vector<512x32xf32>
    %cst_5 = arith.constant 0.000000e+00 : f32
    %6 = vector.broadcast %cst_5 : f32 to vector<512x32xf32>
    %7 = arith.maximumf %5, %6 : vector<512x32xf32>
    %8 = arith.truncf %7 : vector<512x32xf32> to vector<512x32xbf16>
    %c0_6 = arith.constant 0 : index
    %c0_7 = arith.constant 0 : index
    %9 = vector.load %arg4[%c0_6, %c0_7] : memref<512x32xbf16, #tpu.memory_space<vmem>>, vector<512x32xbf16>
    tpu.vector_store %arg4[%c0_6, %c0_7], %8 {strides = array<i32>} : memref<512x32xbf16, #tpu.memory_space<vmem>>, vector<512x32xbf16>,
    return
  }
  func.func @transform_0(%arg0: i32) -> (i32, i32) {
    %c0_i32 = arith.constant 0 : i32
    %c0_i32_0 = arith.constant 0 : i32
    return %arg0, %c0_i32 : i32, i32
  }
  func.func @transform_1(%arg0: i32) -> (i32, i32) {
    %c0_i32 = arith.constant 0 : i32
    %c0_i32_0 = arith.constant 0 : i32
    %c0_i32_1 = arith.constant 0 : i32
    return %c0_i32, %c0_i32_0 : i32, i32
  }
  func.func @transform_2(%arg0: i32) -> (i32, i32) {
    %c0_i32 = arith.constant 0 : i32
    %c0_i32_0 = arith.constant 0 : i32
    %c0_i32_1 = arith.constant 0 : i32
    return %c0_i32, %c0_i32_0 : i32, i32
  }
  func.func @transform_3(%arg0: i32) -> (i32, i32) {
    %c0_i32 = arith.constant 0 : i32
    %c0_i32_0 = arith.constant 0 : i32
    return %arg0, %c0_i32 : i32, i32
  }
}

module attributes {stable_mosaic.version = 11 : i64} {
  func.func @_mm_bias_act_kernel(%arg0: i32, %arg1: memref<512x288xbf16, #tpu.memory_space<vmem>>, %arg2: memref<288x1xbf16, #tpu.memory_space<vmem>>, %arg3: memref<1x1xf32, #tpu.memory_space<vmem>>, %arg4: memref<512x1xf32, #tpu.memory_space<vmem>>) attributes {dimension_semantics = [#tpu.dimension_semantics<parallel>], iteration_bounds = array<i64: 4>, scalar_prefetch = 0 : i64, scratch_operands = 0 : i64, tpu.core_type = #tpu.core_type<tc>, window_params = [{transform_indices = @transform_0, window_bounds = array<i64: 512, 288>}, {pipeline_mode = #tpu.pipeline_mode<synchronous>, transform_indices = @transform_1, window_bounds = array<i64: 288, 1>}, {pipeline_mode = #tpu.pipeline_mode<synchronous>, transform_indices = @transform_2, window_bounds = array<i64: 1, 1>}, {transform_indices = @transform_3, window_bounds = array<i64: 512, 1>}]} {
    %c0 = arith.constant 0 : index
    %c0_0 = arith.constant 0 : index
    %0 = vector.load %arg1[%c0, %c0_0] : memref<512x288xbf16, #tpu.memory_space<vmem>>, vector<512x288xbf16>
    %c0_1 = arith.constant 0 : index
    %c0_2 = arith.constant 0 : index
    %1 = vector.load %arg2[%c0_1, %c0_2] : memref<288x1xbf16, #tpu.memory_space<vmem>>, vector<288x1xbf16>
    %cst = arith.constant dense<0.000000e+00> : vector<512x1xf32>
    %2 = tpu.matmul %0, %1, %cst {dimension_numbers = #tpu.dot_dimension_numbers<[1], [0], [0], [1], [0, 0, 1, 1], [], []>} : vector<512x288xbf16>, vector<288x1xbf16>, vector<512x1xf32> -> vector<512x1xf32>
    %c0_3 = arith.constant 0 : index
    %c0_4 = arith.constant 0 : index
    %3 = vector.load %arg3[%c0_3, %c0_4] : memref<1x1xf32, #tpu.memory_space<vmem>>, vector<1x1xf32>
    %4 = vector.broadcast %3 : vector<1x1xf32> to vector<512x1xf32>
    %5 = arith.addf %2, %4 : vector<512x1xf32>
    %6 = arith.negf %5 : vector<512x1xf32>
    %7 = math.exp %6 : vector<512x1xf32>
    %cst_5 = arith.constant 1.000000e+00 : f32
    %8 = vector.broadcast %cst_5 : f32 to vector<512x1xf32>
    %9 = arith.addf %8, %7 : vector<512x1xf32>
    %10 = arith.divf %8, %9 : vector<512x1xf32>
    %c0_6 = arith.constant 0 : index
    %c0_7 = arith.constant 0 : index
    %11 = vector.load %arg4[%c0_6, %c0_7] : memref<512x1xf32, #tpu.memory_space<vmem>>, vector<512x1xf32>
    tpu.vector_store %arg4[%c0_6, %c0_7], %10 {strides = array<i32>} : memref<512x1xf32, #tpu.memory_space<vmem>>, vector<512x1xf32>,
    return
  }
  func.func @transform_0(%arg0: i32) -> (i32, i32) {
    %c0_i32 = arith.constant 0 : i32
    %c0_i32_0 = arith.constant 0 : i32
    return %arg0, %c0_i32 : i32, i32
  }
  func.func @transform_1(%arg0: i32) -> (i32, i32) {
    %c0_i32 = arith.constant 0 : i32
    %c0_i32_0 = arith.constant 0 : i32
    %c0_i32_1 = arith.constant 0 : i32
    return %c0_i32, %c0_i32_0 : i32, i32
  }
  func.func @transform_2(%arg0: i32) -> (i32, i32) {
    %c0_i32 = arith.constant 0 : i32
    %c0_i32_0 = arith.constant 0 : i32
    %c0_i32_1 = arith.constant 0 : i32
    return %c0_i32, %c0_i32_0 : i32, i32
  }
  func.func @transform_3(%arg0: i32) -> (i32, i32) {
    %c0_i32 = arith.constant 0 : i32
    %c0_i32_0 = arith.constant 0 : i32
    return %arg0, %c0_i32 : i32, i32
  }
}

</mosaic_0001>

<bundles_post_ra>
// kernel: autoencoder_forward.8
= control target key start
LH: loop header
LB: loop body
LE: loop exit
PB: predicated region body
PF: predicated region fallthrough
CT: control target
= control target key end

     0   :  { %8 = vsyncpa [#allocation3], 0  ;;  %s1921_s0 = inlined_call_operand.vmem [shape: bf16[512,9], index: 0, kind: input, shape index: {}]   ;;  %s1922_s1 = inlined_call_operand.hbm [shape: bf16[9,32], index: 1, kind: input, shape index: {}]   ;;  %s1923_s2 = inlined_call_operand.hbm [shape: f32[1,32], index: 2, kind: input, shape index: {}]   ;;  %s1924_s3 = inlined_call_operand.vmem [shape: bf16[512,32], index: 3, kind: output, shape index: {}]  }
   0x1   :  { %9 = vsyncpa [#allocation5], 0  ;;  %s1440_s12 = smov [#allocation2]  }
   0x2   :  { %s17_s13 = sshll.u32 %s1440_s12, 4  ;;  %s18_s13 = int_to_ptr.vmem [resolvable:$true] %s17_s13 }
   0x3   :  { %s1404_s14 = scalar_lea.vmem %s18_s13, 128  ;;  %p1409_p1 = scmp.lt.s32.totalorder %s18_s13, %s18_s13 }
   0x4   :  { %p1405_p0 = scmp.ne.s32.totalorder %s18_s13, %s1404_s14  ;;  %p1410_p2 = scmp.lt.s32.totalorder %s1404_s14, %s1404_s14 }
   0x6   :  { %p1411_p3 = por %p1410_p2, %p1409_p1 }
   0x8   :  { %p1412_p4 = pnand %p1411_p3, %p1405_p0 }
   0xa   :  { %1415 = shalt.err (!%p1412_p4)
}
   0xb   :  { %s1441_s15 = smov 64   ;;  %s1442_s16 = smov 4  }
   0xc   :  { %23 = dma.hbm_to_vmem [thread:$0]  %s1922_s1, 128, %s18_s13, [#allocation3], %s1441_s15, %s1441_s15, %s1442_s16  }
   0xd   :  { %s1443_s19 = smov [#allocation4]  }
   0xe   :  { %s30_s20 = sshll.u32 %s1443_s19, 4  ;;  %s31_s20 = int_to_ptr.vmem [resolvable:$true] %s30_s20 }
   0xf   :  { %s1424_s21 = scalar_lea.vmem %s31_s20, 16  ;;  %s1428_s22 = scalar_lea.vmem %s31_s20, 32 }
  0x10   :  { %p1425_p5 = scmp.ne.s32.totalorder %s31_s20, %s1424_s21  ;;  %p1429_p6 = scmp.lt.s32.totalorder %s31_s20, %s31_s20 }
  0x11   :  { %p1430_p7 = scmp.lt.s32.totalorder %s1428_s22, %s1424_s21 }
  0x13   :  { %p1431_p8 = por %p1430_p7, %p1429_p6 }
  0x15   :  { %p1432_p9 = pnand %p1431_p8, %p1425_p5 }
  0x17   :  { %1435 = shalt.err (!%p1432_p9)
}
  0x18   :  { %33 = dma.hbm_to_vmem [thread:$0]  %s1923_s2, 16, %s31_s20, [#allocation5]  }
  0x19   :  { %1436 = dma.done.wait [#allocation3], 128  }
  0x1a   :  { %1437 = vsyncadd [#allocation3], 4294967168 }
  0x1b   :  { %1438 = dma.done.wait [#allocation5], 16  }
  0x1c   :  { %1439 = vsyncadd [#allocation5], 4294967280  ;;  %vm376_vm0 = vcmask 1043456   ;;  %vm377_vm1 = vcmask 1044480   ;;  %v1444_v0 = vmov 65535   ;;  %vm279_vm2 = vcmask 72704  }
  0x1d   :  { %v378_v1 = vsel %vm376_vm0, 4294967295, %v1444_v0  ;;  %v1363_v3 = vld [vmem:[#allocation2] sm:$0x1f]   ;;  %v1366_v7 = vld [vmem:[%s1921_s0 + $0x8] sm:$0xff]   ;;  %v1368_v9 = vld [vmem:[%s1921_s0 + $0x10] sm:$0xff]   ;;  %vm992_vm3 = vcmask 257024  }
  0x1e   :  { %v379_v2 = vsel %vm377_vm1, %v378_v1, 0  ;;  %v1364_v4 = vld [vmem:[%s1921_s0] sm:$0xff]   ;;  %v1367_v8 = vld [vmem:[%s1921_s0 + $0x88] sm:$0xff]   ;;  %v1369_v10 = vld [vmem:[%s1921_s0 + $0x90] sm:$0xff]  }
  0x1f   :  { %v381_v5 = vand.u32 %v1363_v3, %v379_v2  ;;  %v1365_v6 = vld [vmem:[%s1921_s0 + $0x80] sm:$0xff]   ;;  %1292 = vmatprep.mubr.msk.bf16.mxu0 %vm279_vm2, %v1364_v4  ;;  %v1370_v11 = vld [vmem:[%s1921_s0 + $0x18] sm:$0xff]   ;;  %v1374_v15 = vld [vmem:[%s1921_s0 + $0x28] sm:$0xff]  }
  0x20   :  { %1324 = vmatprep.mubr.msk.bf16.mxu1 %vm279_vm2, %v1365_v6  ;;  %v1371_v12 = vld [vmem:[%s1921_s0 + $0x98] sm:$0xff]   ;;  %v1372_v13 = vld [vmem:[%s1921_s0 + $0x20] sm:$0xff]   ;;  %v1375_v16 = vld [vmem:[%s1921_s0 + $0xa8] sm:$0xff]  }
  0x21   :  { %1290 = vmatprep.subr.bf16.mxu0 %v381_v5  ;;  %1356 = vmatprep.subr.bf16.mxu1 %v381_v5  ;;  %v1373_v14 = vld [vmem:[%s1921_s0 + $0xa0] sm:$0xff]   ;;  %v1376_v17 = vld [vmem:[%s1921_s0 + $0x30] sm:$0xff]   ;;  %v1378_v19 = vld [vmem:[%s1921_s0 + $0x38] sm:$0xff]  }
  0x22   :  { %1291 = vmatpush3.bf16.msra.mxu0 %v381_v5  ;;  %1357 = vmatpush3.bf16.msra.mxu1 %v381_v5  ;;  %v1377_v18 = vld [vmem:[%s1921_s0 + $0xb0] sm:$0xff]   ;;  %v1379_v20 = vld [vmem:[%s1921_s0 + $0xb8] sm:$0xff]   ;;  %v1380_v21 = vld [vmem:[%s1921_s0 + $0x40] sm:$0xff]  }
  0x23   :  { %v1381_v22 = vld [vmem:[%s1921_s0 + $0xc0] sm:$0xff]   ;;  %v1382_v23 = vld [vmem:[%s1921_s0 + $0x48] sm:$0xff]   ;;  %v1384_v25 = vld [vmem:[%s1921_s0 + $0x50] sm:$0xff]  }
  0x24   :  { %v1383_v24 = vld [vmem:[%s1921_s0 + $0xc8] sm:$0xff]   ;;  %v1385_v26 = vld [vmem:[%s1921_s0 + $0xd0] sm:$0xff]   ;;  %v1386_v27 = vld [vmem:[%s1921_s0 + $0x58] sm:$0xff]  }
  0x25   :  { %1293 = vmatmul.mubr.msk.bf16.vlgmr.msra.gmra.mxu0 %vm279_vm2, %v1366_v7  ;;  %1325 = vmatmul.mubr.msk.bf16.vlgmr.msra.gmra.mxu1 %vm279_vm2, %v1367_v8  ;;  %v1387_v28 = vld [vmem:[%s1921_s0 + $0xd8] sm:$0xff]   ;;  %v1388_v29 = vld [vmem:[%s1921_s0 + $0x60] sm:$0xff]   ;;  %v1390_v31 = vld [vmem:[%s1921_s0 + $0x68] sm:$0xff]  }
  0x26   :  { %1296 = vmatprep.mubr.msk.bf16.mxu0 %vm279_vm2, %v1368_v9  ;;  %1328 = vmatprep.mubr.msk.bf16.mxu1 %vm279_vm2, %v1369_v10  ;;  %v1389_v30 = vld [vmem:[%s1921_s0 + $0xe0] sm:$0xff]   ;;  %v1391_v32 = vld [vmem:[%s1921_s0 + $0xe8] sm:$0xff]   ;;  %v1392_v33 = vld [vmem:[%s1921_s0 + $0x70] sm:$0xff]  }
  0x27   :  { %v1393_v34 = vld [vmem:[%s1921_s0 + $0xf0] sm:$0xff]   ;;  %v1394_v35 = vld [vmem:[%s1921_s0 + $0x78] sm:$0xff]   ;;  %v1599_v37 = vld [vmem:[#allocation4] ss:$0 sm:$0xff] }
  0x28   :  { %v1395_v36 = vld [vmem:[%s1921_s0 + $0xf8] sm:$0xff]  }
  0x2d   :  { %1297 = vmatmul.mubr.msk.bf16.gmra.mxu0 %vm279_vm2, %v1370_v11  ;;  %1329 = vmatmul.mubr.msk.bf16.gmra.mxu1 %vm279_vm2, %v1371_v12 }
  0x2e   :  { %1300 = vmatprep.mubr.msk.bf16.mxu0 %vm279_vm2, %v1372_v13  ;;  %1332 = vmatprep.mubr.msk.bf16.mxu1 %vm279_vm2, %v1373_v14 }
  0x35   :  { %1301 = vmatmul.mubr.msk.bf16.gmra.mxu0 %vm279_vm2, %v1374_v15  ;;  %1333 = vmatmul.mubr.msk.bf16.gmra.mxu1 %vm279_vm2, %v1375_v16 }
  0x36   :  { %1304 = vmatprep.mubr.msk.bf16.mxu0 %vm279_vm2, %v1376_v17  ;;  %1336 = vmatprep.mubr.msk.bf16.mxu1 %vm279_vm2, %v1377_v18 }
  0x3d   :  { %1305 = vmatmul.mubr.msk.bf16.gmra.mxu0 %vm279_vm2, %v1378_v19  ;;  %1337 = vmatmul.mubr.msk.bf16.gmra.mxu1 %vm279_vm2, %v1379_v20 }
  0x3e   :  { %1308 = vmatprep.mubr.msk.bf16.mxu0 %vm279_vm2, %v1380_v21  ;;  %1340 = vmatprep.mubr.msk.bf16.mxu1 %vm279_vm2, %v1381_v22 }
  0x45   :  { %1309 = vmatmul.mubr.msk.bf16.gmra.mxu0 %vm279_vm2, %v1382_v23  ;;  %1341 = vmatmul.mubr.msk.bf16.gmra.mxu1 %vm279_vm2, %v1383_v24 }
  0x46   :  { %1312 = vmatprep.mubr.msk.bf16.mxu0 %vm279_vm2, %v1384_v25  ;;  %1344 = vmatprep.mubr.msk.bf16.mxu1 %vm279_vm2, %v1385_v26 }
  0x4d   :  { %1313 = vmatmul.mubr.msk.bf16.gmra.mxu0 %vm279_vm2, %v1386_v27  ;;  %1345 = vmatmul.mubr.msk.bf16.gmra.mxu1 %vm279_vm2, %v1387_v28 }
  0x4e   :  { %1316 = vmatprep.mubr.msk.bf16.mxu0 %vm279_vm2, %v1388_v29  ;;  %1348 = vmatprep.mubr.msk.bf16.mxu1 %vm279_vm2, %v1389_v30 }
  0x55   :  { %1317 = vmatmul.mubr.msk.bf16.gmra.mxu0 %vm279_vm2, %v1390_v31  ;;  %1349 = vmatmul.mubr.msk.bf16.gmra.mxu1 %vm279_vm2, %v1391_v32 }
  0x56   :  { %1320 = vmatprep.mubr.msk.bf16.mxu0 %vm279_vm2, %v1392_v33  ;;  %1352 = vmatprep.mubr.msk.bf16.mxu1 %vm279_vm2, %v1393_v34 }
  0x5d   :  { %1321 = vmatmul.mubr.msk.bf16.gmra.mxu0 %vm279_vm2, %v1394_v35  ;;  %1353 = vmatmul.mubr.msk.bf16.gmra.mxu1 %vm279_vm2, %v1395_v36 }
  0xe5   :  { %v1294_v38 = vpop.f32.mrf.mxu0  ;;  %v1326_v39 = vpop.f32.mrf.mxu1 }
  0xe6   :  { %v426_v40 = vadd.f32 %v1294_v38, %v1599_v37  ;;  %v554_v41 = vadd.f32 %v1326_v39, %v1599_v37 }
  0xe7   :  { %v417_v42 = vpop.f32.mrf.mxu0  ;;  %v545_v43 = vpop.f32.mrf.mxu1 }
  0xe8   :  { %v674_v44 = vmax.f32 %v426_v40, 0.0  ;;  %v706_v45 = vmax.f32 %v554_v41, 0.0  ;;  %v418_v46 = vadd.f32 %v1599_v37, %v417_v42  ;;  %v546_v47 = vadd.f32 %v1599_v37, %v545_v43 }
  0xe9   :  { %v1295_v48 = vpop.f32.mrf.mxu0  ;;  %v1327_v49 = vpop.f32.mrf.mxu1 }
  0xea   :  { %v1195_v50 = vpack.c.bf16 %v674_v44, %v674_v44  ;;  %v1227_v51 = vpack.c.bf16 %v706_v45, %v706_v45  ;;  %v672_v52 = vmax.f32 %v418_v46, 0.0  ;;  %v704_v53 = vmax.f32 %v546_v47, 0.0 }
  0xeb   :  { %v429_v54 = vadd.f32 %v1295_v48, %v1599_v37  ;;  %v557_v55 = vadd.f32 %v1327_v49, %v1599_v37  ;;  %v420_v56 = vpop.f32.mrf.mxu0  ;;  %v548_v57 = vpop.f32.mrf.mxu1 }
  0xec   :  { %995 = vst.msk [vmem:[%s1924_s3 + $0x8] sm:$0xf] %vm992_vm3, %v1195_v50  ;;  %1027 = vst.msk [vmem:[%s1924_s3 + $0x88] sm:$0xf] %vm992_vm3, %v1227_v51  ;;  %v1193_v58 = vpack.c.bf16 %v672_v52, %v672_v52  ;;  %v1225_v59 = vpack.c.bf16 %v704_v53, %v704_v53  ;;  %v421_v60 = vadd.f32 %v1599_v37, %v420_v56 }
  0xed   :  { %v549_v61 = vadd.f32 %v1599_v37, %v548_v57  ;;  %v675_v62 = vmax.f32 %v429_v54, 0.0  ;;  %v707_v63 = vmax.f32 %v557_v55, 0.0  ;;  %v1298_v0 = vpop.f32.mrf.mxu0  ;;  %v1330_v1 = vpop.f32.mrf.mxu1 }
  0xee   :  { %993 = vst.msk [vmem:[%s1924_s3] sm:$0xf] %vm992_vm3, %v1193_v58  ;;  %1025 = vst.msk [vmem:[%s1924_s3 + $0x80] sm:$0xf] %vm992_vm3, %v1225_v59  ;;  %v673_v2 = vmax.f32 %v421_v60, 0.0  ;;  %v442_v4 = vadd.f32 %v1298_v0, %v1599_v37  ;;  %v570_v5 = vadd.f32 %v1330_v1, %v1599_v37 }
  0xef   :  { %v705_v3 = vmax.f32 %v549_v61, 0.0  ;;  %v1196_v6 = vpack.c.bf16 %v675_v62, %v675_v62  ;;  %v1228_v7 = vpack.c.bf16 %v707_v63, %v707_v63  ;;  %v433_v8 = vpop.f32.mrf.mxu0  ;;  %v561_v9 = vpop.f32.mrf.mxu1 }
  0xf0   :  { %v1194_v10 = vpack.c.bf16 %v673_v2, %v673_v2  ;;  %v678_v12 = vmax.f32 %v442_v4, 0.0  ;;  %v710_v13 = vmax.f32 %v570_v5, 0.0  ;;  %v434_v14 = vadd.f32 %v1599_v37, %v433_v8 }
  0xf1   :  { %v1226_v11 = vpack.c.bf16 %v705_v3, %v705_v3  ;;  %996 = vst.msk [vmem:[%s1924_s3 + $0xc] sm:$0xf] %vm992_vm3, %v1196_v6  ;;  %1028 = vst.msk [vmem:[%s1924_s3 + $0x8c] sm:$0xf] %vm992_vm3, %v1228_v7  ;;  %v562_v15 = vadd.f32 %v1599_v37, %v561_v9  ;;  %v1299_v16 = vpop.f32.mrf.mxu0  ;;  %v1331_v17 = vpop.f32.mrf.mxu1 }
  0xf2   :  { %994 = vst.msk [vmem:[%s1924_s3 + $0x4] sm:$0xf] %vm992_vm3, %v1194_v10  ;;  %v1199_v18 = vpack.c.bf16 %v678_v12, %v678_v12  ;;  %v1231_v19 = vpack.c.bf16 %v710_v13, %v710_v13  ;;  %v445_v20 = vadd.f32 %v1299_v16, %v1599_v37  ;;  %v573_v21 = vadd.f32 %v1331_v17, %v1599_v37 }
  0xf3   :  { %1026 = vst.msk [vmem:[%s1924_s3 + $0x84] sm:$0xf] %vm992_vm3, %v1226_v11  ;;  %v676_v22 = vmax.f32 %v434_v14, 0.0  ;;  %v708_v23 = vmax.f32 %v562_v15, 0.0  ;;  %v436_v24 = vpop.f32.mrf.mxu0  ;;  %v564_v25 = vpop.f32.mrf.mxu1 }
  0xf4   :  { %999 = vst.msk [vmem:[%s1924_s3 + $0x18] sm:$0xf] %vm992_vm3, %v1199_v18  ;;  %1031 = vst.msk [vmem:[%s1924_s3 + $0x98] sm:$0xf] %vm992_vm3, %v1231_v19  ;;  %v679_v26 = vmax.f32 %v445_v20, 0.0  ;;  %v711_v27 = vmax.f32 %v573_v21, 0.0  ;;  %v437_v28 = vadd.f32 %v1599_v37, %v436_v24  ;;  %v565_v29 = vadd.f32 %v1599_v37, %v564_v25 }
  0xf5   :  { %v1197_v30 = vpack.c.bf16 %v676_v22, %v676_v22  ;;  %v1229_v31 = vpack.c.bf16 %v708_v23, %v708_v23  ;;  %v1302_v32 = vpop.f32.mrf.mxu0  ;;  %v1334_v33 = vpop.f32.mrf.mxu1 }
  0xf6   :  { %v1200_v34 = vpack.c.bf16 %v679_v26, %v679_v26  ;;  %v1232_v35 = vpack.c.bf16 %v711_v27, %v711_v27  ;;  %v677_v36 = vmax.f32 %v437_v28, 0.0  ;;  %v709_v38 = vmax.f32 %v565_v29, 0.0 }
  0xf7   :  { %997 = vst.msk [vmem:[%s1924_s3 + $0x10] sm:$0xf] %vm992_vm3, %v1197_v30  ;;  %1029 = vst.msk [vmem:[%s1924_s3 + $0x90] sm:$0xf] %vm992_vm3, %v1229_v31  ;;  %v458_v39 = vadd.f32 %v1302_v32, %v1599_v37  ;;  %v586_v40 = vadd.f32 %v1334_v33, %v1599_v37  ;;  %v449_v41 = vpop.f32.mrf.mxu0  ;;  %v577_v42 = vpop.f32.mrf.mxu1 }
  0xf8   :  { %1000 = vst.msk [vmem:[%s1924_s3 + $0x1c] sm:$0xf] %vm992_vm3, %v1200_v34  ;;  %1032 = vst.msk [vmem:[%s1924_s3 + $0x9c] sm:$0xf] %vm992_vm3, %v1232_v35  ;;  %v1198_v43 = vpack.c.bf16 %v677_v36, %v677_v36  ;;  %v1230_v44 = vpack.c.bf16 %v709_v38, %v709_v38  ;;  %v450_v45 = vadd.f32 %v1599_v37, %v449_v41 }
  0xf9   :  { %v578_v46 = vadd.f32 %v1599_v37, %v577_v42  ;;  %v682_v47 = vmax.f32 %v458_v39, 0.0  ;;  %v714_v48 = vmax.f32 %v586_v40, 0.0  ;;  %v1303_v49 = vpop.f32.mrf.mxu0  ;;  %v1335_v50 = vpop.f32.mrf.mxu1 }
  0xfa   :  { %998 = vst.msk [vmem:[%s1924_s3 + $0x14] sm:$0xf] %vm992_vm3, %v1198_v43  ;;  %1030 = vst.msk [vmem:[%s1924_s3 + $0x94] sm:$0xf] %vm992_vm3, %v1230_v44  ;;  %v680_v51 = vmax.f32 %v450_v45, 0.0  ;;  %v461_v53 = vadd.f32 %v1303_v49, %v1599_v37  ;;  %v589_v54 = vadd.f32 %v1335_v50, %v1599_v37 }
  0xfb   :  { %v712_v52 = vmax.f32 %v578_v46, 0.0  ;;  %v1203_v55 = vpack.c.bf16 %v682_v47, %v682_v47  ;;  %v1235_v56 = vpack.c.bf16 %v714_v48, %v714_v48  ;;  %v452_v57 = vpop.f32.mrf.mxu0  ;;  %v580_v58 = vpop.f32.mrf.mxu1 }
  0xfc   :  { %v1201_v59 = vpack.c.bf16 %v680_v51, %v680_v51  ;;  %v683_v61 = vmax.f32 %v461_v53, 0.0  ;;  %v715_v62 = vmax.f32 %v589_v54, 0.0  ;;  %v453_v63 = vadd.f32 %v1599_v37, %v452_v57 }
  0xfd   :  { %v1233_v60 = vpack.c.bf16 %v712_v52, %v712_v52  ;;  %1003 = vst.msk [vmem:[%s1924_s3 + $0x28] sm:$0xf] %vm992_vm3, %v1203_v55  ;;  %1035 = vst.msk [vmem:[%s1924_s3 + $0xa8] sm:$0xf] %vm992_vm3, %v1235_v56  ;;  %v581_v0 = vadd.f32 %v1599_v37, %v580_v58  ;;  %v1306_v1 = vpop.f32.mrf.mxu0  ;;  %v1338_v2 = vpop.f32.mrf.mxu1 }
  0xfe   :  { %1001 = vst.msk [vmem:[%s1924_s3 + $0x20] sm:$0xf] %vm992_vm3, %v1201_v59  ;;  %v1204_v3 = vpack.c.bf16 %v683_v61, %v683_v61  ;;  %v1236_v4 = vpack.c.bf16 %v715_v62, %v715_v62  ;;  %v474_v5 = vadd.f32 %v1306_v1, %v1599_v37  ;;  %v602_v6 = vadd.f32 %v1338_v2, %v1599_v37 }
  0xff   :  { %1033 = vst.msk [vmem:[%s1924_s3 + $0xa0] sm:$0xf] %vm992_vm3, %v1233_v60  ;;  %v681_v7 = vmax.f32 %v453_v63, 0.0  ;;  %v713_v8 = vmax.f32 %v581_v0, 0.0  ;;  %v465_v9 = vpop.f32.mrf.mxu0  ;;  %v593_v10 = vpop.f32.mrf.mxu1 }
 0x100   :  { %1004 = vst.msk [vmem:[%s1924_s3 + $0x2c] sm:$0xf] %vm992_vm3, %v1204_v3  ;;  %1036 = vst.msk [vmem:[%s1924_s3 + $0xac] sm:$0xf] %vm992_vm3, %v1236_v4  ;;  %v686_v11 = vmax.f32 %v474_v5, 0.0  ;;  %v718_v12 = vmax.f32 %v602_v6, 0.0  ;;  %v466_v13 = vadd.f32 %v1599_v37, %v465_v9  ;;  %v594_v14 = vadd.f32 %v1599_v37, %v593_v10 }
 0x101   :  { %v1202_v15 = vpack.c.bf16 %v681_v7, %v681_v7  ;;  %v1234_v16 = vpack.c.bf16 %v713_v8, %v713_v8  ;;  %v1307_v17 = vpop.f32.mrf.mxu0  ;;  %v1339_v18 = vpop.f32.mrf.mxu1 }
 0x102   :  { %v1207_v19 = vpack.c.bf16 %v686_v11, %v686_v11  ;;  %v1239_v20 = vpack.c.bf16 %v718_v12, %v718_v12  ;;  %v684_v21 = vmax.f32 %v466_v13, 0.0  ;;  %v716_v22 = vmax.f32 %v594_v14, 0.0 }
 0x103   :  { %1002 = vst.msk [vmem:[%s1924_s3 + $0x24] sm:$0xf] %vm992_vm3, %v1202_v15  ;;  %1034 = vst.msk [vmem:[%s1924_s3 + $0xa4] sm:$0xf] %vm992_vm3, %v1234_v16  ;;  %v477_v23 = vadd.f32 %v1307_v17, %v1599_v37  ;;  %v605_v24 = vadd.f32 %v1339_v18, %v1599_v37  ;;  %v468_v25 = vpop.f32.mrf.mxu0  ;;  %v596_v26 = vpop.f32.mrf.mxu1 }
 0x104   :  { %1007 = vst.msk [vmem:[%s1924_s3 + $0x38] sm:$0xf] %vm992_vm3, %v1207_v19  ;;  %1039 = vst.msk [vmem:[%s1924_s3 + $0xb8] sm:$0xf] %vm992_vm3, %v1239_v20  ;;  %v1205_v27 = vpack.c.bf16 %v684_v21, %v684_v21  ;;  %v1237_v28 = vpack.c.bf16 %v716_v22, %v716_v22  ;;  %v469_v29 = vadd.f32 %v1599_v37, %v468_v25 }
 0x105   :  { %v597_v30 = vadd.f32 %v1599_v37, %v596_v26  ;;  %v687_v31 = vmax.f32 %v477_v23, 0.0  ;;  %v719_v32 = vmax.f32 %v605_v24, 0.0  ;;  %v1310_v33 = vpop.f32.mrf.mxu0  ;;  %v1342_v34 = vpop.f32.mrf.mxu1 }
 0x106   :  { %1005 = vst.msk [vmem:[%s1924_s3 + $0x30] sm:$0xf] %vm992_vm3, %v1205_v27  ;;  %1037 = vst.msk [vmem:[%s1924_s3 + $0xb0] sm:$0xf] %vm992_vm3, %v1237_v28  ;;  %v685_v35 = vmax.f32 %v469_v29, 0.0  ;;  %v490_v38 = vadd.f32 %v1310_v33, %v1599_v37  ;;  %v618_v39 = vadd.f32 %v1342_v34, %v1599_v37 }
 0x107   :  { %v717_v36 = vmax.f32 %v597_v30, 0.0  ;;  %v1208_v40 = vpack.c.bf16 %v687_v31, %v687_v31  ;;  %v1240_v41 = vpack.c.bf16 %v719_v32, %v719_v32  ;;  %v481_v42 = vpop.f32.mrf.mxu0  ;;  %v609_v43 = vpop.f32.mrf.mxu1 }
 0x108   :  { %v1206_v44 = vpack.c.bf16 %v685_v35, %v685_v35  ;;  %v690_v46 = vmax.f32 %v490_v38, 0.0  ;;  %v722_v47 = vmax.f32 %v618_v39, 0.0  ;;  %v482_v48 = vadd.f32 %v1599_v37, %v481_v42 }
 0x109   :  { %v1238_v45 = vpack.c.bf16 %v717_v36, %v717_v36  ;;  %1008 = vst.msk [vmem:[%s1924_s3 + $0x3c] sm:$0xf] %vm992_vm3, %v1208_v40  ;;  %1040 = vst.msk [vmem:[%s1924_s3 + $0xbc] sm:$0xf] %vm992_vm3, %v1240_v41  ;;  %v610_v49 = vadd.f32 %v1599_v37, %v609_v43  ;;  %v1311_v50 = vpop.f32.mrf.mxu0  ;;  %v1343_v51 = vpop.f32.mrf.mxu1 }
 0x10a   :  { %1006 = vst.msk [vmem:[%s1924_s3 + $0x34] sm:$0xf] %vm992_vm3, %v1206_v44  ;;  %v1211_v52 = vpack.c.bf16 %v690_v46, %v690_v46  ;;  %v1243_v53 = vpack.c.bf16 %v722_v47, %v722_v47  ;;  %v493_v54 = vadd.f32 %v1311_v50, %v1599_v37  ;;  %v621_v55 = vadd.f32 %v1343_v51, %v1599_v37 }
 0x10b   :  { %1038 = vst.msk [vmem:[%s1924_s3 + $0xb4] sm:$0xf] %vm992_vm3, %v1238_v45  ;;  %v688_v56 = vmax.f32 %v482_v48, 0.0  ;;  %v720_v57 = vmax.f32 %v610_v49, 0.0  ;;  %v484_v58 = vpop.f32.mrf.mxu0  ;;  %v612_v59 = vpop.f32.mrf.mxu1 }
 0x10c   :  { %1011 = vst.msk [vmem:[%s1924_s3 + $0x48] sm:$0xf] %vm992_vm3, %v1211_v52  ;;  %1043 = vst.msk [vmem:[%s1924_s3 + $0xc8] sm:$0xf] %vm992_vm3, %v1243_v53  ;;  %v691_v60 = vmax.f32 %v493_v54, 0.0  ;;  %v723_v61 = vmax.f32 %v621_v55, 0.0  ;;  %v485_v62 = vadd.f32 %v1599_v37, %v484_v58  ;;  %v613_v63 = vadd.f32 %v1599_v37, %v612_v59 }
 0x10d   :  { %v1209_v0 = vpack.c.bf16 %v688_v56, %v688_v56  ;;  %v1241_v1 = vpack.c.bf16 %v720_v57, %v720_v57  ;;  %v1314_v2 = vpop.f32.mrf.mxu0  ;;  %v1346_v3 = vpop.f32.mrf.mxu1 }
 0x10e   :  { %v1212_v4 = vpack.c.bf16 %v691_v60, %v691_v60  ;;  %v1244_v5 = vpack.c.bf16 %v723_v61, %v723_v61  ;;  %v689_v6 = vmax.f32 %v485_v62, 0.0  ;;  %v721_v7 = vmax.f32 %v613_v63, 0.0 }
 0x10f   :  { %1009 = vst.msk [vmem:[%s1924_s3 + $0x40] sm:$0xf] %vm992_vm3, %v1209_v0  ;;  %1041 = vst.msk [vmem:[%s1924_s3 + $0xc0] sm:$0xf] %vm992_vm3, %v1241_v1  ;;  %v506_v8 = vadd.f32 %v1314_v2, %v1599_v37  ;;  %v634_v9 = vadd.f32 %v1346_v3, %v1599_v37  ;;  %v497_v10 = vpop.f32.mrf.mxu0  ;;  %v625_v11 = vpop.f32.mrf.mxu1 }
 0x110   :  { %1012 = vst.msk [vmem:[%s1924_s3 + $0x4c] sm:$0xf] %vm992_vm3, %v1212_v4  ;;  %1044 = vst.msk [vmem:[%s1924_s3 + $0xcc] sm:$0xf] %vm992_vm3, %v1244_v5  ;;  %v1210_v12 = vpack.c.bf16 %v689_v6, %v689_v6  ;;  %v1242_v13 = vpack.c.bf16 %v721_v7, %v721_v7  ;;  %v498_v14 = vadd.f32 %v1599_v37, %v497_v10 }
 0x111   :  { %v626_v15 = vadd.f32 %v1599_v37, %v625_v11  ;;  %v694_v16 = vmax.f32 %v506_v8, 0.0  ;;  %v726_v17 = vmax.f32 %v634_v9, 0.0  ;;  %v1315_v18 = vpop.f32.mrf.mxu0  ;;  %v1347_v19 = vpop.f32.mrf.mxu1 }
 0x112   :  { %1010 = vst.msk [vmem:[%s1924_s3 + $0x44] sm:$0xf] %vm992_vm3, %v1210_v12  ;;  %1042 = vst.msk [vmem:[%s1924_s3 + $0xc4] sm:$0xf] %vm992_vm3, %v1242_v13  ;;  %v692_v20 = vmax.f32 %v498_v14, 0.0  ;;  %v509_v22 = vadd.f32 %v1315_v18, %v1599_v37  ;;  %v637_v23 = vadd.f32 %v1347_v19, %v1599_v37 }
 0x113   :  { %v724_v21 = vmax.f32 %v626_v15, 0.0  ;;  %v1215_v24 = vpack.c.bf16 %v694_v16, %v694_v16  ;;  %v1247_v25 = vpack.c.bf16 %v726_v17, %v726_v17  ;;  %v500_v26 = vpop.f32.mrf.mxu0  ;;  %v628_v27 = vpop.f32.mrf.mxu1 }
 0x114   :  { %v1213_v28 = vpack.c.bf16 %v692_v20, %v692_v20  ;;  %v695_v30 = vmax.f32 %v509_v22, 0.0  ;;  %v727_v31 = vmax.f32 %v637_v23, 0.0  ;;  %v501_v32 = vadd.f32 %v1599_v37, %v500_v26 }
 0x115   :  { %v1245_v29 = vpack.c.bf16 %v724_v21, %v724_v21  ;;  %1015 = vst.msk [vmem:[%s1924_s3 + $0x58] sm:$0xf] %vm992_vm3, %v1215_v24  ;;  %1047 = vst.msk [vmem:[%s1924_s3 + $0xd8] sm:$0xf] %vm992_vm3, %v1247_v25  ;;  %v629_v33 = vadd.f32 %v1599_v37, %v628_v27  ;;  %v1318_v34 = vpop.f32.mrf.mxu0  ;;  %v1350_v35 = vpop.f32.mrf.mxu1 }
 0x116   :  { %1013 = vst.msk [vmem:[%s1924_s3 + $0x50] sm:$0xf] %vm992_vm3, %v1213_v28  ;;  %v1216_v36 = vpack.c.bf16 %v695_v30, %v695_v30  ;;  %v1248_v38 = vpack.c.bf16 %v727_v31, %v727_v31  ;;  %v522_v39 = vadd.f32 %v1318_v34, %v1599_v37  ;;  %v650_v40 = vadd.f32 %v1350_v35, %v1599_v37 }
 0x117   :  { %1045 = vst.msk [vmem:[%s1924_s3 + $0xd0] sm:$0xf] %vm992_vm3, %v1245_v29  ;;  %v693_v41 = vmax.f32 %v501_v32, 0.0  ;;  %v725_v42 = vmax.f32 %v629_v33, 0.0  ;;  %v513_v43 = vpop.f32.mrf.mxu0  ;;  %v641_v44 = vpop.f32.mrf.mxu1 }
 0x118   :  { %1016 = vst.msk [vmem:[%s1924_s3 + $0x5c] sm:$0xf] %vm992_vm3, %v1216_v36  ;;  %1048 = vst.msk [vmem:[%s1924_s3 + $0xdc] sm:$0xf] %vm992_vm3, %v1248_v38  ;;  %v698_v45 = vmax.f32 %v522_v39, 0.0  ;;  %v730_v46 = vmax.f32 %v650_v40, 0.0  ;;  %v514_v47 = vadd.f32 %v1599_v37, %v513_v43  ;;  %v642_v48 = vadd.f32 %v1599_v37, %v641_v44 }
 0x119   :  { %v1214_v49 = vpack.c.bf16 %v693_v41, %v693_v41  ;;  %v1246_v50 = vpack.c.bf16 %v725_v42, %v725_v42  ;;  %v1319_v51 = vpop.f32.mrf.mxu0  ;;  %v1351_v52 = vpop.f32.mrf.mxu1 }
 0x11a   :  { %v1219_v53 = vpack.c.bf16 %v698_v45, %v698_v45  ;;  %v1251_v54 = vpack.c.bf16 %v730_v46, %v730_v46  ;;  %v696_v55 = vmax.f32 %v514_v47, 0.0  ;;  %v728_v56 = vmax.f32 %v642_v48, 0.0 }
 0x11b   :  { %1014 = vst.msk [vmem:[%s1924_s3 + $0x54] sm:$0xf] %vm992_vm3, %v1214_v49  ;;  %1046 = vst.msk [vmem:[%s1924_s3 + $0xd4] sm:$0xf] %vm992_vm3, %v1246_v50  ;;  %v525_v57 = vadd.f32 %v1319_v51, %v1599_v37  ;;  %v653_v58 = vadd.f32 %v1351_v52, %v1599_v37  ;;  %v516_v59 = vpop.f32.mrf.mxu0  ;;  %v644_v60 = vpop.f32.mrf.mxu1 }
 0x11c   :  { %1019 = vst.msk [vmem:[%s1924_s3 + $0x68] sm:$0xf] %vm992_vm3, %v1219_v53  ;;  %1051 = vst.msk [vmem:[%s1924_s3 + $0xe8] sm:$0xf] %vm992_vm3, %v1251_v54  ;;  %v1217_v61 = vpack.c.bf16 %v696_v55, %v696_v55  ;;  %v1249_v62 = vpack.c.bf16 %v728_v56, %v728_v56  ;;  %v517_v63 = vadd.f32 %v1599_v37, %v516_v59 }
 0x11d   :  { %v645_v0 = vadd.f32 %v1599_v37, %v644_v60  ;;  %v699_v1 = vmax.f32 %v525_v57, 0.0  ;;  %v731_v2 = vmax.f32 %v653_v58, 0.0  ;;  %v1322_v3 = vpop.f32.mrf.mxu0  ;;  %v1354_v4 = vpop.f32.mrf.mxu1 }
 0x11e   :  { %1017 = vst.msk [vmem:[%s1924_s3 + $0x60] sm:$0xf] %vm992_vm3, %v1217_v61  ;;  %1049 = vst.msk [vmem:[%s1924_s3 + $0xe0] sm:$0xf] %vm992_vm3, %v1249_v62  ;;  %v697_v5 = vmax.f32 %v517_v63, 0.0  ;;  %v538_v7 = vadd.f32 %v1322_v3, %v1599_v37  ;;  %v666_v8 = vadd.f32 %v1354_v4, %v1599_v37 }
 0x11f   :  { %v729_v6 = vmax.f32 %v645_v0, 0.0  ;;  %v1220_v9 = vpack.c.bf16 %v699_v1, %v699_v1  ;;  %v1252_v10 = vpack.c.bf16 %v731_v2, %v731_v2  ;;  %v529_v11 = vpop.f32.mrf.mxu0  ;;  %v657_v12 = vpop.f32.mrf.mxu1 }
 0x120   :  { %v1218_v13 = vpack.c.bf16 %v697_v5, %v697_v5  ;;  %v702_v15 = vmax.f32 %v538_v7, 0.0  ;;  %v734_v16 = vmax.f32 %v666_v8, 0.0  ;;  %v530_v17 = vadd.f32 %v1599_v37, %v529_v11 }
 0x121   :  { %v1250_v14 = vpack.c.bf16 %v729_v6, %v729_v6  ;;  %1020 = vst.msk [vmem:[%s1924_s3 + $0x6c] sm:$0xf] %vm992_vm3, %v1220_v9  ;;  %1052 = vst.msk [vmem:[%s1924_s3 + $0xec] sm:$0xf] %vm992_vm3, %v1252_v10  ;;  %v658_v18 = vadd.f32 %v1599_v37, %v657_v12  ;;  %v1323_v19 = vpop.f32.mrf.mxu0  ;;  %v1355_v20 = vpop.f32.mrf.mxu1 }
 0x122   :  { %1018 = vst.msk [vmem:[%s1924_s3 + $0x64] sm:$0xf] %vm992_vm3, %v1218_v13  ;;  %v1223_v21 = vpack.c.bf16 %v702_v15, %v702_v15  ;;  %v1255_v22 = vpack.c.bf16 %v734_v16, %v734_v16  ;;  %v541_v23 = vadd.f32 %v1323_v19, %v1599_v37  ;;  %v669_v24 = vadd.f32 %v1355_v20, %v1599_v37 }
 0x123   :  { %1050 = vst.msk [vmem:[%s1924_s3 + $0xe4] sm:$0xf] %vm992_vm3, %v1250_v14  ;;  %v700_v25 = vmax.f32 %v530_v17, 0.0  ;;  %v732_v26 = vmax.f32 %v658_v18, 0.0  ;;  %v532_v27 = vpop.f32.mrf.mxu0  ;;  %v660_v28 = vpop.f32.mrf.mxu1 }
 0x124   :  { %1023 = vst.msk [vmem:[%s1924_s3 + $0x78] sm:$0xf] %vm992_vm3, %v1223_v21  ;;  %1055 = vst.msk [vmem:[%s1924_s3 + $0xf8] sm:$0xf] %vm992_vm3, %v1255_v22  ;;  %v703_v29 = vmax.f32 %v541_v23, 0.0  ;;  %v735_v30 = vmax.f32 %v669_v24, 0.0  ;;  %v533_v31 = vadd.f32 %v1599_v37, %v532_v27  ;;  %v661_v32 = vadd.f32 %v1599_v37, %v660_v28 }
 0x125   :  { %v1221_v33 = vpack.c.bf16 %v700_v25, %v700_v25  ;;  %v1253_v34 = vpack.c.bf16 %v732_v26, %v732_v26 }
 0x126   :  { %v1224_v35 = vpack.c.bf16 %v703_v29, %v703_v29  ;;  %v1256_v36 = vpack.c.bf16 %v735_v30, %v735_v30  ;;  %v701_v38 = vmax.f32 %v533_v31, 0.0  ;;  %v733_v39 = vmax.f32 %v661_v32, 0.0 }
 0x127   :  { %1021 = vst.msk [vmem:[%s1924_s3 + $0x70] sm:$0xf] %vm992_vm3, %v1221_v33  ;;  %1053 = vst.msk [vmem:[%s1924_s3 + $0xf0] sm:$0xf] %vm992_vm3, %v1253_v34 }
 0x128   :  { %1024 = vst.msk [vmem:[%s1924_s3 + $0x7c] sm:$0xf] %vm992_vm3, %v1224_v35  ;;  %1056 = vst.msk [vmem:[%s1924_s3 + $0xfc] sm:$0xf] %vm992_vm3, %v1256_v36  ;;  %v1222_v37 = vpack.c.bf16 %v701_v38, %v701_v38  ;;  %v1254_v40 = vpack.c.bf16 %v733_v39, %v733_v39 }
 0x12a   :  { %1022 = vst.msk [vmem:[%s1924_s3 + $0x74] sm:$0xf] %vm992_vm3, %v1222_v37  ;;  %1054 = vst.msk [vmem:[%s1924_s3 + $0xf4] sm:$0xf] %vm992_vm3, %v1254_v40 }
 0x12b   :  { %1061 = vsyncpa [#allocation3], 1 }
 0x12c   :  { %1062 = vsyncpa [#allocation5], 1 }

// kernel: autoencoder_forward.9
= control target key start
LH: loop header
LB: loop body
LE: loop exit
PB: predicated region body
PF: predicated region fallthrough
CT: control target
= control target key end

     0   :  { %8 = vsyncpa [#allocation3], 0  ;;  %s917_s12 = smov [#allocation2]   ;;  %s1181_s0 = inlined_call_operand.vmem [shape: bf16[128,288], index: 0, kind: input, shape index: {}]   ;;  %s1182_s1 = inlined_call_operand.vmem [shape: bf16[288,64], index: 1, kind: input, shape index: {}]   ;;  %s1183_s2 = inlined_call_operand.hbm [shape: f32[1,64], index: 2, kind: input, shape index: {}]   ;;  %s1184_s3 = inlined_call_operand.vmem [shape: bf16[128,64], index: 3, kind: output, shape index: {}]  }
   0x1   :  { %s19_s13 = sshll.u32 %s917_s12, 4  ;;  %s20_s13 = int_to_ptr.vmem [resolvable:$true] %s19_s13 }
   0x2   :  { %s903_s14 = scalar_lea.vmem %s20_s13, 16  ;;  %s907_s15 = scalar_lea.vmem %s20_s13, 32 }
   0x3   :  { %p904_p0 = scmp.ne.s32.totalorder %s20_s13, %s903_s14  ;;  %p908_p1 = scmp.lt.s32.totalorder %s20_s13, %s20_s13 }
   0x4   :  { %p909_p2 = scmp.lt.s32.totalorder %s907_s15, %s903_s14 }
   0x6   :  { %p910_p3 = por %p909_p2, %p908_p1 }
   0x8   :  { %p911_p4 = pnand %p910_p3, %p904_p0 }
   0xa   :  { %914 = shalt.err (!%p911_p4)
}
   0xb   :  { %22 = dma.hbm_to_vmem [thread:$0]  %s1183_s2, 16, %s20_s13, [#allocation3]  }
   0xc   :  { %915 = dma.done.wait [#allocation3], 16  }
   0xd   :  { %916 = vsyncadd [#allocation3], 4294967280  ;;  %v845_v0 = vld [vmem:[%s1182_s1 + $0x78] sm:$0xff]   ;;  %v847_v2 = vld [vmem:[%s1182_s1 + $0x70] sm:$0xff]   ;;  %vm330_vm0 = vcmask 261120   ;;  %vm629_vm1 = vcmask 519168  }
   0xe   :  { %v846_v1 = vld [vmem:[%s1182_s1 + $0x38] sm:$0xff]   ;;  %734 = vmatprep.subr.bf16.mxu0 %v845_v0  ;;  %828 = vmatprep.subr.bf16.mxu1 %v845_v0  ;;  %v848_v3 = vld [vmem:[%s1182_s1 + $0x30] sm:$0xff]   ;;  %v849_v4 = vld [vmem:[%s1182_s1 + $0x68] sm:$0xff]  }
   0xf   :  { %735 = vmatpush3.bf16.msra.mxu0 %v846_v1  ;;  %836 = vmatpush3.bf16.msra.mxu1 %v846_v1  ;;  %v850_v5 = vld [vmem:[%s1182_s1 + $0x28] sm:$0xff]   ;;  %v851_v6 = vld [vmem:[%s1182_s1 + $0x60] sm:$0xff]   ;;  %v853_v8 = vld [vmem:[%s1182_s1 + $0x58] sm:$0xff]  }
  0x10   :  { %736 = vmatprep.subr.bf16.mxu0 %v847_v2  ;;  %829 = vmatprep.subr.bf16.mxu1 %v847_v2  ;;  %v852_v7 = vld [vmem:[%s1182_s1 + $0x20] sm:$0xff]   ;;  %v854_v9 = vld [vmem:[%s1182_s1 + $0x18] sm:$0xff]   ;;  %v855_v10 = vld [vmem:[%s1182_s1 + $0x50] sm:$0xff]  }
  0x11   :  { %v863_v11 = vld [vmem:[%s1181_s0 + $0x4] ss:$12 sps:$4 sm:$0xff]   ;;  %v866_v12 = vld [vmem:[%s1181_s0 + $0x94] ss:$12 sps:$4 sm:$0xff]   ;;  %v857_v14 = vld [vmem:[%s1182_s1 + $0x48] sm:$0xff]  }
  0x12   :  { %v856_v13 = vld [vmem:[%s1182_s1 + $0x10] sm:$0xff]   ;;  %387 = vmatprep.mubr.bf16.mxu0 %v863_v11  ;;  %435 = vmatprep.mubr.bf16.mxu1 %v866_v12  ;;  %v858_v15 = vld [vmem:[%s1182_s1 + $0x8] sm:$0xff]   ;;  %v859_v16 = vld [vmem:[%s1182_s1 + $0x40] sm:$0xff]  }
  0x13   :  { %737 = vmatpush3.bf16.msra.mxu0 %v848_v3  ;;  %837 = vmatpush3.bf16.msra.mxu1 %v848_v3  ;;  %v860_v17 = vld [vmem:[%s1182_s1] sm:$0xff]   ;;  %v867_v19 = vld [vmem:[%s1182_s1 + $0x88] sm:$0xff]   ;;  %v864_v20 = vld [vmem:[%s1181_s0 + $0x90] ss:$12 sps:$4 sm:$0xff]  }
  0x14   :  { %738 = vmatprep.subr.bf16.mxu0 %v849_v4  ;;  %830 = vmatprep.subr.bf16.mxu1 %v849_v4  ;;  %v861_v18 = vld [vmem:[%s1181_s0] ss:$12 sps:$4 sm:$0xff]   ;;  %v868_v21 = vld [vmem:[%s1181_s0 + $0x1c] ss:$12 sps:$4 sm:$0xff]   ;;  %v872_v24 = vld [vmem:[%s1181_s0 + $0x18] ss:$12 sps:$4 sm:$0xff]  }
  0x15   :  { %v870_v22 = vld [vmem:[%s1181_s0 + $0xac] ss:$12 sps:$4 sm:$0xff]   ;;  %v874_v23 = vld [vmem:[%s1182_s1 + $0x80] sm:$0xff]   ;;  %v873_v25 = vld [vmem:[%s1181_s0 + $0xa8] ss:$12 sps:$4 sm:$0xff]  }
  0x16   :  { %v875_v26 = vld [vmem:[%s1181_s0 + $0x34] ss:$12 sps:$4 sm:$0xff]   ;;  %v878_v28 = vld [vmem:[%s1181_s0 + $0x30] ss:$12 sps:$4 sm:$0xff]   ;;  %v880_v30 = vld [vmem:[%s1181_s0 + $0x4c] ss:$12 sps:$4 sm:$0xff]  }
  0x17   :  { %739 = vmatpush3.bf16.msra.mxu0 %v850_v5  ;;  %838 = vmatpush3.bf16.msra.mxu1 %v850_v5  ;;  %v877_v27 = vld [vmem:[%s1181_s0 + $0x8] ss:$12 sps:$4 sm:$0xff]   ;;  %v879_v29 = vld [vmem:[%s1181_s0 + $0x20] ss:$12 sps:$4 sm:$0xff]   ;;  %v882_v31 = vld [vmem:[%s1181_s0 + $0x38] ss:$12 sps:$4 sm:$0xff]  }
  0x18   :  { %740 = vmatprep.subr.bf16.mxu0 %v851_v6  ;;  %831 = vmatprep.subr.bf16.mxu1 %v851_v6  ;;  %v883_v32 = vld [vmem:[%s1181_s0 + $0x48] ss:$12 sps:$4 sm:$0xff]   ;;  %v884_v33 = vld [vmem:[%s1181_s0 + $0x50] ss:$12 sps:$4 sm:$0xff]   ;;  %v888_v36 = vld [vmem:[%s1181_s0 + $0x60] ss:$12 sps:$4 sm:$0xff]  }
  0x19   :  { %v885_v34 = vld [vmem:[%s1181_s0 + $0x64] ss:$12 sps:$4 sm:$0xff]   ;;  %v887_v35 = vld [vmem:[%s1181_s0 + $0x68] ss:$12 sps:$4 sm:$0xff]   ;;  %v889_v37 = vld [vmem:[%s1181_s0 + $0x80] ss:$12 sps:$4 sm:$0xff]  }
  0x1a   :  { %v890_v38 = vld [vmem:[%s1181_s0 + $0x7c] ss:$12 sps:$4 sm:$0xff]   ;;  %v892_v39 = vld [vmem:[%s1181_s0 + $0x98] ss:$12 sps:$4 sm:$0xff]   ;;  %v1091_v60 = vld [vmem:[#allocation2] ss:$0 sm:$0xff] }
  0x1b   :  { %741 = vmatpush3.bf16.msra.mxu0 %v852_v7  ;;  %839 = vmatpush3.bf16.msra.mxu1 %v852_v7  ;;  %v893_v40 = vld [vmem:[%s1181_s0 + $0x78] ss:$12 sps:$4 sm:$0xff]   ;;  %v894_v41 = vld [vmem:[%s1181_s0 + $0xb0] ss:$12 sps:$4 sm:$0xff]  }
  0x1c   :  { %742 = vmatprep.subr.bf16.mxu0 %v853_v8  ;;  %832 = vmatprep.subr.bf16.mxu1 %v853_v8 }
  0x1f   :  { %743 = vmatpush3.bf16.msra.mxu0 %v854_v9  ;;  %840 = vmatpush3.bf16.msra.mxu1 %v854_v9 }
  0x20   :  { %744 = vmatprep.subr.bf16.mxu0 %v855_v10  ;;  %833 = vmatprep.subr.bf16.mxu1 %v855_v10 }
  0x23   :  { %745 = vmatpush3.bf16.msra.mxu0 %v856_v13  ;;  %841 = vmatpush3.bf16.msra.mxu1 %v856_v13 }
  0x24   :  { %746 = vmatprep.subr.bf16.mxu0 %v857_v14  ;;  %834 = vmatprep.subr.bf16.mxu1 %v857_v14 }
  0x27   :  { %747 = vmatpush3.bf16.msra.mxu0 %v858_v15  ;;  %842 = vmatpush3.bf16.msra.mxu1 %v858_v15 }
  0x28   :  { %748 = vmatprep.subr.bf16.mxu0 %v859_v16  ;;  %835 = vmatprep.subr.bf16.mxu1 %v859_v16 }
  0x2b   :  { %749 = vmatpush3.bf16.msra.mxu0 %v860_v17  ;;  %843 = vmatpush3.bf16.msra.mxu1 %v860_v17 }
  0x2c   :  { %808 = vmatprep.subr.bf16.mxu1 %v867_v19 }
  0x2e   :  { %388 = vmatmul.mubr.bf16.vlgmr.msra.gmra.mxu0 %v861_v18  ;;  %436 = vmatmul.mubr.bf16.vlgmr.msra.gmra.mxu1 %v864_v20 }
  0x2f   :  { %809 = vmatpush3.bf16.msra.mxu1 %v867_v19  ;;  %395 = vmatprep.mubr.bf16.mxu0 %v868_v21 }
  0x30   :  { %443 = vmatprep.mubr.bf16.mxu1 %v870_v22  ;;  %810 = vmatprep.subr.bf16.mxu1 %v874_v23 }
  0x33   :  { %811 = vmatpush3.bf16.msra.mxu1 %v874_v23 }
  0x36   :  { %396 = vmatmul.mubr.bf16.gmra.mxu0 %v872_v24  ;;  %444 = vmatmul.mubr.bf16.gmra.mxu1 %v873_v25 }
  0x37   :  { %403 = vmatprep.mubr.bf16.mxu0 %v875_v26  ;;  %812 = vmatprep.mubr.msk.bf16.mxu1 %vm330_vm0, %v877_v27 }
  0x3e   :  { %404 = vmatmul.mubr.bf16.gmra.mxu0 %v878_v28  ;;  %813 = vmatmul.mubr.msk.bf16.vlgmr.msra.gmra.mxu1 %vm330_vm0, %v879_v29 }
  0x3f   :  { %411 = vmatprep.mubr.bf16.mxu0 %v880_v30  ;;  %816 = vmatprep.mubr.msk.bf16.mxu1 %vm330_vm0, %v882_v31 }
  0x46   :  { %412 = vmatmul.mubr.bf16.gmra.mxu0 %v883_v32  ;;  %817 = vmatmul.mubr.msk.bf16.gmra.mxu1 %vm330_vm0, %v884_v33 }
  0x47   :  { %419 = vmatprep.mubr.bf16.mxu0 %v885_v34  ;;  %820 = vmatprep.mubr.msk.bf16.mxu1 %vm330_vm0, %v887_v35 }
  0x4e   :  { %420 = vmatmul.mubr.bf16.gmra.mxu0 %v888_v36  ;;  %821 = vmatmul.mubr.msk.bf16.gmra.mxu1 %vm330_vm0, %v889_v37 }
  0x4f   :  { %427 = vmatprep.mubr.bf16.mxu0 %v890_v38  ;;  %824 = vmatprep.mubr.msk.bf16.mxu1 %vm330_vm0, %v892_v39 }
  0x56   :  { %428 = vmatmul.mubr.bf16.gmra.mxu0 %v893_v40  ;;  %825 = vmatmul.mubr.msk.bf16.gmra.mxu1 %vm330_vm0, %v894_v41 }
  0xee   :  { %v750_v42 = vpop.f32.mrf.mxu0  ;;  %v1075_v43 = vpop.f32.mrf.mxu1 }
  0xf0   :  { %v751_v44 = vpop.f32.mrf.mxu0  ;;  %v1077_v45 = vpop.f32.mrf.mxu1 }
  0xf1   :  { %v752_v57 = vadd.f32 %v751_v44, %v750_v42 }
  0xf2   :  { %v753_v46 = vpop.f32.mrf.mxu0  ;;  %v1079_v47 = vpop.f32.mrf.mxu1 }
  0xf3   :  { %v390_v3 = vadd.f32 %v752_v57, %v1091_v60 }
  0xf4   :  { %v754_v48 = vpop.f32.mrf.mxu0  ;;  %v1081_v49 = vpop.f32.mrf.mxu1 }
  0xf5   :  { %v755_v63 = vadd.f32 %v754_v48, %v753_v46 }
  0xf6   :  { %v756_v50 = vpop.f32.mrf.mxu0  ;;  %v1083_v51 = vpop.f32.mrf.mxu1 }
  0xf7   :  { %v393_v11 = vadd.f32 %v755_v63, %v1091_v60 }
  0xf8   :  { %v757_v52 = vpop.f32.mrf.mxu0  ;;  %v1085_v53 = vpop.f32.mrf.mxu1 }
  0xf9   :  { %v758_v54 = vadd.f32 %v757_v52, %v756_v50 }
  0xfa   :  { %v759_v55 = vpop.f32.mrf.mxu0  ;;  %v1087_v56 = vpop.f32.mrf.mxu1 }
  0xfb   :  { %v398_v62 = vadd.f32 %v758_v54, %v1091_v60  ;;  %v794_v54 = vadd.f32 %v1085_v53, %v1083_v51  ;;  %v788_v53 = vadd.f32 %v1077_v45, %v1075_v43 }
  0xfc   :  { %v760_v58 = vpop.f32.mrf.mxu0  ;;  %v1089_v59 = vpop.f32.mrf.mxu1 }
  0xfd   :  { %v761_v61 = vadd.f32 %v760_v58, %v759_v55 }
  0xfe   :  { %v762_v0 = vpop.f32.mrf.mxu0  ;;  %v814_v1 = vpop.f32.mrf.mxu1 }
  0xff   :  { %v495_v2 = vadd.f32 %v814_v1, %v398_v62  ;;  %v401_v8 = vadd.f32 %v761_v61, %v1091_v60 }
 0x100   :  { %v763_v4 = vpop.f32.mrf.mxu0  ;;  %v486_v5 = vpop.f32.mrf.mxu1 }
 0x101   :  { %v551_v6 = vmax.f32 %v495_v2, 0.0  ;;  %v487_v7 = vadd.f32 %v486_v5, %v390_v3  ;;  %v764_v13 = vadd.f32 %v763_v4, %v762_v0  ;;  %v797_v3 = vadd.f32 %v1089_v59, %v1087_v56 }
 0x102   :  { %v765_v9 = vpop.f32.mrf.mxu0  ;;  %v815_v10 = vpop.f32.mrf.mxu1  ;;  %v791_v56 = vadd.f32 %v1081_v49, %v1079_v47 }
 0x103   :  { %v720_v12 = vpack.c.bf16 %v551_v6, %v551_v6  ;;  %v549_v14 = vmax.f32 %v487_v7, 0.0  ;;  %v498_v15 = vadd.f32 %v815_v10, %v401_v8  ;;  %v406_v26 = vadd.f32 %v764_v13, %v1091_v60 }
 0x104   :  { %v766_v16 = vpop.f32.mrf.mxu0  ;;  %v489_v17 = vpop.f32.mrf.mxu1  ;;  %v438_v13 = vadd.f32 %v788_v53, %v1091_v60 }
 0x105   :  { %632 = vst.msk [vmem:[%s1184_s3 + $0x8] sm:$0xf] %vm629_vm1, %v720_v12  ;;  %v718_v18 = vpack.c.bf16 %v549_v14, %v549_v14  ;;  %v552_v19 = vmax.f32 %v498_v15, 0.0  ;;  %v490_v20 = vadd.f32 %v489_v17, %v393_v11  ;;  %v767_v24 = vadd.f32 %v766_v16, %v765_v9 }
 0x106   :  { %v768_v21 = vpop.f32.mrf.mxu0  ;;  %v818_v22 = vpop.f32.mrf.mxu1  ;;  %v446_v9 = vadd.f32 %v794_v54, %v1091_v60  ;;  %v449_v15 = vadd.f32 %v797_v3, %v1091_v60 }
 0x107   :  { %630 = vst.msk [vmem:[%s1184_s3] sm:$0xf] %vm629_vm1, %v718_v18  ;;  %v721_v23 = vpack.c.bf16 %v552_v19, %v552_v19  ;;  %v550_v25 = vmax.f32 %v490_v20, 0.0  ;;  %v409_v36 = vadd.f32 %v767_v24, %v1091_v60 }
 0x108   :  { %v769_v27 = vpop.f32.mrf.mxu0  ;;  %v502_v28 = vpop.f32.mrf.mxu1 }
 0x109   :  { %633 = vst.msk [vmem:[%s1184_s3 + $0xc] sm:$0xf] %vm629_vm1, %v721_v23  ;;  %v719_v29 = vpack.c.bf16 %v550_v25, %v550_v25  ;;  %v770_v30 = vadd.f32 %v769_v27, %v768_v21  ;;  %v503_v31 = vadd.f32 %v502_v28, %v406_v26  ;;  %v441_v27 = vadd.f32 %v791_v56, %v1091_v60 }
 0x10a   :  { %v771_v32 = vpop.f32.mrf.mxu0  ;;  %v819_v33 = vpop.f32.mrf.mxu1 }
 0x10b   :  { %631 = vst.msk [vmem:[%s1184_s3 + $0x4] sm:$0xf] %vm629_vm1, %v719_v29  ;;  %v414_v34 = vadd.f32 %v770_v30, %v1091_v60  ;;  %v553_v35 = vmax.f32 %v503_v31, 0.0 }
 0x10c   :  { %v772_v37 = vpop.f32.mrf.mxu0  ;;  %v505_v38 = vpop.f32.mrf.mxu1 }
 0x10d   :  { %v511_v39 = vadd.f32 %v818_v22, %v414_v34  ;;  %v722_v40 = vpack.c.bf16 %v553_v35, %v553_v35  ;;  %v773_v41 = vadd.f32 %v772_v37, %v771_v32  ;;  %v506_v42 = vadd.f32 %v505_v38, %v409_v36 }
 0x10e   :  { %v774_v44 = vpop.f32.mrf.mxu0  ;;  %v822_v46 = vpop.f32.mrf.mxu1 }
 0x10f   :  { %v555_v48 = vmax.f32 %v511_v39, 0.0  ;;  %634 = vst.msk [vmem:[%s1184_s3 + $0x10] sm:$0xf] %vm629_vm1, %v722_v40  ;;  %v417_v50 = vadd.f32 %v773_v41, %v1091_v60  ;;  %v554_v52 = vmax.f32 %v506_v42, 0.0 }
 0x110   :  { %v775_v55 = vpop.f32.mrf.mxu0  ;;  %v518_v57 = vpop.f32.mrf.mxu1 }
 0x111   :  { %v724_v58 = vpack.c.bf16 %v555_v48, %v555_v48  ;;  %v514_v61 = vadd.f32 %v819_v33, %v417_v50  ;;  %v723_v62 = vpack.c.bf16 %v554_v52, %v554_v52  ;;  %v776_v63 = vadd.f32 %v775_v55, %v774_v44 }
 0x112   :  { %v777_v0 = vpop.f32.mrf.mxu0  ;;  %v823_v1 = vpop.f32.mrf.mxu1 }
 0x113   :  { %636 = vst.msk [vmem:[%s1184_s3 + $0x18] sm:$0xf] %vm629_vm1, %v724_v58  ;;  %v556_v2 = vmax.f32 %v514_v61, 0.0  ;;  %635 = vst.msk [vmem:[%s1184_s3 + $0x14] sm:$0xf] %vm629_vm1, %v723_v62  ;;  %v422_v51 = vadd.f32 %v776_v63, %v1091_v60 }
 0x114   :  { %v778_v4 = vpop.f32.mrf.mxu0  ;;  %v521_v5 = vpop.f32.mrf.mxu1 }
 0x115   :  { %v725_v6 = vpack.c.bf16 %v556_v2, %v556_v2  ;;  %v519_v7 = vadd.f32 %v518_v57, %v422_v51  ;;  %v779_v8 = vadd.f32 %v778_v4, %v777_v0 }
 0x116   :  { %v780_v10 = vpop.f32.mrf.mxu0  ;;  %v826_v11 = vpop.f32.mrf.mxu1 }
 0x117   :  { %637 = vst.msk [vmem:[%s1184_s3 + $0x1c] sm:$0xf] %vm629_vm1, %v725_v6  ;;  %v557_v12 = vmax.f32 %v519_v7, 0.0  ;;  %v425_v43 = vadd.f32 %v779_v8, %v1091_v60  ;;  %v543_v45 = vadd.f32 %v826_v11, %v446_v9 }
 0x118   :  { %v781_v59 = vpop.f32.mrf.mxu0  ;;  %v534_v14 = vpop.f32.mrf.mxu1 }
 0x119   :  { %v726_v16 = vpack.c.bf16 %v557_v12, %v557_v12  ;;  %v522_v17 = vadd.f32 %v521_v5, %v425_v43  ;;  %v563_v18 = vmax.f32 %v543_v45, 0.0  ;;  %v782_v19 = vadd.f32 %v781_v59, %v780_v10 }
 0x11a   :  { %v535_v20 = vadd.f32 %v534_v14, %v438_v13  ;;  %v783_v21 = vpop.f32.mrf.mxu0  ;;  %v827_v22 = vpop.f32.mrf.mxu1 }
 0x11b   :  { %638 = vst.msk [vmem:[%s1184_s3 + $0x20] sm:$0xf] %vm629_vm1, %v726_v16  ;;  %v558_v23 = vmax.f32 %v522_v17, 0.0  ;;  %v732_v47 = vpack.c.bf16 %v563_v18, %v563_v18  ;;  %v430_v49 = vadd.f32 %v782_v19, %v1091_v60  ;;  %v546_v24 = vadd.f32 %v827_v22, %v449_v15 }
 0x11c   :  { %v561_v25 = vmax.f32 %v535_v20, 0.0  ;;  %v784_v26 = vpop.f32.mrf.mxu0  ;;  %v537_v28 = vpop.f32.mrf.mxu1 }
 0x11d   :  { %v727_v29 = vpack.c.bf16 %v558_v23, %v558_v23  ;;  %644 = vst.msk [vmem:[%s1184_s3 + $0x38] sm:$0xf] %vm629_vm1, %v732_v47  ;;  %v527_v30 = vadd.f32 %v822_v46, %v430_v49  ;;  %v564_v31 = vmax.f32 %v546_v24, 0.0  ;;  %v785_v32 = vadd.f32 %v784_v26, %v783_v21 }
 0x11e   :  { %v730_v33 = vpack.c.bf16 %v561_v25, %v561_v25  ;;  %v538_v34 = vadd.f32 %v537_v28, %v441_v27 }
 0x11f   :  { %639 = vst.msk [vmem:[%s1184_s3 + $0x24] sm:$0xf] %vm629_vm1, %v727_v29  ;;  %v559_v35 = vmax.f32 %v527_v30, 0.0  ;;  %v733_v36 = vpack.c.bf16 %v564_v31, %v564_v31  ;;  %v433_v37 = vadd.f32 %v785_v32, %v1091_v60 }
 0x120   :  { %642 = vst.msk [vmem:[%s1184_s3 + $0x30] sm:$0xf] %vm629_vm1, %v730_v33  ;;  %v562_v38 = vmax.f32 %v538_v34, 0.0 }
 0x121   :  { %v728_v39 = vpack.c.bf16 %v559_v35, %v559_v35  ;;  %645 = vst.msk [vmem:[%s1184_s3 + $0x3c] sm:$0xf] %vm629_vm1, %v733_v36  ;;  %v530_v40 = vadd.f32 %v823_v1, %v433_v37 }
 0x122   :  { %v731_v41 = vpack.c.bf16 %v562_v38, %v562_v38 }
 0x123   :  { %640 = vst.msk [vmem:[%s1184_s3 + $0x28] sm:$0xf] %vm629_vm1, %v728_v39  ;;  %v560_v60 = vmax.f32 %v530_v40, 0.0 }
 0x124   :  { %643 = vst.msk [vmem:[%s1184_s3 + $0x34] sm:$0xf] %vm629_vm1, %v731_v41 }
 0x125   :  { %v729_v42 = vpack.c.bf16 %v560_v60, %v560_v60 }
 0x127   :  { %641 = vst.msk [vmem:[%s1184_s3 + $0x2c] sm:$0xf] %vm629_vm1, %v729_v42 }
 0x128   :  { %650 = vsyncpa [#allocation3], 1 }

// kernel: autoencoder_forward.10
= control target key start
LH: loop header
LB: loop body
LE: loop exit
PB: predicated region body
PF: predicated region fallthrough
CT: control target
= control target key end

     0   :  { %vm372_vm0 = vcmask 523264   ;;  %s913_s1 = inlined_call_operand.vmem [shape: bf16[576,128], index: 1, kind: input, shape index: {}]   ;;  %s914_s0 = inlined_call_operand.vmem [shape: bf16[32,576], index: 0, kind: input, shape index: {}]   ;;  %s915_s2 = inlined_call_operand.vmem [shape: f32[1,128], index: 2, kind: input, shape index: {}]   ;;  %s916_s3 = inlined_call_operand.vmem [shape: bf16[32,128], index: 3, kind: output, shape index: {}]  }
   0x1   :  { %v696_v0 = vld [vmem:[%s913_s1 + $0x78] sm:$0xff]   ;;  %v700_v4 = vld [vmem:[%s913_s1 + $0x70] sm:$0xff]   ;;  %v704_v8 = vld [vmem:[%s913_s1 + $0x68] sm:$0xff]  }
   0x2   :  { %v697_v1 = vld [vmem:[%s913_s1 + $0xf8] sm:$0xff]   ;;  %622 = vmatprep.subr.bf16.mxu0 %v696_v0  ;;  %v701_v5 = vld [vmem:[%s913_s1 + $0xf0] sm:$0xff]   ;;  %v705_v9 = vld [vmem:[%s913_s1 + $0xe8] sm:$0xff]  }
   0x3   :  { %v698_v2 = vld [vmem:[%s913_s1 + $0x38] sm:$0xff]   ;;  %650 = vmatprep.subr.bf16.mxu1 %v697_v1  ;;  %v702_v6 = vld [vmem:[%s913_s1 + $0x30] sm:$0xff]   ;;  %v706_v10 = vld [vmem:[%s913_s1 + $0x28] sm:$0xff]  }
   0x4   :  { %v699_v3 = vld [vmem:[%s913_s1 + $0xb8] sm:$0xff]   ;;  %623 = vmatpush3.bf16.msra.mxu0 %v698_v2  ;;  %v703_v7 = vld [vmem:[%s913_s1 + $0xb0] sm:$0xff]   ;;  %v707_v11 = vld [vmem:[%s913_s1 + $0xa8] sm:$0xff]  }
   0x5   :  { %651 = vmatpush3.bf16.msra.mxu1 %v699_v3  ;;  %624 = vmatprep.subr.bf16.mxu0 %v700_v4  ;;  %v708_v12 = vld [vmem:[%s913_s1 + $0x60] sm:$0xff]   ;;  %v712_v16 = vld [vmem:[%s913_s1 + $0x58] sm:$0xff]   ;;  %v716_v20 = vld [vmem:[%s913_s1 + $0x50] sm:$0xff]  }
   0x6   :  { %652 = vmatprep.subr.bf16.mxu1 %v701_v5  ;;  %v709_v13 = vld [vmem:[%s913_s1 + $0xe0] sm:$0xff]   ;;  %v713_v17 = vld [vmem:[%s913_s1 + $0xd8] sm:$0xff]   ;;  %v717_v21 = vld [vmem:[%s913_s1 + $0xd0] sm:$0xff]  }
   0x7   :  { %v710_v14 = vld [vmem:[%s913_s1 + $0x20] sm:$0xff]   ;;  %v714_v18 = vld [vmem:[%s913_s1 + $0x18] sm:$0xff]   ;;  %v718_v22 = vld [vmem:[%s913_s1 + $0x10] sm:$0xff]  }
   0x8   :  { %625 = vmatpush3.bf16.msra.mxu0 %v702_v6  ;;  %v711_v15 = vld [vmem:[%s913_s1 + $0xa0] sm:$0xff]   ;;  %v715_v19 = vld [vmem:[%s913_s1 + $0x98] sm:$0xff]   ;;  %v719_v23 = vld [vmem:[%s913_s1 + $0x90] sm:$0xff]  }
   0x9   :  { %653 = vmatpush3.bf16.msra.mxu1 %v703_v7  ;;  %626 = vmatprep.subr.bf16.mxu0 %v704_v8  ;;  %v720_v24 = vld [vmem:[%s913_s1 + $0x48] sm:$0xff]   ;;  %v724_v28 = vld [vmem:[%s913_s1 + $0x40] sm:$0xff]   ;;  %v734_v36 = vld [vmem:[%s913_s1 + $0x118] sm:$0xff]  }
   0xa   :  { %654 = vmatprep.subr.bf16.mxu1 %v705_v9  ;;  %v721_v25 = vld [vmem:[%s913_s1 + $0xc8] sm:$0xff]   ;;  %v725_v29 = vld [vmem:[%s913_s1 + $0xc0] sm:$0xff]   ;;  %v735_v37 = vld [vmem:[%s913_s1 + $0x110] sm:$0xff]  }
   0xb   :  { %v722_v26 = vld [vmem:[%s913_s1 + $0x8] sm:$0xff]   ;;  %v726_v30 = vld [vmem:[%s913_s1] sm:$0xff]  }
   0xc   :  { %627 = vmatpush3.bf16.msra.mxu0 %v706_v10  ;;  %v723_v27 = vld [vmem:[%s913_s1 + $0x88] sm:$0xff]   ;;  %v727_v31 = vld [vmem:[%s913_s1 + $0x80] sm:$0xff]  }
   0xd   :  { %655 = vmatpush3.bf16.msra.mxu1 %v707_v11  ;;  %628 = vmatprep.subr.bf16.mxu0 %v708_v12  ;;  %v728_v32 = vld [vmem:[%s914_s0] ss:$20 sps:$4 sm:$0xff]   ;;  %v730_v33 = vld [vmem:[%s914_s0 + $0x4] ss:$20 sps:$4 sm:$0xff]   ;;  %v731_v34 = vld [vmem:[%s914_s0 + $0x8] ss:$20 sps:$4 sm:$0xff]  }
   0xe   :  { %656 = vmatprep.subr.bf16.mxu1 %v709_v13  ;;  %v733_v35 = vld [vmem:[%s914_s0 + $0xc] ss:$20 sps:$4 sm:$0xff]   ;;  %411 = vmatprep.mubr.bf16.mxu0 %v730_v33  ;;  %v738_v39 = vld [vmem:[%s914_s0 + $0x34] ss:$20 sps:$4 sm:$0xff]   ;;  %v741_v42 = vld [vmem:[%s914_s0 + $0x30] ss:$20 sps:$4 sm:$0xff]  }
   0xf   :  { %460 = vmatprep.mubr.bf16.mxu1 %v733_v35  ;;  %v736_v38 = vld [vmem:[%s914_s0 + $0x2c] ss:$20 sps:$4 sm:$0xff]   ;;  %v740_v40 = vld [vmem:[%s914_s0 + $0x28] ss:$20 sps:$4 sm:$0xff]   ;;  %v744_v43 = vld [vmem:[%s914_s0 + $0x10] ss:$20 sps:$4 sm:$0xff]  }
  0x10   :  { %629 = vmatpush3.bf16.msra.mxu0 %v710_v14  ;;  %v742_v41 = vld [vmem:[%s913_s1 + $0x108] sm:$0xff]   ;;  %v743_v44 = vld [vmem:[%s913_s1 + $0x100] sm:$0xff]  }
  0x11   :  { %657 = vmatpush3.bf16.msra.mxu1 %v711_v15  ;;  %630 = vmatprep.subr.bf16.mxu0 %v712_v16  ;;  %v745_v45 = vld [vmem:[%s914_s0 + $0x38] ss:$20 sps:$4 sm:$0xff]   ;;  %v554_v59 = vld [vmem:[%s915_s2] ss:$0 sm:$0xff] }
  0x12   :  { %658 = vmatprep.subr.bf16.mxu1 %v713_v17 }
  0x14   :  { %631 = vmatpush3.bf16.msra.mxu0 %v714_v18 }
  0x15   :  { %659 = vmatpush3.bf16.msra.mxu1 %v715_v19  ;;  %632 = vmatprep.subr.bf16.mxu0 %v716_v20 }
  0x16   :  { %660 = vmatprep.subr.bf16.mxu1 %v717_v21 }
  0x18   :  { %633 = vmatpush3.bf16.msra.mxu0 %v718_v22 }
  0x19   :  { %661 = vmatpush3.bf16.msra.mxu1 %v719_v23  ;;  %634 = vmatprep.subr.bf16.mxu0 %v720_v24 }
  0x1a   :  { %662 = vmatprep.subr.bf16.mxu1 %v721_v25 }
  0x1c   :  { %635 = vmatpush3.bf16.msra.mxu0 %v722_v26 }
  0x1d   :  { %663 = vmatpush3.bf16.msra.mxu1 %v723_v27  ;;  %636 = vmatprep.subr.bf16.mxu0 %v724_v28 }
  0x1e   :  { %664 = vmatprep.subr.bf16.mxu1 %v725_v29 }
  0x20   :  { %637 = vmatpush3.bf16.msra.mxu0 %v726_v30 }
  0x21   :  { %665 = vmatpush3.bf16.msra.mxu1 %v727_v31  ;;  %684 = vmatprep.subr.bf16.mxu0 %v734_v36 }
  0x23   :  { %412 = vmatmul.mubr.bf16.vlgmr.msra.gmra.mxu0 %v728_v32 }
  0x24   :  { %461 = vmatmul.mubr.bf16.vlgmr.msra.gmra.mxu1 %v731_v34  ;;  %685 = vmatpush3.bf16.msra.mxu0 %v734_v36 }
  0x25   :  { %686 = vmatprep.subr.bf16.mxu0 %v735_v37  ;;  %419 = vmatprep.mubr.bf16.mxu0 %v736_v38 }
  0x26   :  { %468 = vmatprep.mubr.bf16.mxu1 %v738_v39 }
  0x28   :  { %687 = vmatpush3.bf16.msra.mxu0 %v735_v37 }
  0x29   :  { %688 = vmatprep.subr.bf16.mxu0 %v742_v41 }
  0x2b   :  { %420 = vmatmul.mubr.bf16.gmra.mxu0 %v740_v40 }
  0x2c   :  { %469 = vmatmul.mubr.bf16.gmra.mxu1 %v741_v42  ;;  %692 = vmatprep.mubr.msk.bf16.mxu0 %vm372_vm0, %v744_v43 }
  0x2d   :  { %689 = vmatpush3.bf16.msra.mxu0 %v742_v41 }
  0x2e   :  { %690 = vmatprep.subr.bf16.mxu0 %v743_v44 }
  0x31   :  { %691 = vmatpush3.bf16.msra.mxu0 %v743_v44 }
  0x34   :  { %693 = vmatmul.mubr.msk.bf16.vlgmr.msra.gmra.mxu0 %vm372_vm0, %v745_v45 }
  0xe3   :  { %v638_v46 = vpop.f32.mrf.mxu0 }
  0xe4   :  { %v666_v47 = vpop.f32.mrf.mxu1 }
  0xe5   :  { %v639_v48 = vpop.f32.mrf.mxu0 }
  0xe6   :  { %v667_v49 = vpop.f32.mrf.mxu1  ;;  %v640_v60 = vadd.f32 %v639_v48, %v638_v46 }
  0xe7   :  { %v641_v50 = vpop.f32.mrf.mxu0  ;;  %v668_v6 = vadd.f32 %v667_v49, %v666_v47 }
  0xe8   :  { %v669_v51 = vpop.f32.mrf.mxu1  ;;  %v414_v5 = vadd.f32 %v640_v60, %v554_v59 }
  0xe9   :  { %v642_v52 = vpop.f32.mrf.mxu0 }
  0xea   :  { %v670_v53 = vpop.f32.mrf.mxu1  ;;  %v643_v1 = vadd.f32 %v642_v52, %v641_v50  ;;  %v463_v16 = vadd.f32 %v668_v6, %v414_v5 }
  0xeb   :  { %v644_v54 = vpop.f32.mrf.mxu0  ;;  %v671_v14 = vadd.f32 %v670_v53, %v669_v51 }
  0xec   :  { %v672_v55 = vpop.f32.mrf.mxu1  ;;  %v417_v11 = vadd.f32 %v643_v1, %v554_v59 }
  0xed   :  { %v645_v56 = vpop.f32.mrf.mxu0 }
  0xee   :  { %v646_v57 = vadd.f32 %v645_v56, %v644_v54  ;;  %v673_v58 = vpop.f32.mrf.mxu1  ;;  %v466_v20 = vadd.f32 %v671_v14, %v417_v11 }
  0xef   :  { %v674_v61 = vadd.f32 %v673_v58, %v672_v55  ;;  %v647_v62 = vpop.f32.mrf.mxu0 }
  0xf0   :  { %v422_v63 = vadd.f32 %v646_v57, %v554_v59  ;;  %v675_v0 = vpop.f32.mrf.mxu1 }
  0xf1   :  { %v648_v2 = vpop.f32.mrf.mxu0 }
  0xf2   :  { %v649_v3 = vadd.f32 %v648_v2, %v647_v62  ;;  %v676_v4 = vpop.f32.mrf.mxu1  ;;  %v471_v7 = vadd.f32 %v674_v61, %v422_v63 }
  0xf3   :  { %v677_v9 = vadd.f32 %v676_v4, %v675_v0 }
  0xf4   :  { %v425_v8 = vadd.f32 %v649_v3, %v554_v59  ;;  %v694_v10 = vpop.f32.mrf.mxu0 }
  0xf5   :  { %v520_v15 = vadd.f32 %v694_v10, %v471_v7 }
  0xf6   :  { %v511_v12 = vpop.f32.mrf.mxu0  ;;  %v474_v13 = vadd.f32 %v677_v9, %v425_v8 }
  0xf7   :  { %v512_v18 = vadd.f32 %v511_v12, %v463_v16  ;;  %v528_v22 = vmax.f32 %v520_v15, 0.0 }
  0xf8   :  { %v695_v17 = vpop.f32.mrf.mxu0 }
  0xf9   :  { %v523_v19 = vadd.f32 %v695_v17, %v474_v13  ;;  %v526_v25 = vmax.f32 %v512_v18, 0.0 }
  0xfa   :  { %v514_v21 = vpop.f32.mrf.mxu0 }
  0xfb   :  { %v529_v23 = vmax.f32 %v523_v19, 0.0  ;;  %v515_v24 = vadd.f32 %v514_v21, %v466_v20 }
  0xfd   :  { %v619_v26 = vpack.c.bf16 %v529_v23, %v528_v22  ;;  %v527_v27 = vmax.f32 %v515_v24, 0.0 }
  0xff   :  { %621 = vst [vmem:[%s916_s3 + $0x8] sm:$0xff] %v619_v26   ;;  %v614_v28 = vpack.c.bf16 %v527_v27, %v526_v25 }
 0x101   :  { %615 = vst [vmem:[%s916_s3] sm:$0xff] %v614_v28  }

// kernel: autoencoder_forward.11
= control target key start
LH: loop header
LB: loop body
LE: loop exit
PB: predicated region body
PF: predicated region fallthrough
CT: control target
= control target key end

     0   :  { %v2722_v22 = vmov 1966171168   ;;  %v292_v24 = vlaneseq  ;;  %vm1767_vm0 = vcmask 261120   ;;  %s3360_s1 = inlined_call_operand.vmem [shape: bf16[2048,32], index: 1, kind: input, shape index: {}]   ;;  %s3361_s0 = inlined_call_operand.vmem [shape: bf16[2,2048], index: 0, kind: input, shape index: {}]   ;;  %s3362_s3 = inlined_call_operand.vmem [shape: bf16[32,2048], index: 3, kind: input, shape index: {}]   ;;  %s3363_s2 = inlined_call_operand.vmem [shape: f32[1,32], index: 2, kind: input, shape index: {}]   ;;  %s3364_s4 = inlined_call_operand.vmem [shape: f32[1,2048], index: 4, kind: input, shape index: {}]   ;;  %s3365_s5 = inlined_call_operand.vmem [shape: bf16[2,2048], index: 5, kind: output, shape index: {}]  }
   0x1   :  { %v2592_v0 = vld [vmem:[%s3360_s1 + $0x78] sm:$0xff]   ;;  %v2596_v4 = vld [vmem:[%s3360_s1 + $0x70] sm:$0xff]   ;;  %v2600_v8 = vld [vmem:[%s3360_s1 + $0x68] sm:$0xff]   ;;  %v290_v23 = vunpack.c.l.s4 %v2722_v22 }
   0x2   :  { %v2593_v1 = vld [vmem:[%s3360_s1 + $0xf8] sm:$0xff]   ;;  %2414 = vmatprep.subr.bf16.mxu0 %v2592_v0  ;;  %v2597_v5 = vld [vmem:[%s3360_s1 + $0xf0] sm:$0xff]   ;;  %v2601_v9 = vld [vmem:[%s3360_s1 + $0xe8] sm:$0xff]   ;;  %v2832_v30 = vshrl.u32 %v292_v24, 7 }
   0x3   :  { %v2594_v2 = vld [vmem:[%s3360_s1 + $0x38] sm:$0xff]   ;;  %2436 = vmatprep.subr.bf16.mxu1 %v2593_v1  ;;  %v2598_v6 = vld [vmem:[%s3360_s1 + $0x30] sm:$0xff]   ;;  %v2602_v10 = vld [vmem:[%s3360_s1 + $0x28] sm:$0xff]   ;;  %v291_v29 = vunpack.c.0.s8 %v290_v23 }
   0x4   :  { %v2595_v3 = vld [vmem:[%s3360_s1 + $0xb8] sm:$0xff]   ;;  %2415 = vmatpush3.bf16.msra.mxu0 %v2594_v2  ;;  %v2599_v7 = vld [vmem:[%s3360_s1 + $0xb0] sm:$0xff]   ;;  %v2603_v11 = vld [vmem:[%s3360_s1 + $0xa8] sm:$0xff]  }
   0x5   :  { %2437 = vmatpush3.bf16.msra.mxu1 %v2595_v3  ;;  %2416 = vmatprep.subr.bf16.mxu0 %v2596_v4  ;;  %v2604_v12 = vld [vmem:[%s3360_s1 + $0x60] sm:$0xff]   ;;  %v2608_v16 = vld [vmem:[%s3360_s1 + $0x58] sm:$0xff]   ;;  %v2612_v20 = vld [vmem:[%s3360_s1 + $0x50] sm:$0xff]   ;;  %v2847_v35 = vsub.s32 %v291_v29, %v2832_v30 }
   0x6   :  { %2438 = vmatprep.subr.bf16.mxu1 %v2597_v5  ;;  %v2605_v13 = vld [vmem:[%s3360_s1 + $0xe0] sm:$0xff]   ;;  %v2609_v17 = vld [vmem:[%s3360_s1 + $0xd8] sm:$0xff]   ;;  %v2613_v21 = vld [vmem:[%s3360_s1 + $0xd0] sm:$0xff]  }
   0x7   :  { %v2606_v14 = vld [vmem:[%s3360_s1 + $0x20] sm:$0xff]   ;;  %v2610_v18 = vld [vmem:[%s3360_s1 + $0x18] sm:$0xff]   ;;  %v2614_v25 = vld [vmem:[%s3360_s1 + $0x10] sm:$0xff]  }
   0x8   :  { %2417 = vmatpush3.bf16.msra.mxu0 %v2598_v6  ;;  %v2607_v15 = vld [vmem:[%s3360_s1 + $0xa0] sm:$0xff]   ;;  %v2611_v19 = vld [vmem:[%s3360_s1 + $0x98] sm:$0xff]   ;;  %v2615_v26 = vld [vmem:[%s3360_s1 + $0x90] sm:$0xff]  }
   0x9   :  { %2439 = vmatpush3.bf16.msra.mxu1 %v2599_v7  ;;  %2418 = vmatprep.subr.bf16.mxu0 %v2600_v8  ;;  %v2616_v27 = vld [vmem:[%s3360_s1 + $0x48] sm:$0xff]   ;;  %v2620_v33 = vld [vmem:[%s3360_s1 + $0x40] sm:$0xff]   ;;  %v2626_v41 = vld [vmem:[%s3360_s1 + $0x178] sm:$0xff]  }
   0xa   :  { %2440 = vmatprep.subr.bf16.mxu1 %v2601_v9  ;;  %v2617_v28 = vld [vmem:[%s3360_s1 + $0xc8] sm:$0xff]   ;;  %v2621_v34 = vld [vmem:[%s3360_s1 + $0xc0] sm:$0xff]   ;;  %v2627_v42 = vld [vmem:[%s3360_s1 + $0x1f8] sm:$0xff]  }
   0xb   :  { %v2618_v31 = vld [vmem:[%s3360_s1 + $0x8] sm:$0xff]   ;;  %v2622_v36 = vld [vmem:[%s3360_s1] sm:$0xff]   ;;  %v2628_v47 = vld [vmem:[%s3360_s1 + $0x138] sm:$0xff]  }
   0xc   :  { %2419 = vmatpush3.bf16.msra.mxu0 %v2602_v10  ;;  %v2619_v32 = vld [vmem:[%s3360_s1 + $0x88] sm:$0xff]   ;;  %v2623_v37 = vld [vmem:[%s3360_s1 + $0x80] sm:$0xff]   ;;  %v2630_v50 = vld [vmem:[%s3360_s1 + $0x170] sm:$0xff]  }
   0xd   :  { %2441 = vmatpush3.bf16.msra.mxu1 %v2603_v11  ;;  %2420 = vmatprep.subr.bf16.mxu0 %v2604_v12  ;;  %v21_v38 = vld [vmem:[%s3361_s0] sm:$0xff]  ;;  %v2629_v52 = vld [vmem:[%s3360_s1 + $0x1b8] sm:$0xff]   ;;  %v2631_v54 = vld [vmem:[%s3360_s1 + $0x1f0] sm:$0xff]  }
   0xe   :  { %2442 = vmatprep.subr.bf16.mxu1 %v2605_v13  ;;  %v288_v39 = vcombine.high %v21_v38, %v21_v38  ;;  %v295_v40 = vrot.slane %v21_v38, %v2847_v35  ;;  %v2632_v55 = vld [vmem:[%s3360_s1 + $0x130] sm:$0xff]   ;;  %v2634_v57 = vld [vmem:[%s3360_s1 + $0x168] sm:$0xff]   ;;  %v2638_v61 = vld [vmem:[%s3360_s1 + $0x160] sm:$0xff]  }
   0xf   :  { %v2633_v58 = vld [vmem:[%s3360_s1 + $0x1b0] sm:$0xff]   ;;  %v2635_v59 = vld [vmem:[%s3360_s1 + $0x1e8] sm:$0xff]   ;;  %v2639_v63 = vld [vmem:[%s3360_s1 + $0x1e0] sm:$0xff]  }
  0x10   :  { %2421 = vmatpush3.bf16.msra.mxu0 %v2606_v14  ;;  %v303_v43 = vcombine.high %v295_v40, %v295_v40  ;;  %v311_v44 = vrot.slane %v295_v40, %v2847_v35  ;;  %v2867_v45 = vrot.slane %v288_v39, %v2847_v35  ;;  %v2636_v60 = vld [vmem:[%s3360_s1 + $0x128] sm:$0xff]   ;;  %v2640_v0 = vld [vmem:[%s3360_s1 + $0x120] sm:$0xff]   ;;  %v2642_v1 = vld [vmem:[%s3360_s1 + $0x158] sm:$0xff]  }
  0x11   :  { %2443 = vmatpush3.bf16.msra.mxu1 %v2607_v15  ;;  %2422 = vmatprep.subr.bf16.mxu0 %v2608_v16  ;;  %v2637_v62 = vld [vmem:[%s3360_s1 + $0x1a8] sm:$0xff]   ;;  %v2641_v2 = vld [vmem:[%s3360_s1 + $0x1a0] sm:$0xff]   ;;  %v2643_v3 = vld [vmem:[%s3360_s1 + $0x1d8] sm:$0xff]  }
  0x12   :  { %2444 = vmatprep.subr.bf16.mxu1 %v2609_v17  ;;  %v325_v46 = vrot.slane %v303_v43, %v2847_v35  ;;  %v304_v48 = vcombine.high %v2867_v45, %v2867_v45  ;;  %v333_v49 = vcombine.high %v311_v44, %v311_v44  ;;  %v2644_v4 = vld [vmem:[%s3360_s1 + $0x118] sm:$0xff]   ;;  %v2927_v5 = vld [vmem:[%s3361_s0 + $0x8] sm:$0xff]  ;;  %v2646_v6 = vld [vmem:[%s3360_s1 + $0x150] sm:$0xff]  }
  0x13   :  { %v2645_v7 = vld [vmem:[%s3360_s1 + $0x198] sm:$0xff]   ;;  %v2647_v8 = vld [vmem:[%s3360_s1 + $0x1d0] sm:$0xff]   ;;  %v2650_v10 = vld [vmem:[%s3360_s1 + $0x148] sm:$0xff]   ;;  %v2949_v12 = vrot.slane %v2927_v5, %v2847_v35 }
  0x14   :  { %2423 = vmatpush3.bf16.msra.mxu0 %v2610_v18  ;;  %1202 = vmatprep.mubr.bf16.mxu0 %v325_v46  ;;  %v335_v51 = vcombine.high %v325_v46, %v325_v46  ;;  %v332_v53 = vrot.slane %v304_v48, %v2847_v35  ;;  %v2648_v9 = vld [vmem:[%s3360_s1 + $0x110] sm:$0xff]   ;;  %v2651_v13 = vld [vmem:[%s3360_s1 + $0x1c8] sm:$0xff]   ;;  %v2654_v15 = vld [vmem:[%s3360_s1 + $0x140] sm:$0xff]  }
  0x15   :  { %2445 = vmatpush3.bf16.msra.mxu1 %v2611_v19  ;;  %2424 = vmatprep.subr.bf16.mxu0 %v2612_v20  ;;  %v2649_v11 = vld [vmem:[%s3360_s1 + $0x190] sm:$0xff]   ;;  %v2652_v14 = vld [vmem:[%s3360_s1 + $0x108] sm:$0xff]   ;;  %v352_v17 = vcombine.high %v2949_v12, %v2949_v12  ;;  %v2655_v18 = vld [vmem:[%s3360_s1 + $0x1c0] sm:$0xff]   ;;  %v318_v20 = vrot.slane %v2867_v45, %v2847_v35 }
  0x16   :  { %2446 = vmatprep.subr.bf16.mxu1 %v2613_v21  ;;  %1242 = vmatprep.mubr.bf16.mxu1 %v335_v51  ;;  %v336_v56 = vcombine.high %v332_v53, %v332_v53  ;;  %v2653_v16 = vld [vmem:[%s3360_s1 + $0x188] sm:$0xff]   ;;  %v2656_v19 = vld [vmem:[%s3360_s1 + $0x100] sm:$0xff]   ;;  %v2658_v21 = vld [vmem:[%s3360_s1 + $0x278] sm:$0xff]  }
  0x17   :  { %v2657_v22 = vld [vmem:[%s3360_s1 + $0x180] sm:$0xff]   ;;  %v374_v23 = vrot.slane %v352_v17, %v2847_v35  ;;  %v2659_v24 = vld [vmem:[%s3360_s1 + $0x2f8] sm:$0xff]   ;;  %v2669_v39 = vld [vmem:[%s3360_s1 + $0x2a8] sm:$0xff]  }
  0x18   :  { %2425 = vmatpush3.bf16.msra.mxu0 %v2614_v25  ;;  %v2660_v25 = vld [vmem:[%s3360_s1 + $0x238] sm:$0xff]   ;;  %v2670_v38 = vld [vmem:[%s3360_s1 + $0x260] sm:$0xff]   ;;  %v2678_v46 = vld [vmem:[%s3360_s1 + $0x250] sm:$0xff]  }
  0x19   :  { %2447 = vmatpush3.bf16.msra.mxu1 %v2615_v26  ;;  %2426 = vmatprep.subr.bf16.mxu0 %v2616_v27  ;;  %v334_v26 = vcombine.high %v318_v20, %v318_v20  ;;  %v2662_v27 = vld [vmem:[%s3360_s1 + $0x270] sm:$0xff]   ;;  %v384_v29 = vcombine.high %v374_v23, %v374_v23  ;;  %v2671_v40 = vld [vmem:[%s3360_s1 + $0x2e0] sm:$0xff]   ;;  %v2676_v45 = vld [vmem:[%s3360_s1 + $0x218] sm:$0xff]  }
  0x1a   :  { %2448 = vmatprep.subr.bf16.mxu1 %v2617_v28  ;;  %v2661_v28 = vld [vmem:[%s3360_s1 + $0x2b8] sm:$0xff]   ;;  %v2673_v43 = vld [vmem:[%s3360_s1 + $0x2a0] sm:$0xff]   ;;  %v2682_v51 = vld [vmem:[%s3360_s1 + $0x248] sm:$0xff]  }
  0x1b   :  { %v2677_v48 = vld [vmem:[%s3360_s1 + $0x298] sm:$0xff]  }
  0x1c   :  { %2427 = vmatpush3.bf16.msra.mxu0 %v2618_v31  ;;  %v2663_v31 = vld [vmem:[%s3360_s1 + $0x2f0] sm:$0xff]   ;;  %v2706_v17 = vld [vmem:[%s3360_s1 + $0x358] sm:$0xff]  }
  0x1d   :  { %2449 = vmatpush3.bf16.msra.mxu1 %v2619_v32  ;;  %2428 = vmatprep.subr.bf16.mxu0 %v2620_v33  ;;  %v2664_v32 = vld [vmem:[%s3360_s1 + $0x230] sm:$0xff]   ;;  %v2666_v33 = vld [vmem:[%s3360_s1 + $0x268] sm:$0xff]  }
  0x1e   :  { %2450 = vmatprep.subr.bf16.mxu1 %v2621_v34  ;;  %v2665_v34 = vld [vmem:[%s3360_s1 + $0x2b0] sm:$0xff]  }
  0x20   :  { %2429 = vmatpush3.bf16.msra.mxu0 %v2622_v36  ;;  %v2667_v36 = vld [vmem:[%s3360_s1 + $0x2e8] sm:$0xff]  }
  0x21   :  { %2451 = vmatpush3.bf16.msra.mxu1 %v2623_v37  ;;  %2458 = vmatprep.subr.bf16.mxu0 %v2626_v41  ;;  %v2668_v37 = vld [vmem:[%s3360_s1 + $0x228] sm:$0xff]   ;;  %v2672_v41 = vld [vmem:[%s3360_s1 + $0x220] sm:$0xff]  }
  0x22   :  { %2480 = vmatprep.subr.bf16.mxu1 %v2627_v42  ;;  %v2674_v42 = vld [vmem:[%s3360_s1 + $0x258] sm:$0xff]  }
  0x23   :  { %1203 = vmatmul.mubr.bf16.vlgmr.msra.gmra.mxu0 %v311_v44  ;;  %v2675_v44 = vld [vmem:[%s3360_s1 + $0x2d8] sm:$0xff]  }
  0x24   :  { %2459 = vmatpush3.bf16.msra.mxu0 %v2628_v47  ;;  %1243 = vmatmul.mubr.bf16.vlgmr.msra.gmra.mxu1 %v333_v49  ;;  %v337_v47 = vcombine.high %v2927_v5, %v2927_v5  ;;  %v2679_v49 = vld [vmem:[%s3360_s1 + $0x2d0] sm:$0xff]   ;;  %v2693_v5 = vld [vmem:[%s3360_s1 + $0x3b8] sm:$0xff]  }
  0x25   :  { %2460 = vmatprep.subr.bf16.mxu0 %v2630_v50  ;;  %2481 = vmatpush3.bf16.msra.mxu1 %v2629_v52  ;;  %v2680_v50 = vld [vmem:[%s3360_s1 + $0x210] sm:$0xff]  }
  0x26   :  { %1282 = vmatprep.mubr.bf16.mxu0 %v332_v53  ;;  %2482 = vmatprep.subr.bf16.mxu1 %v2631_v54  ;;  %v2681_v52 = vld [vmem:[%s3360_s1 + $0x290] sm:$0xff]   ;;  %v3055_v53 = vrot.slane %v337_v47, %v2847_v35  ;;  %v2683_v54 = vld [vmem:[%s3360_s1 + $0x2c8] sm:$0xff]   ;;  %v1499_v47 = vld [vmem:[%s3362_s3 + $0x40] sm:$0xff] }
  0x27   :  { %1322 = vmatprep.mubr.bf16.mxu1 %v336_v56  ;;  %v2686_v56 = vld [vmem:[%s3360_s1 + $0x240] sm:$0xff]  }
  0x28   :  { %2461 = vmatpush3.bf16.msra.mxu0 %v2632_v55  ;;  %v2684_v55 = vld [vmem:[%s3360_s1 + $0x208] sm:$0xff]  }
  0x29   :  { %2462 = vmatprep.subr.bf16.mxu0 %v2634_v57  ;;  %2483 = vmatpush3.bf16.msra.mxu1 %v2633_v58  ;;  %v2685_v57 = vld [vmem:[%s3360_s1 + $0x288] sm:$0xff]   ;;  %v353_v58 = vcombine.high %v3055_v53, %v3055_v53 }
  0x2a   :  { %2484 = vmatprep.subr.bf16.mxu1 %v2635_v59  ;;  %v2687_v59 = vld [vmem:[%s3360_s1 + $0x2c0] sm:$0xff]  }
  0x2c   :  { %2463 = vmatpush3.bf16.msra.mxu0 %v2636_v60  ;;  %v2688_v60 = vld [vmem:[%s3360_s1 + $0x200] sm:$0xff]  }
  0x2d   :  { %2464 = vmatprep.subr.bf16.mxu0 %v2638_v61  ;;  %2485 = vmatpush3.bf16.msra.mxu1 %v2637_v62  ;;  %v360_v61 = vrot.slane %v2949_v12, %v2847_v35  ;;  %v2690_v62 = vld [vmem:[%s3360_s1 + $0x378] sm:$0xff]   ;;  %v2700_v12 = vld [vmem:[%s3360_s1 + $0x328] sm:$0xff]  }
  0x2e   :  { %2486 = vmatprep.subr.bf16.mxu1 %v2639_v63  ;;  %v2689_v63 = vld [vmem:[%s3360_s1 + $0x280] sm:$0xff]  }
  0x30   :  { %2465 = vmatpush3.bf16.msra.mxu0 %v2640_v0  ;;  %v381_v0 = vrot.slane %v353_v58, %v2847_v35 }
  0x31   :  { %2466 = vmatprep.subr.bf16.mxu0 %v2642_v1  ;;  %2487 = vmatpush3.bf16.msra.mxu1 %v2641_v2  ;;  %v2691_v1 = vld [vmem:[%s3360_s1 + $0x3f8] sm:$0xff]  }
  0x32   :  { %2488 = vmatprep.subr.bf16.mxu1 %v2643_v3  ;;  %v2692_v2 = vld [vmem:[%s3360_s1 + $0x338] sm:$0xff]   ;;  %v382_v3 = vcombine.high %v360_v61, %v360_v61 }
  0x34   :  { %2467 = vmatpush3.bf16.msra.mxu0 %v2644_v4  ;;  %v2694_v4 = vld [vmem:[%s3360_s1 + $0x370] sm:$0xff]  }
  0x35   :  { %2468 = vmatprep.subr.bf16.mxu0 %v2646_v6  ;;  %2489 = vmatpush3.bf16.msra.mxu1 %v2645_v7  ;;  %v385_v6 = vcombine.high %v381_v0, %v381_v0  ;;  %v2695_v7 = vld [vmem:[%s3360_s1 + $0x3f0] sm:$0xff]  }
  0x36   :  { %2490 = vmatprep.subr.bf16.mxu1 %v2647_v8  ;;  %v2696_v8 = vld [vmem:[%s3360_s1 + $0x330] sm:$0xff]  }
  0x38   :  { %2469 = vmatpush3.bf16.msra.mxu0 %v2648_v9  ;;  %v2698_v9 = vld [vmem:[%s3360_s1 + $0x368] sm:$0xff]  }
  0x39   :  { %2470 = vmatprep.subr.bf16.mxu0 %v2650_v10  ;;  %2491 = vmatpush3.bf16.msra.mxu1 %v2649_v11  ;;  %v2697_v10 = vld [vmem:[%s3360_s1 + $0x3b0] sm:$0xff]   ;;  %v2699_v11 = vld [vmem:[%s3360_s1 + $0x3e8] sm:$0xff]  }
  0x3a   :  { %2492 = vmatprep.subr.bf16.mxu1 %v2651_v13  ;;  %v2702_v13 = vld [vmem:[%s3360_s1 + $0x360] sm:$0xff]  }
  0x3c   :  { %2471 = vmatpush3.bf16.msra.mxu0 %v2652_v14  ;;  %v2701_v14 = vld [vmem:[%s3360_s1 + $0x3a8] sm:$0xff]  }
  0x3d   :  { %2472 = vmatprep.subr.bf16.mxu0 %v2654_v15  ;;  %2493 = vmatpush3.bf16.msra.mxu1 %v2653_v16  ;;  %v2703_v15 = vld [vmem:[%s3360_s1 + $0x3e0] sm:$0xff]  }
  0x3e   :  { %2494 = vmatprep.subr.bf16.mxu1 %v2655_v18  ;;  %v2704_v16 = vld [vmem:[%s3360_s1 + $0x320] sm:$0xff]  }
  0x3f   :  { %v2705_v18 = vld [vmem:[%s3360_s1 + $0x3a0] sm:$0xff]  }
  0x40   :  { %2473 = vmatpush3.bf16.msra.mxu0 %v2656_v19  ;;  %v2707_v19 = vld [vmem:[%s3360_s1 + $0x3d8] sm:$0xff]  }
  0x41   :  { %2502 = vmatprep.subr.bf16.mxu0 %v2658_v21  ;;  %2495 = vmatpush3.bf16.msra.mxu1 %v2657_v22  ;;  %v2710_v21 = vld [vmem:[%s3360_s1 + $0x350] sm:$0xff]   ;;  %v2709_v22 = vld [vmem:[%s3360_s1 + $0x398] sm:$0xff]  }
  0x42   :  { %2524 = vmatprep.subr.bf16.mxu1 %v2659_v24  ;;  %v2712_v24 = vld [vmem:[%s3360_s1 + $0x310] sm:$0xff]  }
  0x43   :  { %1283 = vmatmul.mubr.bf16.vlgmr.msra.gmra.mxu0 %v318_v20  ;;  %v2708_v20 = vld [vmem:[%s3360_s1 + $0x318] sm:$0xff]  }
  0x44   :  { %2503 = vmatpush3.bf16.msra.mxu0 %v2660_v25  ;;  %1362 = vmatprep.mubr.bf16.mxu0 %v374_v23  ;;  %v2711_v23 = vld [vmem:[%s3360_s1 + $0x3d0] sm:$0xff]   ;;  %v2714_v25 = vld [vmem:[%s3360_s1 + $0x348] sm:$0xff]  }
  0x45   :  { %1323 = vmatmul.mubr.bf16.vlgmr.msra.gmra.mxu1 %v334_v26  ;;  %2504 = vmatprep.subr.bf16.mxu0 %v2662_v27  ;;  %v2713_v26 = vld [vmem:[%s3360_s1 + $0x390] sm:$0xff]   ;;  %v2715_v27 = vld [vmem:[%s3360_s1 + $0x3c8] sm:$0xff]  }
  0x46   :  { %2525 = vmatpush3.bf16.msra.mxu1 %v2661_v28  ;;  %1402 = vmatprep.mubr.bf16.mxu1 %v384_v29  ;;  %v2716_v28 = vld [vmem:[%s3360_s1 + $0x308] sm:$0xff]   ;;  %v2718_v29 = vld [vmem:[%s3360_s1 + $0x340] sm:$0xff]  }
  0x47   :  { %2526 = vmatprep.subr.bf16.mxu1 %v2663_v31  ;;  %v2717_v31 = vld [vmem:[%s3360_s1 + $0x388] sm:$0xff]  }
  0x48   :  { %2505 = vmatpush3.bf16.msra.mxu0 %v2664_v32  ;;  %v2719_v32 = vld [vmem:[%s3360_s1 + $0x3c0] sm:$0xff]  }
  0x49   :  { %2506 = vmatprep.subr.bf16.mxu0 %v2666_v33  ;;  %v2720_v33 = vld [vmem:[%s3360_s1 + $0x300] sm:$0xff]  }
  0x4a   :  { %2527 = vmatpush3.bf16.msra.mxu1 %v2665_v34  ;;  %v367_v34 = vrot.slane %v3055_v53, %v2847_v35 }
  0x4b   :  { %2528 = vmatprep.subr.bf16.mxu1 %v2667_v36  ;;  %v2721_v36 = vld [vmem:[%s3360_s1 + $0x380] sm:$0xff]  }
  0x4c   :  { %2507 = vmatpush3.bf16.msra.mxu0 %v2668_v37  ;;  %v383_v37 = vcombine.high %v367_v34, %v367_v34 }
  0x4d   :  { %2508 = vmatprep.subr.bf16.mxu0 %v2670_v38  ;;  %v1507_v38 = vld [vmem:[%s3362_s3 + $0x80] sm:$0xff] }
  0x4e   :  { %2529 = vmatpush3.bf16.msra.mxu1 %v2669_v39  ;;  %v1515_v39 = vld [vmem:[%s3362_s3 + $0xc0] sm:$0xff] }
  0x4f   :  { %2530 = vmatprep.subr.bf16.mxu1 %v2671_v40  ;;  %v1508_v40 = vld [vmem:[%s3362_s3 + $0x88] sm:$0xff] }
  0x50   :  { %2509 = vmatpush3.bf16.msra.mxu0 %v2672_v41  ;;  %v2383_v41 = vcombine.high %v1507_v38, %v1515_v39 }
  0x51   :  { %2510 = vmatprep.subr.bf16.mxu0 %v2674_v42  ;;  %v1516_v42 = vld [vmem:[%s3362_s3 + $0xc8] sm:$0xff] }
  0x52   :  { %2531 = vmatpush3.bf16.msra.mxu1 %v2673_v43  ;;  %v2382_v43 = vcombine.low %v1507_v38, %v1515_v39 }
  0x53   :  { %2532 = vmatprep.subr.bf16.mxu1 %v2675_v44  ;;  %v2384_v44 = vcombine.low %v1508_v40, %v1516_v42 }
  0x54   :  { %2511 = vmatpush3.bf16.msra.mxu0 %v2676_v45  ;;  %v2385_v45 = vcombine.high %v1508_v40, %v1516_v42 }
  0x55   :  { %2512 = vmatprep.subr.bf16.mxu0 %v2678_v46  ;;  %v1491_v46 = vld [vmem:[%s3362_s3] sm:$0xff] }
  0x56   :  { %2533 = vmatpush3.bf16.msra.mxu1 %v2677_v48  ;;  %v1492_v48 = vld [vmem:[%s3362_s3 + $0x8] sm:$0xff] }
  0x57   :  { %2534 = vmatprep.subr.bf16.mxu1 %v2679_v49  ;;  %v2367_v49 = vcombine.high %v1491_v46, %v1499_v47 }
  0x58   :  { %2513 = vmatpush3.bf16.msra.mxu0 %v2680_v50  ;;  %v1500_v50 = vld [vmem:[%s3362_s3 + $0x48] sm:$0xff] }
  0x59   :  { %2514 = vmatprep.subr.bf16.mxu0 %v2682_v51  ;;  %v2366_v51 = vcombine.low %v1491_v46, %v1499_v47  ;;  %v2369_v53 = vcombine.high %v1492_v48, %v1500_v50  ;;  %v1493_v46 = vld [vmem:[%s3362_s3 + $0x10] sm:$0xff] }
  0x5a   :  { %2535 = vmatpush3.bf16.msra.mxu1 %v2681_v52  ;;  %v2368_v52 = vcombine.low %v1492_v48, %v1500_v50  ;;  %v1494_v50 = vld [vmem:[%s3362_s3 + $0x18] sm:$0xff] }
  0x5b   :  { %2536 = vmatprep.subr.bf16.mxu1 %v2683_v54  ;;  %v3208_v54 = vld [vmem:[%s3362_s3 + $0x90] sm:$0xff] }
  0x5c   :  { %2515 = vmatpush3.bf16.msra.mxu0 %v2684_v55  ;;  %v3213_v55 = vld [vmem:[%s3362_s3 + $0xd0] sm:$0xff] }
  0x5d   :  { %2516 = vmatprep.subr.bf16.mxu0 %v2686_v56  ;;  %v3218_v56 = vld [vmem:[%s3362_s3 + $0x98] sm:$0xff]  ;;  %v2387_v58 = vcombine.high %v3208_v54, %v3213_v55 }
  0x5e   :  { %2537 = vmatpush3.bf16.msra.mxu1 %v2685_v57  ;;  %v2386_v57 = vcombine.low %v3208_v54, %v3213_v55  ;;  %v1503_v54 = vld [vmem:[%s3362_s3 + $0x60] sm:$0xff]  ;;  %v1496_v55 = vld [vmem:[%s3362_s3 + $0x28] sm:$0xff] }
  0x5f   :  { %2538 = vmatprep.subr.bf16.mxu1 %v2687_v59  ;;  %v3227_v59 = vld [vmem:[%s3362_s3 + $0xd8] sm:$0xff] }
  0x60   :  { %2517 = vmatpush3.bf16.msra.mxu0 %v2688_v60  ;;  %v2723_v60 = vmov 0  }
  0x61   :  { %2546 = vmatprep.subr.bf16.mxu0 %v2690_v62  ;;  %v2389_v62 = vcombine.high %v3218_v56, %v3227_v59 }
  0x62   :  { %2539 = vmatpush3.bf16.msra.mxu1 %v2689_v63 }
  0x63   :  { %1363 = vmatmul.mubr.bf16.vlgmr.msra.gmra.mxu0 %v360_v61  ;;  %2568 = vmatprep.subr.bf16.mxu1 %v2691_v1  ;;  %v2388_v61 = vcombine.low %v3218_v56, %v3227_v59  ;;  %v2237_v1 = vld [vmem:[%s3363_s2] ss:$0 sm:$0xff]  ;;  %v1504_v56 = vld [vmem:[%s3362_s3 + $0x68] sm:$0xff] }
  0x64   :  { %2547 = vmatpush3.bf16.msra.mxu0 %v2692_v2  ;;  %1442 = vmatprep.mubr.bf16.mxu0 %v381_v0 }
  0x65   :  { %1403 = vmatmul.mubr.bf16.vlgmr.msra.gmra.mxu1 %v382_v3  ;;  %2548 = vmatprep.subr.bf16.mxu0 %v2694_v4 }
  0x66   :  { %2569 = vmatpush3.bf16.msra.mxu1 %v2693_v5  ;;  %1482 = vmatprep.mubr.bf16.mxu1 %v385_v6 }
  0x67   :  { %2570 = vmatprep.subr.bf16.mxu1 %v2695_v7 }
  0x68   :  { %2549 = vmatpush3.bf16.msra.mxu0 %v2696_v8 }
  0x69   :  { %2550 = vmatprep.subr.bf16.mxu0 %v2698_v9 }
  0x6a   :  { %2571 = vmatpush3.bf16.msra.mxu1 %v2697_v10 }
  0x6b   :  { %2572 = vmatprep.subr.bf16.mxu1 %v2699_v11 }
  0x6c   :  { %2551 = vmatpush3.bf16.msra.mxu0 %v2700_v12 }
  0x6d   :  { %2552 = vmatprep.subr.bf16.mxu0 %v2702_v13 }
  0x6e   :  { %2573 = vmatpush3.bf16.msra.mxu1 %v2701_v14 }
  0x6f   :  { %2574 = vmatprep.subr.bf16.mxu1 %v2703_v15 }
  0x70   :  { %2553 = vmatpush3.bf16.msra.mxu0 %v2704_v16 }
  0x71   :  { %2554 = vmatprep.subr.bf16.mxu0 %v2706_v17 }
  0x72   :  { %2575 = vmatpush3.bf16.msra.mxu1 %v2705_v18 }
  0x73   :  { %2576 = vmatprep.subr.bf16.mxu1 %v2707_v19 }
  0x74   :  { %2555 = vmatpush3.bf16.msra.mxu0 %v2708_v20 }
  0x75   :  { %2556 = vmatprep.subr.bf16.mxu0 %v2710_v21 }
  0x76   :  { %2577 = vmatpush3.bf16.msra.mxu1 %v2709_v22 }
  0x77   :  { %2578 = vmatprep.subr.bf16.mxu1 %v2711_v23 }
  0x78   :  { %2557 = vmatpush3.bf16.msra.mxu0 %v2712_v24 }
  0x79   :  { %2558 = vmatprep.subr.bf16.mxu0 %v2714_v25 }
  0x7a   :  { %2579 = vmatpush3.bf16.msra.mxu1 %v2713_v26 }
  0x7b   :  { %2580 = vmatprep.subr.bf16.mxu1 %v2715_v27 }
  0x7c   :  { %2559 = vmatpush3.bf16.msra.mxu0 %v2716_v28 }
  0x7d   :  { %2560 = vmatprep.subr.bf16.mxu0 %v2718_v29 }
  0x7e   :  { %2581 = vmatpush3.bf16.msra.mxu1 %v2717_v31 }
  0x7f   :  { %2582 = vmatprep.subr.bf16.mxu1 %v2719_v32 }
  0x80   :  { %2561 = vmatpush3.bf16.msra.mxu0 %v2720_v33 }
  0x81   :  { %1783 = vmatprep.subr.bf16.mxu0 %v2383_v41 }
  0x82   :  { %2583 = vmatpush3.bf16.msra.mxu1 %v2721_v36 }
  0x83   :  { %1443 = vmatmul.mubr.bf16.vlgmr.msra.gmra.mxu0 %v367_v34  ;;  %1824 = vmatprep.subr.bf16.mxu1 %v2385_v45 }
  0x84   :  { %1784 = vmatpush1.bf16.msra.mxu0 %v2382_v43  ;;  %1803 = vmatprep.mubr.bf16.mxu0 %v2723_v60 }
  0x85   :  { %1483 = vmatmul.mubr.bf16.vlgmr.msra.gmra.mxu1 %v383_v37  ;;  %1785 = vmatprep.subr.bf16.mxu0 %v2367_v49  ;;  %v1501_v49 = vld [vmem:[%s3362_s3 + $0x50] sm:$0xff] }
  0x86   :  { %1825 = vmatpush1.bf16.msra.mxu1 %v2384_v44  ;;  %1844 = vmatprep.mubr.bf16.mxu1 %v2723_v60 }
  0x87   :  { %1826 = vmatprep.subr.bf16.mxu1 %v2369_v53 }
  0x88   :  { %1786 = vmatpush1.bf16.msra.mxu0 %v2366_v51  ;;  %v1502_v51 = vld [vmem:[%s3362_s3 + $0x58] sm:$0xff] }
  0x89   :  { %1865 = vmatprep.subr.bf16.mxu0 %v2387_v58 }
  0x8a   :  { %1827 = vmatpush1.bf16.msra.mxu1 %v2368_v52 }
  0x8b   :  { %1906 = vmatprep.subr.bf16.mxu1 %v2389_v62  ;;  %v2371_v62 = vcombine.high %v1493_v46, %v1501_v49 }
  0xe3   :  { %v2430_v63 = vpop.f32.mrf.mxu0 }
  0xe4   :  { %v2452_v0 = vpop.f32.mrf.mxu1 }
  0xe5   :  { %v2431_v2 = vpop.f32.mrf.mxu0 }
  0xe6   :  { %v2432_v3 = vadd.f32 %v2431_v2, %v2430_v63  ;;  %v2453_v4 = vpop.f32.mrf.mxu1  ;;  %v2373_v63 = vcombine.high %v1494_v50, %v1502_v51  ;;  %v1512_v2 = vld [vmem:[%s3362_s3 + $0xa8] sm:$0xff] }
  0xe7   :  { %v2433_v5 = vpop.f32.mrf.mxu0  ;;  %v2454_v7 = vadd.f32 %v2453_v4, %v2452_v0  ;;  %v1511_v0 = vld [vmem:[%s3362_s3 + $0xa0] sm:$0xff]  ;;  %v2370_v4 = vcombine.low %v1493_v46, %v1501_v49  ;;  %v1549_v46 = vsub.s32 5, %v2832_v30 }
  0xe8   :  { %v1205_v6 = vadd.f32 %v2432_v3, %v2237_v1  ;;  %v2455_v8 = vpop.f32.mrf.mxu1  ;;  %v1519_v1 = vld [vmem:[%s3362_s3 + $0xe0] sm:$0xff]  ;;  %v1520_v3 = vld [vmem:[%s3362_s3 + $0xe8] sm:$0xff]  ;;  %v2372_v5 = vcombine.low %v1494_v50, %v1502_v51 }
  0xe9   :  { %v2434_v9 = vpop.f32.mrf.mxu0  ;;  %v1495_v8 = vld [vmem:[%s3362_s3 + $0x20] sm:$0xff]  ;;  %v2392_v59 = vcombine.low %v1512_v2, %v1520_v3 }
  0xea   :  { %v1245_v10 = vadd.f32 %v2454_v7, %v1205_v6  ;;  %v2456_v11 = vpop.f32.mrf.mxu1  ;;  %v2391_v6 = vcombine.high %v1511_v0, %v1519_v1  ;;  %v2393_v7 = vcombine.high %v1512_v2, %v1520_v3  ;;  %v2377_v9 = vcombine.high %v1496_v55, %v1504_v56 }
  0xeb   :  { %v1521_v11 = vld [vmem:[%s3362_s3 + $0xf0] sm:$0xff] }
 0x103   :  { %v2474_v12 = vpop.f32.mrf.mxu0 }
 0x105   :  { %v2496_v13 = vpop.f32.mrf.mxu1  ;;  %v2475_v14 = vpop.f32.mrf.mxu0 }
 0x106   :  { %v2476_v28 = vadd.f32 %v2475_v14, %v2474_v12  ;;  %v1514_v12 = vld [vmem:[%s3362_s3 + $0xb8] sm:$0xff]  ;;  %v2374_v14 = vcombine.low %v1495_v8, %v1503_v54 }
 0x107   :  { %v2497_v15 = vpop.f32.mrf.mxu1  ;;  %v2477_v16 = vpop.f32.mrf.mxu0 }
 0x108   :  { %v1285_v29 = vadd.f32 %v2476_v28, %v1245_v10  ;;  %v2498_v31 = vadd.f32 %v2497_v15, %v2496_v13  ;;  %v1513_v10 = vld [vmem:[%s3362_s3 + $0xb0] sm:$0xff]  ;;  %v1522_v13 = vld [vmem:[%s3362_s3 + $0xf8] sm:$0xff]  ;;  %v2376_v15 = vcombine.low %v1496_v55, %v1504_v56  ;;  %v1533_v28 = vsub.s32 1, %v2832_v30 }
 0x109   :  { %v2499_v17 = vpop.f32.mrf.mxu1  ;;  %v2478_v18 = vpop.f32.mrf.mxu0  ;;  %v2395_v16 = vcombine.high %v1513_v10, %v1521_v11 }
 0x10a   :  { %v1325_v33 = vadd.f32 %v2498_v31, %v1285_v29  ;;  %v2397_v17 = vcombine.high %v1514_v12, %v1522_v13  ;;  %v1497_v18 = vld [vmem:[%s3362_s3 + $0x30] sm:$0xff]  ;;  %v1541_v29 = vsub.s32 3, %v2832_v30  ;;  %v1529_v31 = vsub.s32 0, %v2832_v30 }
 0x10b   :  { %v2500_v19 = vpop.f32.mrf.mxu1 }
 0x10c   :  { %v1505_v19 = vld [vmem:[%s3362_s3 + $0x70] sm:$0xff] }
 0x123   :  { %v2518_v20 = vpop.f32.mrf.mxu0 }
 0x125   :  { %v2540_v21 = vpop.f32.mrf.mxu1  ;;  %v2519_v22 = vpop.f32.mrf.mxu0 }
 0x126   :  { %v2520_v32 = vadd.f32 %v2519_v22, %v2518_v20  ;;  %v1498_v20 = vld [vmem:[%s3362_s3 + $0x38] sm:$0xff]  ;;  %v2394_v22 = vcombine.low %v1513_v10, %v1521_v11  ;;  %v1524_v10 = vld [vmem:[%s3364_s4 + $0x8] sm:$0xff] }
 0x127   :  { %v2541_v23 = vpop.f32.mrf.mxu1  ;;  %v2521_v24 = vpop.f32.mrf.mxu0 }
 0x128   :  { %v1365_v34 = vadd.f32 %v2520_v32, %v1325_v33  ;;  %v2542_v36 = vadd.f32 %v2541_v23, %v2540_v21  ;;  %v1506_v21 = vld [vmem:[%s3362_s3 + $0x78] sm:$0xff]  ;;  %v2396_v23 = vcombine.low %v1514_v12, %v1522_v13  ;;  %v2379_v24 = vcombine.high %v1497_v18, %v1505_v19 }
 0x129   :  { %v2543_v25 = vpop.f32.mrf.mxu1  ;;  %v2522_v26 = vpop.f32.mrf.mxu0  ;;  %v1537_v32 = vsub.s32 2, %v2832_v30  ;;  %v1566_v13 = vrot.slane %v1524_v10, %v1533_v28 }
 0x12a   :  { %v1405_v40 = vadd.f32 %v2542_v36, %v1365_v34  ;;  %v2381_v25 = vcombine.high %v1498_v20, %v1506_v21  ;;  %v2378_v26 = vcombine.low %v1497_v18, %v1505_v19  ;;  %v1562_v18 = vrot.slane %v1524_v10, %v1529_v31 }
 0x12b   :  { %v2544_v27 = vpop.f32.mrf.mxu1 }
 0x12c   :  { %v2380_v27 = vcombine.low %v1498_v20, %v1506_v21  ;;  %v1570_v20 = vrot.slane %v1524_v10, %v1537_v32 }
 0x143   :  { %v2562_v37 = vpop.f32.mrf.mxu0 }
 0x145   :  { %v2584_v38 = vpop.f32.mrf.mxu1  ;;  %v2563_v39 = vpop.f32.mrf.mxu0 }
 0x146   :  { %v2564_v41 = vadd.f32 %v2563_v39, %v2562_v37 }
 0x147   :  { %v2585_v42 = vpop.f32.mrf.mxu1  ;;  %v2565_v43 = vpop.f32.mrf.mxu0 }
 0x148   :  { %v1445_v44 = vadd.f32 %v2564_v41, %v1405_v40  ;;  %v2586_v45 = vadd.f32 %v2585_v42, %v2584_v38  ;;  %v1545_v42 = vsub.s32 4, %v2832_v30  ;;  %v1553_v43 = vsub.s32 6, %v2832_v30 }
 0x149   :  { %v2587_v47 = vpop.f32.mrf.mxu1  ;;  %v2566_v48 = vpop.f32.mrf.mxu0 }
 0x14a   :  { %v1485_v52 = vadd.f32 %v2586_v45, %v1445_v44  ;;  %v1557_v47 = vsub.s32 7, %v2832_v30 }
 0x14b   :  { %v2588_v53 = vpop.f32.mrf.mxu1 }
 0x14c   :  { %v3250_v58 = vpack.c.bf16 %v1485_v52, %v1485_v52 }
 0x14e   :  { %2398 = vmatmul.mubr.msk.bf16.vlgmr.msra.gmra.mxu0 %vm1767_vm0, %v3250_v58  ;;  %2399 = vmatmul.mubr.msk.bf16.vlgmr.msra.gmra.mxu1 %vm1767_vm0, %v3250_v58 }
 0x14f   :  { %1866 = vmatpush1.bf16.msra.mxu0 %v2386_v57  ;;  %1907 = vmatpush1.bf16.msra.mxu1 %v2388_v61  ;;  %v2390_v57 = vcombine.low %v1511_v0, %v1519_v1  ;;  %v2375_v61 = vcombine.high %v1495_v8, %v1503_v54 }
 0x150   :  { %1867 = vmatprep.subr.bf16.mxu0 %v2371_v62  ;;  %1908 = vmatprep.subr.bf16.mxu1 %v2373_v63 }
 0x151   :  { %1885 = vmatprep.mubr.bf16.mxu0 %v2723_v60  ;;  %1926 = vmatprep.mubr.bf16.mxu1 %v2723_v60 }
 0x153   :  { %1868 = vmatpush1.bf16.msra.mxu0 %v2370_v4  ;;  %1909 = vmatpush1.bf16.msra.mxu1 %v2372_v5 }
 0x154   :  { %1947 = vmatprep.subr.bf16.mxu0 %v2391_v6  ;;  %1988 = vmatprep.subr.bf16.mxu1 %v2393_v7 }
 0x156   :  { %2400 = vmatmul.mubr.msk.bf16.vlgmr.msra.gmra.mxu0 %vm1767_vm0, %v3250_v58  ;;  %2401 = vmatmul.mubr.msk.bf16.vlgmr.msra.gmra.mxu1 %vm1767_vm0, %v3250_v58 }
 0x157   :  { %1948 = vmatpush1.bf16.msra.mxu0 %v2390_v57  ;;  %1989 = vmatpush1.bf16.msra.mxu1 %v2392_v59 }
 0x158   :  { %1949 = vmatprep.subr.bf16.mxu0 %v2375_v61  ;;  %1990 = vmatprep.subr.bf16.mxu1 %v2377_v9 }
 0x159   :  { %1967 = vmatprep.mubr.bf16.mxu0 %v2723_v60  ;;  %2008 = vmatprep.mubr.bf16.mxu1 %v2723_v60 }
 0x15b   :  { %1950 = vmatpush1.bf16.msra.mxu0 %v2374_v14  ;;  %1991 = vmatpush1.bf16.msra.mxu1 %v2376_v15 }
 0x15c   :  { %2029 = vmatprep.subr.bf16.mxu0 %v2395_v16  ;;  %2070 = vmatprep.subr.bf16.mxu1 %v2397_v17  ;;  %v1574_v17 = vrot.slane %v1524_v10, %v1541_v29 }
 0x15e   :  { %2402 = vmatmul.mubr.msk.bf16.vlgmr.msra.gmra.mxu0 %vm1767_vm0, %v3250_v58  ;;  %2403 = vmatmul.mubr.msk.bf16.vlgmr.msra.gmra.mxu1 %vm1767_vm0, %v3250_v58 }
 0x15f   :  { %2030 = vmatpush1.bf16.msra.mxu0 %v2394_v22  ;;  %2071 = vmatpush1.bf16.msra.mxu1 %v2396_v23 }
 0x160   :  { %2031 = vmatprep.subr.bf16.mxu0 %v2379_v24  ;;  %2072 = vmatprep.subr.bf16.mxu1 %v2381_v25 }
 0x161   :  { %2049 = vmatprep.mubr.bf16.mxu0 %v2723_v60  ;;  %2090 = vmatprep.mubr.bf16.mxu1 %v2723_v60  ;;  %v1523_v60 = vld [vmem:[%s3364_s4] sm:$0xff] }
 0x162   :  { %v1534_v33 = vrot.slane %v1523_v60, %v1533_v28  ;;  %v1542_v34 = vrot.slane %v1523_v60, %v1541_v29  ;;  %v1530_v36 = vrot.slane %v1523_v60, %v1529_v31  ;;  %v1538_v38 = vrot.slane %v1523_v60, %v1537_v32 }
 0x163   :  { %2032 = vmatpush1.bf16.msra.mxu0 %v2378_v26  ;;  %2073 = vmatpush1.bf16.msra.mxu1 %v2380_v27  ;;  %v1546_v63 = vrot.slane %v1523_v60, %v1545_v42  ;;  %v1554_v0 = vrot.slane %v1523_v60, %v1553_v43  ;;  %v1550_v1 = vrot.slane %v1523_v60, %v1549_v46 }
 0x164   :  { %v1558_v2 = vrot.slane %v1523_v60, %v1557_v47  ;;  %v1578_v32 = vrot.slane %v1524_v10, %v1545_v42 }
 0x166   :  { %2404 = vmatmul.mubr.msk.bf16.vlgmr.msra.gmra.mxu0 %vm1767_vm0, %v3250_v58  ;;  %2405 = vmatmul.mubr.msk.bf16.vlgmr.msra.gmra.mxu1 %vm1767_vm0, %v3250_v58 }
 0x20e   :  { %v1805_v37 = vpop.f32.mrf.mxu0  ;;  %v1846_v39 = vpop.f32.mrf.mxu1 }
 0x20f   :  { %v1806_v48 = vadd.f32 %v1805_v37, %v1530_v36  ;;  %v1847_v49 = vadd.f32 %v1846_v39, %v1538_v38 }
 0x210   :  { %v1807_v40 = vpop.f32.mrf.mxu0  ;;  %v1848_v41 = vpop.f32.mrf.mxu1 }
 0x211   :  { %v1808_v44 = vadd.f32 %v1807_v40, %v1534_v33  ;;  %v1849_v45 = vadd.f32 %v1848_v41, %v1542_v34  ;;  %v1586_v40 = vrot.slane %v1524_v10, %v1553_v43  ;;  %v1582_v41 = vrot.slane %v1524_v10, %v1549_v46 }
 0x212   :  { %v1809_v50 = vpop.f32.mrf.mxu0  ;;  %v1850_v51 = vpop.f32.mrf.mxu1 }
 0x213   :  { %v2406_v52 = vpack.c.bf16 %v1808_v44, %v1806_v48  ;;  %v2407_v53 = vpack.c.bf16 %v1849_v45, %v1847_v49  ;;  %v1590_v44 = vrot.slane %v1524_v10, %v1557_v47 }
 0x214   :  { %v1810_v58 = vpop.f32.mrf.mxu0  ;;  %v1851_v62 = vpop.f32.mrf.mxu1 }
 0x215   :  { %v2141_v5 = vrot.slane %v2406_v52, %v2847_v35  ;;  %v2148_v6 = vrot.slane %v2407_v53, %v2847_v35 }
 0x216   :  { %v1887_v3 = vpop.f32.mrf.mxu0  ;;  %v1928_v4 = vpop.f32.mrf.mxu1 }
 0x217   :  { %v1888_v8 = vadd.f32 %v1887_v3, %v1546_v63  ;;  %v1929_v54 = vadd.f32 %v1928_v4, %v1554_v0  ;;  %v2163_v14 = vcombine.low %v2141_v5, %v2148_v6 }
 0x218   :  { %v1889_v7 = vpop.f32.mrf.mxu0  ;;  %v1930_v30 = vpop.f32.mrf.mxu1 }
 0x219   :  { %v1890_v55 = vadd.f32 %v1889_v7, %v1550_v1  ;;  %v1931_v56 = vadd.f32 %v1930_v30, %v1558_v2  ;;  %v2171_v25 = vrot.slane %v2163_v14, %v2847_v35 }
 0x21a   :  { %v1891_v57 = vpop.f32.mrf.mxu0  ;;  %v1932_v59 = vpop.f32.mrf.mxu1 }
 0x21b   :  { %v2408_v61 = vpack.c.bf16 %v1890_v55, %v1888_v8  ;;  %v2409_v9 = vpack.c.bf16 %v1931_v56, %v1929_v54 }
 0x21c   :  { %v1892_v11 = vpop.f32.mrf.mxu0  ;;  %v1933_v12 = vpop.f32.mrf.mxu1 }
 0x21d   :  { %v2155_v15 = vrot.slane %v2408_v61, %v2847_v35  ;;  %v2162_v16 = vrot.slane %v2409_v9, %v2847_v35 }
 0x21e   :  { %v1969_v19 = vpop.f32.mrf.mxu0  ;;  %v2010_v21 = vpop.f32.mrf.mxu1 }
 0x21f   :  { %v2164_v22 = vcombine.low %v2155_v15, %v2162_v16  ;;  %v1970_v28 = vadd.f32 %v1969_v19, %v1562_v18  ;;  %v2011_v33 = vadd.f32 %v2010_v21, %v1570_v20 }
 0x220   :  { %v1971_v23 = vpop.f32.mrf.mxu0  ;;  %v2012_v24 = vpop.f32.mrf.mxu1 }
 0x221   :  { %v2178_v26 = vrot.slane %v2164_v22, %v2847_v35  ;;  %v1972_v27 = vadd.f32 %v1971_v23, %v1566_v13  ;;  %v2013_v60 = vadd.f32 %v2012_v24, %v1574_v17 }
 0x222   :  { %v1973_v34 = vpop.f32.mrf.mxu0  ;;  %v2014_v36 = vpop.f32.mrf.mxu1 }
 0x223   :  { %v2179_v37 = vcombine.low %v2171_v25, %v2178_v26  ;;  %v2410_v38 = vpack.c.bf16 %v1972_v27, %v1970_v28  ;;  %v2411_v29 = vpack.c.bf16 %v2013_v60, %v2011_v33 }
 0x224   :  { %v1974_v31 = vpop.f32.mrf.mxu0  ;;  %v2015_v39 = vpop.f32.mrf.mxu1 }
 0x225   :  { %2231 = vst [vmem:[%s3365_s5] sm:$0xff] %v2179_v37  ;;  %v2190_v49 = vrot.slane %v2410_v38, %v2847_v35  ;;  %v2197_v50 = vrot.slane %v2411_v29, %v2847_v35 }
 0x226   :  { %v2051_v45 = vpop.f32.mrf.mxu0  ;;  %v2092_v48 = vpop.f32.mrf.mxu1 }
 0x227   :  { %v2052_v53 = vadd.f32 %v2051_v45, %v1578_v32  ;;  %v2093_v58 = vadd.f32 %v2092_v48, %v1586_v40  ;;  %v2212_v46 = vcombine.low %v2190_v49, %v2197_v50 }
 0x228   :  { %v2053_v51 = vpop.f32.mrf.mxu0  ;;  %v2094_v52 = vpop.f32.mrf.mxu1 }
 0x229   :  { %v2054_v62 = vadd.f32 %v2053_v51, %v1582_v41  ;;  %v2095_v63 = vadd.f32 %v2094_v52, %v1590_v44  ;;  %v2220_v6 = vrot.slane %v2212_v46, %v2847_v35 }
 0x22a   :  { %v2055_v0 = vpop.f32.mrf.mxu0  ;;  %v2096_v1 = vpop.f32.mrf.mxu1 }
 0x22b   :  { %v2412_v2 = vpack.c.bf16 %v2054_v62, %v2052_v53  ;;  %v2413_v3 = vpack.c.bf16 %v2095_v63, %v2093_v58 }
 0x22c   :  { %v2056_v42 = vpop.f32.mrf.mxu0  ;;  %v2097_v43 = vpop.f32.mrf.mxu1 }
 0x22d   :  { %v2204_v47 = vrot.slane %v2412_v2, %v2847_v35  ;;  %v2211_v4 = vrot.slane %v2413_v3, %v2847_v35 }
 0x22f   :  { %v2213_v5 = vcombine.low %v2204_v47, %v2211_v4 }
 0x231   :  { %v2227_v7 = vrot.slane %v2213_v5, %v2847_v35 }
 0x233   :  { %v2228_v30 = vcombine.low %v2220_v6, %v2227_v7 }
 0x235   :  { %2232 = vst [vmem:[%s3365_s5 + $0x8] sm:$0xff] %v2228_v30 }

// kernel: autoencoder_forward.12
= control target key start
LH: loop header
LB: loop body
LE: loop exit
PB: predicated region body
PF: predicated region fallthrough
CT: control target
= control target key end

     0   :  { %s2950_s1 = inlined_call_operand.vmem [shape: bf16[1152,128], index: 1, kind: input, shape index: {}]   ;;  %s2951_s0 = inlined_call_operand.vmem [shape: bf16[128,1152], index: 0, kind: input, shape index: {}]   ;;  %s2952_s2 = inlined_call_operand.vmem [shape: f32[1,128], index: 2, kind: input, shape index: {}]   ;;  %s2953_s3 = inlined_call_operand.vmem [shape: bf16[128,128], index: 3, kind: output, shape index: {}]  }
   0x1   :  { %v2175_v0 = vld [vmem:[%s2950_s1 + $0x78] sm:$0xff]   ;;  %v2179_v4 = vld [vmem:[%s2950_s1 + $0x70] sm:$0xff]   ;;  %v2183_v8 = vld [vmem:[%s2950_s1 + $0x68] sm:$0xff]  }
   0x2   :  { %v2176_v1 = vld [vmem:[%s2950_s1 + $0xf8] sm:$0xff]   ;;  %1855 = vmatprep.subr.bf16.mxu0 %v2175_v0  ;;  %v2180_v5 = vld [vmem:[%s2950_s1 + $0xf0] sm:$0xff]   ;;  %v2184_v9 = vld [vmem:[%s2950_s1 + $0xe8] sm:$0xff]  }
   0x3   :  { %v2177_v2 = vld [vmem:[%s2950_s1 + $0x38] sm:$0xff]   ;;  %1919 = vmatprep.subr.bf16.mxu1 %v2176_v1  ;;  %v2181_v6 = vld [vmem:[%s2950_s1 + $0x30] sm:$0xff]   ;;  %v2185_v10 = vld [vmem:[%s2950_s1 + $0x28] sm:$0xff]  }
   0x4   :  { %v2178_v3 = vld [vmem:[%s2950_s1 + $0xb8] sm:$0xff]   ;;  %1856 = vmatpush3.bf16.msra.mxu0 %v2177_v2  ;;  %v2182_v7 = vld [vmem:[%s2950_s1 + $0xb0] sm:$0xff]   ;;  %v2186_v11 = vld [vmem:[%s2950_s1 + $0xa8] sm:$0xff]  }
   0x5   :  { %1920 = vmatpush3.bf16.msra.mxu1 %v2178_v3  ;;  %1857 = vmatprep.subr.bf16.mxu0 %v2179_v4  ;;  %v2187_v12 = vld [vmem:[%s2950_s1 + $0x60] sm:$0xff]   ;;  %v2191_v16 = vld [vmem:[%s2950_s1 + $0x58] sm:$0xff]   ;;  %v2195_v20 = vld [vmem:[%s2950_s1 + $0x50] sm:$0xff]  }
   0x6   :  { %1921 = vmatprep.subr.bf16.mxu1 %v2180_v5  ;;  %v2188_v13 = vld [vmem:[%s2950_s1 + $0xe0] sm:$0xff]   ;;  %v2192_v17 = vld [vmem:[%s2950_s1 + $0xd8] sm:$0xff]   ;;  %v2196_v21 = vld [vmem:[%s2950_s1 + $0xd0] sm:$0xff]  }
   0x7   :  { %v2189_v14 = vld [vmem:[%s2950_s1 + $0x20] sm:$0xff]   ;;  %v2193_v18 = vld [vmem:[%s2950_s1 + $0x18] sm:$0xff]   ;;  %v2197_v22 = vld [vmem:[%s2950_s1 + $0x10] sm:$0xff]  }
   0x8   :  { %1858 = vmatpush3.bf16.msra.mxu0 %v2181_v6  ;;  %v2190_v15 = vld [vmem:[%s2950_s1 + $0xa0] sm:$0xff]   ;;  %v2194_v19 = vld [vmem:[%s2950_s1 + $0x98] sm:$0xff]   ;;  %v2198_v23 = vld [vmem:[%s2950_s1 + $0x90] sm:$0xff]  }
   0x9   :  { %1922 = vmatpush3.bf16.msra.mxu1 %v2182_v7  ;;  %1859 = vmatprep.subr.bf16.mxu0 %v2183_v8  ;;  %v2199_v24 = vld [vmem:[%s2950_s1 + $0x48] sm:$0xff]   ;;  %v2203_v28 = vld [vmem:[%s2950_s1 + $0x40] sm:$0xff]   ;;  %v2213_v36 = vld [vmem:[%s2950_s1 + $0x178] sm:$0xff]  }
   0xa   :  { %1923 = vmatprep.subr.bf16.mxu1 %v2184_v9  ;;  %v2200_v25 = vld [vmem:[%s2950_s1 + $0xc8] sm:$0xff]   ;;  %v2204_v29 = vld [vmem:[%s2950_s1 + $0xc0] sm:$0xff]   ;;  %v2214_v37 = vld [vmem:[%s2950_s1 + $0x1f8] sm:$0xff]  }
   0xb   :  { %v2201_v26 = vld [vmem:[%s2950_s1 + $0x8] sm:$0xff]   ;;  %v2205_v30 = vld [vmem:[%s2950_s1] sm:$0xff]   ;;  %v2215_v38 = vld [vmem:[%s2950_s1 + $0x138] sm:$0xff]  }
   0xc   :  { %1860 = vmatpush3.bf16.msra.mxu0 %v2185_v10  ;;  %v2202_v27 = vld [vmem:[%s2950_s1 + $0x88] sm:$0xff]   ;;  %v2206_v31 = vld [vmem:[%s2950_s1 + $0x80] sm:$0xff]   ;;  %v2216_v39 = vld [vmem:[%s2950_s1 + $0x1b8] sm:$0xff]  }
   0xd   :  { %1924 = vmatpush3.bf16.msra.mxu1 %v2186_v11  ;;  %1861 = vmatprep.subr.bf16.mxu0 %v2187_v12  ;;  %v2207_v32 = vld [vmem:[%s2951_s0] ss:$36 sps:$4 sm:$0xff]   ;;  %v2210_v34 = vld [vmem:[%s2951_s0 + $0x8] ss:$36 sps:$4 sm:$0xff]   ;;  %v2219_v41 = vld [vmem:[%s2951_s0 + $0x54] ss:$36 sps:$4 sm:$0xff]  }
   0xe   :  { %1925 = vmatprep.subr.bf16.mxu1 %v2188_v13  ;;  %v2209_v33 = vld [vmem:[%s2951_s0 + $0x4] ss:$36 sps:$4 sm:$0xff]   ;;  %v2212_v35 = vld [vmem:[%s2951_s0 + $0xc] ss:$36 sps:$4 sm:$0xff]   ;;  %v2227_v48 = vld [vmem:[%s2951_s0 + $0x94] ss:$36 sps:$4 sm:$0xff]  }
   0xf   :  { %1078 = vmatprep.mubr.bf16.mxu0 %v2209_v33  ;;  %1175 = vmatprep.mubr.bf16.mxu1 %v2212_v35  ;;  %v2217_v40 = vld [vmem:[%s2951_s0 + $0x4c] ss:$36 sps:$4 sm:$0xff]   ;;  %v2229_v49 = vld [vmem:[%s2951_s0 + $0x9c] ss:$36 sps:$4 sm:$0xff]   ;;  %v2239_v57 = vld [vmem:[%s2951_s0 + $0xe4] ss:$36 sps:$4 sm:$0xff]  }
  0x10   :  { %1862 = vmatpush3.bf16.msra.mxu0 %v2189_v14  ;;  %v2221_v42 = vld [vmem:[%s2951_s0 + $0x48] ss:$36 sps:$4 sm:$0xff]   ;;  %v2222_v43 = vld [vmem:[%s2951_s0 + $0x50] ss:$36 sps:$4 sm:$0xff]   ;;  %v2232_v51 = vld [vmem:[%s2951_s0 + $0x98] ss:$36 sps:$4 sm:$0xff]  }
  0x11   :  { %1926 = vmatpush3.bf16.msra.mxu1 %v2190_v15  ;;  %1863 = vmatprep.subr.bf16.mxu0 %v2191_v16  ;;  %v2223_v44 = vld [vmem:[%s2950_s1 + $0x170] sm:$0xff]   ;;  %v2233_v52 = vld [vmem:[%s2950_s1 + $0x168] sm:$0xff]   ;;  %v2237_v56 = vld [vmem:[%s2951_s0 + $0xdc] ss:$36 sps:$4 sm:$0xff]  }
  0x12   :  { %1927 = vmatprep.subr.bf16.mxu1 %v2192_v17  ;;  %v2224_v45 = vld [vmem:[%s2950_s1 + $0x1f0] sm:$0xff]   ;;  %v2234_v53 = vld [vmem:[%s2950_s1 + $0x1e8] sm:$0xff]   ;;  %v2241_v58 = vld [vmem:[%s2951_s0 + $0xd8] ss:$36 sps:$4 sm:$0xff]  }
  0x13   :  { %v2225_v46 = vld [vmem:[%s2950_s1 + $0x130] sm:$0xff]   ;;  %v2235_v54 = vld [vmem:[%s2950_s1 + $0x128] sm:$0xff]   ;;  %v2242_v59 = vld [vmem:[%s2951_s0 + $0xe0] ss:$36 sps:$4 sm:$0xff]  }
  0x14   :  { %1864 = vmatpush3.bf16.msra.mxu0 %v2193_v18  ;;  %v2226_v47 = vld [vmem:[%s2950_s1 + $0x1b0] sm:$0xff]   ;;  %v2236_v55 = vld [vmem:[%s2950_s1 + $0x1a8] sm:$0xff]   ;;  %v2243_v60 = vld [vmem:[%s2950_s1 + $0x160] sm:$0xff]  }
  0x15   :  { %1928 = vmatpush3.bf16.msra.mxu1 %v2194_v19  ;;  %1865 = vmatprep.subr.bf16.mxu0 %v2195_v20  ;;  %v2231_v50 = vld [vmem:[%s2951_s0 + $0x90] ss:$36 sps:$4 sm:$0xff]   ;;  %v2244_v61 = vld [vmem:[%s2950_s1 + $0x1e0] sm:$0xff]   ;;  %v2253_v3 = vld [vmem:[%s2950_s1 + $0x158] sm:$0xff]  }
  0x16   :  { %1929 = vmatprep.subr.bf16.mxu1 %v2196_v21  ;;  %v2245_v62 = vld [vmem:[%s2950_s1 + $0x120] sm:$0xff]   ;;  %v2249_v1 = vld [vmem:[%s2951_s0 + $0x12c] ss:$36 sps:$4 sm:$0xff]   ;;  %v2254_v5 = vld [vmem:[%s2950_s1 + $0x1d8] sm:$0xff]  }
  0x17   :  { %v2246_v63 = vld [vmem:[%s2950_s1 + $0x1a0] sm:$0xff]   ;;  %v2252_v4 = vld [vmem:[%s2951_s0 + $0x128] ss:$36 sps:$4 sm:$0xff]   ;;  %v2255_v6 = vld [vmem:[%s2950_s1 + $0x118] sm:$0xff]  }
  0x18   :  { %1866 = vmatpush3.bf16.msra.mxu0 %v2197_v22  ;;  %v2247_v0 = vld [vmem:[%s2951_s0 + $0x124] ss:$36 sps:$4 sm:$0xff]   ;;  %v2256_v7 = vld [vmem:[%s2950_s1 + $0x198] sm:$0xff]   ;;  %v2257_v8 = vld [vmem:[%s2951_s0 + $0x16c] ss:$36 sps:$4 sm:$0xff]  }
  0x19   :  { %1930 = vmatpush3.bf16.msra.mxu1 %v2198_v23  ;;  %1867 = vmatprep.subr.bf16.mxu0 %v2199_v24  ;;  %v2251_v2 = vld [vmem:[%s2951_s0 + $0x120] ss:$36 sps:$4 sm:$0xff]   ;;  %v2259_v9 = vld [vmem:[%s2951_s0 + $0x174] ss:$36 sps:$4 sm:$0xff]   ;;  %v2261_v12 = vld [vmem:[%s2951_s0 + $0x168] ss:$36 sps:$4 sm:$0xff]  }
  0x1a   :  { %1931 = vmatprep.subr.bf16.mxu1 %v2200_v25  ;;  %v2263_v10 = vld [vmem:[%s2950_s1 + $0x150] sm:$0xff]   ;;  %v2269_v17 = vld [vmem:[%s2951_s0 + $0x1bc] ss:$36 sps:$4 sm:$0xff]   ;;  %v2273_v18 = vld [vmem:[%s2950_s1 + $0x148] sm:$0xff]  }
  0x1b   :  { %v2264_v11 = vld [vmem:[%s2950_s1 + $0x1d0] sm:$0xff]   ;;  %v2274_v19 = vld [vmem:[%s2950_s1 + $0x1c8] sm:$0xff]   ;;  %v2272_v23 = vld [vmem:[%s2951_s0 + $0x1b8] ss:$36 sps:$4 sm:$0xff]  }
  0x1c   :  { %1868 = vmatpush3.bf16.msra.mxu0 %v2201_v26  ;;  %v2265_v13 = vld [vmem:[%s2950_s1 + $0x110] sm:$0xff]   ;;  %v2275_v20 = vld [vmem:[%s2950_s1 + $0x108] sm:$0xff]   ;;  %v2277_v24 = vld [vmem:[%s2951_s0 + $0x1fc] ss:$36 sps:$4 sm:$0xff]  }
  0x1d   :  { %1932 = vmatpush3.bf16.msra.mxu1 %v2202_v27  ;;  %1869 = vmatprep.subr.bf16.mxu0 %v2203_v28  ;;  %v2266_v14 = vld [vmem:[%s2950_s1 + $0x190] sm:$0xff]   ;;  %v2276_v21 = vld [vmem:[%s2950_s1 + $0x188] sm:$0xff]   ;;  %v2283_v26 = vld [vmem:[%s2950_s1 + $0x140] sm:$0xff]  }
  0x1e   :  { %1933 = vmatprep.subr.bf16.mxu1 %v2204_v29  ;;  %v2262_v15 = vld [vmem:[%s2951_s0 + $0x170] ss:$36 sps:$4 sm:$0xff]   ;;  %v2279_v25 = vld [vmem:[%s2951_s0 + $0x204] ss:$36 sps:$4 sm:$0xff]  }
  0x1f   :  { %v2267_v16 = vld [vmem:[%s2951_s0 + $0x1b4] ss:$36 sps:$4 sm:$0xff]   ;;  %v2284_v27 = vld [vmem:[%s2950_s1 + $0x1c0] sm:$0xff]  }
  0x20   :  { %1870 = vmatpush3.bf16.msra.mxu0 %v2205_v30  ;;  %v2271_v22 = vld [vmem:[%s2951_s0 + $0x1b0] ss:$36 sps:$4 sm:$0xff]   ;;  %v2285_v28 = vld [vmem:[%s2950_s1 + $0x100] sm:$0xff]   ;;  %v2281_v30 = vld [vmem:[%s2951_s0 + $0x1f8] ss:$36 sps:$4 sm:$0xff]  }
  0x21   :  { %1934 = vmatpush3.bf16.msra.mxu1 %v2206_v31  ;;  %1983 = vmatprep.subr.bf16.mxu0 %v2213_v36  ;;  %v2286_v29 = vld [vmem:[%s2950_s1 + $0x180] sm:$0xff]   ;;  %v2289_v33 = vld [vmem:[%s2951_s0 + $0x14] ss:$36 sps:$4 sm:$0xff]  }
  0x22   :  { %2047 = vmatprep.subr.bf16.mxu1 %v2214_v37  ;;  %v2282_v31 = vld [vmem:[%s2951_s0 + $0x200] ss:$36 sps:$4 sm:$0xff]   ;;  %v2287_v35 = vld [vmem:[%s2951_s0 + $0x10] ss:$36 sps:$4 sm:$0xff]   ;;  %v2290_v36 = vld [vmem:[%s2951_s0 + $0x18] ss:$36 sps:$4 sm:$0xff]  }
  0x23   :  { %1079 = vmatmul.mubr.bf16.vlgmr.msra.gmra.mxu0 %v2207_v32  ;;  %v2293_v32 = vld [vmem:[%s2950_s1 + $0x238] sm:$0xff]  }
  0x24   :  { %1176 = vmatmul.mubr.bf16.vlgmr.msra.gmra.mxu1 %v2210_v34  ;;  %1984 = vmatpush3.bf16.msra.mxu0 %v2215_v38  ;;  %v2292_v34 = vld [vmem:[%s2951_s0 + $0x1c] ss:$36 sps:$4 sm:$0xff]   ;;  %v2296_v38 = vld [vmem:[%s2951_s0 + $0x64] ss:$36 sps:$4 sm:$0xff]  }
  0x25   :  { %2048 = vmatpush3.bf16.msra.mxu1 %v2216_v39  ;;  %1086 = vmatprep.mubr.bf16.mxu0 %v2217_v40  ;;  %v2294_v37 = vld [vmem:[%s2951_s0 + $0x5c] ss:$36 sps:$4 sm:$0xff]   ;;  %v2300_v39 = vld [vmem:[%s2950_s1 + $0x230] sm:$0xff]   ;;  %v2307_v40 = vld [vmem:[%s2950_s1 + $0x228] sm:$0xff]  }
  0x26   :  { %1183 = vmatprep.mubr.bf16.mxu1 %v2219_v41  ;;  %1985 = vmatprep.subr.bf16.mxu0 %v2223_v44  ;;  %v2298_v41 = vld [vmem:[%s2951_s0 + $0x58] ss:$36 sps:$4 sm:$0xff]   ;;  %v2303_v44 = vld [vmem:[%s2951_s0 + $0xac] ss:$36 sps:$4 sm:$0xff]  }
  0x27   :  { %2049 = vmatprep.subr.bf16.mxu1 %v2224_v45  ;;  %v2314_v45 = vld [vmem:[%s2950_s1 + $0x220] sm:$0xff]  }
  0x28   :  { %1986 = vmatpush3.bf16.msra.mxu0 %v2225_v46  ;;  %v2321_v46 = vld [vmem:[%s2950_s1 + $0x218] sm:$0xff]  }
  0x29   :  { %2050 = vmatpush3.bf16.msra.mxu1 %v2226_v47  ;;  %1987 = vmatprep.subr.bf16.mxu0 %v2233_v52  ;;  %v2305_v47 = vld [vmem:[%s2951_s0 + $0xa0] ss:$36 sps:$4 sm:$0xff]   ;;  %v2312_v52 = vld [vmem:[%s2951_s0 + $0xe8] ss:$36 sps:$4 sm:$0xff]  }
  0x2a   :  { %2051 = vmatprep.subr.bf16.mxu1 %v2234_v53  ;;  %v2335_v53 = vld [vmem:[%s2950_s1 + $0x208] sm:$0xff]  }
  0x2b   :  { %1087 = vmatmul.mubr.bf16.gmra.mxu0 %v2221_v42  ;;  %v2299_v42 = vld [vmem:[%s2951_s0 + $0x60] ss:$36 sps:$4 sm:$0xff]  }
  0x2c   :  { %1184 = vmatmul.mubr.bf16.gmra.mxu1 %v2222_v43  ;;  %1094 = vmatprep.mubr.bf16.mxu0 %v2227_v48  ;;  %v2301_v43 = vld [vmem:[%s2951_s0 + $0xa4] ss:$36 sps:$4 sm:$0xff]  }
  0x2d   :  { %1191 = vmatprep.mubr.bf16.mxu1 %v2229_v49  ;;  %1988 = vmatpush3.bf16.msra.mxu0 %v2235_v54  ;;  %v2306_v48 = vld [vmem:[%s2951_s0 + $0xa8] ss:$36 sps:$4 sm:$0xff]   ;;  %v2313_v54 = vld [vmem:[%s2951_s0 + $0xf0] ss:$36 sps:$4 sm:$0xff]  }
  0x2e   :  { %2052 = vmatpush3.bf16.msra.mxu1 %v2236_v55  ;;  %1989 = vmatprep.subr.bf16.mxu0 %v2243_v60  ;;  %v2308_v49 = vld [vmem:[%s2951_s0 + $0xec] ss:$36 sps:$4 sm:$0xff]   ;;  %v2315_v55 = vld [vmem:[%s2951_s0 + $0x134] ss:$36 sps:$4 sm:$0xff]   ;;  %v2322_v60 = vld [vmem:[%s2951_s0 + $0x17c] ss:$36 sps:$4 sm:$0xff]  }
  0x2f   :  { %2053 = vmatprep.subr.bf16.mxu1 %v2244_v61  ;;  %v2324_v61 = vld [vmem:[%s2951_s0 + $0x184] ss:$36 sps:$4 sm:$0xff]  }
  0x31   :  { %1990 = vmatpush3.bf16.msra.mxu0 %v2245_v62  ;;  %v2326_v62 = vld [vmem:[%s2951_s0 + $0x178] ss:$36 sps:$4 sm:$0xff]  }
  0x32   :  { %2054 = vmatpush3.bf16.msra.mxu1 %v2246_v63  ;;  %1991 = vmatprep.subr.bf16.mxu0 %v2253_v3  ;;  %v2327_v63 = vld [vmem:[%s2951_s0 + $0x180] ss:$36 sps:$4 sm:$0xff]   ;;  %v2334_v3 = vld [vmem:[%s2951_s0 + $0x1c8] ss:$36 sps:$4 sm:$0xff]  }
  0x33   :  { %1095 = vmatmul.mubr.bf16.gmra.mxu0 %v2231_v50  ;;  %2055 = vmatprep.subr.bf16.mxu1 %v2254_v5  ;;  %v2310_v50 = vld [vmem:[%s2951_s0 + $0xf4] ss:$36 sps:$4 sm:$0xff]  }
  0x34   :  { %1192 = vmatmul.mubr.bf16.gmra.mxu1 %v2232_v51  ;;  %1102 = vmatprep.mubr.bf16.mxu0 %v2237_v56  ;;  %v2328_v51 = vld [vmem:[%s2950_s1 + $0x210] sm:$0xff]   ;;  %v2317_v56 = vld [vmem:[%s2951_s0 + $0x13c] ss:$36 sps:$4 sm:$0xff]  }
  0x35   :  { %1199 = vmatprep.mubr.bf16.mxu1 %v2239_v57  ;;  %1992 = vmatpush3.bf16.msra.mxu0 %v2255_v6  ;;  %v2342_v57 = vld [vmem:[%s2950_s1 + $0x200] sm:$0xff]   ;;  %v2338_v5 = vld [vmem:[%s2951_s0 + $0x214] ss:$36 sps:$4 sm:$0xff]   ;;  %v2340_v6 = vld [vmem:[%s2951_s0 + $0x208] ss:$36 sps:$4 sm:$0xff]  }
  0x36   :  { %2056 = vmatpush3.bf16.msra.mxu1 %v2256_v7  ;;  %1993 = vmatprep.subr.bf16.mxu0 %v2263_v10  ;;  %v2341_v7 = vld [vmem:[%s2951_s0 + $0x210] ss:$36 sps:$4 sm:$0xff]   ;;  %v2345_v10 = vld [vmem:[%s2951_s0 + $0x68] ss:$36 sps:$4 sm:$0xff]  }
  0x37   :  { %2057 = vmatprep.subr.bf16.mxu1 %v2264_v11  ;;  %v2346_v11 = vld [vmem:[%s2951_s0 + $0x188] ss:$36 sps:$4 sm:$0xff]  }
  0x39   :  { %1994 = vmatpush3.bf16.msra.mxu0 %v2265_v13  ;;  %v2348_v13 = vld [vmem:[%s2951_s0 + $0x1d0] ss:$36 sps:$4 sm:$0xff]  }
  0x3a   :  { %2058 = vmatpush3.bf16.msra.mxu1 %v2266_v14  ;;  %1995 = vmatprep.subr.bf16.mxu0 %v2273_v18  ;;  %v2349_v14 = vld [vmem:[%s2951_s0 + $0xf8] ss:$36 sps:$4 sm:$0xff]   ;;  %v2806_v18 = vld [vmem:[%s2952_s2] ss:$0 sm:$0xff] }
  0x3b   :  { %1103 = vmatmul.mubr.bf16.gmra.mxu0 %v2241_v58  ;;  %2059 = vmatprep.subr.bf16.mxu1 %v2274_v19  ;;  %v2319_v58 = vld [vmem:[%s2951_s0 + $0x130] ss:$36 sps:$4 sm:$0xff]  }
  0x3c   :  { %1200 = vmatmul.mubr.bf16.gmra.mxu1 %v2242_v59  ;;  %1110 = vmatprep.mubr.bf16.mxu0 %v2247_v0  ;;  %v2320_v59 = vld [vmem:[%s2951_s0 + $0x138] ss:$36 sps:$4 sm:$0xff]   ;;  %v2329_v0 = vld [vmem:[%s2951_s0 + $0x1c4] ss:$36 sps:$4 sm:$0xff]  }
  0x3d   :  { %1207 = vmatprep.mubr.bf16.mxu1 %v2249_v1  ;;  %1996 = vmatpush3.bf16.msra.mxu0 %v2275_v20  ;;  %v2331_v1 = vld [vmem:[%s2951_s0 + $0x1cc] ss:$36 sps:$4 sm:$0xff]  }
  0x3e   :  { %2060 = vmatpush3.bf16.msra.mxu1 %v2276_v21  ;;  %1997 = vmatprep.subr.bf16.mxu0 %v2283_v26 }
  0x3f   :  { %2061 = vmatprep.subr.bf16.mxu1 %v2284_v27 }
  0x41   :  { %1998 = vmatpush3.bf16.msra.mxu0 %v2285_v28 }
  0x42   :  { %2062 = vmatpush3.bf16.msra.mxu1 %v2286_v29  ;;  %2127 = vmatprep.subr.bf16.mxu0 %v2293_v32 }
  0x43   :  { %1111 = vmatmul.mubr.bf16.gmra.mxu0 %v2251_v2  ;;  %2159 = vmatprep.subr.bf16.mxu1 %v2293_v32  ;;  %v2333_v2 = vld [vmem:[%s2951_s0 + $0x1c0] ss:$36 sps:$4 sm:$0xff]  }
  0x44   :  { %1208 = vmatmul.mubr.bf16.gmra.mxu1 %v2252_v4  ;;  %1118 = vmatprep.mubr.bf16.mxu0 %v2257_v8  ;;  %v2336_v4 = vld [vmem:[%s2951_s0 + $0x20c] ss:$36 sps:$4 sm:$0xff]   ;;  %v2343_v8 = vld [vmem:[%s2951_s0 + $0x20] ss:$36 sps:$4 sm:$0xff]  }
  0x45   :  { %1215 = vmatprep.mubr.bf16.mxu1 %v2259_v9  ;;  %v2344_v9 = vld [vmem:[%s2951_s0 + $0x140] ss:$36 sps:$4 sm:$0xff]  }
  0x4b   :  { %1119 = vmatmul.mubr.bf16.gmra.mxu0 %v2261_v12  ;;  %v2347_v12 = vld [vmem:[%s2951_s0 + $0xb0] ss:$36 sps:$4 sm:$0xff]  }
  0x4c   :  { %1216 = vmatmul.mubr.bf16.gmra.mxu1 %v2262_v15  ;;  %1126 = vmatprep.mubr.bf16.mxu0 %v2267_v16  ;;  %v2350_v15 = vld [vmem:[%s2951_s0 + $0x218] ss:$36 sps:$4 sm:$0xff]  }
  0x4d   :  { %1223 = vmatprep.mubr.bf16.mxu1 %v2269_v17 }
  0x53   :  { %1127 = vmatmul.mubr.bf16.gmra.mxu0 %v2271_v22 }
  0x54   :  { %1224 = vmatmul.mubr.bf16.gmra.mxu1 %v2272_v23  ;;  %1134 = vmatprep.mubr.bf16.mxu0 %v2277_v24 }
  0x55   :  { %1231 = vmatprep.mubr.bf16.mxu1 %v2279_v25 }
  0x5b   :  { %1135 = vmatmul.mubr.bf16.gmra.mxu0 %v2281_v30 }
  0x5c   :  { %1232 = vmatmul.mubr.bf16.gmra.mxu1 %v2282_v31  ;;  %1272 = vmatprep.mubr.bf16.mxu0 %v2289_v33 }
  0x5d   :  { %1369 = vmatprep.mubr.bf16.mxu1 %v2292_v34 }
  0x63   :  { %1273 = vmatmul.mubr.bf16.vlgmr.msra.gmra.mxu0 %v2287_v35 }
  0x64   :  { %1370 = vmatmul.mubr.bf16.vlgmr.msra.gmra.mxu1 %v2290_v36  ;;  %2128 = vmatpush3.bf16.msra.mxu0 %v2293_v32 }
  0x65   :  { %2167 = vmatpush3.bf16.msra.mxu1 %v2293_v32  ;;  %1280 = vmatprep.mubr.bf16.mxu0 %v2294_v37 }
  0x66   :  { %1377 = vmatprep.mubr.bf16.mxu1 %v2296_v38  ;;  %2129 = vmatprep.subr.bf16.mxu0 %v2300_v39 }
  0x67   :  { %2160 = vmatprep.subr.bf16.mxu1 %v2300_v39 }
  0x68   :  { %2130 = vmatpush3.bf16.msra.mxu0 %v2300_v39 }
  0x69   :  { %2168 = vmatpush3.bf16.msra.mxu1 %v2300_v39  ;;  %2131 = vmatprep.subr.bf16.mxu0 %v2307_v40 }
  0x6a   :  { %2161 = vmatprep.subr.bf16.mxu1 %v2307_v40 }
  0x6b   :  { %1281 = vmatmul.mubr.bf16.gmra.mxu0 %v2298_v41 }
  0x6c   :  { %1378 = vmatmul.mubr.bf16.gmra.mxu1 %v2299_v42  ;;  %1288 = vmatprep.mubr.bf16.mxu0 %v2301_v43 }
  0x6d   :  { %1385 = vmatprep.mubr.bf16.mxu1 %v2303_v44  ;;  %2132 = vmatpush3.bf16.msra.mxu0 %v2307_v40 }
  0x6e   :  { %2169 = vmatpush3.bf16.msra.mxu1 %v2307_v40  ;;  %2133 = vmatprep.subr.bf16.mxu0 %v2314_v45 }
  0x6f   :  { %2162 = vmatprep.subr.bf16.mxu1 %v2314_v45 }
  0x71   :  { %2134 = vmatpush3.bf16.msra.mxu0 %v2314_v45 }
  0x72   :  { %2170 = vmatpush3.bf16.msra.mxu1 %v2314_v45  ;;  %2135 = vmatprep.subr.bf16.mxu0 %v2321_v46 }
  0x73   :  { %1289 = vmatmul.mubr.bf16.gmra.mxu0 %v2305_v47  ;;  %2163 = vmatprep.subr.bf16.mxu1 %v2321_v46 }
  0x74   :  { %1386 = vmatmul.mubr.bf16.gmra.mxu1 %v2306_v48  ;;  %1296 = vmatprep.mubr.bf16.mxu0 %v2308_v49 }
  0x75   :  { %1393 = vmatprep.mubr.bf16.mxu1 %v2310_v50  ;;  %2136 = vmatpush3.bf16.msra.mxu0 %v2321_v46 }
  0x76   :  { %2171 = vmatpush3.bf16.msra.mxu1 %v2321_v46  ;;  %2137 = vmatprep.subr.bf16.mxu0 %v2328_v51 }
  0x77   :  { %2164 = vmatprep.subr.bf16.mxu1 %v2328_v51 }
  0x79   :  { %2138 = vmatpush3.bf16.msra.mxu0 %v2328_v51 }
  0x7a   :  { %2172 = vmatpush3.bf16.msra.mxu1 %v2328_v51  ;;  %2139 = vmatprep.subr.bf16.mxu0 %v2335_v53 }
  0x7b   :  { %1297 = vmatmul.mubr.bf16.gmra.mxu0 %v2312_v52  ;;  %2165 = vmatprep.subr.bf16.mxu1 %v2335_v53 }
  0x7c   :  { %1394 = vmatmul.mubr.bf16.gmra.mxu1 %v2313_v54  ;;  %1304 = vmatprep.mubr.bf16.mxu0 %v2315_v55 }
  0x7d   :  { %1401 = vmatprep.mubr.bf16.mxu1 %v2317_v56  ;;  %2140 = vmatpush3.bf16.msra.mxu0 %v2335_v53 }
  0x7e   :  { %2173 = vmatpush3.bf16.msra.mxu1 %v2335_v53  ;;  %2141 = vmatprep.subr.bf16.mxu0 %v2342_v57 }
  0x7f   :  { %2166 = vmatprep.subr.bf16.mxu1 %v2342_v57 }
  0x81   :  { %2142 = vmatpush3.bf16.msra.mxu0 %v2342_v57 }
  0x82   :  { %2174 = vmatpush3.bf16.msra.mxu1 %v2342_v57 }
  0x83   :  { %1305 = vmatmul.mubr.bf16.gmra.mxu0 %v2319_v58 }
  0x84   :  { %1402 = vmatmul.mubr.bf16.gmra.mxu1 %v2320_v59  ;;  %1312 = vmatprep.mubr.bf16.mxu0 %v2322_v60 }
  0x85   :  { %1409 = vmatprep.mubr.bf16.mxu1 %v2324_v61 }
  0x8b   :  { %1313 = vmatmul.mubr.bf16.gmra.mxu0 %v2326_v62 }
  0x8c   :  { %1410 = vmatmul.mubr.bf16.gmra.mxu1 %v2327_v63  ;;  %1320 = vmatprep.mubr.bf16.mxu0 %v2329_v0 }
  0x8d   :  { %1417 = vmatprep.mubr.bf16.mxu1 %v2331_v1 }
  0x93   :  { %1321 = vmatmul.mubr.bf16.gmra.mxu0 %v2333_v2 }
  0x94   :  { %1418 = vmatmul.mubr.bf16.gmra.mxu1 %v2334_v3  ;;  %1328 = vmatprep.mubr.bf16.mxu0 %v2336_v4 }
  0x95   :  { %1425 = vmatprep.mubr.bf16.mxu1 %v2338_v5 }
  0x9b   :  { %1329 = vmatmul.mubr.bf16.gmra.mxu0 %v2340_v6 }
  0x9c   :  { %1426 = vmatmul.mubr.bf16.gmra.mxu1 %v2341_v7  ;;  %2143 = vmatprep.mubr.bf16.mxu0 %v2343_v8 }
  0x9d   :  { %2151 = vmatprep.mubr.bf16.mxu1 %v2344_v9 }
  0xa3   :  { %2144 = vmatmul.mubr.bf16.vlgmr.msra.gmra.mxu0 %v2345_v10 }
  0xa4   :  { %2152 = vmatmul.mubr.bf16.vlgmr.msra.gmra.mxu1 %v2346_v11  ;;  %2147 = vmatprep.mubr.bf16.mxu0 %v2347_v12 }
  0xa5   :  { %2155 = vmatprep.mubr.bf16.mxu1 %v2348_v13 }
  0xab   :  { %2148 = vmatmul.mubr.bf16.gmra.mxu0 %v2349_v14 }
  0xac   :  { %2156 = vmatmul.mubr.bf16.gmra.mxu1 %v2350_v15 }
  0xe3   :  { %v1871_v16 = vpop.f32.mrf.mxu0 }
  0xe4   :  { %v1935_v17 = vpop.f32.mrf.mxu1 }
  0xe5   :  { %v1872_v19 = vpop.f32.mrf.mxu0 }
  0xe6   :  { %v1873_v20 = vadd.f32 %v1872_v19, %v1871_v16  ;;  %v1936_v21 = vpop.f32.mrf.mxu1 }
  0xe7   :  { %v1937_v22 = vadd.f32 %v1936_v21, %v1935_v17  ;;  %v1874_v23 = vpop.f32.mrf.mxu0 }
  0xe8   :  { %v1081_v24 = vadd.f32 %v1873_v20, %v2806_v18  ;;  %v1938_v25 = vpop.f32.mrf.mxu1 }
  0xe9   :  { %v1875_v26 = vpop.f32.mrf.mxu0 }
  0xea   :  { %v2809_v27 = vadd.f32 %v1937_v22, %v1081_v24  ;;  %v1876_v28 = vadd.f32 %v1875_v26, %v1874_v23  ;;  %v1939_v29 = vpop.f32.mrf.mxu1 }
  0xeb   :  { %v1940_v30 = vadd.f32 %v1939_v29, %v1938_v25  ;;  %v1877_v31 = vpop.f32.mrf.mxu0 }
  0xec   :  { %v1084_v32 = vadd.f32 %v1876_v28, %v2806_v18  ;;  %v1941_v33 = vpop.f32.mrf.mxu1 }
  0xed   :  { %v1878_v34 = vpop.f32.mrf.mxu0 }
  0xee   :  { %v2812_v35 = vadd.f32 %v1940_v30, %v1084_v32  ;;  %v1879_v36 = vadd.f32 %v1878_v34, %v1877_v31  ;;  %v1942_v37 = vpop.f32.mrf.mxu1 }
  0xef   :  { %v1943_v38 = vadd.f32 %v1942_v37, %v1941_v33  ;;  %v1880_v39 = vpop.f32.mrf.mxu0 }
  0xf0   :  { %v1089_v40 = vadd.f32 %v1879_v36, %v2806_v18  ;;  %v1944_v41 = vpop.f32.mrf.mxu1 }
  0xf1   :  { %v1881_v42 = vpop.f32.mrf.mxu0 }
  0xf2   :  { %v2815_v43 = vadd.f32 %v1943_v38, %v1089_v40  ;;  %v1882_v44 = vadd.f32 %v1881_v42, %v1880_v39  ;;  %v1945_v45 = vpop.f32.mrf.mxu1 }
  0xf3   :  { %v1946_v46 = vadd.f32 %v1945_v45, %v1944_v41  ;;  %v1883_v47 = vpop.f32.mrf.mxu0 }
  0xf4   :  { %v1092_v48 = vadd.f32 %v1882_v44, %v2806_v18  ;;  %v1947_v49 = vpop.f32.mrf.mxu1 }
  0xf5   :  { %v1884_v50 = vpop.f32.mrf.mxu0 }
  0xf6   :  { %v2818_v51 = vadd.f32 %v1946_v46, %v1092_v48  ;;  %v1885_v52 = vadd.f32 %v1884_v50, %v1883_v47  ;;  %v1948_v53 = vpop.f32.mrf.mxu1 }
  0xf7   :  { %v1949_v54 = vadd.f32 %v1948_v53, %v1947_v49  ;;  %v1886_v55 = vpop.f32.mrf.mxu0 }
  0xf8   :  { %v1097_v56 = vadd.f32 %v1885_v52, %v2806_v18  ;;  %v1950_v57 = vpop.f32.mrf.mxu1 }
  0xf9   :  { %v1887_v58 = vpop.f32.mrf.mxu0 }
  0xfa   :  { %v2821_v59 = vadd.f32 %v1949_v54, %v1097_v56  ;;  %v1888_v60 = vadd.f32 %v1887_v58, %v1886_v55  ;;  %v1951_v61 = vpop.f32.mrf.mxu1 }
  0xfb   :  { %v1952_v62 = vadd.f32 %v1951_v61, %v1950_v57  ;;  %v1889_v63 = vpop.f32.mrf.mxu0 }
  0xfc   :  { %v1100_v0 = vadd.f32 %v1888_v60, %v2806_v18  ;;  %v1953_v1 = vpop.f32.mrf.mxu1 }
  0xfd   :  { %v1890_v2 = vpop.f32.mrf.mxu0 }
  0xfe   :  { %v2824_v3 = vadd.f32 %v1952_v62, %v1100_v0  ;;  %v1891_v4 = vadd.f32 %v1890_v2, %v1889_v63  ;;  %v1954_v5 = vpop.f32.mrf.mxu1 }
  0xff   :  { %v1955_v6 = vadd.f32 %v1954_v5, %v1953_v1  ;;  %v1892_v7 = vpop.f32.mrf.mxu0 }
 0x100   :  { %2954 = vst [vmem:[#allocation2_spill] sm:$0xff] %v2824_v3  ;;  %v1105_v8 = vadd.f32 %v1891_v4, %v2806_v18  ;;  %v1956_v9 = vpop.f32.mrf.mxu1 }
 0x101   :  { %v1893_v10 = vpop.f32.mrf.mxu0 }
 0x102   :  { %v2827_v11 = vadd.f32 %v1955_v6, %v1105_v8  ;;  %v1894_v12 = vadd.f32 %v1893_v10, %v1892_v7  ;;  %v1957_v13 = vpop.f32.mrf.mxu1 }
 0x103   :  { %v1958_v14 = vadd.f32 %v1957_v13, %v1956_v9  ;;  %v1895_v15 = vpop.f32.mrf.mxu0 }
 0x104   :  { %v1108_v16 = vadd.f32 %v1894_v12, %v2806_v18  ;;  %v1959_v17 = vpop.f32.mrf.mxu1 }
 0x105   :  { %v1896_v19 = vpop.f32.mrf.mxu0 }
 0x106   :  { %v2830_v20 = vadd.f32 %v1958_v14, %v1108_v16  ;;  %v1897_v21 = vadd.f32 %v1896_v19, %v1895_v15  ;;  %v1960_v22 = vpop.f32.mrf.mxu1 }
 0x107   :  { %v1961_v23 = vadd.f32 %v1960_v22, %v1959_v17  ;;  %v1898_v24 = vpop.f32.mrf.mxu0 }
 0x108   :  { %2955 = vst [vmem:[#allocation3_spill] sm:$0xff] %v2830_v20  ;;  %v1113_v25 = vadd.f32 %v1897_v21, %v2806_v18  ;;  %v1962_v26 = vpop.f32.mrf.mxu1 }
 0x109   :  { %v1899_v28 = vpop.f32.mrf.mxu0 }
 0x10a   :  { %v2833_v29 = vadd.f32 %v1961_v23, %v1113_v25  ;;  %v1900_v30 = vadd.f32 %v1899_v28, %v1898_v24  ;;  %v1963_v31 = vpop.f32.mrf.mxu1 }
 0x10b   :  { %v1964_v32 = vadd.f32 %v1963_v31, %v1962_v26  ;;  %v1901_v33 = vpop.f32.mrf.mxu0 }
 0x10c   :  { %v1116_v34 = vadd.f32 %v1900_v30, %v2806_v18  ;;  %v1965_v36 = vpop.f32.mrf.mxu1 }
 0x10d   :  { %v1902_v37 = vpop.f32.mrf.mxu0 }
 0x10e   :  { %v2836_v38 = vadd.f32 %v1964_v32, %v1116_v34  ;;  %v1903_v39 = vadd.f32 %v1902_v37, %v1901_v33  ;;  %v1966_v40 = vpop.f32.mrf.mxu1 }
 0x10f   :  { %v1967_v41 = vadd.f32 %v1966_v40, %v1965_v36  ;;  %v1904_v42 = vpop.f32.mrf.mxu0 }
 0x110   :  { %2956 = vst [vmem:[#allocation4_spill] sm:$0xff] %v2836_v38  ;;  %v1121_v44 = vadd.f32 %v1903_v39, %v2806_v18  ;;  %v1968_v45 = vpop.f32.mrf.mxu1 }
 0x111   :  { %v1905_v46 = vpop.f32.mrf.mxu0 }
 0x112   :  { %v2839_v47 = vadd.f32 %v1967_v41, %v1121_v44  ;;  %v1906_v48 = vadd.f32 %v1905_v46, %v1904_v42  ;;  %v1969_v49 = vpop.f32.mrf.mxu1 }
 0x113   :  { %v1970_v50 = vadd.f32 %v1969_v49, %v1968_v45  ;;  %v1907_v52 = vpop.f32.mrf.mxu0 }
 0x114   :  { %v1124_v53 = vadd.f32 %v1906_v48, %v2806_v18  ;;  %v1971_v54 = vpop.f32.mrf.mxu1 }
 0x115   :  { %v1908_v55 = vpop.f32.mrf.mxu0 }
 0x116   :  { %v2842_v56 = vadd.f32 %v1970_v50, %v1124_v53  ;;  %v1909_v57 = vadd.f32 %v1908_v55, %v1907_v52  ;;  %v1972_v58 = vpop.f32.mrf.mxu1 }
 0x117   :  { %v1973_v60 = vadd.f32 %v1972_v58, %v1971_v54  ;;  %v1910_v61 = vpop.f32.mrf.mxu0 }
 0x118   :  { %2957 = vst [vmem:[#allocation5_spill] sm:$0xff] %v2842_v56  ;;  %v1129_v62 = vadd.f32 %v1909_v57, %v2806_v18  ;;  %v1974_v63 = vpop.f32.mrf.mxu1 }
 0x119   :  { %v1911_v0 = vpop.f32.mrf.mxu0 }
 0x11a   :  { %v2845_v1 = vadd.f32 %v1973_v60, %v1129_v62  ;;  %v1912_v2 = vadd.f32 %v1911_v0, %v1910_v61  ;;  %v1975_v4 = vpop.f32.mrf.mxu1 }
 0x11b   :  { %v1976_v5 = vadd.f32 %v1975_v4, %v1974_v63  ;;  %v1913_v6 = vpop.f32.mrf.mxu0 }
 0x11c   :  { %2958 = vst [vmem:[#allocation6_spill] sm:$0xff] %v2845_v1  ;;  %v1132_v7 = vadd.f32 %v1912_v2, %v2806_v18  ;;  %v1977_v8 = vpop.f32.mrf.mxu1 }
 0x11d   :  { %v1914_v9 = vpop.f32.mrf.mxu0 }
 0x11e   :  { %v2848_v10 = vadd.f32 %v1976_v5, %v1132_v7  ;;  %v1915_v12 = vadd.f32 %v1914_v9, %v1913_v6  ;;  %v1978_v13 = vpop.f32.mrf.mxu1 }
 0x11f   :  { %v1979_v14 = vadd.f32 %v1978_v13, %v1977_v8  ;;  %v1916_v15 = vpop.f32.mrf.mxu0 }
 0x120   :  { %2959 = vst [vmem:[#allocation7_spill] sm:$0xff] %v2848_v10  ;;  %v1137_v16 = vadd.f32 %v1915_v12, %v2806_v18  ;;  %v1980_v17 = vpop.f32.mrf.mxu1 }
 0x121   :  { %v1917_v19 = vpop.f32.mrf.mxu0 }
 0x122   :  { %v2851_v21 = vadd.f32 %v1979_v14, %v1137_v16  ;;  %v1918_v22 = vadd.f32 %v1917_v19, %v1916_v15  ;;  %v1981_v23 = vpop.f32.mrf.mxu1 }
 0x123   :  { %v1982_v24 = vadd.f32 %v1981_v23, %v1980_v17  ;;  %v1999_v25 = vpop.f32.mrf.mxu0 }
 0x124   :  { %2960 = vst [vmem:[#allocation8_spill] sm:$0xff] %v2851_v21  ;;  %v1140_v26 = vadd.f32 %v1918_v22, %v2806_v18  ;;  %v2063_v28 = vpop.f32.mrf.mxu1 }
 0x125   :  { %v2000_v30 = vpop.f32.mrf.mxu0 }
 0x126   :  { %v2854_v31 = vadd.f32 %v1982_v24, %v1140_v26  ;;  %v2001_v32 = vadd.f32 %v2000_v30, %v1999_v25  ;;  %v2064_v33 = vpop.f32.mrf.mxu1 }
 0x127   :  { %v2002_v34 = vpop.f32.mrf.mxu0  ;;  %v2065_v37 = vadd.f32 %v2064_v33, %v2063_v28 }
 0x128   :  { %2961 = vst [vmem:[#allocation9_spill] sm:$0xff] %v2854_v31  ;;  %v1275_v36 = vadd.f32 %v2001_v32, %v2809_v27  ;;  %v2857_v39 = vpop.f32.mrf.mxu1 }
 0x129   :  { %v2003_v40 = vpop.f32.mrf.mxu0 }
 0x12a   :  { %v2859_v41 = vpop.f32.mrf.mxu1  ;;  %v2861_v42 = vadd.f32 %v2065_v37, %v1275_v36  ;;  %v2004_v10 = vadd.f32 %v2003_v40, %v2002_v34 }
 0x12b   :  { %v2005_v44 = vpop.f32.mrf.mxu0 }
 0x12c   :  { %2962 = vst [vmem:[#allocation10_spill] sm:$0xff] %v2861_v42  ;;  %v2069_v45 = vpop.f32.mrf.mxu1  ;;  %v1278_v56 = vadd.f32 %v2004_v10, %v2812_v35 }
 0x12d   :  { %v2006_v18 = vpop.f32.mrf.mxu0 }
 0x12e   :  { %v2070_v46 = vpop.f32.mrf.mxu1  ;;  %v2007_v42 = vadd.f32 %v2006_v18, %v2005_v44  ;;  %v2068_v44 = vadd.f32 %v2859_v41, %v2857_v39 }
 0x12f   :  { %v2008_v48 = vpop.f32.mrf.mxu0  ;;  %v2071_v18 = vadd.f32 %v2070_v46, %v2069_v45 }
 0x130   :  { %v2072_v49 = vpop.f32.mrf.mxu1 }
 0x131   :  { %v2009_v50 = vpop.f32.mrf.mxu0 }
 0x132   :  { %v2073_v52 = vpop.f32.mrf.mxu1  ;;  %v2010_v21 = vadd.f32 %v2009_v50, %v2008_v48 }
 0x133   :  { %v2011_v53 = vpop.f32.mrf.mxu0  ;;  %v2074_v48 = vadd.f32 %v2073_v52, %v2072_v49 }
 0x134   :  { %v2075_v54 = vpop.f32.mrf.mxu1 }
 0x135   :  { %v2012_v55 = vpop.f32.mrf.mxu0 }
 0x136   :  { %v2076_v27 = vpop.f32.mrf.mxu1 }
 0x137   :  { %v2014_v57 = vpop.f32.mrf.mxu0 }
 0x138   :  { %v2863_v58 = vpop.f32.mrf.mxu1 }
 0x139   :  { %v2015_v60 = vpop.f32.mrf.mxu0 }
 0x13a   :  { %v2865_v61 = vpop.f32.mrf.mxu1  ;;  %v2016_v35 = vadd.f32 %v2015_v60, %v2014_v57 }
 0x13b   :  { %v2017_v62 = vpop.f32.mrf.mxu0  ;;  %v2899_v41 = vadd.f32 %v2865_v61, %v2863_v58 }
 0x13c   :  { %v2867_v63 = vpop.f32.mrf.mxu1 }
 0x13d   :  { %v2018_v0 = vpop.f32.mrf.mxu0 }
 0x13e   :  { %v2082_v2 = vpop.f32.mrf.mxu1  ;;  %v2019_v38 = vadd.f32 %v2018_v0, %v2017_v62 }
 0x13f   :  { %v2020_v4 = vpop.f32.mrf.mxu0  ;;  %v2083_v45 = vadd.f32 %v2082_v2, %v2867_v63 }
 0x140   :  { %v2869_v5 = vpop.f32.mrf.mxu1 }
 0x141   :  { %2963 = vst [vmem:[#allocation11_spill] sm:$0xff] %v2869_v5  ;;  %v2021_v6 = vpop.f32.mrf.mxu0 }
 0x142   :  { %v2871_v7 = vpop.f32.mrf.mxu1  ;;  %v2022_v46 = vadd.f32 %v2021_v6, %v2020_v4 }
 0x143   :  { %2964 = vst [vmem:[#allocation12_spill] sm:$0xff] %v2871_v7  ;;  %v2023_v8 = vpop.f32.mrf.mxu0  ;;  %v2013_v7 = vadd.f32 %v2012_v55, %v2011_v53  ;;  %v2077_v55 = vadd.f32 %v2076_v27, %v2075_v54  ;;  %v2971_v27 = vld [vmem:[#allocation5_spill] sm:$0xff] }
 0x144   :  { %v2873_v9 = vpop.f32.mrf.mxu1 }
 0x145   :  { %2965 = vst [vmem:[#allocation13_spill] sm:$0xff] %v2873_v9  ;;  %v2024_v12 = vpop.f32.mrf.mxu0  ;;  %v1291_v34 = vadd.f32 %v2013_v7, %v2821_v59 }
 0x146   :  { %v2088_v13 = vpop.f32.mrf.mxu1  ;;  %v2025_v50 = vadd.f32 %v2024_v12, %v2023_v8 }
 0x147   :  { %v2026_v14 = vpop.f32.mrf.mxu0  ;;  %v2895_v39 = vadd.f32 %v2077_v55, %v1291_v34  ;;  %v2981_v55 = vld [vmem:[#allocation7_spill] sm:$0xff] }
 0x148   :  { %v2090_v15 = vpop.f32.mrf.mxu1  ;;  %v1307_v49 = vadd.f32 %v2025_v50, %v2833_v29 }
 0x149   :  { %v2027_v16 = vpop.f32.mrf.mxu0 }
 0x14a   :  { %v2091_v17 = vpop.f32.mrf.mxu1  ;;  %v2028_v10 = vadd.f32 %v2027_v16, %v2026_v14 }
 0x14b   :  { %v2029_v19 = vpop.f32.mrf.mxu0  ;;  %v2092_v14 = vadd.f32 %v2091_v17, %v2090_v15 }
 0x14c   :  { %v2093_v22 = vpop.f32.mrf.mxu1  ;;  %v2972_v8 = vld [vmem:[#allocation13_spill] sm:$0xff] }
 0x14d   :  { %v2030_v23 = vpop.f32.mrf.mxu0  ;;  %v2089_v12 = vadd.f32 %v2088_v13, %v2972_v8 }
 0x14e   :  { %v2094_v24 = vpop.f32.mrf.mxu1  ;;  %v2031_v40 = vadd.f32 %v2030_v23, %v2029_v19  ;;  %v2973_v23 = vld [vmem:[#allocation3_spill] sm:$0xff] }
 0x14f   :  { %v2032_v25 = vpop.f32.mrf.mxu0  ;;  %v2095_v54 = vadd.f32 %v2094_v24, %v2093_v22  ;;  %v1404_v24 = vadd.f32 %v2089_v12, %v1307_v49 }
 0x150   :  { %v2096_v26 = vpop.f32.mrf.mxu1  ;;  %v1315_v59 = vadd.f32 %v2031_v40, %v2839_v47 }
 0x151   :  { %v2033_v28 = vpop.f32.mrf.mxu0 }
 0x152   :  { %v2097_v30 = vpop.f32.mrf.mxu1  ;;  %v2034_v62 = vadd.f32 %v2033_v28, %v2032_v25  ;;  %v1412_v29 = vadd.f32 %v2095_v54, %v1315_v59  ;;  %v1302_v25 = vadd.f32 %v2022_v46, %v2973_v23  ;;  %v2974_v28 = vld [vmem:[#allocation11_spill] sm:$0xff]  ;;  %v2982_v46 = vld [vmem:[#allocation9_spill] sm:$0xff] }
 0x153   :  { %v2035_v32 = vpop.f32.mrf.mxu0  ;;  %v2098_v63 = vadd.f32 %v2097_v30, %v2096_v26  ;;  %v2978_v30 = vld [vmem:[#allocation8_spill] sm:$0xff] }
 0x154   :  { %v2875_v33 = vpop.f32.mrf.mxu1  ;;  %v1318_v57 = vadd.f32 %v2034_v62, %v2971_v27 }
 0x155   :  { %2966 = vst [vmem:[#allocation14_spill] sm:$0xff] %v2875_v33  ;;  %v2036_v36 = vpop.f32.mrf.mxu0  ;;  %v1283_v33 = vadd.f32 %v2007_v42, %v2815_v43  ;;  %v1299_v43 = vadd.f32 %v2019_v38, %v2827_v11  ;;  %v2969_v38 = vld [vmem:[#allocation2_spill] sm:$0xff] }
 0x156   :  { %v2877_v37 = vpop.f32.mrf.mxu1  ;;  %v2904_v52 = vadd.f32 %v2016_v35, %v2969_v38  ;;  %v2037_v2 = vadd.f32 %v2036_v36, %v2035_v32  ;;  %v1415_v15 = vadd.f32 %v2098_v63, %v1318_v57 }
 0x157   :  { %2967 = vst [vmem:[#allocation15_spill] sm:$0xff] %v2877_v37  ;;  %v2038_v31 = vpop.f32.mrf.mxu0  ;;  %v1286_v37 = vadd.f32 %v2010_v21, %v2818_v51  ;;  %v1375_v51 = vadd.f32 %v2068_v44, %v1278_v56  ;;  %v1380_v7 = vadd.f32 %v2071_v18, %v1283_v33  ;;  %v2970_v56 = vld [vmem:[#allocation4_spill] sm:$0xff]  ;;  %v1396_v16 = vadd.f32 %v2083_v45, %v1299_v43 }
 0x158   :  { %v2879_v1 = vpop.f32.mrf.mxu1  ;;  %v1310_v47 = vadd.f32 %v2028_v10, %v2970_v56  ;;  %v2975_v33 = vld [vmem:[#allocation12_spill] sm:$0xff] }
 0x159   :  { %2968 = vst [vmem:[#allocation16_spill] sm:$0xff] %v2879_v1  ;;  %v2039_v5 = vpop.f32.mrf.mxu0  ;;  %v1383_v19 = vadd.f32 %v2074_v48, %v1286_v37  ;;  %v2086_v37 = vadd.f32 %v2975_v33, %v2974_v28  ;;  %v2980_v48 = vld [vmem:[#allocation6_spill] sm:$0xff] }
 0x15a   :  { %v2881_v20 = vpop.f32.mrf.mxu1  ;;  %v2040_v4 = vadd.f32 %v2039_v5, %v2038_v31  ;;  %v2979_v5 = vld [vmem:[#allocation10_spill] sm:$0xff]  ;;  %v1323_v50 = vadd.f32 %v2037_v2, %v2980_v48 }
 0x15b   :  { %v2041_v9 = vpop.f32.mrf.mxu0 }
 0x15c   :  { %v2884_v3 = vpop.f32.mrf.mxu1  ;;  %v1326_v35 = vadd.f32 %v2040_v4, %v2981_v55  ;;  %v1399_v4 = vadd.f32 %v2086_v37, %v1302_v25  ;;  %v1391_v25 = vadd.f32 %v2899_v41, %v2904_v52 }
 0x15d   :  { %v2042_v1 = vpop.f32.mrf.mxu0 }
 0x15e   :  { %v2106_v53 = vpop.f32.mrf.mxu1  ;;  %v2043_v58 = vadd.f32 %v2042_v1, %v2041_v9  ;;  %v1407_v1 = vadd.f32 %v2092_v14, %v1310_v47  ;;  %v2976_v9 = vld [vmem:[#allocation14_spill] sm:$0xff]  ;;  %v2977_v17 = vld [vmem:[#allocation15_spill] sm:$0xff] }
 0x15f   :  { %v2044_v0 = vpop.f32.mrf.mxu0  ;;  %v2101_v26 = vadd.f32 %v2977_v17, %v2976_v9  ;;  %v2107_v43 = vadd.f32 %v2106_v53, %v2884_v3 }
 0x160   :  { %v2892_v42 = vpop.f32.mrf.mxu1  ;;  %v1331_v31 = vadd.f32 %v2043_v58, %v2978_v30 }
 0x161   :  { %v2045_v21 = vpop.f32.mrf.mxu0  ;;  %v1420_v63 = vadd.f32 %v2101_v26, %v1323_v50 }
 0x162   :  { %v2109_v11 = vpop.f32.mrf.mxu1  ;;  %v2046_v40 = vadd.f32 %v2045_v21, %v2044_v0 }
 0x163   :  { %v2145_v60 = vpop.f32.mrf.mxu0  ;;  %v2110_v12 = vadd.f32 %v2109_v11, %v2892_v42 }
 0x164   :  { %v2153_v61 = vpop.f32.mrf.mxu1  ;;  %v1477_v22 = vadd.f32 %v2145_v60, %v1380_v7  ;;  %v1334_v49 = vadd.f32 %v2046_v40, %v2982_v46  ;;  %v1428_v60 = vadd.f32 %v2107_v43, %v1331_v31 }
 0x165   :  { %v1468_v6 = vpop.f32.mrf.mxu0  ;;  %v1509_v44 = vadd.f32 %v2153_v61, %v1412_v29  ;;  %v2983_v29 = vld [vmem:[#allocation16_spill] sm:$0xff] }
 0x166   :  { %v1500_v34 = vpop.f32.mrf.mxu1  ;;  %v1469_v32 = vadd.f32 %v1468_v6, %v2979_v5  ;;  %v1533_v59 = vmax.f32 %v1477_v22, 0.0  ;;  %v2104_v6 = vadd.f32 %v2881_v20, %v2983_v29  ;;  %v1431_v28 = vadd.f32 %v2110_v12, %v1334_v49 }
 0x167   :  { %v2146_v13 = vpop.f32.mrf.mxu0  ;;  %v1501_v10 = vadd.f32 %v1500_v34, %v1404_v24  ;;  %v1541_v38 = vmax.f32 %v1509_v44, 0.0 }
 0x168   :  { %v1480_v36 = vadd.f32 %v2146_v13, %v1383_v19  ;;  %v2154_v18 = vpop.f32.mrf.mxu1  ;;  %v1531_v54 = vmax.f32 %v1469_v32, 0.0  ;;  %v1423_v34 = vadd.f32 %v2104_v6, %v1326_v35 }
 0x169   :  { %v1512_v62 = vadd.f32 %v2154_v18, %v1415_v15  ;;  %v1471_v0 = vpop.f32.mrf.mxu0  ;;  %v1539_v14 = vmax.f32 %v1501_v10, 0.0 }
 0x16a   :  { %v1534_v21 = vmax.f32 %v1480_v36, 0.0  ;;  %v1472_v7 = vadd.f32 %v1471_v0, %v1375_v51  ;;  %v1503_v45 = vpop.f32.mrf.mxu1 }
 0x16b   :  { %v1542_v56 = vmax.f32 %v1512_v62, 0.0  ;;  %v1504_v47 = vadd.f32 %v1503_v45, %v1407_v1  ;;  %v2149_v19 = vpop.f32.mrf.mxu0 }
 0x16c   :  { %v1816_v27 = vpack.c.bf16 %v1534_v21, %v1533_v59  ;;  %v1532_v57 = vmax.f32 %v1472_v7, 0.0  ;;  %v2157_v8 = vpop.f32.mrf.mxu1  ;;  %v1493_v61 = vadd.f32 %v2149_v19, %v1396_v16 }
 0x16d   :  { %v1836_v58 = vpack.c.bf16 %v1542_v56, %v1541_v38  ;;  %v1540_v3 = vmax.f32 %v1504_v47, 0.0  ;;  %v1484_v53 = vpop.f32.mrf.mxu0  ;;  %v1525_v11 = vadd.f32 %v2157_v8, %v1428_v60 }
 0x16e   :  { %1848 = vst [vmem:[%s2953_s3 + $0x8] sm:$0xff] %v1816_v27   ;;  %v1811_v51 = vpack.c.bf16 %v1532_v57, %v1531_v54  ;;  %v1516_v2 = vpop.f32.mrf.mxu1  ;;  %v1485_v16 = vadd.f32 %v1484_v53, %v2895_v39  ;;  %v1537_v40 = vmax.f32 %v1493_v61, 0.0 }
 0x16f   :  { %1852 = vst [vmem:[%s2953_s3 + $0x28] sm:$0xff] %v1836_v58   ;;  %v1831_v42 = vpack.c.bf16 %v1540_v3, %v1539_v14  ;;  %v2150_v23 = vpop.f32.mrf.mxu0  ;;  %v1517_v20 = vadd.f32 %v1516_v2, %v1420_v63  ;;  %v1545_v1 = vmax.f32 %v1525_v11, 0.0 }
 0x170   :  { %1812 = vst [vmem:[%s2953_s3] sm:$0xff] %v1811_v51   ;;  %v1496_v33 = vadd.f32 %v2150_v23, %v1399_v4  ;;  %v2158_v22 = vpop.f32.mrf.mxu1  ;;  %v1535_v17 = vmax.f32 %v1485_v16, 0.0 }
 0x171   :  { %1851 = vst [vmem:[%s2953_s3 + $0x20] sm:$0xff] %v1831_v42   ;;  %v1528_v37 = vadd.f32 %v2158_v22, %v1431_v28  ;;  %v1487_v24 = vpop.f32.mrf.mxu0  ;;  %v1543_v31 = vmax.f32 %v1517_v20, 0.0 }
 0x172   :  { %v1538_v44 = vmax.f32 %v1496_v33, 0.0  ;;  %v1488_v13 = vadd.f32 %v1487_v24, %v1391_v25  ;;  %v1519_v15 = vpop.f32.mrf.mxu1 }
 0x173   :  { %v1546_v9 = vmax.f32 %v1528_v37, 0.0  ;;  %v1520_v39 = vadd.f32 %v1519_v15, %v1423_v34 }
 0x174   :  { %v1826_v26 = vpack.c.bf16 %v1538_v44, %v1537_v40  ;;  %v1536_v30 = vmax.f32 %v1488_v13, 0.0 }
 0x175   :  { %v1846_v41 = vpack.c.bf16 %v1546_v9, %v1545_v1  ;;  %v1544_v52 = vmax.f32 %v1520_v39, 0.0 }
 0x176   :  { %1850 = vst [vmem:[%s2953_s3 + $0x18] sm:$0xff] %v1826_v26   ;;  %v1821_v5 = vpack.c.bf16 %v1536_v30, %v1535_v17 }
 0x177   :  { %1854 = vst [vmem:[%s2953_s3 + $0x38] sm:$0xff] %v1846_v41   ;;  %v1841_v32 = vpack.c.bf16 %v1544_v52, %v1543_v31 }
 0x178   :  { %1849 = vst [vmem:[%s2953_s3 + $0x10] sm:$0xff] %v1821_v5  }
 0x179   :  { %1853 = vst [vmem:[%s2953_s3 + $0x30] sm:$0xff] %v1841_v32  }

// kernel: autoencoder_forward.13
= control target key start
LH: loop header
LB: loop body
LE: loop exit
PB: predicated region body
PF: predicated region fallthrough
CT: control target
= control target key end

     0   :  { %v5355_v0 = vmov 0   ;;  %vm4155_vm0 = vcmask 519168   ;;  %s7608_s1 = inlined_call_operand.vmem [shape: bf16[1152,64], index: 1, kind: input, shape index: {}]   ;;  %s7609_s0 = inlined_call_operand.vmem [shape: bf16[512,1152], index: 0, kind: input, shape index: {}]   ;;  %s7610_s2 = inlined_call_operand.vmem [shape: f32[1,64], index: 2, kind: input, shape index: {}]   ;;  %s7611_s3 = inlined_call_operand.vmem [shape: bf16[512,64], index: 3, kind: output, shape index: {}]  }
   0x1   :  { %2390 = vmatprep.subr.bf16.mxu0 %v5355_v0  ;;  %4833 = vmatprep.subr.bf16.mxu1 %v5355_v0  ;;  %v4866_v1 = vld [vmem:[%s7608_s1 + $0x38] sm:$0xff]   ;;  %v4867_v2 = vld [vmem:[%s7608_s1 + $0x30] sm:$0xff]   ;;  %v4868_v3 = vld [vmem:[%s7608_s1 + $0x28] sm:$0xff]  }
   0x2   :  { %2391 = vmatpush1.bf16.msra.mxu0 %v4866_v1  ;;  %4849 = vmatpush1.bf16.msra.mxu1 %v4866_v1  ;;  %v4869_v4 = vld [vmem:[%s7608_s1 + $0x20] sm:$0xff]   ;;  %v4870_v5 = vld [vmem:[%s7608_s1 + $0x18] sm:$0xff]   ;;  %v4871_v7 = vld [vmem:[%s7608_s1 + $0x10] sm:$0xff]  }
   0x3   :  { %2392 = vmatprep.subr.bf16.mxu0 %v5355_v0  ;;  %4834 = vmatprep.subr.bf16.mxu1 %v5355_v0  ;;  %v4884_v6 = vld [vmem:[%s7609_s0 + $0x4] ss:$36 sps:$4 sm:$0xff]   ;;  %v4874_v11 = vld [vmem:[%s7608_s1 + $0x78] sm:$0xff]   ;;  %v4875_v12 = vld [vmem:[%s7608_s1 + $0x70] sm:$0xff]  }
   0x4   :  { %v4887_v8 = vld [vmem:[%s7609_s0 + $0x6c4] ss:$36 sps:$4 sm:$0xff]   ;;  %2422 = vmatprep.mubr.bf16.mxu0 %v4884_v6  ;;  %v4878_v15 = vld [vmem:[%s7608_s1 + $0x58] sm:$0xff]   ;;  %v4879_v16 = vld [vmem:[%s7608_s1 + $0x50] sm:$0xff]  }
   0x5   :  { %2614 = vmatprep.mubr.bf16.mxu1 %v4887_v8  ;;  %v4872_v9 = vld [vmem:[%s7608_s1 + $0x8] sm:$0xff]   ;;  %v4873_v10 = vld [vmem:[%s7608_s1] sm:$0xff]   ;;  %v4888_v21 = vld [vmem:[%s7608_s1 + $0xb8] sm:$0xff]  }
   0x6   :  { %2393 = vmatpush1.bf16.msra.mxu0 %v4867_v2  ;;  %4850 = vmatpush1.bf16.msra.mxu1 %v4867_v2  ;;  %v4876_v13 = vld [vmem:[%s7608_s1 + $0x68] sm:$0xff]   ;;  %v4877_v14 = vld [vmem:[%s7608_s1 + $0x60] sm:$0xff]   ;;  %v4889_v22 = vld [vmem:[%s7608_s1 + $0x138] sm:$0xff]  }
   0x7   :  { %2394 = vmatprep.subr.bf16.mxu0 %v5355_v0  ;;  %4835 = vmatprep.subr.bf16.mxu1 %v5355_v0  ;;  %v4880_v17 = vld [vmem:[%s7608_s1 + $0x48] sm:$0xff]   ;;  %v4881_v18 = vld [vmem:[%s7608_s1 + $0x40] sm:$0xff]   ;;  %v4890_v25 = vld [vmem:[%s7608_s1 + $0xb0] sm:$0xff]  }
   0x8   :  { %v4882_v19 = vld [vmem:[%s7609_s0] ss:$36 sps:$4 sm:$0xff]   ;;  %v4891_v23 = vld [vmem:[%s7609_s0 + $0x4c] ss:$36 sps:$4 sm:$0xff]   ;;  %v4900_v30 = vld [vmem:[%s7609_s0 + $0x94] ss:$36 sps:$4 sm:$0xff]  }
   0x9   :  { %v4885_v20 = vld [vmem:[%s7609_s0 + $0x6c0] ss:$36 sps:$4 sm:$0xff]   ;;  %v4893_v24 = vld [vmem:[%s7609_s0 + $0x70c] ss:$36 sps:$4 sm:$0xff]   ;;  %v4902_v31 = vld [vmem:[%s7609_s0 + $0x754] ss:$36 sps:$4 sm:$0xff]  }
   0xa   :  { %2395 = vmatpush1.bf16.msra.mxu0 %v4868_v3  ;;  %4851 = vmatpush1.bf16.msra.mxu1 %v4868_v3  ;;  %v4899_v26 = vld [vmem:[%s7608_s1 + $0x130] sm:$0xff]   ;;  %v4895_v27 = vld [vmem:[%s7609_s0 + $0x48] ss:$36 sps:$4 sm:$0xff]   ;;  %v4898_v33 = vld [vmem:[%s7608_s1 + $0xa0] sm:$0xff]  }
   0xb   :  { %2396 = vmatprep.subr.bf16.mxu0 %v5355_v0  ;;  %4836 = vmatprep.subr.bf16.mxu1 %v5355_v0  ;;  %v4896_v28 = vld [vmem:[%s7609_s0 + $0x708] ss:$36 sps:$4 sm:$0xff]   ;;  %v4904_v34 = vld [vmem:[%s7609_s0 + $0x90] ss:$36 sps:$4 sm:$0xff]   ;;  %v4925_v36 = vld [vmem:[%s7608_s1 + $0x120] sm:$0xff]  }
   0xc   :  { %v4897_v29 = vld [vmem:[%s7608_s1 + $0xa8] sm:$0xff]   ;;  %v4905_v35 = vld [vmem:[%s7609_s0 + $0x750] ss:$36 sps:$4 sm:$0xff]   ;;  %v4906_v37 = vld [vmem:[%s7608_s1 + $0x98] sm:$0xff]  }
   0xd   :  { %v4915_v32 = vld [vmem:[%s7608_s1 + $0x128] sm:$0xff]   ;;  %v4908_v38 = vld [vmem:[%s7609_s0 + $0xdc] ss:$36 sps:$4 sm:$0xff]   ;;  %v4907_v41 = vld [vmem:[%s7608_s1 + $0x90] sm:$0xff]  }
   0xe   :  { %2397 = vmatpush1.bf16.msra.mxu0 %v4869_v4  ;;  %4852 = vmatpush1.bf16.msra.mxu1 %v4869_v4  ;;  %v4910_v39 = vld [vmem:[%s7609_s0 + $0x79c] ss:$36 sps:$4 sm:$0xff]   ;;  %v4914_v44 = vld [vmem:[%s7608_s1 + $0x88] sm:$0xff]   ;;  %v4951_v47 = vld [vmem:[%s7608_s1 + $0x110] sm:$0xff]  }
   0xf   :  { %2398 = vmatprep.subr.bf16.mxu0 %v5355_v0  ;;  %4837 = vmatprep.subr.bf16.mxu1 %v5355_v0  ;;  %v4941_v40 = vld [vmem:[%s7608_s1 + $0x118] sm:$0xff]   ;;  %v4917_v45 = vld [vmem:[%s7609_s0 + $0x124] ss:$36 sps:$4 sm:$0xff]   ;;  %v4926_v53 = vld [vmem:[%s7609_s0 + $0x16c] ss:$36 sps:$4 sm:$0xff]  }
  0x10   :  { %v4912_v42 = vld [vmem:[%s7609_s0 + $0xd8] ss:$36 sps:$4 sm:$0xff]   ;;  %v4919_v46 = vld [vmem:[%s7609_s0 + $0x7e4] ss:$36 sps:$4 sm:$0xff]   ;;  %v4928_v54 = vld [vmem:[%s7609_s0 + $0x82c] ss:$36 sps:$4 sm:$0xff]  }
  0x11   :  { %v4913_v43 = vld [vmem:[%s7609_s0 + $0x798] ss:$36 sps:$4 sm:$0xff]   ;;  %v4916_v48 = vld [vmem:[%s7608_s1 + $0x80] sm:$0xff]   ;;  %v4965_v51 = vld [vmem:[%s7608_s1 + $0x108] sm:$0xff]  }
  0x12   :  { %2399 = vmatpush1.bf16.msra.mxu0 %v4870_v5  ;;  %4853 = vmatpush1.bf16.msra.mxu1 %v4870_v5  ;;  %v4921_v49 = vld [vmem:[%s7609_s0 + $0x120] ss:$36 sps:$4 sm:$0xff]   ;;  %v4923_v52 = vld [vmem:[%s7608_s1 + $0xf8] sm:$0xff]   ;;  %v4924_v56 = vld [vmem:[%s7608_s1 + $0xf0] sm:$0xff]  }
  0x13   :  { %2400 = vmatprep.subr.bf16.mxu0 %v5355_v0  ;;  %4838 = vmatprep.subr.bf16.mxu1 %v5355_v0  ;;  %v4922_v50 = vld [vmem:[%s7609_s0 + $0x7e0] ss:$36 sps:$4 sm:$0xff]   ;;  %v4930_v57 = vld [vmem:[%s7609_s0 + $0x168] ss:$36 sps:$4 sm:$0xff]   ;;  %v4934_v60 = vld [vmem:[%s7609_s0 + $0x1b4] ss:$36 sps:$4 sm:$0xff]  }
  0x14   :  { %v4973_v55 = vld [vmem:[%s7608_s1 + $0x100] sm:$0xff]   ;;  %v4931_v58 = vld [vmem:[%s7609_s0 + $0x828] ss:$36 sps:$4 sm:$0xff]   ;;  %v4936_v61 = vld [vmem:[%s7609_s0 + $0x874] ss:$36 sps:$4 sm:$0xff]  }
  0x15   :  { %v4932_v59 = vld [vmem:[%s7608_s1 + $0xe8] sm:$0xff]   ;;  %v4986_v62 = vld [vmem:[%s7608_s1 + $0x178] sm:$0xff]   ;;  %v4933_v63 = vld [vmem:[%s7608_s1 + $0xe0] sm:$0xff]  }
  0x16   :  { %2401 = vmatpush1.bf16.msra.mxu0 %v4871_v7  ;;  %4854 = vmatpush1.bf16.msra.mxu1 %v4871_v7  ;;  %v4938_v1 = vld [vmem:[%s7609_s0 + $0x1b0] ss:$36 sps:$4 sm:$0xff]   ;;  %v4940_v4 = vld [vmem:[%s7608_s1 + $0xd8] sm:$0xff]   ;;  %v5008_v7 = vld [vmem:[%s7608_s1 + $0x168] sm:$0xff]  }
  0x17   :  { %2402 = vmatprep.subr.bf16.mxu0 %v5355_v0  ;;  %4839 = vmatprep.subr.bf16.mxu1 %v5355_v0  ;;  %v4939_v2 = vld [vmem:[%s7609_s0 + $0x870] ss:$36 sps:$4 sm:$0xff]   ;;  %v4943_v5 = vld [vmem:[%s7609_s0 + $0x1fc] ss:$36 sps:$4 sm:$0xff]  }
  0x18   :  { %v4994_v3 = vld [vmem:[%s7608_s1 + $0x170] sm:$0xff]   ;;  %v4945_v6 = vld [vmem:[%s7609_s0 + $0x8bc] ss:$36 sps:$4 sm:$0xff]  }
  0x19   :  { %v4942_v8 = vld [vmem:[%s7608_s1 + $0xd0] sm:$0xff]  }
  0x1a   :  { %2403 = vmatpush1.bf16.msra.mxu0 %v4872_v9  ;;  %4855 = vmatpush1.bf16.msra.mxu1 %v4872_v9  ;;  %v4947_v9 = vld [vmem:[%s7609_s0 + $0x1f8] ss:$36 sps:$4 sm:$0xff]  }
  0x1b   :  { %2404 = vmatprep.subr.bf16.mxu0 %v5355_v0  ;;  %4840 = vmatprep.subr.bf16.mxu1 %v5355_v0 }
  0x1e   :  { %2405 = vmatpush1.bf16.msra.mxu0 %v4873_v10  ;;  %4856 = vmatpush1.bf16.msra.mxu1 %v4873_v10  ;;  %v4948_v10 = vld [vmem:[%s7609_s0 + $0x8b8] ss:$36 sps:$4 sm:$0xff]  }
  0x1f   :  { %2406 = vmatprep.subr.bf16.mxu0 %v5355_v0  ;;  %4841 = vmatprep.subr.bf16.mxu1 %v5355_v0 }
  0x22   :  { %2407 = vmatpush2.bf16.msra.mxu0 %v4874_v11  ;;  %4857 = vmatpush2.bf16.msra.mxu1 %v4874_v11  ;;  %v4949_v11 = vld [vmem:[%s7608_s1 + $0xc8] sm:$0xff]  }
  0x23   :  { %2408 = vmatprep.subr.bf16.mxu0 %v5355_v0  ;;  %4842 = vmatprep.subr.bf16.mxu1 %v5355_v0 }
  0x26   :  { %2409 = vmatpush2.bf16.msra.mxu0 %v4875_v12  ;;  %4858 = vmatpush2.bf16.msra.mxu1 %v4875_v12  ;;  %v4952_v12 = vld [vmem:[%s7609_s0 + $0x244] ss:$36 sps:$4 sm:$0xff]  }
  0x27   :  { %2410 = vmatprep.subr.bf16.mxu0 %v5355_v0  ;;  %4843 = vmatprep.subr.bf16.mxu1 %v5355_v0 }
  0x2a   :  { %2411 = vmatpush2.bf16.msra.mxu0 %v4876_v13  ;;  %4859 = vmatpush2.bf16.msra.mxu1 %v4876_v13  ;;  %v4956_v13 = vld [vmem:[%s7609_s0 + $0xc] ss:$36 sps:$4 sm:$0xff]  }
  0x2b   :  { %2412 = vmatprep.subr.bf16.mxu0 %v5355_v0  ;;  %4844 = vmatprep.subr.bf16.mxu1 %v5355_v0 }
  0x2e   :  { %2413 = vmatpush2.bf16.msra.mxu0 %v4877_v14  ;;  %4860 = vmatpush2.bf16.msra.mxu1 %v4877_v14  ;;  %v5016_v14 = vld [vmem:[%s7608_s1 + $0x160] sm:$0xff]  }
  0x2f   :  { %2414 = vmatprep.subr.bf16.mxu0 %v5355_v0  ;;  %4845 = vmatprep.subr.bf16.mxu1 %v5355_v0 }
  0x32   :  { %2415 = vmatpush2.bf16.msra.mxu0 %v4878_v15  ;;  %4861 = vmatpush2.bf16.msra.mxu1 %v4878_v15  ;;  %v4950_v15 = vld [vmem:[%s7608_s1 + $0xc0] sm:$0xff]  }
  0x33   :  { %2416 = vmatprep.subr.bf16.mxu0 %v5355_v0  ;;  %4846 = vmatprep.subr.bf16.mxu1 %v5355_v0 }
  0x36   :  { %2417 = vmatpush2.bf16.msra.mxu0 %v4879_v16  ;;  %4862 = vmatpush2.bf16.msra.mxu1 %v4879_v16  ;;  %v4954_v16 = vld [vmem:[%s7609_s0 + $0x8] ss:$36 sps:$4 sm:$0xff]  }
  0x37   :  { %2418 = vmatprep.subr.bf16.mxu0 %v5355_v0  ;;  %4847 = vmatprep.subr.bf16.mxu1 %v5355_v0 }
  0x3a   :  { %2419 = vmatpush2.bf16.msra.mxu0 %v4880_v17  ;;  %4863 = vmatpush2.bf16.msra.mxu1 %v4880_v17  ;;  %v4957_v17 = vld [vmem:[%s7609_s0 + $0x240] ss:$36 sps:$4 sm:$0xff]  }
  0x3b   :  { %2420 = vmatprep.subr.bf16.mxu0 %v5355_v0  ;;  %4848 = vmatprep.subr.bf16.mxu1 %v5355_v0 }
  0x3e   :  { %2421 = vmatpush2.bf16.msra.mxu0 %v4881_v18  ;;  %4864 = vmatpush2.bf16.msra.mxu1 %v4881_v18  ;;  %v5029_v18 = vld [vmem:[%s7608_s1 + $0x158] sm:$0xff]  }
  0x3f   :  { %2679 = vmatprep.subr.bf16.mxu1 %v5355_v0  ;;  %2968 = vmatprep.subr.bf16.mxu0 %v5355_v0 }
  0x41   :  { %2423 = vmatmul.mubr.bf16.vlgmr.msra.gmra.mxu0 %v4882_v19  ;;  %2615 = vmatmul.mubr.bf16.vlgmr.msra.gmra.mxu1 %v4885_v20  ;;  %v4958_v19 = vld [vmem:[%s7608_s1 + $0x1b8] sm:$0xff]   ;;  %v4959_v20 = vld [vmem:[%s7609_s0 + $0x28c] ss:$36 sps:$4 sm:$0xff]  }
  0x42   :  { %2680 = vmatpush1.bf16.msra.mxu1 %v4888_v21  ;;  %2969 = vmatpush1.bf16.msra.mxu0 %v4889_v22  ;;  %v4961_v21 = vld [vmem:[%s7609_s0 + $0x54] ss:$36 sps:$4 sm:$0xff]  }
  0x43   :  { %2681 = vmatprep.subr.bf16.mxu1 %v5355_v0  ;;  %2430 = vmatprep.mubr.bf16.mxu0 %v4891_v23  ;;  %v5037_v22 = vld [vmem:[%s7608_s1 + $0x150] sm:$0xff]  }
  0x44   :  { %2622 = vmatprep.mubr.bf16.mxu1 %v4893_v24  ;;  %2970 = vmatprep.subr.bf16.mxu0 %v5355_v0  ;;  %v4972_v23 = vld [vmem:[%s7608_s1 + $0x1b0] sm:$0xff]   ;;  %v4963_v24 = vld [vmem:[%s7609_s0 + $0x288] ss:$36 sps:$4 sm:$0xff]  }
  0x46   :  { %2682 = vmatpush1.bf16.msra.mxu1 %v4890_v25  ;;  %2971 = vmatpush1.bf16.msra.mxu0 %v4899_v26  ;;  %v4964_v25 = vld [vmem:[%s7609_s0 + $0x50] ss:$36 sps:$4 sm:$0xff]  }
  0x47   :  { %2683 = vmatprep.subr.bf16.mxu1 %v5355_v0  ;;  %2972 = vmatprep.subr.bf16.mxu0 %v5355_v0  ;;  %v4966_v26 = vld [vmem:[%s7609_s0 + $0x2d4] ss:$36 sps:$4 sm:$0xff]  }
  0x49   :  { %2431 = vmatmul.mubr.bf16.gmra.mxu0 %v4895_v27  ;;  %2623 = vmatmul.mubr.bf16.gmra.mxu1 %v4896_v28  ;;  %v4968_v27 = vld [vmem:[%s7609_s0 + $0x9c] ss:$36 sps:$4 sm:$0xff]   ;;  %v4987_v28 = vld [vmem:[%s7608_s1 + $0x1a8] sm:$0xff]  }
  0x4a   :  { %2684 = vmatpush1.bf16.msra.mxu1 %v4897_v29  ;;  %2438 = vmatprep.mubr.bf16.mxu0 %v4900_v30  ;;  %v5051_v29 = vld [vmem:[%s7608_s1 + $0x148] sm:$0xff]   ;;  %v5001_v30 = vld [vmem:[%s7608_s1 + $0x1a0] sm:$0xff]  }
  0x4b   :  { %2685 = vmatprep.subr.bf16.mxu1 %v5355_v0  ;;  %2630 = vmatprep.mubr.bf16.mxu1 %v4902_v31  ;;  %v5059_v31 = vld [vmem:[%s7608_s1 + $0x140] sm:$0xff]  }
  0x4c   :  { %2973 = vmatpush1.bf16.msra.mxu0 %v4915_v32  ;;  %v5727_v32 = vld [vmem:[%s7608_s1 + $0x238] sm:$0xff]  }
  0x4d   :  { %2974 = vmatprep.subr.bf16.mxu0 %v5355_v0 }
  0x4e   :  { %2686 = vmatpush1.bf16.msra.mxu1 %v4898_v33  ;;  %v4970_v33 = vld [vmem:[%s7609_s0 + $0x2d0] ss:$36 sps:$4 sm:$0xff]  }
  0x4f   :  { %2687 = vmatprep.subr.bf16.mxu1 %v5355_v0 }
  0x50   :  { %2975 = vmatpush1.bf16.msra.mxu0 %v4925_v36  ;;  %v4976_v36 = vld [vmem:[%s7609_s0 + $0xe4] ss:$36 sps:$4 sm:$0xff]  }
  0x51   :  { %2439 = vmatmul.mubr.bf16.gmra.mxu0 %v4904_v34  ;;  %2631 = vmatmul.mubr.bf16.gmra.mxu1 %v4905_v35  ;;  %v4971_v34 = vld [vmem:[%s7609_s0 + $0x98] ss:$36 sps:$4 sm:$0xff]  }
  0x52   :  { %2688 = vmatpush1.bf16.msra.mxu1 %v4906_v37  ;;  %2446 = vmatprep.mubr.bf16.mxu0 %v4908_v38  ;;  %v4974_v35 = vld [vmem:[%s7609_s0 + $0x31c] ss:$36 sps:$4 sm:$0xff]   ;;  %v5030_v38 = vld [vmem:[%s7608_s1 + $0x190] sm:$0xff]  }
  0x53   :  { %2689 = vmatprep.subr.bf16.mxu1 %v5355_v0  ;;  %2638 = vmatprep.mubr.bf16.mxu1 %v4910_v39  ;;  %v5015_v37 = vld [vmem:[%s7608_s1 + $0x198] sm:$0xff]  }
  0x54   :  { %2976 = vmatprep.subr.bf16.mxu0 %v5355_v0  ;;  %v4978_v39 = vld [vmem:[%s7609_s0 + $0x318] ss:$36 sps:$4 sm:$0xff]  }
  0x55   :  { %2977 = vmatpush1.bf16.msra.mxu0 %v4941_v40  ;;  %v4979_v40 = vld [vmem:[%s7609_s0 + $0xe0] ss:$36 sps:$4 sm:$0xff]  }
  0x56   :  { %2690 = vmatpush1.bf16.msra.mxu1 %v4907_v41  ;;  %2978 = vmatprep.subr.bf16.mxu0 %v5355_v0  ;;  %v4980_v41 = vld [vmem:[%s7609_s0 + $0x364] ss:$36 sps:$4 sm:$0xff]  }
  0x57   :  { %2691 = vmatprep.subr.bf16.mxu1 %v5355_v0 }
  0x59   :  { %2447 = vmatmul.mubr.bf16.gmra.mxu0 %v4912_v42  ;;  %2639 = vmatmul.mubr.bf16.gmra.mxu1 %v4913_v43  ;;  %v4982_v42 = vld [vmem:[%s7609_s0 + $0x12c] ss:$36 sps:$4 sm:$0xff]  }
  0x5a   :  { %2692 = vmatpush1.bf16.msra.mxu1 %v4914_v44  ;;  %2454 = vmatprep.mubr.bf16.mxu0 %v4917_v45  ;;  %v5044_v43 = vld [vmem:[%s7608_s1 + $0x188] sm:$0xff]   ;;  %v5058_v44 = vld [vmem:[%s7608_s1 + $0x180] sm:$0xff]  }
  0x5b   :  { %2693 = vmatprep.subr.bf16.mxu1 %v5355_v0  ;;  %2646 = vmatprep.mubr.bf16.mxu1 %v4919_v46  ;;  %v4984_v45 = vld [vmem:[%s7609_s0 + $0x360] ss:$36 sps:$4 sm:$0xff]   ;;  %v4985_v46 = vld [vmem:[%s7609_s0 + $0x128] ss:$36 sps:$4 sm:$0xff]  }
  0x5c   :  { %2979 = vmatpush1.bf16.msra.mxu0 %v4951_v47  ;;  %v4988_v47 = vld [vmem:[%s7609_s0 + $0x3ac] ss:$36 sps:$4 sm:$0xff]  }
  0x5d   :  { %2980 = vmatprep.subr.bf16.mxu0 %v5355_v0 }
  0x5e   :  { %2694 = vmatpush1.bf16.msra.mxu1 %v4916_v48  ;;  %v4990_v48 = vld [vmem:[%s7609_s0 + $0x174] ss:$36 sps:$4 sm:$0xff]  }
  0x5f   :  { %2695 = vmatprep.subr.bf16.mxu1 %v5355_v0 }
  0x60   :  { %2981 = vmatpush1.bf16.msra.mxu0 %v4965_v51  ;;  %v4992_v51 = vld [vmem:[%s7609_s0 + $0x3a8] ss:$36 sps:$4 sm:$0xff]  }
  0x61   :  { %2455 = vmatmul.mubr.bf16.gmra.mxu0 %v4921_v49  ;;  %2647 = vmatmul.mubr.bf16.gmra.mxu1 %v4922_v50  ;;  %v5073_v49 = vld [vmem:[%s7608_s1 + $0x1f8] sm:$0xff]   ;;  %v5086_v50 = vld [vmem:[%s7608_s1 + $0x1f0] sm:$0xff]  }
  0x62   :  { %2696 = vmatpush2.bf16.msra.mxu1 %v4923_v52  ;;  %2462 = vmatprep.mubr.bf16.mxu0 %v4926_v53  ;;  %v4993_v52 = vld [vmem:[%s7609_s0 + $0x170] ss:$36 sps:$4 sm:$0xff]  }
  0x63   :  { %2697 = vmatprep.subr.bf16.mxu1 %v5355_v0  ;;  %2654 = vmatprep.mubr.bf16.mxu1 %v4928_v54  ;;  %v4995_v53 = vld [vmem:[%s7609_s0 + $0x3f4] ss:$36 sps:$4 sm:$0xff]   ;;  %v4997_v54 = vld [vmem:[%s7609_s0 + $0x1bc] ss:$36 sps:$4 sm:$0xff]  }
  0x64   :  { %2982 = vmatprep.subr.bf16.mxu0 %v5355_v0 }
  0x65   :  { %2983 = vmatpush1.bf16.msra.mxu0 %v4973_v55  ;;  %v5100_v55 = vld [vmem:[%s7608_s1 + $0x1e8] sm:$0xff]  }
  0x66   :  { %2698 = vmatpush2.bf16.msra.mxu1 %v4924_v56  ;;  %2984 = vmatprep.subr.bf16.mxu0 %v5355_v0  ;;  %v4999_v56 = vld [vmem:[%s7609_s0 + $0x3f0] ss:$36 sps:$4 sm:$0xff]  }
  0x67   :  { %2699 = vmatprep.subr.bf16.mxu1 %v5355_v0 }
  0x69   :  { %2463 = vmatmul.mubr.bf16.gmra.mxu0 %v4930_v57  ;;  %2655 = vmatmul.mubr.bf16.gmra.mxu1 %v4931_v58  ;;  %v5000_v57 = vld [vmem:[%s7609_s0 + $0x1b8] ss:$36 sps:$4 sm:$0xff]  }
  0x6a   :  { %2700 = vmatpush2.bf16.msra.mxu1 %v4932_v59  ;;  %2470 = vmatprep.mubr.bf16.mxu0 %v4934_v60  ;;  %v5002_v58 = vld [vmem:[%s7609_s0 + $0x43c] ss:$36 sps:$4 sm:$0xff]   ;;  %v5004_v59 = vld [vmem:[%s7609_s0 + $0x204] ss:$36 sps:$4 sm:$0xff]  }
  0x6b   :  { %2701 = vmatprep.subr.bf16.mxu1 %v5355_v0  ;;  %2662 = vmatprep.mubr.bf16.mxu1 %v4936_v61  ;;  %v5113_v60 = vld [vmem:[%s7608_s1 + $0x1e0] sm:$0xff]   ;;  %v5006_v61 = vld [vmem:[%s7609_s0 + $0x438] ss:$36 sps:$4 sm:$0xff]  }
  0x6c   :  { %2985 = vmatpush2.bf16.msra.mxu0 %v4986_v62  ;;  %v5007_v62 = vld [vmem:[%s7609_s0 + $0x200] ss:$36 sps:$4 sm:$0xff]  }
  0x6d   :  { %2986 = vmatprep.subr.bf16.mxu0 %v5355_v0 }
  0x6e   :  { %2702 = vmatpush2.bf16.msra.mxu1 %v4933_v63  ;;  %v5009_v63 = vld [vmem:[%s7609_s0 + $0x484] ss:$36 sps:$4 sm:$0xff]  }
  0x6f   :  { %2703 = vmatprep.subr.bf16.mxu1 %v5355_v0 }
  0x70   :  { %2987 = vmatpush2.bf16.msra.mxu0 %v4994_v3  ;;  %v5014_v3 = vld [vmem:[%s7609_s0 + $0x248] ss:$36 sps:$4 sm:$0xff]  }
  0x71   :  { %2471 = vmatmul.mubr.bf16.gmra.mxu0 %v4938_v1  ;;  %2663 = vmatmul.mubr.bf16.gmra.mxu1 %v4939_v2  ;;  %v5011_v1 = vld [vmem:[%s7609_s0 + $0x24c] ss:$36 sps:$4 sm:$0xff]   ;;  %v5013_v2 = vld [vmem:[%s7609_s0 + $0x480] ss:$36 sps:$4 sm:$0xff]  }
  0x72   :  { %2704 = vmatpush2.bf16.msra.mxu1 %v4940_v4  ;;  %2478 = vmatprep.mubr.bf16.mxu0 %v4943_v5  ;;  %v5017_v4 = vld [vmem:[%s7609_s0 + $0x4cc] ss:$36 sps:$4 sm:$0xff]   ;;  %v5019_v5 = vld [vmem:[%s7609_s0 + $0x294] ss:$36 sps:$4 sm:$0xff]  }
  0x73   :  { %2705 = vmatprep.subr.bf16.mxu1 %v5355_v0  ;;  %2670 = vmatprep.mubr.bf16.mxu1 %v4945_v6  ;;  %v5127_v6 = vld [vmem:[%s7608_s1 + $0x1d8] sm:$0xff]  }
  0x74   :  { %2988 = vmatprep.subr.bf16.mxu0 %v5355_v0 }
  0x75   :  { %2989 = vmatpush2.bf16.msra.mxu0 %v5008_v7  ;;  %v5021_v7 = vld [vmem:[%s7609_s0 + $0x4c8] ss:$36 sps:$4 sm:$0xff]  }
  0x76   :  { %2706 = vmatpush2.bf16.msra.mxu1 %v4942_v8  ;;  %2990 = vmatprep.subr.bf16.mxu0 %v5355_v0  ;;  %v5022_v8 = vld [vmem:[%s7609_s0 + $0x290] ss:$36 sps:$4 sm:$0xff]  }
  0x77   :  { %2707 = vmatprep.subr.bf16.mxu1 %v5355_v0 }
  0x79   :  { %2479 = vmatmul.mubr.bf16.gmra.mxu0 %v4947_v9  ;;  %2671 = vmatmul.mubr.bf16.gmra.mxu1 %v4948_v10  ;;  %v5023_v9 = vld [vmem:[%s7609_s0 + $0x514] ss:$36 sps:$4 sm:$0xff]   ;;  %v5025_v10 = vld [vmem:[%s7609_s0 + $0x2dc] ss:$36 sps:$4 sm:$0xff]  }
  0x7a   :  { %2708 = vmatpush2.bf16.msra.mxu1 %v4949_v11  ;;  %2486 = vmatprep.mubr.bf16.mxu0 %v4952_v12  ;;  %v5027_v11 = vld [vmem:[%s7609_s0 + $0x510] ss:$36 sps:$4 sm:$0xff]   ;;  %v5028_v12 = vld [vmem:[%s7609_s0 + $0x2d8] ss:$36 sps:$4 sm:$0xff]  }
  0x7b   :  { %2709 = vmatprep.subr.bf16.mxu1 %v5355_v0  ;;  %2711 = vmatprep.mubr.bf16.mxu1 %v4956_v13  ;;  %v5031_v13 = vld [vmem:[%s7609_s0 + $0x55c] ss:$36 sps:$4 sm:$0xff]  }
  0x7c   :  { %2991 = vmatpush2.bf16.msra.mxu0 %v5016_v14  ;;  %v5033_v14 = vld [vmem:[%s7609_s0 + $0x324] ss:$36 sps:$4 sm:$0xff]  }
  0x7d   :  { %2992 = vmatprep.subr.bf16.mxu0 %v5355_v0 }
  0x7e   :  { %2710 = vmatpush2.bf16.msra.mxu1 %v4950_v15  ;;  %v5140_v15 = vld [vmem:[%s7608_s1 + $0x1d0] sm:$0xff]  }
  0x7f   :  { %3257 = vmatprep.subr.bf16.mxu1 %v5355_v0 }
  0x80   :  { %2993 = vmatpush2.bf16.msra.mxu0 %v5029_v18  ;;  %v5038_v18 = vld [vmem:[%s7609_s0 + $0x5a4] ss:$36 sps:$4 sm:$0xff]  }
  0x81   :  { %2487 = vmatmul.mubr.bf16.gmra.mxu0 %v4957_v17  ;;  %2712 = vmatmul.mubr.bf16.vlgmr.msra.gmra.mxu1 %v4954_v16  ;;  %v5035_v16 = vld [vmem:[%s7609_s0 + $0x558] ss:$36 sps:$4 sm:$0xff]   ;;  %v5036_v17 = vld [vmem:[%s7609_s0 + $0x320] ss:$36 sps:$4 sm:$0xff]  }
  0x82   :  { %3258 = vmatpush1.bf16.msra.mxu1 %v4958_v19  ;;  %2494 = vmatprep.mubr.bf16.mxu0 %v4959_v20  ;;  %v5040_v19 = vld [vmem:[%s7609_s0 + $0x36c] ss:$36 sps:$4 sm:$0xff]   ;;  %v5042_v20 = vld [vmem:[%s7609_s0 + $0x5a0] ss:$36 sps:$4 sm:$0xff]  }
  0x83   :  { %2719 = vmatprep.mubr.bf16.mxu1 %v4961_v21  ;;  %3259 = vmatprep.subr.bf16.mxu1 %v5355_v0  ;;  %v5043_v21 = vld [vmem:[%s7609_s0 + $0x368] ss:$36 sps:$4 sm:$0xff]  }
  0x84   :  { %2994 = vmatprep.subr.bf16.mxu0 %v5355_v0 }
  0x85   :  { %2995 = vmatpush2.bf16.msra.mxu0 %v5037_v22  ;;  %v5045_v22 = vld [vmem:[%s7609_s0 + $0x5ec] ss:$36 sps:$4 sm:$0xff]  }
  0x86   :  { %3260 = vmatpush1.bf16.msra.mxu1 %v4972_v23  ;;  %2996 = vmatprep.subr.bf16.mxu0 %v5355_v0  ;;  %v5047_v23 = vld [vmem:[%s7609_s0 + $0x3b4] ss:$36 sps:$4 sm:$0xff]  }
  0x87   :  { %3261 = vmatprep.subr.bf16.mxu1 %v5355_v0 }
  0x89   :  { %2495 = vmatmul.mubr.bf16.gmra.mxu0 %v4963_v24  ;;  %2720 = vmatmul.mubr.bf16.gmra.mxu1 %v4964_v25  ;;  %v5154_v24 = vld [vmem:[%s7608_s1 + $0x1c8] sm:$0xff]  }
  0x8a   :  { %2502 = vmatprep.mubr.bf16.mxu0 %v4966_v26  ;;  %2727 = vmatprep.mubr.bf16.mxu1 %v4968_v27  ;;  %v5049_v25 = vld [vmem:[%s7609_s0 + $0x5e8] ss:$36 sps:$4 sm:$0xff]   ;;  %v5050_v26 = vld [vmem:[%s7609_s0 + $0x3b0] ss:$36 sps:$4 sm:$0xff]  }
  0x8b   :  { %3262 = vmatpush1.bf16.msra.mxu1 %v4987_v28  ;;  %2997 = vmatpush2.bf16.msra.mxu0 %v5051_v29  ;;  %v5052_v27 = vld [vmem:[%s7609_s0 + $0x634] ss:$36 sps:$4 sm:$0xff]   ;;  %v5054_v28 = vld [vmem:[%s7609_s0 + $0x3fc] ss:$36 sps:$4 sm:$0xff]  }
  0x8c   :  { %3263 = vmatprep.subr.bf16.mxu1 %v5355_v0  ;;  %2998 = vmatprep.subr.bf16.mxu0 %v5355_v0  ;;  %v5056_v29 = vld [vmem:[%s7609_s0 + $0x630] ss:$36 sps:$4 sm:$0xff]  }
  0x8f   :  { %3264 = vmatpush1.bf16.msra.mxu1 %v5001_v30  ;;  %2999 = vmatpush2.bf16.msra.mxu0 %v5059_v31  ;;  %v5060_v30 = vld [vmem:[%s7609_s0 + $0x67c] ss:$36 sps:$4 sm:$0xff]   ;;  %v5062_v31 = vld [vmem:[%s7609_s0 + $0x444] ss:$36 sps:$4 sm:$0xff]  }
  0x90   :  { %3265 = vmatprep.subr.bf16.mxu1 %v5355_v0  ;;  %4753 = vmatprep.subr.bf16.mxu0 %v5727_v32 }
  0x91   :  { %2503 = vmatmul.mubr.bf16.gmra.mxu0 %v4970_v33  ;;  %2728 = vmatmul.mubr.bf16.gmra.mxu1 %v4971_v34  ;;  %v5167_v33 = vld [vmem:[%s7608_s1 + $0x1c0] sm:$0xff]   ;;  %v5064_v34 = vld [vmem:[%s7609_s0 + $0x678] ss:$36 sps:$4 sm:$0xff]  }
  0x92   :  { %2510 = vmatprep.mubr.bf16.mxu0 %v4974_v35  ;;  %2735 = vmatprep.mubr.bf16.mxu1 %v4976_v36  ;;  %v5065_v35 = vld [vmem:[%s7609_s0 + $0x440] ss:$36 sps:$4 sm:$0xff]   ;;  %v5066_v36 = vld [vmem:[%s7609_s0 + $0x48c] ss:$36 sps:$4 sm:$0xff]  }
  0x93   :  { %3266 = vmatpush1.bf16.msra.mxu1 %v5015_v37  ;;  %v5070_v37 = vld [vmem:[%s7609_s0 + $0x14] ss:$36 sps:$4 sm:$0xff]  }
  0x94   :  { %3267 = vmatprep.subr.bf16.mxu1 %v5355_v0 }
  0x97   :  { %3268 = vmatpush1.bf16.msra.mxu1 %v5030_v38  ;;  %v5068_v38 = vld [vmem:[%s7609_s0 + $0x10] ss:$36 sps:$4 sm:$0xff]  }
  0x98   :  { %3269 = vmatprep.subr.bf16.mxu1 %v5355_v0 }
  0x99   :  { %2511 = vmatmul.mubr.bf16.gmra.mxu0 %v4978_v39  ;;  %2736 = vmatmul.mubr.bf16.gmra.mxu1 %v4979_v40  ;;  %v5071_v39 = vld [vmem:[%s7609_s0 + $0x488] ss:$36 sps:$4 sm:$0xff]   ;;  %v5074_v40 = vld [vmem:[%s7609_s0 + $0x4d4] ss:$36 sps:$4 sm:$0xff]  }
  0x9a   :  { %2518 = vmatprep.mubr.bf16.mxu0 %v4980_v41  ;;  %2743 = vmatprep.mubr.bf16.mxu1 %v4982_v42  ;;  %v5076_v41 = vld [vmem:[%s7609_s0 + $0x5c] ss:$36 sps:$4 sm:$0xff]   ;;  %v5099_v42 = vld [vmem:[%s7608_s1 + $0x230] sm:$0xff]  }
  0x9b   :  { %3270 = vmatpush1.bf16.msra.mxu1 %v5044_v43 }
  0x9c   :  { %3271 = vmatprep.subr.bf16.mxu1 %v5355_v0 }
  0x9f   :  { %3272 = vmatpush1.bf16.msra.mxu1 %v5058_v44 }
  0xa0   :  { %3273 = vmatprep.subr.bf16.mxu1 %v5355_v0 }
  0xa1   :  { %2519 = vmatmul.mubr.bf16.gmra.mxu0 %v4984_v45  ;;  %2744 = vmatmul.mubr.bf16.gmra.mxu1 %v4985_v46 }
  0xa2   :  { %2526 = vmatprep.mubr.bf16.mxu0 %v4988_v47  ;;  %2751 = vmatprep.mubr.bf16.mxu1 %v4990_v48  ;;  %v5126_v47 = vld [vmem:[%s7608_s1 + $0x228] sm:$0xff]  }
  0xa3   :  { %3274 = vmatpush2.bf16.msra.mxu1 %v5073_v49 }
  0xa4   :  { %3275 = vmatprep.subr.bf16.mxu1 %v5355_v0 }
  0xa7   :  { %3276 = vmatpush2.bf16.msra.mxu1 %v5086_v50  ;;  %v5078_v50 = vld [vmem:[%s7609_s0 + $0x4d0] ss:$36 sps:$4 sm:$0xff]  }
  0xa8   :  { %3277 = vmatprep.subr.bf16.mxu1 %v5355_v0 }
  0xa9   :  { %2527 = vmatmul.mubr.bf16.gmra.mxu0 %v4992_v51  ;;  %2752 = vmatmul.mubr.bf16.gmra.mxu1 %v4993_v52  ;;  %v5080_v51 = vld [vmem:[%s7609_s0 + $0x51c] ss:$36 sps:$4 sm:$0xff]   ;;  %v5082_v52 = vld [vmem:[%s7609_s0 + $0xa4] ss:$36 sps:$4 sm:$0xff]  }
  0xaa   :  { %2534 = vmatprep.mubr.bf16.mxu0 %v4995_v53  ;;  %2759 = vmatprep.mubr.bf16.mxu1 %v4997_v54 }
  0xab   :  { %3278 = vmatpush2.bf16.msra.mxu1 %v5100_v55  ;;  %v5153_v55 = vld [vmem:[%s7608_s1 + $0x220] sm:$0xff]  }
  0xac   :  { %3279 = vmatprep.subr.bf16.mxu1 %v5355_v0 }
  0xaf   :  { %3280 = vmatpush2.bf16.msra.mxu1 %v5113_v60  ;;  %v5180_v60 = vld [vmem:[%s7608_s1 + $0x218] sm:$0xff]  }
  0xb0   :  { %3281 = vmatprep.subr.bf16.mxu1 %v5355_v0 }
  0xb1   :  { %2535 = vmatmul.mubr.bf16.gmra.mxu0 %v4999_v56  ;;  %2760 = vmatmul.mubr.bf16.gmra.mxu1 %v5000_v57 }
  0xb2   :  { %2542 = vmatprep.mubr.bf16.mxu0 %v5002_v58  ;;  %2767 = vmatprep.mubr.bf16.mxu1 %v5004_v59 }
  0xb3   :  { %3282 = vmatpush2.bf16.msra.mxu1 %v5127_v6 }
  0xb4   :  { %3283 = vmatprep.subr.bf16.mxu1 %v5355_v0 }
  0xb7   :  { %3284 = vmatpush2.bf16.msra.mxu1 %v5140_v15  ;;  %v5098_v15 = vld [vmem:[%s7609_s0 + $0x134] ss:$36 sps:$4 sm:$0xff]  }
  0xb8   :  { %3285 = vmatprep.subr.bf16.mxu1 %v5355_v0 }
  0xb9   :  { %2543 = vmatmul.mubr.bf16.gmra.mxu0 %v5006_v61  ;;  %2768 = vmatmul.mubr.bf16.gmra.mxu1 %v5007_v62 }
  0xba   :  { %2550 = vmatprep.mubr.bf16.mxu0 %v5009_v63  ;;  %2775 = vmatprep.mubr.bf16.mxu1 %v5011_v1  ;;  %v5084_v63 = vld [vmem:[%s7609_s0 + $0x518] ss:$36 sps:$4 sm:$0xff]   ;;  %v5085_v1 = vld [vmem:[%s7609_s0 + $0xa0] ss:$36 sps:$4 sm:$0xff]  }
  0xbb   :  { %3286 = vmatpush2.bf16.msra.mxu1 %v5154_v24  ;;  %v5093_v24 = vld [vmem:[%s7609_s0 + $0x5a8] ss:$36 sps:$4 sm:$0xff]  }
  0xbc   :  { %3287 = vmatprep.subr.bf16.mxu1 %v5355_v0  ;;  %v5057_v0 = vld [vmem:[%s7609_s0 + $0x3f8] ss:$36 sps:$4 sm:$0xff]  }
  0xbf   :  { %3288 = vmatpush2.bf16.msra.mxu1 %v5167_v33 }
  0xc1   :  { %2551 = vmatmul.mubr.bf16.gmra.mxu0 %v5013_v2  ;;  %2776 = vmatmul.mubr.bf16.gmra.mxu1 %v5014_v3  ;;  %v5087_v2 = vld [vmem:[%s7609_s0 + $0x564] ss:$36 sps:$4 sm:$0xff]   ;;  %v5089_v3 = vld [vmem:[%s7609_s0 + $0xec] ss:$36 sps:$4 sm:$0xff]  }
  0xc2   :  { %2558 = vmatprep.mubr.bf16.mxu0 %v5017_v4  ;;  %2783 = vmatprep.mubr.bf16.mxu1 %v5019_v5 }
  0xc9   :  { %2559 = vmatmul.mubr.bf16.gmra.mxu0 %v5021_v7  ;;  %2784 = vmatmul.mubr.bf16.gmra.mxu1 %v5022_v8 }
  0xca   :  { %2566 = vmatprep.mubr.bf16.mxu0 %v5023_v9  ;;  %2791 = vmatprep.mubr.bf16.mxu1 %v5025_v10 }
  0xd1   :  { %2567 = vmatmul.mubr.bf16.gmra.mxu0 %v5027_v11  ;;  %2792 = vmatmul.mubr.bf16.gmra.mxu1 %v5028_v12  ;;  %v5091_v12 = vld [vmem:[%s7609_s0 + $0x560] ss:$36 sps:$4 sm:$0xff]  }
  0xd2   :  { %2574 = vmatprep.mubr.bf16.mxu0 %v5031_v13  ;;  %2799 = vmatprep.mubr.bf16.mxu1 %v5033_v14  ;;  %v5092_v13 = vld [vmem:[%s7609_s0 + $0xe8] ss:$36 sps:$4 sm:$0xff]  }
  0xd3   :  { %v5095_v14 = vld [vmem:[%s7609_s0 + $0x5ac] ss:$36 sps:$4 sm:$0xff]  }
  0xd9   :  { %2575 = vmatmul.mubr.bf16.gmra.mxu0 %v5035_v16  ;;  %2800 = vmatmul.mubr.bf16.gmra.mxu1 %v5036_v17 }
  0xda   :  { %2582 = vmatprep.mubr.bf16.mxu0 %v5038_v18  ;;  %2807 = vmatprep.mubr.bf16.mxu1 %v5040_v19 }
  0xe1   :  { %2583 = vmatmul.mubr.bf16.gmra.mxu0 %v5042_v20  ;;  %2808 = vmatmul.mubr.bf16.gmra.mxu1 %v5043_v21 }
  0xe2   :  { %2590 = vmatprep.mubr.bf16.mxu0 %v5045_v22  ;;  %2815 = vmatprep.mubr.bf16.mxu1 %v5047_v23 }
  0xe9   :  { %2591 = vmatmul.mubr.bf16.gmra.mxu0 %v5049_v25  ;;  %2816 = vmatmul.mubr.bf16.gmra.mxu1 %v5050_v26  ;;  %v5096_v25 = vld [vmem:[%s7609_s0 + $0x130] ss:$36 sps:$4 sm:$0xff]  }
  0xea   :  { %2598 = vmatprep.mubr.bf16.mxu0 %v5052_v27  ;;  %2823 = vmatprep.mubr.bf16.mxu1 %v5054_v28  ;;  %v5103_v26 = vld [vmem:[%s7609_s0 + $0x5f4] ss:$36 sps:$4 sm:$0xff]   ;;  %v5106_v27 = vld [vmem:[%s7609_s0 + $0x17c] ss:$36 sps:$4 sm:$0xff]  }
  0xf1   :  { %2599 = vmatmul.mubr.bf16.gmra.mxu0 %v5056_v29  ;;  %2824 = vmatmul.mubr.bf16.gmra.mxu1 %v5057_v0 }
  0xf2   :  { %2606 = vmatprep.mubr.bf16.mxu0 %v5060_v30  ;;  %2831 = vmatprep.mubr.bf16.mxu1 %v5062_v31  ;;  %v5205_v31 = vld [vmem:[%s7608_s1 + $0x210] sm:$0xff]  }
  0xf9   :  { %2607 = vmatmul.mubr.bf16.gmra.mxu0 %v5064_v34  ;;  %2832 = vmatmul.mubr.bf16.gmra.mxu1 %v5065_v35 }
  0xfa   :  { %2839 = vmatprep.mubr.bf16.mxu1 %v5066_v36  ;;  %3000 = vmatprep.mubr.bf16.mxu0 %v5070_v37  ;;  %v5101_v37 = vld [vmem:[%s7609_s0 + $0x5f0] ss:$36 sps:$4 sm:$0xff]  }
 0x101   :  { %v5963_v43 = vpop.f32.mrf.mxu0  ;;  %v5965_v44 = vpop.f32.mrf.mxu1  ;;  %2840 = vmatmul.mubr.bf16.gmra.mxu1 %v5071_v39  ;;  %3001 = vmatmul.mubr.bf16.vlgmr.msra.gmra.mxu0 %v5068_v38  ;;  %v5104_v38 = vld [vmem:[%s7609_s0 + $0x178] ss:$36 sps:$4 sm:$0xff]  }
 0x102   :  { %4754 = vmatpush3.bf16.msra.mxu0 %v5727_v32  ;;  %2847 = vmatprep.mubr.bf16.mxu1 %v5074_v40  ;;  %v5079_v32 = vld [vmem:[%s7609_s0 + $0x58] ss:$36 sps:$4 sm:$0xff]   ;;  %v5112_v40 = vld [vmem:[%s7609_s0 + $0x1c4] ss:$36 sps:$4 sm:$0xff]  }
 0x103   :  { %v2426_v45 = vpop.f32.mrf.mxu0  ;;  %v2618_v46 = vpop.f32.mrf.mxu1  ;;  %3008 = vmatprep.mubr.bf16.mxu0 %v5076_v41  ;;  %4755 = vmatprep.subr.bf16.mxu0 %v5099_v42  ;;  %v5109_v39 = vld [vmem:[%s7609_s0 + $0x63c] ss:$36 sps:$4 sm:$0xff]  }
 0x105   :  { %v5971_v48 = vpop.f32.mrf.mxu0  ;;  %v5973_v49 = vpop.f32.mrf.mxu1 }
 0x106   :  { %4756 = vmatpush3.bf16.msra.mxu0 %v5099_v42 }
 0x107   :  { %v2429_v53 = vpop.f32.mrf.mxu0  ;;  %v2621_v54 = vpop.f32.mrf.mxu1  ;;  %4757 = vmatprep.subr.bf16.mxu0 %v5126_v47 }
 0x108   :  { %v5110_v53 = vld [vmem:[%s7609_s0 + $0x1c0] ss:$36 sps:$4 sm:$0xff]  }
 0x109   :  { %v5990_v56 = vpop.f32.mrf.mxu0  ;;  %v5992_v57 = vpop.f32.mrf.mxu1  ;;  %2848 = vmatmul.mubr.bf16.gmra.mxu1 %v5078_v50  ;;  %3009 = vmatmul.mubr.bf16.gmra.mxu0 %v5079_v32  ;;  %v5116_v54 = vld [vmem:[%s7609_s0 + $0x684] ss:$36 sps:$4 sm:$0xff]  }
 0x10a   :  { %2855 = vmatprep.mubr.bf16.mxu1 %v5080_v51  ;;  %3016 = vmatprep.mubr.bf16.mxu0 %v5082_v52  ;;  %v5107_v52 = vld [vmem:[%s7609_s0 + $0x638] ss:$36 sps:$4 sm:$0xff]  }
 0x10b   :  { %v2434_v58 = vpop.f32.mrf.mxu0  ;;  %v2626_v59 = vpop.f32.mrf.mxu1  ;;  %4758 = vmatpush3.bf16.msra.mxu0 %v5126_v47 }
 0x10c   :  { %4759 = vmatprep.subr.bf16.mxu0 %v5153_v55 }
 0x10d   :  { %v5997_v61 = vpop.f32.mrf.mxu0  ;;  %v5999_v62 = vpop.f32.mrf.mxu1 }
 0x10f   :  { %v2437_v4 = vpop.f32.mrf.mxu0  ;;  %v2629_v5 = vpop.f32.mrf.mxu1  ;;  %4760 = vmatpush3.bf16.msra.mxu0 %v5153_v55  ;;  %v5119_v55 = vld [vmem:[%s7609_s0 + $0x20c] ss:$36 sps:$4 sm:$0xff]  }
 0x110   :  { %4761 = vmatprep.subr.bf16.mxu0 %v5180_v60  ;;  %v5114_v5 = vld [vmem:[%s7609_s0 + $0x680] ss:$36 sps:$4 sm:$0xff]  }
 0x111   :  { %v6013_v6 = vpop.f32.mrf.mxu0  ;;  %v6015_v7 = vpop.f32.mrf.mxu1  ;;  %2856 = vmatmul.mubr.bf16.gmra.mxu1 %v5084_v63  ;;  %3017 = vmatmul.mubr.bf16.gmra.mxu0 %v5085_v1 }
 0x112   :  { %2863 = vmatprep.mubr.bf16.mxu1 %v5087_v2  ;;  %3024 = vmatprep.mubr.bf16.mxu0 %v5089_v3 }
 0x113   :  { %v2442_v8 = vpop.f32.mrf.mxu0  ;;  %v2634_v9 = vpop.f32.mrf.mxu1  ;;  %4762 = vmatpush3.bf16.msra.mxu0 %v5180_v60 }
 0x114   :  { %4763 = vmatprep.subr.bf16.mxu0 %v5205_v31  ;;  %v5117_v8 = vld [vmem:[%s7609_s0 + $0x208] ss:$36 sps:$4 sm:$0xff]  }
 0x115   :  { %v6017_v10 = vpop.f32.mrf.mxu0  ;;  %v6019_v11 = vpop.f32.mrf.mxu1  ;;  %v5122_v9 = vld [vmem:[%s7609_s0 + $0x6cc] ss:$36 sps:$4 sm:$0xff]  }
 0x117   :  { %v2445_v16 = vpop.f32.mrf.mxu0  ;;  %v2637_v17 = vpop.f32.mrf.mxu1  ;;  %4764 = vmatpush3.bf16.msra.mxu0 %v5205_v31 }
 0x119   :  { %v6033_v18 = vpop.f32.mrf.mxu0  ;;  %v6035_v19 = vpop.f32.mrf.mxu1  ;;  %2864 = vmatmul.mubr.bf16.gmra.mxu1 %v5091_v12  ;;  %3025 = vmatmul.mubr.bf16.gmra.mxu0 %v5092_v13  ;;  %v5125_v12 = vld [vmem:[%s7609_s0 + $0x254] ss:$36 sps:$4 sm:$0xff]  }
 0x11a   :  { %2871 = vmatprep.mubr.bf16.mxu1 %v5095_v14  ;;  %3032 = vmatprep.mubr.bf16.mxu0 %v5098_v15 }
 0x11b   :  { %v2450_v20 = vpop.f32.mrf.mxu0  ;;  %v2642_v21 = vpop.f32.mrf.mxu1 }
 0x11c   :  { %v6123_v21 = vld [vmem:[%s7610_s2] ss:$0 sm:$0xff] }
 0x11d   :  { %v6037_v22 = vpop.f32.mrf.mxu0  ;;  %v6039_v23 = vpop.f32.mrf.mxu1 }
 0x11f   :  { %v2453_v28 = vpop.f32.mrf.mxu0  ;;  %v2645_v29 = vpop.f32.mrf.mxu1 }
 0x120   :  { %v5130_v28 = vld [vmem:[%s7609_s0 + $0x714] ss:$36 sps:$4 sm:$0xff]   ;;  %v5133_v29 = vld [vmem:[%s7609_s0 + $0x29c] ss:$36 sps:$4 sm:$0xff]  }
 0x121   :  { %v6053_v0 = vpop.f32.mrf.mxu0  ;;  %v6055_v30 = vpop.f32.mrf.mxu1  ;;  %2872 = vmatmul.mubr.bf16.gmra.mxu1 %v5093_v24  ;;  %3033 = vmatmul.mubr.bf16.gmra.mxu0 %v5096_v25 }
 0x122   :  { %2879 = vmatprep.mubr.bf16.mxu1 %v5103_v26  ;;  %3040 = vmatprep.mubr.bf16.mxu0 %v5106_v27  ;;  %v5120_v26 = vld [vmem:[%s7609_s0 + $0x6c8] ss:$36 sps:$4 sm:$0xff]   ;;  %v5123_v27 = vld [vmem:[%s7609_s0 + $0x250] ss:$36 sps:$4 sm:$0xff]  }
 0x123   :  { %v2458_v33 = vpop.f32.mrf.mxu0  ;;  %v2650_v34 = vpop.f32.mrf.mxu1 }
 0x124   :  { %v2425_v34 = vadd.f32 %v6123_v21, %v5963_v43 }
 0x125   :  { %v6060_v35 = vpop.f32.mrf.mxu0  ;;  %v6062_v36 = vpop.f32.mrf.mxu1 }
 0x126   :  { %7612 = vst [vmem:[#allocation2_spill] sm:$0xff] %v6062_v36 }
 0x127   :  { %v2461_v41 = vpop.f32.mrf.mxu0  ;;  %v2653_v42 = vpop.f32.mrf.mxu1 }
 0x129   :  { %v6076_v45 = vpop.f32.mrf.mxu0  ;;  %v6078_v46 = vpop.f32.mrf.mxu1  ;;  %2880 = vmatmul.mubr.bf16.gmra.mxu1 %v5101_v37  ;;  %3041 = vmatmul.mubr.bf16.gmra.mxu0 %v5104_v38 }
 0x12a   :  { %7613 = vst [vmem:[#allocation3_spill] sm:$0xff] %v6078_v46  ;;  %2887 = vmatprep.mubr.bf16.mxu1 %v5109_v39  ;;  %3048 = vmatprep.mubr.bf16.mxu0 %v5112_v40  ;;  %v5230_v40 = vld [vmem:[%s7608_s1 + $0x208] sm:$0xff]  }
 0x12b   :  { %v2466_v47 = vpop.f32.mrf.mxu0  ;;  %v2658_v50 = vpop.f32.mrf.mxu1  ;;  %4765 = vmatprep.subr.bf16.mxu0 %v5230_v40 }
 0x12c   :  { %v2428_v47 = vadd.f32 %v6123_v21, %v5971_v48  ;;  %4766 = vmatpush3.bf16.msra.mxu0 %v5230_v40  ;;  %v5139_v48 = vld [vmem:[%s7609_s0 + $0x2e4] ss:$36 sps:$4 sm:$0xff]  }
 0x12d   :  { %v6080_v32 = vpop.f32.mrf.mxu0  ;;  %v6082_v51 = vpop.f32.mrf.mxu1 }
 0x12e   :  { %7614 = vst [vmem:[#allocation4_spill] sm:$0xff] %v6082_v51 }
 0x12f   :  { %v2469_v58 = vpop.f32.mrf.mxu0  ;;  %v2661_v59 = vpop.f32.mrf.mxu1 }
 0x131   :  { %v6096_v60 = vpop.f32.mrf.mxu0  ;;  %v6098_v63 = vpop.f32.mrf.mxu1  ;;  %2888 = vmatmul.mubr.bf16.gmra.mxu1 %v5107_v52  ;;  %3049 = vmatmul.mubr.bf16.gmra.mxu0 %v5110_v53  ;;  %v5128_v52 = vld [vmem:[%s7609_s0 + $0x710] ss:$36 sps:$4 sm:$0xff]   ;;  %v5131_v53 = vld [vmem:[%s7609_s0 + $0x298] ss:$36 sps:$4 sm:$0xff]  }
 0x132   :  { %7615 = vst [vmem:[#allocation5_spill] sm:$0xff] %v6098_v63  ;;  %2895 = vmatprep.mubr.bf16.mxu1 %v5116_v54  ;;  %3056 = vmatprep.mubr.bf16.mxu0 %v5119_v55  ;;  %v5136_v55 = vld [vmem:[%s7609_s0 + $0x75c] ss:$36 sps:$4 sm:$0xff]  }
 0x133   :  { %v2474_v1 = vpop.f32.mrf.mxu0  ;;  %v2666_v2 = vpop.f32.mrf.mxu1 }
 0x134   :  { %v2433_v1 = vadd.f32 %v6123_v21, %v5990_v56  ;;  %v5134_v56 = vld [vmem:[%s7609_s0 + $0x758] ss:$36 sps:$4 sm:$0xff]  }
 0x135   :  { %v6100_v3 = vpop.f32.mrf.mxu0  ;;  %v6102_v4 = vpop.f32.mrf.mxu1 }
 0x136   :  { %7616 = vst [vmem:[#allocation6_spill] sm:$0xff] %v6102_v4 }
 0x137   :  { %v2477_v13 = vpop.f32.mrf.mxu0  ;;  %v2669_v14 = vpop.f32.mrf.mxu1 }
 0x138   :  { %v2436_v13 = vadd.f32 %v6123_v21, %v5997_v61  ;;  %v5146_v61 = vld [vmem:[%s7609_s0 + $0x32c] ss:$36 sps:$4 sm:$0xff]  }
 0x139   :  { %v6116_v15 = vpop.f32.mrf.mxu0  ;;  %v6118_v16 = vpop.f32.mrf.mxu1  ;;  %2896 = vmatmul.mubr.bf16.gmra.mxu1 %v5114_v5  ;;  %3057 = vmatmul.mubr.bf16.gmra.mxu0 %v5117_v8 }
 0x13a   :  { %7617 = vst [vmem:[#allocation7_spill] sm:$0xff] %v6118_v16  ;;  %2903 = vmatprep.mubr.bf16.mxu1 %v5122_v9  ;;  %3064 = vmatprep.mubr.bf16.mxu0 %v5125_v12 }
 0x13b   :  { %v2482_v17 = vpop.f32.mrf.mxu0  ;;  %v2674_v20 = vpop.f32.mrf.mxu1 }
 0x13c   :  { %v5137_v20 = vld [vmem:[%s7609_s0 + $0x2e0] ss:$36 sps:$4 sm:$0xff]  }
 0x13d   :  { %v6125_v24 = vpop.f32.mrf.mxu0  ;;  %v6127_v25 = vpop.f32.mrf.mxu1 }
 0x13e   :  { %7618 = vst [vmem:[#allocation8_spill] sm:$0xff] %v6127_v25 }
 0x13f   :  { %v2485_v31 = vpop.f32.mrf.mxu0  ;;  %v2677_v33 = vpop.f32.mrf.mxu1 }
 0x140   :  { %v2441_v31 = vadd.f32 %v6123_v21, %v6013_v6  ;;  %v5141_v6 = vld [vmem:[%s7609_s0 + $0x7a0] ss:$36 sps:$4 sm:$0xff]  }
 0x141   :  { %v6143_v37 = vpop.f32.mrf.mxu0  ;;  %v2713_v38 = vpop.f32.mrf.mxu1  ;;  %2904 = vmatmul.mubr.bf16.gmra.mxu1 %v5120_v26  ;;  %3065 = vmatmul.mubr.bf16.gmra.mxu0 %v5123_v27  ;;  %v5143_v27 = vld [vmem:[%s7609_s0 + $0x7a4] ss:$36 sps:$4 sm:$0xff]  }
 0x142   :  { %v6145_v39 = vadd.f32 %v2713_v38, %v2425_v34  ;;  %2911 = vmatprep.mubr.bf16.mxu1 %v5130_v28  ;;  %3072 = vmatprep.mubr.bf16.mxu0 %v5133_v29 }
 0x143   :  { %v2490_v41 = vpop.f32.mrf.mxu0  ;;  %v2715_v42 = vpop.f32.mrf.mxu1 }
 0x144   :  { %v2444_v42 = vadd.f32 %v6123_v21, %v6017_v10  ;;  %v5152_v10 = vld [vmem:[%s7609_s0 + $0x374] ss:$36 sps:$4 sm:$0xff]  }
 0x145   :  { %v6152_v43 = vpop.f32.mrf.mxu0  ;;  %v2716_v50 = vpop.f32.mrf.mxu1 }
 0x146   :  { %v6160_v54 = vadd.f32 %v2716_v50, %v2428_v47 }
 0x147   :  { %v2493_v58 = vpop.f32.mrf.mxu0  ;;  %v2718_v59 = vpop.f32.mrf.mxu1 }
 0x148   :  { %v2449_v59 = vadd.f32 %v6123_v21, %v6033_v18  ;;  %v5147_v18 = vld [vmem:[%s7609_s0 + $0x7e8] ss:$36 sps:$4 sm:$0xff]  }
 0x149   :  { %v6170_v2 = vpop.f32.mrf.mxu0  ;;  %v2721_v5 = vpop.f32.mrf.mxu1  ;;  %2912 = vmatmul.mubr.bf16.gmra.mxu1 %v5128_v52  ;;  %3073 = vmatmul.mubr.bf16.gmra.mxu0 %v5131_v53  ;;  %v5144_v52 = vld [vmem:[%s7609_s0 + $0x328] ss:$36 sps:$4 sm:$0xff]  }
 0x14a   :  { %v6172_v8 = vadd.f32 %v2721_v5, %v2433_v1  ;;  %2919 = vmatprep.mubr.bf16.mxu1 %v5136_v55  ;;  %3080 = vmatprep.mubr.bf16.mxu0 %v5139_v48  ;;  %v5149_v55 = vld [vmem:[%s7609_s0 + $0x7ec] ss:$36 sps:$4 sm:$0xff]  }
 0x14b   :  { %v2498_v9 = vpop.f32.mrf.mxu0  ;;  %v2723_v12 = vpop.f32.mrf.mxu1 }
 0x14d   :  { %v6176_v14 = vpop.f32.mrf.mxu0  ;;  %v2724_v17 = vpop.f32.mrf.mxu1 }
 0x14e   :  { %v6184_v26 = vadd.f32 %v2724_v17, %v2436_v13  ;;  %v2452_v17 = vadd.f32 %v6123_v21, %v6037_v22  ;;  %v5160_v22 = vld [vmem:[%s7609_s0 + $0x3bc] ss:$36 sps:$4 sm:$0xff]  }
 0x14f   :  { %v2501_v28 = vpop.f32.mrf.mxu0  ;;  %v2726_v29 = vpop.f32.mrf.mxu1 }
 0x150   :  { %v5157_v28 = vld [vmem:[%s7609_s0 + $0x834] ss:$36 sps:$4 sm:$0xff]  }
 0x151   :  { %v6194_v33 = vpop.f32.mrf.mxu0  ;;  %v2729_v34 = vpop.f32.mrf.mxu1  ;;  %2920 = vmatmul.mubr.bf16.gmra.mxu1 %v5134_v56  ;;  %3081 = vmatmul.mubr.bf16.gmra.mxu0 %v5137_v20 }
 0x152   :  { %v6196_v38 = vadd.f32 %v2729_v34, %v2441_v31  ;;  %2927 = vmatprep.mubr.bf16.mxu1 %v5143_v27  ;;  %3088 = vmatprep.mubr.bf16.mxu0 %v5146_v61  ;;  %v5150_v27 = vld [vmem:[%s7609_s0 + $0x370] ss:$36 sps:$4 sm:$0xff]   ;;  %v2457_v34 = vadd.f32 %v6123_v21, %v6053_v0 }
 0x153   :  { %v2506_v40 = vpop.f32.mrf.mxu0  ;;  %v2731_v41 = vpop.f32.mrf.mxu1 }
 0x155   :  { %v6200_v47 = vpop.f32.mrf.mxu0  ;;  %v2732_v50 = vpop.f32.mrf.mxu1 }
 0x156   :  { %v6208_v53 = vadd.f32 %v2732_v50, %v2444_v42  ;;  %v5255_v50 = vld [vmem:[%s7608_s1 + $0x200] sm:$0xff]   ;;  %v2508_v16 = vadd.f32 %v6123_v21, %v6200_v47 }
 0x157   :  { %v2509_v48 = vpop.f32.mrf.mxu0  ;;  %v2734_v58 = vpop.f32.mrf.mxu1  ;;  %4767 = vmatprep.subr.bf16.mxu0 %v5255_v50  ;;  %v5204_v47 = vld [vmem:[%s7609_s0 + $0x13c] ss:$36 sps:$4 sm:$0xff]  }
 0x158   :  { %v5155_v48 = vld [vmem:[%s7609_s0 + $0x830] ss:$36 sps:$4 sm:$0xff]   ;;  %v5158_v58 = vld [vmem:[%s7609_s0 + $0x3b8] ss:$36 sps:$4 sm:$0xff]   ;;  %4768 = vmatpush3.bf16.msra.mxu0 %v5255_v50 }
 0x159   :  { %v6218_v1 = vpop.f32.mrf.mxu0  ;;  %v2737_v5 = vpop.f32.mrf.mxu1  ;;  %2928 = vmatmul.mubr.bf16.gmra.mxu1 %v5141_v6  ;;  %3089 = vmatmul.mubr.bf16.gmra.mxu0 %v5144_v52 }
 0x15a   :  { %v6220_v9 = vadd.f32 %v2737_v5, %v2449_v59  ;;  %2935 = vmatprep.mubr.bf16.mxu1 %v5149_v55  ;;  %3096 = vmatprep.mubr.bf16.mxu0 %v5152_v10  ;;  %v2460_v55 = vadd.f32 %v6123_v21, %v6060_v35  ;;  %v5163_v5 = vld [vmem:[%s7609_s0 + $0x87c] ss:$36 sps:$4 sm:$0xff]   ;;  %v5166_v35 = vld [vmem:[%s7609_s0 + $0x404] ss:$36 sps:$4 sm:$0xff]  }
 0x15b   :  { %v2514_v12 = vpop.f32.mrf.mxu0  ;;  %v2739_v13 = vpop.f32.mrf.mxu1 }
 0x15d   :  { %v6224_v56 = vpop.f32.mrf.mxu0  ;;  %v2740_v20 = vpop.f32.mrf.mxu1 }
 0x15e   :  { %v6232_v61 = vadd.f32 %v2740_v20, %v2452_v17  ;;  %v2465_v17 = vadd.f32 %v6123_v21, %v6076_v45  ;;  %v5161_v45 = vld [vmem:[%s7609_s0 + $0x878] ss:$36 sps:$4 sm:$0xff]   ;;  %v2516_v63 = vadd.f32 %v6123_v21, %v6224_v56  ;;  %v5211_v56 = vld [vmem:[%s7609_s0 + $0x184] ss:$36 sps:$4 sm:$0xff]  }
 0x15f   :  { %v2517_v29 = vpop.f32.mrf.mxu0  ;;  %v2742_v31 = vpop.f32.mrf.mxu1 }
 0x160   :  { %v2468_v29 = vadd.f32 %v6123_v21, %v6080_v32  ;;  %v5173_v32 = vld [vmem:[%s7609_s0 + $0x44c] ss:$36 sps:$4 sm:$0xff]  }
 0x161   :  { %v6242_v40 = vpop.f32.mrf.mxu0  ;;  %v2745_v41 = vpop.f32.mrf.mxu1  ;;  %2936 = vmatmul.mubr.bf16.gmra.mxu1 %v5147_v18  ;;  %3097 = vmatmul.mubr.bf16.gmra.mxu0 %v5150_v27 }
 0x162   :  { %v6244_v42 = vadd.f32 %v2745_v41, %v2457_v34  ;;  %2943 = vmatprep.mubr.bf16.mxu1 %v5157_v28  ;;  %3104 = vmatprep.mubr.bf16.mxu0 %v5160_v22  ;;  %v5164_v41 = vld [vmem:[%s7609_s0 + $0x400] ss:$36 sps:$4 sm:$0xff]  }
 0x163   :  { %v2522_v6 = vpop.f32.mrf.mxu0  ;;  %v2747_v52 = vpop.f32.mrf.mxu1 }
 0x164   :  { %v5170_v6 = vld [vmem:[%s7609_s0 + $0x8c4] ss:$36 sps:$4 sm:$0xff]  }
 0x165   :  { %v6251_v0 = vpop.f32.mrf.mxu0  ;;  %v2748_v10 = vpop.f32.mrf.mxu1 }
 0x166   :  { %v6259_v59 = vadd.f32 %v2748_v10, %v2460_v55  ;;  %v2473_v10 = vadd.f32 %v6123_v21, %v6096_v60  ;;  %v5168_v60 = vld [vmem:[%s7609_s0 + $0x8c0] ss:$36 sps:$4 sm:$0xff]   ;;  %v2524_v46 = vadd.f32 %v6123_v21, %v6251_v0  ;;  %v5217_v0 = vld [vmem:[%s7609_s0 + $0x1cc] ss:$36 sps:$4 sm:$0xff]  }
 0x167   :  { %v2525_v12 = vpop.f32.mrf.mxu0  ;;  %v2750_v13 = vpop.f32.mrf.mxu1 }
 0x168   :  { %v2476_v13 = vadd.f32 %v6123_v21, %v6100_v3  ;;  %v5179_v3 = vld [vmem:[%s7609_s0 + $0x1c] ss:$36 sps:$4 sm:$0xff]  }
 0x169   :  { %v6269_v20 = vpop.f32.mrf.mxu0  ;;  %v2753_v18 = vpop.f32.mrf.mxu1  ;;  %2944 = vmatmul.mubr.bf16.gmra.mxu1 %v5155_v48  ;;  %3105 = vmatmul.mubr.bf16.gmra.mxu0 %v5158_v58 }
 0x16a   :  { %v6271_v27 = vadd.f32 %v2753_v18, %v2465_v17  ;;  %2951 = vmatprep.mubr.bf16.mxu1 %v5163_v5  ;;  %3112 = vmatprep.mubr.bf16.mxu0 %v5166_v35 }
 0x16b   :  { %v2530_v28 = vpop.f32.mrf.mxu0  ;;  %v2755_v22 = vpop.f32.mrf.mxu1 }
 0x16c   :  { %v5171_v28 = vld [vmem:[%s7609_s0 + $0x448] ss:$36 sps:$4 sm:$0xff]  }
 0x16d   :  { %v6275_v31 = vpop.f32.mrf.mxu0  ;;  %v2756_v34 = vpop.f32.mrf.mxu1 }
 0x16e   :  { %v6283_v50 = vadd.f32 %v2756_v34, %v2468_v29  ;;  %v5176_v29 = vld [vmem:[%s7609_s0 + $0x494] ss:$36 sps:$4 sm:$0xff]  }
 0x16f   :  { %v2533_v52 = vpop.f32.mrf.mxu0  ;;  %v2758_v55 = vpop.f32.mrf.mxu1 }
 0x171   :  { %v6293_v48 = vpop.f32.mrf.mxu0  ;;  %v2761_v58 = vpop.f32.mrf.mxu1  ;;  %2952 = vmatmul.mubr.bf16.gmra.mxu1 %v5161_v45  ;;  %3113 = vmatmul.mubr.bf16.gmra.mxu0 %v5164_v41  ;;  %v2481_v41 = vadd.f32 %v6123_v21, %v6116_v15  ;;  %v5174_v15 = vld [vmem:[%s7609_s0 + $0x490] ss:$36 sps:$4 sm:$0xff]  }
 0x172   :  { %v6295_v5 = vadd.f32 %v2761_v58, %v2473_v10  ;;  %2959 = vmatprep.mubr.bf16.mxu1 %v5170_v6  ;;  %3120 = vmatprep.mubr.bf16.mxu0 %v5173_v32  ;;  %v2484_v58 = vadd.f32 %v6123_v21, %v6125_v24  ;;  %v5186_v24 = vld [vmem:[%s7609_s0 + $0x64] ss:$36 sps:$4 sm:$0xff]  }
 0x173   :  { %v2538_v35 = vpop.f32.mrf.mxu0  ;;  %v2763_v12 = vpop.f32.mrf.mxu1 }
 0x175   :  { %v6299_v17 = vpop.f32.mrf.mxu0  ;;  %v2764_v18 = vpop.f32.mrf.mxu1 }
 0x176   :  { %v6307_v22 = vadd.f32 %v2764_v18, %v2476_v13  ;;  %v5177_v13 = vld [vmem:[%s7609_s0 + $0x18] ss:$36 sps:$4 sm:$0xff]  }
 0x177   :  { %v2541_v34 = vpop.f32.mrf.mxu0  ;;  %v2766_v45 = vpop.f32.mrf.mxu1 }
 0x179   :  { %v6317_v6 = vpop.f32.mrf.mxu0  ;;  %v2769_v32 = vpop.f32.mrf.mxu1  ;;  %2960 = vmatmul.mubr.bf16.gmra.mxu1 %v5168_v60  ;;  %3121 = vmatmul.mubr.bf16.gmra.mxu0 %v5171_v28  ;;  %v5183_v60 = vld [vmem:[%s7609_s0 + $0x4dc] ss:$36 sps:$4 sm:$0xff]  }
 0x17a   :  { %v6319_v52 = vadd.f32 %v2769_v32, %v2481_v41  ;;  %3128 = vmatprep.mubr.bf16.mxu0 %v5176_v29  ;;  %3289 = vmatprep.mubr.bf16.mxu1 %v5179_v3  ;;  %v2489_v3 = vadd.f32 %v6123_v21, %v6143_v37  ;;  %v5181_v37 = vld [vmem:[%s7609_s0 + $0x4d8] ss:$36 sps:$4 sm:$0xff]  }
 0x17b   :  { %v2546_v55 = vpop.f32.mrf.mxu0  ;;  %v2771_v10 = vpop.f32.mrf.mxu1 }
 0x17c   :  { %v2492_v10 = vadd.f32 %v6123_v21, %v6152_v43  ;;  %v5192_v43 = vld [vmem:[%s7609_s0 + $0xac] ss:$36 sps:$4 sm:$0xff]  }
 0x17d   :  { %v6323_v35 = vpop.f32.mrf.mxu0  ;;  %v2772_v12 = vpop.f32.mrf.mxu1 }
 0x17e   :  { %v6331_v18 = vadd.f32 %v2772_v12, %v2484_v58 }
 0x17f   :  { %v2549_v28 = vpop.f32.mrf.mxu0  ;;  %v2774_v29 = vpop.f32.mrf.mxu1 }
 0x180   :  { %v2497_v29 = vadd.f32 %v6123_v21, %v6170_v2  ;;  %v5187_v2 = vld [vmem:[%s7609_s0 + $0x520] ss:$36 sps:$4 sm:$0xff]  }
 0x181   :  { %v6341_v34 = vpop.f32.mrf.mxu0  ;;  %v2777_v45 = vpop.f32.mrf.mxu1  ;;  %3129 = vmatmul.mubr.bf16.gmra.mxu0 %v5174_v15  ;;  %3290 = vmatmul.mubr.bf16.vlgmr.msra.gmra.mxu1 %v5177_v13  ;;  %v5184_v15 = vld [vmem:[%s7609_s0 + $0x60] ss:$36 sps:$4 sm:$0xff]  }
 0x182   :  { %v6343_v41 = vadd.f32 %v2777_v45, %v2489_v3  ;;  %3136 = vmatprep.mubr.bf16.mxu0 %v5183_v60  ;;  %3297 = vmatprep.mubr.bf16.mxu1 %v5186_v24  ;;  %v5189_v60 = vld [vmem:[%s7609_s0 + $0x524] ss:$36 sps:$4 sm:$0xff]  }
 0x183   :  { %v2554_v32 = vpop.f32.mrf.mxu0  ;;  %v2779_v55 = vpop.f32.mrf.mxu1 }
 0x185   :  { %v6347_v58 = vpop.f32.mrf.mxu0  ;;  %v2780_v12 = vpop.f32.mrf.mxu1 }
 0x186   :  { %v6355_v13 = vadd.f32 %v2780_v12, %v2492_v10  ;;  %v2500_v12 = vadd.f32 %v6123_v21, %v6176_v14  ;;  %v5198_v14 = vld [vmem:[%s7609_s0 + $0xf4] ss:$36 sps:$4 sm:$0xff]  }
 0x187   :  { %v2557_v24 = vpop.f32.mrf.mxu0  ;;  %v2782_v28 = vpop.f32.mrf.mxu1 }
 0x189   :  { %v6365_v3 = vpop.f32.mrf.mxu0  ;;  %v2785_v45 = vpop.f32.mrf.mxu1  ;;  %3137 = vmatmul.mubr.bf16.gmra.mxu0 %v5181_v37  ;;  %3298 = vmatmul.mubr.bf16.gmra.mxu1 %v5184_v15  ;;  %v5190_v37 = vld [vmem:[%s7609_s0 + $0xa8] ss:$36 sps:$4 sm:$0xff]  }
 0x18a   :  { %v6367_v32 = vadd.f32 %v2785_v45, %v2497_v29  ;;  %3144 = vmatprep.mubr.bf16.mxu0 %v5189_v60  ;;  %3305 = vmatprep.mubr.bf16.mxu1 %v5192_v43  ;;  %v5195_v60 = vld [vmem:[%s7609_s0 + $0x56c] ss:$36 sps:$4 sm:$0xff]   ;;  %v2505_v29 = vadd.f32 %v6123_v21, %v6194_v33 }
 0x18b   :  { %v2562_v55 = vpop.f32.mrf.mxu0  ;;  %v2787_v10 = vpop.f32.mrf.mxu1  ;;  %v5193_v33 = vld [vmem:[%s7609_s0 + $0x568] ss:$36 sps:$4 sm:$0xff]  }
 0x18d   :  { %v6371_v25 = vpop.f32.mrf.mxu0  ;;  %v2788_v24 = vpop.f32.mrf.mxu1 }
 0x18e   :  { %v6379_v15 = vadd.f32 %v2788_v24, %v2500_v12 }
 0x18f   :  { %v2565_v43 = vpop.f32.mrf.mxu0  ;;  %v2790_v28 = vpop.f32.mrf.mxu1 }
 0x191   :  { %v6389_v45 = vpop.f32.mrf.mxu0  ;;  %v2793_v55 = vpop.f32.mrf.mxu1  ;;  %3145 = vmatmul.mubr.bf16.gmra.mxu0 %v5187_v2  ;;  %3306 = vmatmul.mubr.bf16.gmra.mxu1 %v5190_v37  ;;  %v5196_v2 = vld [vmem:[%s7609_s0 + $0xf0] ss:$36 sps:$4 sm:$0xff]  }
 0x192   :  { %v6391_v10 = vadd.f32 %v2793_v55, %v2505_v29  ;;  %3152 = vmatprep.mubr.bf16.mxu0 %v5195_v60  ;;  %3313 = vmatprep.mubr.bf16.mxu1 %v5198_v14  ;;  %v5201_v60 = vld [vmem:[%s7609_s0 + $0x5b4] ss:$36 sps:$4 sm:$0xff]   ;;  %v2513_v29 = vadd.f32 %v6123_v21, %v6218_v1 }
 0x193   :  { %v2570_v12 = vpop.f32.mrf.mxu0  ;;  %v2795_v24 = vpop.f32.mrf.mxu1  ;;  %v5199_v1 = vld [vmem:[%s7609_s0 + $0x5b0] ss:$36 sps:$4 sm:$0xff]  }
 0x195   :  { %v6395_v4 = vpop.f32.mrf.mxu0  ;;  %v2796_v43 = vpop.f32.mrf.mxu1 }
 0x196   :  { %v6403_v37 = vadd.f32 %v2796_v43, %v2508_v16 }
 0x197   :  { %v2573_v14 = vpop.f32.mrf.mxu0  ;;  %v2798_v28 = vpop.f32.mrf.mxu1 }
 0x199   :  { %v6413_v55 = vpop.f32.mrf.mxu0  ;;  %v2801_v12 = vpop.f32.mrf.mxu1  ;;  %3153 = vmatmul.mubr.bf16.gmra.mxu0 %v5193_v33  ;;  %3314 = vmatmul.mubr.bf16.gmra.mxu1 %v5196_v2  ;;  %v5202_v33 = vld [vmem:[%s7609_s0 + $0x138] ss:$36 sps:$4 sm:$0xff]  }
 0x19a   :  { %v6415_v16 = vadd.f32 %v2801_v12, %v2513_v29  ;;  %3160 = vmatprep.mubr.bf16.mxu0 %v5201_v60  ;;  %3321 = vmatprep.mubr.bf16.mxu1 %v5204_v47  ;;  %v5208_v60 = vld [vmem:[%s7609_s0 + $0x5fc] ss:$36 sps:$4 sm:$0xff]   ;;  %v2521_v29 = vadd.f32 %v6123_v21, %v6242_v40 }
 0x19b   :  { %v2578_v24 = vpop.f32.mrf.mxu0  ;;  %v2803_v43 = vpop.f32.mrf.mxu1  ;;  %v5206_v40 = vld [vmem:[%s7609_s0 + $0x5f8] ss:$36 sps:$4 sm:$0xff]  }
 0x19d   :  { %v6419_v51 = vpop.f32.mrf.mxu0  ;;  %v2804_v14 = vpop.f32.mrf.mxu1 }
 0x19e   :  { %v6427_v2 = vadd.f32 %v2804_v14, %v2516_v63 }
 0x19f   :  { %v2581_v47 = vpop.f32.mrf.mxu0  ;;  %v2806_v28 = vpop.f32.mrf.mxu1 }
 0x1a1   :  { %v6437_v12 = vpop.f32.mrf.mxu0  ;;  %v2809_v24 = vpop.f32.mrf.mxu1  ;;  %3161 = vmatmul.mubr.bf16.gmra.mxu0 %v5199_v1  ;;  %3322 = vmatmul.mubr.bf16.gmra.mxu1 %v5202_v33  ;;  %v5209_v1 = vld [vmem:[%s7609_s0 + $0x180] ss:$36 sps:$4 sm:$0xff]  }
 0x1a2   :  { %v6439_v63 = vadd.f32 %v2809_v24, %v2521_v29  ;;  %3168 = vmatprep.mubr.bf16.mxu0 %v5208_v60  ;;  %3329 = vmatprep.mubr.bf16.mxu1 %v5211_v56  ;;  %v5214_v60 = vld [vmem:[%s7609_s0 + $0x644] ss:$36 sps:$4 sm:$0xff]   ;;  %v2529_v29 = vadd.f32 %v6123_v21, %v6269_v20 }
 0x1a3   :  { %v2586_v43 = vpop.f32.mrf.mxu0  ;;  %v2811_v14 = vpop.f32.mrf.mxu1  ;;  %v5212_v20 = vld [vmem:[%s7609_s0 + $0x640] ss:$36 sps:$4 sm:$0xff]  }
 0x1a4   :  { %7619 = vst [vmem:[#allocation9_spill] sm:$0xff] %v6439_v63 }
 0x1a5   :  { %v6443_v36 = vpop.f32.mrf.mxu0  ;;  %v2812_v47 = vpop.f32.mrf.mxu1 }
 0x1a6   :  { %v6451_v33 = vadd.f32 %v2812_v47, %v2524_v46 }
 0x1a7   :  { %v2589_v56 = vpop.f32.mrf.mxu0  ;;  %v2814_v28 = vpop.f32.mrf.mxu1 }
 0x1a8   :  { %7620 = vst [vmem:[#allocation10_spill] sm:$0xff] %v6451_v33  ;;  %v2532_v33 = vadd.f32 %v6123_v21, %v6275_v31  ;;  %v5223_v31 = vld [vmem:[%s7609_s0 + $0x214] ss:$36 sps:$4 sm:$0xff]  }
 0x1a9   :  { %v6461_v24 = vpop.f32.mrf.mxu0  ;;  %v2817_v43 = vpop.f32.mrf.mxu1  ;;  %3169 = vmatmul.mubr.bf16.gmra.mxu0 %v5206_v40  ;;  %3330 = vmatmul.mubr.bf16.gmra.mxu1 %v5209_v1  ;;  %v5215_v40 = vld [vmem:[%s7609_s0 + $0x1c8] ss:$36 sps:$4 sm:$0xff]  }
 0x1aa   :  { %v6463_v46 = vadd.f32 %v2817_v43, %v2529_v29  ;;  %3176 = vmatprep.mubr.bf16.mxu0 %v5214_v60  ;;  %3337 = vmatprep.mubr.bf16.mxu1 %v5217_v0  ;;  %v5220_v60 = vld [vmem:[%s7609_s0 + $0x68c] ss:$36 sps:$4 sm:$0xff]   ;;  %v2537_v29 = vadd.f32 %v6123_v21, %v6293_v48 }
 0x1ab   :  { %v2594_v14 = vpop.f32.mrf.mxu0  ;;  %v2819_v47 = vpop.f32.mrf.mxu1  ;;  %v5218_v48 = vld [vmem:[%s7609_s0 + $0x688] ss:$36 sps:$4 sm:$0xff]  }
 0x1ac   :  { %7621 = vst [vmem:[#allocation11_spill] sm:$0xff] %v6463_v46 }
 0x1ad   :  { %v6467_v63 = vpop.f32.mrf.mxu0  ;;  %v2820_v56 = vpop.f32.mrf.mxu1 }
 0x1ae   :  { %v6475_v1 = vadd.f32 %v2820_v56, %v2532_v33 }
 0x1af   :  { %v2597_v0 = vpop.f32.mrf.mxu0  ;;  %v2822_v28 = vpop.f32.mrf.mxu1 }
 0x1b0   :  { %7622 = vst [vmem:[#allocation12_spill] sm:$0xff] %v6475_v1  ;;  %v2540_v1 = vadd.f32 %v6123_v21, %v6299_v17  ;;  %v5229_v17 = vld [vmem:[%s7609_s0 + $0x25c] ss:$36 sps:$4 sm:$0xff]  }
 0x1b1   :  { %v6485_v43 = vpop.f32.mrf.mxu0  ;;  %v2825_v14 = vpop.f32.mrf.mxu1  ;;  %3177 = vmatmul.mubr.bf16.gmra.mxu0 %v5212_v20  ;;  %3338 = vmatmul.mubr.bf16.gmra.mxu1 %v5215_v40  ;;  %v5221_v20 = vld [vmem:[%s7609_s0 + $0x210] ss:$36 sps:$4 sm:$0xff]  }
 0x1b2   :  { %v6487_v33 = vadd.f32 %v2825_v14, %v2537_v29  ;;  %3184 = vmatprep.mubr.bf16.mxu0 %v5220_v60  ;;  %3345 = vmatprep.mubr.bf16.mxu1 %v5223_v31  ;;  %v5226_v60 = vld [vmem:[%s7609_s0 + $0x6d4] ss:$36 sps:$4 sm:$0xff]   ;;  %v2545_v29 = vadd.f32 %v6123_v21, %v6317_v6 }
 0x1b3   :  { %v2602_v47 = vpop.f32.mrf.mxu0  ;;  %v2827_v56 = vpop.f32.mrf.mxu1  ;;  %v5224_v6 = vld [vmem:[%s7609_s0 + $0x6d0] ss:$36 sps:$4 sm:$0xff]  }
 0x1b4   :  { %7623 = vst [vmem:[#allocation13_spill] sm:$0xff] %v6487_v33 }
 0x1b5   :  { %v6491_v46 = vpop.f32.mrf.mxu0  ;;  %v2828_v0 = vpop.f32.mrf.mxu1 }
 0x1b6   :  { %v6499_v40 = vadd.f32 %v2828_v0, %v2540_v1 }
 0x1b7   :  { %v2605_v31 = vpop.f32.mrf.mxu0  ;;  %v2830_v28 = vpop.f32.mrf.mxu1 }
 0x1b8   :  { %7624 = vst [vmem:[#allocation14_spill] sm:$0xff] %v6499_v40  ;;  %v2548_v40 = vadd.f32 %v6123_v21, %v6323_v35  ;;  %v5236_v35 = vld [vmem:[%s7609_s0 + $0x2a4] ss:$36 sps:$4 sm:$0xff]  }
 0x1b9   :  { %v6509_v14 = vpop.f32.mrf.mxu0  ;;  %v2833_v47 = vpop.f32.mrf.mxu1  ;;  %3185 = vmatmul.mubr.bf16.gmra.mxu0 %v5218_v48  ;;  %3346 = vmatmul.mubr.bf16.gmra.mxu1 %v5221_v20  ;;  %v5227_v48 = vld [vmem:[%s7609_s0 + $0x258] ss:$36 sps:$4 sm:$0xff]  }
 0x1ba   :  { %v6511_v1 = vadd.f32 %v2833_v47, %v2545_v29  ;;  %3192 = vmatprep.mubr.bf16.mxu0 %v5226_v60  ;;  %3353 = vmatprep.mubr.bf16.mxu1 %v5229_v17  ;;  %v5233_v60 = vld [vmem:[%s7609_s0 + $0x71c] ss:$36 sps:$4 sm:$0xff]   ;;  %v2553_v29 = vadd.f32 %v6123_v21, %v6341_v34 }
 0x1bb   :  { %v2610_v56 = vpop.f32.mrf.mxu0  ;;  %v2835_v0 = vpop.f32.mrf.mxu1  ;;  %v5231_v34 = vld [vmem:[%s7609_s0 + $0x718] ss:$36 sps:$4 sm:$0xff]  }
 0x1bc   :  { %7625 = vst [vmem:[#allocation15_spill] sm:$0xff] %v6511_v1 }
 0x1bd   :  { %v6515_v33 = vpop.f32.mrf.mxu0  ;;  %v2836_v31 = vpop.f32.mrf.mxu1 }
 0x1be   :  { %v6523_v20 = vadd.f32 %v2836_v31, %v2548_v40 }
 0x1bf   :  { %v2613_v17 = vpop.f32.mrf.mxu0  ;;  %v2838_v28 = vpop.f32.mrf.mxu1 }
 0x1c0   :  { %7626 = vst [vmem:[#allocation16_spill] sm:$0xff] %v6523_v20  ;;  %v2556_v17 = vadd.f32 %v6123_v21, %v6347_v58  ;;  %v5242_v58 = vld [vmem:[%s7609_s0 + $0x2ec] ss:$36 sps:$4 sm:$0xff]  }
 0x1c1   :  { %v2841_v47 = vpop.f32.mrf.mxu1  ;;  %v3002_v56 = vpop.f32.mrf.mxu0  ;;  %3193 = vmatmul.mubr.bf16.gmra.mxu0 %v5224_v6  ;;  %3354 = vmatmul.mubr.bf16.gmra.mxu1 %v5227_v48  ;;  %v5234_v6 = vld [vmem:[%s7609_s0 + $0x2a0] ss:$36 sps:$4 sm:$0xff]  }
 0x1c2   :  { %v6533_v0 = vadd.f32 %v2841_v47, %v2553_v29  ;;  %v6536_v40 = vadd.f32 %v3002_v56, %v6145_v39  ;;  %3200 = vmatprep.mubr.bf16.mxu0 %v5233_v60  ;;  %3361 = vmatprep.mubr.bf16.mxu1 %v5236_v35  ;;  %v2561_v29 = vadd.f32 %v6123_v21, %v6365_v3  ;;  %v5237_v3 = vld [vmem:[%s7609_s0 + $0x760] ss:$36 sps:$4 sm:$0xff]  }
 0x1c3   :  { %v2843_v31 = vpop.f32.mrf.mxu1  ;;  %v3004_v20 = vpop.f32.mrf.mxu0 }
 0x1c4   :  { %v5239_v20 = vld [vmem:[%s7609_s0 + $0x764] ss:$36 sps:$4 sm:$0xff]  }
 0x1c5   :  { %v2844_v28 = vpop.f32.mrf.mxu1  ;;  %v3005_v1 = vpop.f32.mrf.mxu0 }
 0x1c6   :  { %v6546_v48 = vadd.f32 %v2844_v28, %v2556_v17  ;;  %v6549_v39 = vadd.f32 %v3005_v1, %v6160_v54  ;;  %v2564_v28 = vadd.f32 %v6123_v21, %v6371_v25  ;;  %v5248_v25 = vld [vmem:[%s7609_s0 + $0x334] ss:$36 sps:$4 sm:$0xff]  }
 0x1c7   :  { %v2846_v60 = vpop.f32.mrf.mxu1  ;;  %v3007_v35 = vpop.f32.mrf.mxu0 }
 0x1c9   :  { %v2849_v47 = vpop.f32.mrf.mxu1  ;;  %v3010_v56 = vpop.f32.mrf.mxu0  ;;  %3201 = vmatmul.mubr.bf16.gmra.mxu0 %v5231_v34  ;;  %3362 = vmatmul.mubr.bf16.gmra.mxu1 %v5234_v6  ;;  %v5240_v34 = vld [vmem:[%s7609_s0 + $0x2e8] ss:$36 sps:$4 sm:$0xff]  }
 0x1ca   :  { %v6559_v31 = vadd.f32 %v2849_v47, %v2561_v29  ;;  %v6562_v54 = vadd.f32 %v3010_v56, %v6172_v8  ;;  %3208 = vmatprep.mubr.bf16.mxu0 %v5239_v20  ;;  %3369 = vmatprep.mubr.bf16.mxu1 %v5242_v58  ;;  %v5245_v20 = vld [vmem:[%s7609_s0 + $0x7ac] ss:$36 sps:$4 sm:$0xff]   ;;  %v2569_v47 = vadd.f32 %v6123_v21, %v6389_v45 }
 0x1cb   :  { %v2851_v1 = vpop.f32.mrf.mxu1  ;;  %v3012_v17 = vpop.f32.mrf.mxu0  ;;  %v5243_v45 = vld [vmem:[%s7609_s0 + $0x7a8] ss:$36 sps:$4 sm:$0xff]  }
 0x1cd   :  { %v2852_v60 = vpop.f32.mrf.mxu1  ;;  %v3013_v35 = vpop.f32.mrf.mxu0 }
 0x1ce   :  { %v6572_v6 = vadd.f32 %v2852_v60, %v2564_v28  ;;  %v6575_v8 = vadd.f32 %v3013_v35, %v6184_v26  ;;  %v2572_v35 = vadd.f32 %v6123_v21, %v6395_v4  ;;  %v5254_v4 = vld [vmem:[%s7609_s0 + $0x37c] ss:$36 sps:$4 sm:$0xff]  }
 0x1cf   :  { %v2854_v58 = vpop.f32.mrf.mxu1  ;;  %v3015_v29 = vpop.f32.mrf.mxu0 }
 0x1d1   :  { %v2857_v56 = vpop.f32.mrf.mxu1  ;;  %v3018_v1 = vpop.f32.mrf.mxu0  ;;  %3209 = vmatmul.mubr.bf16.gmra.mxu0 %v5237_v3  ;;  %3370 = vmatmul.mubr.bf16.gmra.mxu1 %v5240_v34  ;;  %v5246_v3 = vld [vmem:[%s7609_s0 + $0x330] ss:$36 sps:$4 sm:$0xff]  }
 0x1d2   :  { %v6585_v17 = vadd.f32 %v2857_v56, %v2569_v47  ;;  %v6588_v26 = vadd.f32 %v3018_v1, %v6196_v38  ;;  %3216 = vmatprep.mubr.bf16.mxu0 %v5245_v20  ;;  %3377 = vmatprep.mubr.bf16.mxu1 %v5248_v25  ;;  %v5251_v20 = vld [vmem:[%s7609_s0 + $0x7f4] ss:$36 sps:$4 sm:$0xff]   ;;  %v2577_v56 = vadd.f32 %v6123_v21, %v6413_v55 }
 0x1d3   :  { %v2859_v28 = vpop.f32.mrf.mxu1  ;;  %v3020_v60 = vpop.f32.mrf.mxu0  ;;  %v5249_v55 = vld [vmem:[%s7609_s0 + $0x7f0] ss:$36 sps:$4 sm:$0xff]  }
 0x1d5   :  { %v2860_v58 = vpop.f32.mrf.mxu1  ;;  %v3021_v29 = vpop.f32.mrf.mxu0 }
 0x1d6   :  { %v6598_v34 = vadd.f32 %v2860_v58, %v2572_v35  ;;  %v6601_v38 = vadd.f32 %v3021_v29, %v6208_v53  ;;  %v2580_v29 = vadd.f32 %v6123_v21, %v6419_v51  ;;  %v5261_v51 = vld [vmem:[%s7609_s0 + $0x3c4] ss:$36 sps:$4 sm:$0xff]  }
 0x1d7   :  { %v2862_v25 = vpop.f32.mrf.mxu1  ;;  %v3023_v47 = vpop.f32.mrf.mxu0 }
 0x1d9   :  { %v2865_v1 = vpop.f32.mrf.mxu1  ;;  %v3026_v28 = vpop.f32.mrf.mxu0  ;;  %3217 = vmatmul.mubr.bf16.gmra.mxu0 %v5243_v45  ;;  %3378 = vmatmul.mubr.bf16.gmra.mxu1 %v5246_v3  ;;  %v5252_v45 = vld [vmem:[%s7609_s0 + $0x378] ss:$36 sps:$4 sm:$0xff]  }
 0x1da   :  { %v6611_v60 = vadd.f32 %v2865_v1, %v2577_v56  ;;  %v6614_v53 = vadd.f32 %v3026_v28, %v6220_v9  ;;  %3224 = vmatprep.mubr.bf16.mxu0 %v5251_v20  ;;  %3385 = vmatprep.mubr.bf16.mxu1 %v5254_v4  ;;  %v5258_v20 = vld [vmem:[%s7609_s0 + $0x83c] ss:$36 sps:$4 sm:$0xff]   ;;  %v2585_v1 = vadd.f32 %v6123_v21, %v6437_v12 }
 0x1db   :  { %v2867_v35 = vpop.f32.mrf.mxu1  ;;  %v3028_v58 = vpop.f32.mrf.mxu0  ;;  %v5256_v12 = vld [vmem:[%s7609_s0 + $0x838] ss:$36 sps:$4 sm:$0xff]  }
 0x1dd   :  { %v2868_v25 = vpop.f32.mrf.mxu1  ;;  %v3029_v47 = vpop.f32.mrf.mxu0 }
 0x1de   :  { %v6624_v3 = vadd.f32 %v2868_v25, %v2580_v29  ;;  %v6627_v9 = vadd.f32 %v3029_v47, %v6232_v61  ;;  %v2588_v47 = vadd.f32 %v6123_v21, %v6443_v36  ;;  %v5267_v36 = vld [vmem:[%s7609_s0 + $0x40c] ss:$36 sps:$4 sm:$0xff]  }
 0x1df   :  { %v2870_v4 = vpop.f32.mrf.mxu1  ;;  %v3031_v56 = vpop.f32.mrf.mxu0 }
 0x1e1   :  { %v2873_v28 = vpop.f32.mrf.mxu1  ;;  %v3034_v35 = vpop.f32.mrf.mxu0  ;;  %3225 = vmatmul.mubr.bf16.gmra.mxu0 %v5249_v55  ;;  %3386 = vmatmul.mubr.bf16.gmra.mxu1 %v5252_v45  ;;  %v5259_v55 = vld [vmem:[%s7609_s0 + $0x3c0] ss:$36 sps:$4 sm:$0xff]  }
 0x1e2   :  { %v6637_v58 = vadd.f32 %v2873_v28, %v2585_v1  ;;  %v6640_v61 = vadd.f32 %v3034_v35, %v6244_v42  ;;  %3232 = vmatprep.mubr.bf16.mxu0 %v5258_v20  ;;  %3393 = vmatprep.mubr.bf16.mxu1 %v5261_v51  ;;  %v5264_v20 = vld [vmem:[%s7609_s0 + $0x884] ss:$36 sps:$4 sm:$0xff]   ;;  %v2593_v28 = vadd.f32 %v6123_v21, %v6461_v24 }
 0x1e3   :  { %v2875_v29 = vpop.f32.mrf.mxu1  ;;  %v3036_v25 = vpop.f32.mrf.mxu0  ;;  %v5262_v24 = vld [vmem:[%s7609_s0 + $0x880] ss:$36 sps:$4 sm:$0xff]  }
 0x1e5   :  { %v2876_v4 = vpop.f32.mrf.mxu1  ;;  %v3037_v56 = vpop.f32.mrf.mxu0 }
 0x1e6   :  { %v6650_v45 = vadd.f32 %v2876_v4, %v2588_v47  ;;  %v6653_v42 = vadd.f32 %v3037_v56, %v6259_v59  ;;  %v2596_v56 = vadd.f32 %v6123_v21, %v6467_v63  ;;  %v5273_v63 = vld [vmem:[%s7609_s0 + $0x454] ss:$36 sps:$4 sm:$0xff]  }
 0x1e7   :  { %v2878_v51 = vpop.f32.mrf.mxu1  ;;  %v3039_v1 = vpop.f32.mrf.mxu0 }
 0x1e9   :  { %v2881_v35 = vpop.f32.mrf.mxu1  ;;  %v3042_v29 = vpop.f32.mrf.mxu0  ;;  %3233 = vmatmul.mubr.bf16.gmra.mxu0 %v5256_v12  ;;  %3394 = vmatmul.mubr.bf16.gmra.mxu1 %v5259_v55  ;;  %v5265_v12 = vld [vmem:[%s7609_s0 + $0x408] ss:$36 sps:$4 sm:$0xff]  }
 0x1ea   :  { %v6663_v25 = vadd.f32 %v2881_v35, %v2593_v28  ;;  %v6666_v59 = vadd.f32 %v3042_v29, %v6271_v27  ;;  %3240 = vmatprep.mubr.bf16.mxu0 %v5264_v20  ;;  %3401 = vmatprep.mubr.bf16.mxu1 %v5267_v36  ;;  %v5270_v20 = vld [vmem:[%s7609_s0 + $0x8cc] ss:$36 sps:$4 sm:$0xff]   ;;  %v2601_v35 = vadd.f32 %v6123_v21, %v6485_v43 }
 0x1eb   :  { %v2883_v47 = vpop.f32.mrf.mxu1  ;;  %v3044_v4 = vpop.f32.mrf.mxu0  ;;  %v5268_v43 = vld [vmem:[%s7609_s0 + $0x8c8] ss:$36 sps:$4 sm:$0xff]  }
 0x1ed   :  { %v2884_v51 = vpop.f32.mrf.mxu1  ;;  %v3045_v1 = vpop.f32.mrf.mxu0 }
 0x1ee   :  { %v6676_v55 = vadd.f32 %v2884_v51, %v2596_v56  ;;  %v6679_v27 = vadd.f32 %v3045_v1, %v6283_v50  ;;  %v2604_v1 = vadd.f32 %v6123_v21, %v6491_v46  ;;  %v5277_v46 = vld [vmem:[%s7609_s0 + $0x20] ss:$36 sps:$4 sm:$0xff]  }
 0x1ef   :  { %v2886_v36 = vpop.f32.mrf.mxu1  ;;  %v3047_v28 = vpop.f32.mrf.mxu0 }
 0x1f1   :  { %v2889_v29 = vpop.f32.mrf.mxu1  ;;  %v3050_v47 = vpop.f32.mrf.mxu0  ;;  %3241 = vmatmul.mubr.bf16.gmra.mxu0 %v5262_v24  ;;  %3402 = vmatmul.mubr.bf16.gmra.mxu1 %v5265_v12  ;;  %v5271_v24 = vld [vmem:[%s7609_s0 + $0x450] ss:$36 sps:$4 sm:$0xff]  }
 0x1f2   :  { %v6689_v4 = vadd.f32 %v2889_v29, %v2601_v35  ;;  %v6692_v50 = vadd.f32 %v3050_v47, %v6295_v5  ;;  %3248 = vmatprep.mubr.bf16.mxu0 %v5270_v20  ;;  %3409 = vmatprep.mubr.bf16.mxu1 %v5273_v63  ;;  %v5276_v20 = vld [vmem:[%s7609_s0 + $0x49c] ss:$36 sps:$4 sm:$0xff]   ;;  %v2609_v29 = vadd.f32 %v6123_v21, %v6509_v14 }
 0x1f3   :  { %v2891_v56 = vpop.f32.mrf.mxu1  ;;  %v3052_v51 = vpop.f32.mrf.mxu0  ;;  %v5274_v14 = vld [vmem:[%s7609_s0 + $0x498] ss:$36 sps:$4 sm:$0xff]  }
 0x1f5   :  { %v2892_v36 = vpop.f32.mrf.mxu1  ;;  %v3053_v28 = vpop.f32.mrf.mxu0 }
 0x1f6   :  { %v6702_v12 = vadd.f32 %v2892_v36, %v2604_v1  ;;  %v6705_v5 = vadd.f32 %v3053_v28, %v6307_v22  ;;  %v2612_v28 = vadd.f32 %v6123_v21, %v6515_v33  ;;  %v5282_v33 = vld [vmem:[%s7609_s0 + $0xb0] ss:$36 sps:$4 sm:$0xff]  }
 0x1f7   :  { %v2894_v63 = vpop.f32.mrf.mxu1  ;;  %v3055_v35 = vpop.f32.mrf.mxu0 }
 0x1f9   :  { %v2897_v47 = vpop.f32.mrf.mxu1  ;;  %v3058_v56 = vpop.f32.mrf.mxu0  ;;  %3249 = vmatmul.mubr.bf16.gmra.mxu0 %v5268_v43  ;;  %3410 = vmatmul.mubr.bf16.gmra.mxu1 %v5271_v24  ;;  %v5278_v43 = vld [vmem:[%s7609_s0 + $0x68] ss:$36 sps:$4 sm:$0xff]  }
 0x1fa   :  { %v6715_v51 = vadd.f32 %v2897_v47, %v2609_v29  ;;  %v6718_v22 = vadd.f32 %v3058_v56, %v6319_v52  ;;  %3417 = vmatprep.mubr.bf16.mxu1 %v5276_v20  ;;  %4769 = vmatprep.mubr.bf16.mxu0 %v5277_v46  ;;  %v5281_v20 = vld [vmem:[%s7609_s0 + $0x4e4] ss:$36 sps:$4 sm:$0xff]   ;;  %v2617_v47 = vadd.f32 %v6123_v21, %v5965_v44 }
 0x1fb   :  { %v2899_v1 = vpop.f32.mrf.mxu1  ;;  %v3060_v36 = vpop.f32.mrf.mxu0 }
 0x1fd   :  { %v2900_v63 = vpop.f32.mrf.mxu1  ;;  %v3061_v35 = vpop.f32.mrf.mxu0 }
 0x1fe   :  { %v6728_v24 = vadd.f32 %v2900_v63, %v2612_v28  ;;  %v6731_v52 = vadd.f32 %v3061_v35, %v6331_v18  ;;  %v6749_v35 = vld [vmem:[%s7610_s2] ss:$0 sm:$0xff] }
 0x1ff   :  { %v2902_v46 = vpop.f32.mrf.mxu1  ;;  %v3063_v29 = vpop.f32.mrf.mxu0  ;;  %v2620_v44 = vadd.f32 %v6749_v35, %v5973_v49  ;;  %v5287_v49 = vld [vmem:[%s7609_s0 + $0x140] ss:$36 sps:$4 sm:$0xff]  }
 0x200   :  { %v5286_v46 = vld [vmem:[%s7609_s0 + $0x52c] ss:$36 sps:$4 sm:$0xff]  }
 0x201   :  { %v2905_v56 = vpop.f32.mrf.mxu1  ;;  %v3066_v1 = vpop.f32.mrf.mxu0  ;;  %3418 = vmatmul.mubr.bf16.gmra.mxu1 %v5274_v14  ;;  %4770 = vmatmul.mubr.bf16.vlgmr.msra.gmra.mxu0 %v5278_v43  ;;  %v5279_v43 = vld [vmem:[%s7609_s0 + $0x4e0] ss:$36 sps:$4 sm:$0xff]  }
 0x202   :  { %v6741_v36 = vadd.f32 %v2905_v56, %v2617_v47  ;;  %v6744_v18 = vadd.f32 %v3066_v1, %v6343_v41  ;;  %3425 = vmatprep.mubr.bf16.mxu1 %v5281_v20  ;;  %4773 = vmatprep.mubr.bf16.mxu0 %v5282_v33  ;;  %v5283_v41 = vld [vmem:[%s7609_s0 + $0xf8] ss:$36 sps:$4 sm:$0xff]   ;;  %v2625_v56 = vadd.f32 %v6749_v35, %v5992_v57  ;;  %v5284_v57 = vld [vmem:[%s7609_s0 + $0x528] ss:$36 sps:$4 sm:$0xff]  }
 0x203   :  { %v2907_v28 = vpop.f32.mrf.mxu1  ;;  %v3068_v63 = vpop.f32.mrf.mxu0 }
 0x205   :  { %v2908_v21 = vpop.f32.mrf.mxu1  ;;  %v3069_v14 = vpop.f32.mrf.mxu0 }
 0x206   :  { %v6759_v20 = vadd.f32 %v2908_v21, %v2620_v44  ;;  %v6762_v33 = vadd.f32 %v3069_v14, %v6355_v13  ;;  %v2628_v14 = vadd.f32 %v6749_v35, %v5999_v62  ;;  %v5292_v62 = vld [vmem:[%s7609_s0 + $0x1d0] ss:$36 sps:$4 sm:$0xff]  }
 0x207   :  { %v2910_v29 = vpop.f32.mrf.mxu1  ;;  %v3071_v47 = vpop.f32.mrf.mxu0 }
 0x209   :  { %v2913_v1 = vpop.f32.mrf.mxu1  ;;  %v3074_v28 = vpop.f32.mrf.mxu0  ;;  %3426 = vmatmul.mubr.bf16.gmra.mxu1 %v5279_v43  ;;  %4774 = vmatmul.mubr.bf16.gmra.mxu0 %v5283_v41  ;;  %v5288_v43 = vld [vmem:[%s7609_s0 + $0x188] ss:$36 sps:$4 sm:$0xff]  }
 0x20a   :  { %v6772_v63 = vadd.f32 %v2913_v1, %v2625_v56  ;;  %v6775_v13 = vadd.f32 %v3074_v28, %v6367_v32  ;;  %3433 = vmatprep.mubr.bf16.mxu1 %v5286_v46  ;;  %4777 = vmatprep.mubr.bf16.mxu0 %v5287_v49  ;;  %v5291_v46 = vld [vmem:[%s7609_s0 + $0x574] ss:$36 sps:$4 sm:$0xff]   ;;  %v2633_v1 = vadd.f32 %v6749_v35, %v6015_v7 }
 0x20b   :  { %v2915_v44 = vpop.f32.mrf.mxu1  ;;  %v3076_v21 = vpop.f32.mrf.mxu0  ;;  %v5289_v7 = vld [vmem:[%s7609_s0 + $0x570] ss:$36 sps:$4 sm:$0xff]  }
 0x20d   :  { %v2916_v29 = vpop.f32.mrf.mxu1  ;;  %v3077_v47 = vpop.f32.mrf.mxu0 }
 0x20e   :  { %v6785_v41 = vadd.f32 %v2916_v29, %v2628_v14  ;;  %v6788_v32 = vadd.f32 %v3077_v47, %v6379_v15  ;;  %v2636_v47 = vadd.f32 %v6749_v35, %v6019_v11  ;;  %v5297_v11 = vld [vmem:[%s7609_s0 + $0x260] ss:$36 sps:$4 sm:$0xff]  }
 0x20f   :  { %v2918_v49 = vpop.f32.mrf.mxu1  ;;  %v3079_v56 = vpop.f32.mrf.mxu0 }
 0x211   :  { %v2921_v28 = vpop.f32.mrf.mxu1  ;;  %v3082_v44 = vpop.f32.mrf.mxu0  ;;  %3434 = vmatmul.mubr.bf16.gmra.mxu1 %v5284_v57  ;;  %4778 = vmatmul.mubr.bf16.gmra.mxu0 %v5288_v43  ;;  %v5293_v57 = vld [vmem:[%s7609_s0 + $0x218] ss:$36 sps:$4 sm:$0xff]  }
 0x212   :  { %v6798_v21 = vadd.f32 %v2921_v28, %v2633_v1  ;;  %v6801_v15 = vadd.f32 %v3082_v44, %v6391_v10  ;;  %3441 = vmatprep.mubr.bf16.mxu1 %v5291_v46  ;;  %4781 = vmatprep.mubr.bf16.mxu0 %v5292_v62  ;;  %v5296_v46 = vld [vmem:[%s7609_s0 + $0x5bc] ss:$36 sps:$4 sm:$0xff]   ;;  %v2641_v28 = vadd.f32 %v6749_v35, %v6035_v19 }
 0x213   :  { %v2923_v14 = vpop.f32.mrf.mxu1  ;;  %v3084_v29 = vpop.f32.mrf.mxu0  ;;  %v5294_v19 = vld [vmem:[%s7609_s0 + $0x5b8] ss:$36 sps:$4 sm:$0xff]  }
 0x215   :  { %v2924_v49 = vpop.f32.mrf.mxu1  ;;  %v3085_v56 = vpop.f32.mrf.mxu0 }
 0x216   :  { %v6811_v43 = vadd.f32 %v2924_v49, %v2636_v47  ;;  %v6814_v10 = vadd.f32 %v3085_v56, %v6403_v37  ;;  %v2644_v56 = vadd.f32 %v6749_v35, %v6039_v23  ;;  %v5302_v23 = vld [vmem:[%s7609_s0 + $0x2f0] ss:$36 sps:$4 sm:$0xff]  }
 0x217   :  { %v2926_v62 = vpop.f32.mrf.mxu1  ;;  %v3087_v1 = vpop.f32.mrf.mxu0 }
 0x219   :  { %v2929_v44 = vpop.f32.mrf.mxu1  ;;  %v3090_v14 = vpop.f32.mrf.mxu0  ;;  %3442 = vmatmul.mubr.bf16.gmra.mxu1 %v5289_v7  ;;  %4782 = vmatmul.mubr.bf16.gmra.mxu0 %v5293_v57  ;;  %v5298_v7 = vld [vmem:[%s7609_s0 + $0x2a8] ss:$36 sps:$4 sm:$0xff]  }
 0x21a   :  { %v6824_v29 = vadd.f32 %v2929_v44, %v2641_v28  ;;  %v6827_v37 = vadd.f32 %v3090_v14, %v6415_v16  ;;  %3449 = vmatprep.mubr.bf16.mxu1 %v5296_v46  ;;  %4785 = vmatprep.mubr.bf16.mxu0 %v5297_v11  ;;  %v5301_v46 = vld [vmem:[%s7609_s0 + $0x604] ss:$36 sps:$4 sm:$0xff]   ;;  %v2649_v44 = vadd.f32 %v6749_v35, %v6055_v30 }
 0x21b   :  { %v2931_v47 = vpop.f32.mrf.mxu1  ;;  %v3092_v49 = vpop.f32.mrf.mxu0  ;;  %v5299_v30 = vld [vmem:[%s7609_s0 + $0x600] ss:$36 sps:$4 sm:$0xff]  }
 0x21d   :  { %v2932_v62 = vpop.f32.mrf.mxu1  ;;  %v3093_v1 = vpop.f32.mrf.mxu0 }
 0x21e   :  { %v6837_v57 = vadd.f32 %v2932_v62, %v2644_v56  ;;  %v6840_v16 = vadd.f32 %v3093_v1, %v6427_v2  ;;  %v7630_v2 = vld [vmem:[#allocation9_spill] sm:$0xff] }
 0x21f   :  { %v2934_v11 = vpop.f32.mrf.mxu1  ;;  %v3095_v28 = vpop.f32.mrf.mxu0 }
 0x220   :  { %7627 = vst [vmem:[#allocation17_spill] sm:$0xff] %v6837_v57  ;;  %7628 = vst [vmem:[#allocation18_spill] sm:$0xff] %v6840_v16  ;;  %v7632_v16 = vld [vmem:[#allocation2_spill] sm:$0xff] }
 0x221   :  { %v2937_v14 = vpop.f32.mrf.mxu1  ;;  %v3098_v47 = vpop.f32.mrf.mxu0  ;;  %3450 = vmatmul.mubr.bf16.gmra.mxu1 %v5294_v19  ;;  %4786 = vmatmul.mubr.bf16.gmra.mxu0 %v5298_v7  ;;  %v2652_v11 = vadd.f32 %v6749_v35, %v7632_v16  ;;  %v5303_v19 = vld [vmem:[%s7609_s0 + $0x338] ss:$36 sps:$4 sm:$0xff]   ;;  %v5307_v16 = vld [vmem:[%s7609_s0 + $0x380] ss:$36 sps:$4 sm:$0xff]  }
 0x222   :  { %v6850_v49 = vadd.f32 %v2937_v14, %v2649_v44  ;;  %v6853_v56 = vadd.f32 %v3098_v47, %v7630_v2  ;;  %3457 = vmatprep.mubr.bf16.mxu1 %v5301_v46  ;;  %4789 = vmatprep.mubr.bf16.mxu0 %v5302_v23  ;;  %v7634_v44 = vld [vmem:[#allocation10_spill] sm:$0xff]  ;;  %v5306_v23 = vld [vmem:[%s7609_s0 + $0x64c] ss:$36 sps:$4 sm:$0xff]  }
 0x223   :  { %v2939_v62 = vpop.f32.mrf.mxu1  ;;  %v3100_v1 = vpop.f32.mrf.mxu0  ;;  %v7636_v2 = vld [vmem:[#allocation3_spill] sm:$0xff] }
 0x224   :  { %7629 = vst [vmem:[#allocation19_spill] sm:$0xff] %v6850_v49  ;;  %7631 = vst [vmem:[#allocation9_spill] sm:$0xff] %v6853_v56  ;;  %v2657_v62 = vadd.f32 %v6749_v35, %v7636_v2  ;;  %v5304_v2 = vld [vmem:[%s7609_s0 + $0x648] ss:$36 sps:$4 sm:$0xff]  }
 0x225   :  { %v2940_v28 = vpop.f32.mrf.mxu1  ;;  %v3101_v57 = vpop.f32.mrf.mxu0 }
 0x226   :  { %v6863_v7 = vadd.f32 %v2940_v28, %v2652_v11  ;;  %v6866_v46 = vadd.f32 %v3101_v57, %v7634_v44  ;;  %v7638_v57 = vld [vmem:[#allocation11_spill] sm:$0xff] }
 0x227   :  { %v2942_v14 = vpop.f32.mrf.mxu1  ;;  %v3103_v47 = vpop.f32.mrf.mxu0 }
 0x228   :  { %7633 = vst [vmem:[#allocation2_spill] sm:$0xff] %v6863_v7  ;;  %7635 = vst [vmem:[#allocation10_spill] sm:$0xff] %v6866_v46  ;;  %v7640_v7 = vld [vmem:[#allocation4_spill] sm:$0xff] }
 0x229   :  { %v2945_v1 = vpop.f32.mrf.mxu1  ;;  %v3106_v56 = vpop.f32.mrf.mxu0  ;;  %3458 = vmatmul.mubr.bf16.gmra.mxu1 %v5299_v30  ;;  %4790 = vmatmul.mubr.bf16.gmra.mxu0 %v5303_v19  ;;  %v2660_v14 = vadd.f32 %v6749_v35, %v7640_v7  ;;  %v5308_v30 = vld [vmem:[%s7609_s0 + $0x3c8] ss:$36 sps:$4 sm:$0xff]   ;;  %v5312_v7 = vld [vmem:[%s7609_s0 + $0x410] ss:$36 sps:$4 sm:$0xff]  }
 0x22a   :  { %v6876_v11 = vadd.f32 %v2945_v1, %v2657_v62  ;;  %v6879_v28 = vadd.f32 %v3106_v56, %v7638_v57  ;;  %3465 = vmatprep.mubr.bf16.mxu1 %v5306_v23  ;;  %4793 = vmatprep.mubr.bf16.mxu0 %v5307_v16  ;;  %v7642_v56 = vld [vmem:[#allocation12_spill] sm:$0xff]  ;;  %v7644_v1 = vld [vmem:[#allocation5_spill] sm:$0xff] }
 0x22b   :  { %v2947_v44 = vpop.f32.mrf.mxu1  ;;  %v3108_v46 = vpop.f32.mrf.mxu0  ;;  %v2665_v57 = vadd.f32 %v6749_v35, %v7644_v1  ;;  %v5309_v1 = vld [vmem:[%s7609_s0 + $0x690] ss:$36 sps:$4 sm:$0xff]  }
 0x22c   :  { %7637 = vst [vmem:[#allocation3_spill] sm:$0xff] %v6876_v11  ;;  %7639 = vst [vmem:[#allocation11_spill] sm:$0xff] %v6879_v28  ;;  %v5311_v46 = vld [vmem:[%s7609_s0 + $0x694] ss:$36 sps:$4 sm:$0xff]  }
 0x22d   :  { %v2948_v47 = vpop.f32.mrf.mxu1  ;;  %v3109_v49 = vpop.f32.mrf.mxu0 }
 0x22e   :  { %v6889_v19 = vadd.f32 %v2948_v47, %v2660_v14  ;;  %v6892_v23 = vadd.f32 %v3109_v49, %v7642_v56  ;;  %v7646_v49 = vld [vmem:[#allocation13_spill] sm:$0xff] }
 0x22f   :  { %v2950_v16 = vpop.f32.mrf.mxu1  ;;  %v3111_v62 = vpop.f32.mrf.mxu0 }
 0x230   :  { %7641 = vst [vmem:[#allocation4_spill] sm:$0xff] %v6889_v19  ;;  %7643 = vst [vmem:[#allocation12_spill] sm:$0xff] %v6892_v23  ;;  %v7648_v19 = vld [vmem:[#allocation6_spill] sm:$0xff] }
 0x231   :  { %v2953_v44 = vpop.f32.mrf.mxu1  ;;  %v3114_v28 = vpop.f32.mrf.mxu0  ;;  %3466 = vmatmul.mubr.bf16.gmra.mxu1 %v5304_v2  ;;  %4794 = vmatmul.mubr.bf16.gmra.mxu0 %v5308_v30  ;;  %v2668_v16 = vadd.f32 %v6749_v35, %v7648_v19  ;;  %v5313_v2 = vld [vmem:[%s7609_s0 + $0x458] ss:$36 sps:$4 sm:$0xff]   ;;  %v5317_v19 = vld [vmem:[%s7609_s0 + $0x4a0] ss:$36 sps:$4 sm:$0xff]  }
 0x232   :  { %v6902_v14 = vadd.f32 %v2953_v44, %v2665_v57  ;;  %v6905_v47 = vadd.f32 %v3114_v28, %v7646_v49  ;;  %3473 = vmatprep.mubr.bf16.mxu1 %v5311_v46  ;;  %4797 = vmatprep.mubr.bf16.mxu0 %v5312_v7  ;;  %v7650_v28 = vld [vmem:[#allocation14_spill] sm:$0xff]  ;;  %v7652_v44 = vld [vmem:[#allocation7_spill] sm:$0xff] }
 0x233   :  { %v2955_v56 = vpop.f32.mrf.mxu1  ;;  %v3116_v23 = vpop.f32.mrf.mxu0  ;;  %v2673_v49 = vadd.f32 %v6749_v35, %v7652_v44  ;;  %v5314_v44 = vld [vmem:[%s7609_s0 + $0x6d8] ss:$36 sps:$4 sm:$0xff]  }
 0x234   :  { %7645 = vst [vmem:[#allocation5_spill] sm:$0xff] %v6902_v14  ;;  %7647 = vst [vmem:[#allocation13_spill] sm:$0xff] %v6905_v47  ;;  %v5316_v23 = vld [vmem:[%s7609_s0 + $0x6dc] ss:$36 sps:$4 sm:$0xff]  }
 0x235   :  { %v2956_v62 = vpop.f32.mrf.mxu1  ;;  %v3117_v11 = vpop.f32.mrf.mxu0 }
 0x236   :  { %v6915_v30 = vadd.f32 %v2956_v62, %v2668_v16  ;;  %v6918_v46 = vadd.f32 %v3117_v11, %v7650_v28  ;;  %v7653_v11 = vld [vmem:[#allocation15_spill] sm:$0xff] }
 0x237   :  { %v2958_v7 = vpop.f32.mrf.mxu1  ;;  %v3119_v57 = vpop.f32.mrf.mxu0 }
 0x238   :  { %7649 = vst [vmem:[#allocation6_spill] sm:$0xff] %v6915_v30  ;;  %7651 = vst [vmem:[#allocation14_spill] sm:$0xff] %v6918_v46  ;;  %v7654_v30 = vld [vmem:[#allocation8_spill] sm:$0xff] }
 0x239   :  { %v2961_v56 = vpop.f32.mrf.mxu1  ;;  %v3122_v47 = vpop.f32.mrf.mxu0  ;;  %3474 = vmatmul.mubr.bf16.gmra.mxu1 %v5309_v1  ;;  %4798 = vmatmul.mubr.bf16.gmra.mxu0 %v5313_v2  ;;  %v2676_v7 = vadd.f32 %v6749_v35, %v7654_v30  ;;  %v5318_v1 = vld [vmem:[%s7609_s0 + $0x4e8] ss:$36 sps:$4 sm:$0xff]   ;;  %v5322_v35 = vld [vmem:[%s7609_s0 + $0x530] ss:$36 sps:$4 sm:$0xff]  }
 0x23a   :  { %v6928_v16 = vadd.f32 %v2961_v56, %v2673_v49  ;;  %v6931_v62 = vadd.f32 %v3122_v47, %v7653_v11  ;;  %3481 = vmatprep.mubr.bf16.mxu1 %v5316_v23  ;;  %4801 = vmatprep.mubr.bf16.mxu0 %v5317_v19  ;;  %v7655_v47 = vld [vmem:[#allocation16_spill] sm:$0xff] }
 0x23b   :  { %v2963_v28 = vpop.f32.mrf.mxu1  ;;  %v3124_v46 = vpop.f32.mrf.mxu0 }
 0x23c   :  { %v5321_v46 = vld [vmem:[%s7609_s0 + $0x724] ss:$36 sps:$4 sm:$0xff]  }
 0x23d   :  { %v2964_v57 = vpop.f32.mrf.mxu1  ;;  %v3125_v14 = vpop.f32.mrf.mxu0 }
 0x23e   :  { %v6941_v2 = vadd.f32 %v2964_v57, %v2676_v7  ;;  %v6944_v23 = vadd.f32 %v3125_v14, %v7655_v47 }
 0x23f   :  { %v2966_v30 = vpop.f32.mrf.mxu1  ;;  %v3127_v19 = vpop.f32.mrf.mxu0 }
 0x240   :  { %v5319_v30 = vld [vmem:[%s7609_s0 + $0x720] ss:$36 sps:$4 sm:$0xff]  }
 0x241   :  { %v3130_v49 = vpop.f32.mrf.mxu0  ;;  %v3291_v56 = vpop.f32.mrf.mxu1  ;;  %3482 = vmatmul.mubr.bf16.gmra.mxu1 %v5314_v44  ;;  %4802 = vmatmul.mubr.bf16.gmra.mxu0 %v5318_v1  ;;  %v5323_v44 = vld [vmem:[%s7609_s0 + $0x578] ss:$36 sps:$4 sm:$0xff]   ;;  %v5326_v1 = vld [vmem:[%s7609_s0 + $0x76c] ss:$36 sps:$4 sm:$0xff]  }
 0x242   :  { %v6953_v11 = vadd.f32 %v3130_v49, %v6533_v0  ;;  %v6956_v14 = vadd.f32 %v3291_v56, %v6536_v40  ;;  %3489 = vmatprep.mubr.bf16.mxu1 %v5321_v46  ;;  %4805 = vmatprep.mubr.bf16.mxu0 %v5322_v35  ;;  %v5327_v46 = vld [vmem:[%s7609_s0 + $0x5c0] ss:$36 sps:$4 sm:$0xff]  }
 0x243   :  { %v3132_v28 = vpop.f32.mrf.mxu0  ;;  %v3293_v7 = vpop.f32.mrf.mxu1 }
 0x245   :  { %v3133_v57 = vpop.f32.mrf.mxu0  ;;  %v3294_v47 = vpop.f32.mrf.mxu1 }
 0x246   :  { %v6965_v0 = vadd.f32 %v3133_v57, %v6546_v48  ;;  %v6968_v40 = vadd.f32 %v3294_v47, %v6549_v39 }
 0x247   :  { %v3135_v35 = vpop.f32.mrf.mxu0  ;;  %v3296_v19 = vpop.f32.mrf.mxu1 }
 0x248   :  { %v5324_v35 = vld [vmem:[%s7609_s0 + $0x768] ss:$36 sps:$4 sm:$0xff]  }
 0x249   :  { %v3138_v49 = vpop.f32.mrf.mxu0  ;;  %v3299_v56 = vpop.f32.mrf.mxu1  ;;  %3490 = vmatmul.mubr.bf16.gmra.mxu1 %v5319_v30  ;;  %4806 = vmatmul.mubr.bf16.gmra.mxu0 %v5323_v44  ;;  %v5328_v30 = vld [vmem:[%s7609_s0 + $0x608] ss:$36 sps:$4 sm:$0xff]   ;;  %v5331_v44 = vld [vmem:[%s7609_s0 + $0x7b4] ss:$36 sps:$4 sm:$0xff]  }
 0x24a   :  { %v6977_v48 = vadd.f32 %v3138_v49, %v6559_v31  ;;  %v6980_v39 = vadd.f32 %v3299_v56, %v6562_v54  ;;  %3497 = vmatprep.mubr.bf16.mxu1 %v5326_v1  ;;  %4809 = vmatprep.mubr.bf16.mxu0 %v5327_v46  ;;  %v5332_v1 = vld [vmem:[%s7609_s0 + $0x650] ss:$36 sps:$4 sm:$0xff]  }
 0x24b   :  { %v3140_v28 = vpop.f32.mrf.mxu0  ;;  %v3301_v7 = vpop.f32.mrf.mxu1 }
 0x24d   :  { %v3141_v57 = vpop.f32.mrf.mxu0  ;;  %v3302_v47 = vpop.f32.mrf.mxu1 }
 0x24e   :  { %v6989_v31 = vadd.f32 %v3141_v57, %v6572_v6  ;;  %v6992_v54 = vadd.f32 %v3302_v47, %v6575_v8 }
 0x24f   :  { %v3143_v46 = vpop.f32.mrf.mxu0  ;;  %v3304_v19 = vpop.f32.mrf.mxu1 }
 0x250   :  { %v5329_v46 = vld [vmem:[%s7609_s0 + $0x7b0] ss:$36 sps:$4 sm:$0xff]  }
 0x251   :  { %v3146_v49 = vpop.f32.mrf.mxu0  ;;  %v3307_v56 = vpop.f32.mrf.mxu1  ;;  %3498 = vmatmul.mubr.bf16.gmra.mxu1 %v5324_v35  ;;  %4810 = vmatmul.mubr.bf16.gmra.mxu0 %v5328_v30  ;;  %v5333_v35 = vld [vmem:[%s7609_s0 + $0x698] ss:$36 sps:$4 sm:$0xff]  }
 0x252   :  { %v7001_v6 = vadd.f32 %v3146_v49, %v6585_v17  ;;  %v7004_v8 = vadd.f32 %v3307_v56, %v6588_v26  ;;  %3505 = vmatprep.mubr.bf16.mxu1 %v5331_v44  ;;  %4813 = vmatprep.mubr.bf16.mxu0 %v5332_v1  ;;  %v5336_v30 = vld [vmem:[%s7609_s0 + $0x7fc] ss:$36 sps:$4 sm:$0xff]  }
 0x253   :  { %v3148_v28 = vpop.f32.mrf.mxu0  ;;  %v3309_v7 = vpop.f32.mrf.mxu1  ;;  %v5337_v44 = vld [vmem:[%s7609_s0 + $0x6e0] ss:$36 sps:$4 sm:$0xff]  }
 0x255   :  { %v3149_v57 = vpop.f32.mrf.mxu0  ;;  %v3310_v47 = vpop.f32.mrf.mxu1 }
 0x256   :  { %v7013_v17 = vadd.f32 %v3149_v57, %v6598_v34  ;;  %v7016_v26 = vadd.f32 %v3310_v47, %v6601_v38 }
 0x257   :  { %v3151_v1 = vpop.f32.mrf.mxu0  ;;  %v3312_v19 = vpop.f32.mrf.mxu1 }
 0x258   :  { %v5334_v1 = vld [vmem:[%s7609_s0 + $0x7f8] ss:$36 sps:$4 sm:$0xff]  }
 0x259   :  { %v3154_v49 = vpop.f32.mrf.mxu0  ;;  %v3315_v56 = vpop.f32.mrf.mxu1  ;;  %3506 = vmatmul.mubr.bf16.gmra.mxu1 %v5329_v46  ;;  %4814 = vmatmul.mubr.bf16.gmra.mxu0 %v5333_v35  ;;  %v5338_v46 = vld [vmem:[%s7609_s0 + $0x728] ss:$36 sps:$4 sm:$0xff]  }
 0x25a   :  { %v7025_v34 = vadd.f32 %v3154_v49, %v6611_v60  ;;  %v7028_v38 = vadd.f32 %v3315_v56, %v6614_v53  ;;  %3513 = vmatprep.mubr.bf16.mxu1 %v5336_v30  ;;  %4817 = vmatprep.mubr.bf16.mxu0 %v5337_v44  ;;  %v5341_v35 = vld [vmem:[%s7609_s0 + $0x844] ss:$36 sps:$4 sm:$0xff]   ;;  %v5342_v30 = vld [vmem:[%s7609_s0 + $0x770] ss:$36 sps:$4 sm:$0xff]  }
 0x25b   :  { %v3156_v28 = vpop.f32.mrf.mxu0  ;;  %v3317_v7 = vpop.f32.mrf.mxu1 }
 0x25d   :  { %v3157_v57 = vpop.f32.mrf.mxu0  ;;  %v3318_v47 = vpop.f32.mrf.mxu1 }
 0x25e   :  { %v7037_v60 = vadd.f32 %v3157_v57, %v6624_v3  ;;  %v7040_v53 = vadd.f32 %v3318_v47, %v6627_v9 }
 0x25f   :  { %v3159_v44 = vpop.f32.mrf.mxu0  ;;  %v3320_v19 = vpop.f32.mrf.mxu1 }
 0x260   :  { %v5339_v44 = vld [vmem:[%s7609_s0 + $0x840] ss:$36 sps:$4 sm:$0xff]  }
 0x261   :  { %v3162_v49 = vpop.f32.mrf.mxu0  ;;  %v3323_v56 = vpop.f32.mrf.mxu1  ;;  %3514 = vmatmul.mubr.bf16.gmra.mxu1 %v5334_v1  ;;  %4818 = vmatmul.mubr.bf16.gmra.mxu0 %v5338_v46  ;;  %v5343_v1 = vld [vmem:[%s7609_s0 + $0x7b8] ss:$36 sps:$4 sm:$0xff]   ;;  %v5346_v46 = vld [vmem:[%s7609_s0 + $0x88c] ss:$36 sps:$4 sm:$0xff]  }
 0x262   :  { %v7049_v3 = vadd.f32 %v3162_v49, %v6637_v58  ;;  %v7052_v9 = vadd.f32 %v3323_v56, %v6640_v61  ;;  %3521 = vmatprep.mubr.bf16.mxu1 %v5341_v35  ;;  %4821 = vmatprep.mubr.bf16.mxu0 %v5342_v30  ;;  %v5347_v35 = vld [vmem:[%s7609_s0 + $0x800] ss:$36 sps:$4 sm:$0xff]  }
 0x263   :  { %v3164_v28 = vpop.f32.mrf.mxu0  ;;  %v3325_v7 = vpop.f32.mrf.mxu1 }
 0x265   :  { %v3165_v57 = vpop.f32.mrf.mxu0  ;;  %v3326_v47 = vpop.f32.mrf.mxu1 }
 0x266   :  { %v7061_v58 = vadd.f32 %v3165_v57, %v6650_v45  ;;  %v7064_v61 = vadd.f32 %v3326_v47, %v6653_v42 }
 0x267   :  { %v3167_v30 = vpop.f32.mrf.mxu0  ;;  %v3328_v19 = vpop.f32.mrf.mxu1 }
 0x268   :  { %v5344_v30 = vld [vmem:[%s7609_s0 + $0x888] ss:$36 sps:$4 sm:$0xff]  }
 0x269   :  { %v3170_v49 = vpop.f32.mrf.mxu0  ;;  %v3331_v56 = vpop.f32.mrf.mxu1  ;;  %3522 = vmatmul.mubr.bf16.gmra.mxu1 %v5339_v44  ;;  %4822 = vmatmul.mubr.bf16.gmra.mxu0 %v5343_v1  ;;  %v5348_v44 = vld [vmem:[%s7609_s0 + $0x848] ss:$36 sps:$4 sm:$0xff]   ;;  %v5351_v1 = vld [vmem:[%s7609_s0 + $0x8d4] ss:$36 sps:$4 sm:$0xff]  }
 0x26a   :  { %v7073_v45 = vadd.f32 %v3170_v49, %v6663_v25  ;;  %v7076_v42 = vadd.f32 %v3331_v56, %v6666_v59  ;;  %3529 = vmatprep.mubr.bf16.mxu1 %v5346_v46  ;;  %4825 = vmatprep.mubr.bf16.mxu0 %v5347_v35  ;;  %v5352_v46 = vld [vmem:[%s7609_s0 + $0x890] ss:$36 sps:$4 sm:$0xff]  }
 0x26b   :  { %v3172_v28 = vpop.f32.mrf.mxu0  ;;  %v3333_v7 = vpop.f32.mrf.mxu1 }
 0x26d   :  { %v3173_v57 = vpop.f32.mrf.mxu0  ;;  %v3334_v47 = vpop.f32.mrf.mxu1 }
 0x26e   :  { %v7085_v25 = vadd.f32 %v3173_v57, %v6676_v55  ;;  %v7088_v59 = vadd.f32 %v3334_v47, %v6679_v27 }
 0x26f   :  { %v3175_v35 = vpop.f32.mrf.mxu0  ;;  %v3336_v19 = vpop.f32.mrf.mxu1 }
 0x270   :  { %v5349_v35 = vld [vmem:[%s7609_s0 + $0x8d0] ss:$36 sps:$4 sm:$0xff]  }
 0x271   :  { %v3178_v49 = vpop.f32.mrf.mxu0  ;;  %v3339_v56 = vpop.f32.mrf.mxu1  ;;  %3530 = vmatmul.mubr.bf16.gmra.mxu1 %v5344_v30  ;;  %4826 = vmatmul.mubr.bf16.gmra.mxu0 %v5348_v44  ;;  %v5353_v30 = vld [vmem:[%s7609_s0 + $0x8d8] ss:$36 sps:$4 sm:$0xff]  }
 0x272   :  { %v7097_v55 = vadd.f32 %v3178_v49, %v6689_v4  ;;  %v7100_v27 = vadd.f32 %v3339_v56, %v6692_v50  ;;  %3537 = vmatprep.mubr.bf16.mxu1 %v5351_v1  ;;  %4829 = vmatprep.mubr.bf16.mxu0 %v5352_v46 }
 0x273   :  { %v3180_v28 = vpop.f32.mrf.mxu0  ;;  %v3341_v7 = vpop.f32.mrf.mxu1 }
 0x274   :  { %7656 = vst [vmem:[#allocation7_spill] sm:$0xff] %v7097_v55 }
 0x275   :  { %v3181_v57 = vpop.f32.mrf.mxu0  ;;  %v3342_v47 = vpop.f32.mrf.mxu1 }
 0x276   :  { %v7109_v4 = vadd.f32 %v3181_v57, %v6702_v12  ;;  %v7112_v50 = vadd.f32 %v3342_v47, %v6705_v5 }
 0x277   :  { %v3183_v44 = vpop.f32.mrf.mxu0  ;;  %v3344_v1 = vpop.f32.mrf.mxu1 }
 0x278   :  { %7657 = vst [vmem:[#allocation15_spill] sm:$0xff] %v7109_v4  ;;  %v7683_v4 = vld [vmem:[#allocation6_spill] sm:$0xff] }
 0x279   :  { %v3186_v46 = vpop.f32.mrf.mxu0  ;;  %v3347_v19 = vpop.f32.mrf.mxu1  ;;  %3538 = vmatmul.mubr.bf16.gmra.mxu1 %v5349_v35  ;;  %4830 = vmatmul.mubr.bf16.gmra.mxu0 %v5353_v30 }
 0x27a   :  { %v7115_v49 = vadd.f32 %v3186_v46, %v6715_v51  ;;  %v7118_v56 = vadd.f32 %v3347_v19, %v6718_v22 }
 0x27b   :  { %v3188_v28 = vpop.f32.mrf.mxu0  ;;  %v3349_v7 = vpop.f32.mrf.mxu1 }
 0x27d   :  { %v3189_v55 = vpop.f32.mrf.mxu0  ;;  %v3350_v12 = vpop.f32.mrf.mxu1 }
 0x27e   :  { %v7121_v57 = vadd.f32 %v3189_v55, %v6728_v24  ;;  %v7124_v5 = vadd.f32 %v3350_v12, %v6731_v52 }
 0x27f   :  { %v3191_v47 = vpop.f32.mrf.mxu0  ;;  %v3352_v44 = vpop.f32.mrf.mxu1 }
 0x281   :  { %v3194_v35 = vpop.f32.mrf.mxu0  ;;  %v3355_v30 = vpop.f32.mrf.mxu1 }
 0x282   :  { %v7127_v51 = vadd.f32 %v3194_v35, %v6741_v36  ;;  %v7130_v22 = vadd.f32 %v3355_v30, %v6744_v18 }
 0x283   :  { %v3196_v1 = vpop.f32.mrf.mxu0  ;;  %v3357_v46 = vpop.f32.mrf.mxu1 }
 0x284   :  { %7658 = vst [vmem:[#allocation8_spill] sm:$0xff] %v7127_v51  ;;  %v7677_v51 = vld [vmem:[#allocation4_spill] sm:$0xff] }
 0x285   :  { %v3197_v19 = vpop.f32.mrf.mxu0  ;;  %v3358_v28 = vpop.f32.mrf.mxu1 }
 0x286   :  { %v7133_v24 = vadd.f32 %v3197_v19, %v6759_v20  ;;  %v7136_v52 = vadd.f32 %v3358_v28, %v6762_v33 }
 0x287   :  { %v3199_v55 = vpop.f32.mrf.mxu0  ;;  %v3360_v7 = vpop.f32.mrf.mxu1 }
 0x288   :  { %7659 = vst [vmem:[#allocation16_spill] sm:$0xff] %v7133_v24  ;;  %v7671_v24 = vld [vmem:[#allocation2_spill] sm:$0xff] }
 0x289   :  { %v3202_v12 = vpop.f32.mrf.mxu0  ;;  %v3363_v47 = vpop.f32.mrf.mxu1 }
 0x28a   :  { %v7139_v36 = vadd.f32 %v3202_v12, %v6772_v63  ;;  %v7142_v18 = vadd.f32 %v3363_v47, %v6775_v13 }
 0x28b   :  { %v3204_v44 = vpop.f32.mrf.mxu0  ;;  %v3365_v35 = vpop.f32.mrf.mxu1 }
 0x28c   :  { %7660 = vst [vmem:[#allocation20_spill] sm:$0xff] %v7139_v36  ;;  %v7680_v36 = vld [vmem:[#allocation5_spill] sm:$0xff] }
 0x28d   :  { %v3205_v30 = vpop.f32.mrf.mxu0  ;;  %v3366_v1 = vpop.f32.mrf.mxu1 }
 0x28e   :  { %v7145_v20 = vadd.f32 %v3205_v30, %v6785_v41  ;;  %v7148_v33 = vadd.f32 %v3366_v1, %v6788_v32 }
 0x28f   :  { %v3207_v46 = vpop.f32.mrf.mxu0  ;;  %v3368_v19 = vpop.f32.mrf.mxu1 }
 0x290   :  { %7661 = vst [vmem:[#allocation21_spill] sm:$0xff] %v7145_v20  ;;  %v7674_v20 = vld [vmem:[#allocation3_spill] sm:$0xff] }
 0x291   :  { %v3210_v28 = vpop.f32.mrf.mxu0  ;;  %v3371_v55 = vpop.f32.mrf.mxu1 }
 0x292   :  { %v7151_v63 = vadd.f32 %v3210_v28, %v6798_v21  ;;  %v7154_v13 = vadd.f32 %v3371_v55, %v6801_v15 }
 0x293   :  { %v3212_v7 = vpop.f32.mrf.mxu0  ;;  %v3373_v12 = vpop.f32.mrf.mxu1 }
 0x294   :  { %7662 = vst [vmem:[#allocation22_spill] sm:$0xff] %v7151_v63  ;;  %v7665_v12 = vld [vmem:[#allocation17_spill] sm:$0xff]  ;;  %v7668_v63 = vld [vmem:[#allocation19_spill] sm:$0xff] }
 0x295   :  { %v3213_v47 = vpop.f32.mrf.mxu0  ;;  %v3374_v44 = vpop.f32.mrf.mxu1 }
 0x296   :  { %v7157_v41 = vadd.f32 %v3213_v47, %v6811_v43  ;;  %v7160_v32 = vadd.f32 %v3374_v44, %v6814_v10  ;;  %v7667_v47 = vld [vmem:[#allocation18_spill] sm:$0xff] }
 0x297   :  { %v3215_v35 = vpop.f32.mrf.mxu0  ;;  %v3376_v30 = vpop.f32.mrf.mxu1 }
 0x298   :  { %7663 = vst [vmem:[#allocation23_spill] sm:$0xff] %v7157_v41 }
 0x299   :  { %v3218_v1 = vpop.f32.mrf.mxu0  ;;  %v3379_v46 = vpop.f32.mrf.mxu1 }
 0x29a   :  { %v7163_v21 = vadd.f32 %v3218_v1, %v6824_v29  ;;  %v7166_v15 = vadd.f32 %v3379_v46, %v6827_v37  ;;  %v7670_v1 = vld [vmem:[#allocation9_spill] sm:$0xff] }
 0x29b   :  { %v3220_v19 = vpop.f32.mrf.mxu0  ;;  %v3381_v28 = vpop.f32.mrf.mxu1 }
 0x29c   :  { %7664 = vst [vmem:[#allocation24_spill] sm:$0xff] %v7163_v21 }
 0x29d   :  { %v3221_v55 = vpop.f32.mrf.mxu0  ;;  %v3382_v7 = vpop.f32.mrf.mxu1 }
 0x29e   :  { %v7169_v43 = vadd.f32 %v3221_v55, %v7665_v12  ;;  %v7172_v10 = vadd.f32 %v3382_v7, %v7667_v47  ;;  %v7673_v12 = vld [vmem:[#allocation10_spill] sm:$0xff] }
 0x29f   :  { %v3223_v44 = vpop.f32.mrf.mxu0  ;;  %v3384_v35 = vpop.f32.mrf.mxu1 }
 0x2a0   :  { %7666 = vst [vmem:[#allocation17_spill] sm:$0xff] %v7169_v43 }
 0x2a1   :  { %v3226_v30 = vpop.f32.mrf.mxu0  ;;  %v3387_v41 = vpop.f32.mrf.mxu1 }
 0x2a2   :  { %v7175_v29 = vadd.f32 %v3226_v30, %v7668_v63  ;;  %v7178_v37 = vadd.f32 %v3387_v41, %v7670_v1  ;;  %v7676_v30 = vld [vmem:[#allocation11_spill] sm:$0xff] }
 0x2a3   :  { %v3228_v46 = vpop.f32.mrf.mxu0  ;;  %v3389_v19 = vpop.f32.mrf.mxu1 }
 0x2a4   :  { %7669 = vst [vmem:[#allocation18_spill] sm:$0xff] %v7175_v29 }
 0x2a5   :  { %v3229_v28 = vpop.f32.mrf.mxu0  ;;  %v3390_v21 = vpop.f32.mrf.mxu1 }
 0x2a6   :  { %v7181_v55 = vadd.f32 %v3229_v28, %v7671_v24  ;;  %v7184_v7 = vadd.f32 %v3390_v21, %v7673_v12  ;;  %v7679_v28 = vld [vmem:[#allocation12_spill] sm:$0xff] }
 0x2a7   :  { %v3231_v47 = vpop.f32.mrf.mxu0  ;;  %v3392_v44 = vpop.f32.mrf.mxu1 }
 0x2a8   :  { %7672 = vst [vmem:[#allocation19_spill] sm:$0xff] %v7181_v55 }
 0x2a9   :  { %v3234_v35 = vpop.f32.mrf.mxu0  ;;  %v3395_v43 = vpop.f32.mrf.mxu1 }
 0x2aa   :  { %v7187_v63 = vadd.f32 %v3234_v35, %v7674_v20  ;;  %v7190_v41 = vadd.f32 %v3395_v43, %v7676_v30  ;;  %v7682_v35 = vld [vmem:[#allocation13_spill] sm:$0xff] }
 0x2ab   :  { %v3236_v1 = vpop.f32.mrf.mxu0  ;;  %v3397_v46 = vpop.f32.mrf.mxu1 }
 0x2ac   :  { %7675 = vst [vmem:[#allocation9_spill] sm:$0xff] %v7187_v63 }
 0x2ad   :  { %v3237_v19 = vpop.f32.mrf.mxu0  ;;  %v3398_v29 = vpop.f32.mrf.mxu1 }
 0x2ae   :  { %v7193_v24 = vadd.f32 %v3237_v19, %v7677_v51  ;;  %v7196_v21 = vadd.f32 %v3398_v29, %v7679_v28  ;;  %v7685_v19 = vld [vmem:[#allocation14_spill] sm:$0xff] }
 0x2af   :  { %v3239_v12 = vpop.f32.mrf.mxu0  ;;  %v3400_v47 = vpop.f32.mrf.mxu1 }
 0x2b0   :  { %7678 = vst [vmem:[#allocation2_spill] sm:$0xff] %v7193_v24 }
 0x2b1   :  { %v3242_v44 = vpop.f32.mrf.mxu0  ;;  %v3403_v55 = vpop.f32.mrf.mxu1 }
 0x2b2   :  { %v7199_v20 = vadd.f32 %v3242_v44, %v7680_v36  ;;  %v7202_v43 = vadd.f32 %v3403_v55, %v7682_v35 }
 0x2b3   :  { %v3244_v30 = vpop.f32.mrf.mxu0  ;;  %v3405_v1 = vpop.f32.mrf.mxu1 }
 0x2b4   :  { %7681 = vst [vmem:[#allocation10_spill] sm:$0xff] %v7199_v20 }
 0x2b5   :  { %v3245_v46 = vpop.f32.mrf.mxu0  ;;  %v3406_v63 = vpop.f32.mrf.mxu1 }
 0x2b6   :  { %v7205_v51 = vadd.f32 %v3245_v46, %v7683_v4  ;;  %v7208_v29 = vadd.f32 %v3406_v63, %v7685_v19 }
 0x2b7   :  { %v3247_v28 = vpop.f32.mrf.mxu0  ;;  %v3408_v12 = vpop.f32.mrf.mxu1 }
 0x2b8   :  { %7684 = vst [vmem:[#allocation3_spill] sm:$0xff] %v7205_v51 }
 0x2b9   :  { %v3250_v47 = vpop.f32.mrf.mxu0  ;;  %v7210_v24 = vpop.f32.mrf.mxu1 }
 0x2ba   :  { %v7213_v36 = vadd.f32 %v3250_v47, %v6928_v16 }
 0x2bb   :  { %v3252_v55 = vpop.f32.mrf.mxu0  ;;  %v3413_v44 = vpop.f32.mrf.mxu1 }
 0x2bc   :  { %7686 = vst [vmem:[#allocation11_spill] sm:$0xff] %v7213_v36 }
 0x2bd   :  { %v3253_v35 = vpop.f32.mrf.mxu0  ;;  %v7215_v30 = vpop.f32.mrf.mxu1 }
 0x2be   :  { %v7218_v1 = vadd.f32 %v3253_v35, %v6941_v2 }
 0x2bf   :  { %v3255_v4 = vpop.f32.mrf.mxu0  ;;  %v3416_v46 = vpop.f32.mrf.mxu1 }
 0x2c1   :  { %v3419_v63 = vpop.f32.mrf.mxu1  ;;  %v4771_v19 = vpop.f32.mrf.mxu0 }
 0x2c2   :  { %v7221_v28 = vadd.f32 %v3419_v63, %v6953_v11  ;;  %v3589_v12 = vadd.f32 %v4771_v19, %v6980_v39 }
 0x2c3   :  { %v3421_v51 = vpop.f32.mrf.mxu1  ;;  %v3580_v16 = vpop.f32.mrf.mxu0 }
 0x2c4   :  { %v3837_v47 = vmax.f32 %v3589_v12, 0.0  ;;  %v3581_v55 = vadd.f32 %v3580_v16, %v6956_v14 }
 0x2c5   :  { %v3422_v44 = vpop.f32.mrf.mxu1  ;;  %v4772_v36 = vpop.f32.mrf.mxu0 }
 0x2c6   :  { %v4651_v20 = vpack.c.bf16 %v3837_v47, %v3837_v47  ;;  %v3835_v2 = vmax.f32 %v3581_v55, 0.0  ;;  %v7226_v35 = vadd.f32 %v3422_v44, %v6965_v0  ;;  %v3592_v4 = vadd.f32 %v4772_v36, %v6992_v54 }
 0x2c7   :  { %v3424_v46 = vpop.f32.mrf.mxu1  ;;  %v3583_v11 = vpop.f32.mrf.mxu0 }
 0x2c8   :  { %4158 = vst.msk [vmem:[%s7611_s3 + $0x8] sm:$0xf] %vm4155_vm0, %v4651_v20  ;;  %v4649_v39 = vpack.c.bf16 %v3835_v2, %v3835_v2  ;;  %v3838_v51 = vmax.f32 %v3592_v4, 0.0  ;;  %v3584_v14 = vadd.f32 %v3583_v11, %v6968_v40 }
 0x2c9   :  { %v7234_v63 = vpop.f32.mrf.mxu1  ;;  %v4775_v19 = vpop.f32.mrf.mxu0 }
 0x2ca   :  { %4156 = vst.msk [vmem:[%s7611_s3] sm:$0xf] %vm4155_vm0, %v4649_v39  ;;  %v4652_v0 = vpack.c.bf16 %v3838_v51, %v3838_v51  ;;  %v3836_v54 = vmax.f32 %v3584_v14, 0.0  ;;  %v3605_v36 = vadd.f32 %v4775_v19, %v7028_v38 }
 0x2cb   :  { %v3429_v12 = vpop.f32.mrf.mxu1  ;;  %v3596_v16 = vpop.f32.mrf.mxu0 }
 0x2cc   :  { %4159 = vst.msk [vmem:[%s7611_s3 + $0xc] sm:$0xf] %vm4155_vm0, %v4652_v0  ;;  %v4650_v40 = vpack.c.bf16 %v3836_v54, %v3836_v54  ;;  %v3841_v20 = vmax.f32 %v3605_v36, 0.0  ;;  %v3597_v47 = vadd.f32 %v3596_v16, %v7004_v8 }
 0x2cd   :  { %v7246_v55 = vpop.f32.mrf.mxu1  ;;  %v4776_v44 = vpop.f32.mrf.mxu0 }
 0x2ce   :  { %4157 = vst.msk [vmem:[%s7611_s3 + $0x4] sm:$0xf] %vm4155_vm0, %v4650_v40  ;;  %v4655_v38 = vpack.c.bf16 %v3841_v20, %v3841_v20  ;;  %v3839_v2 = vmax.f32 %v3597_v47, 0.0  ;;  %v3608_v4 = vadd.f32 %v4776_v44, %v7040_v53 }
 0x2cf   :  { %v3432_v46 = vpop.f32.mrf.mxu1  ;;  %v3599_v11 = vpop.f32.mrf.mxu0 }
 0x2d0   :  { %4162 = vst.msk [vmem:[%s7611_s3 + $0x18] sm:$0xf] %vm4155_vm0, %v4655_v38  ;;  %v4653_v8 = vpack.c.bf16 %v3839_v2, %v3839_v2  ;;  %v3842_v39 = vmax.f32 %v3608_v4, 0.0  ;;  %v3600_v51 = vadd.f32 %v3599_v11, %v7016_v26 }
 0x2d1   :  { %v7258_v14 = vpop.f32.mrf.mxu1  ;;  %v4779_v19 = vpop.f32.mrf.mxu0 }
 0x2d2   :  { %4160 = vst.msk [vmem:[%s7611_s3 + $0x10] sm:$0xf] %vm4155_vm0, %v4653_v8  ;;  %v4656_v53 = vpack.c.bf16 %v3842_v39, %v3842_v39  ;;  %v3840_v0 = vmax.f32 %v3600_v51, 0.0  ;;  %v3621_v54 = vadd.f32 %v4779_v19, %v7076_v42 }
 0x2d3   :  { %v3437_v36 = vpop.f32.mrf.mxu1  ;;  %v3612_v12 = vpop.f32.mrf.mxu0 }
 0x2d4   :  { %4163 = vst.msk [vmem:[%s7611_s3 + $0x1c] sm:$0xf] %vm4155_vm0, %v4656_v53  ;;  %v4654_v26 = vpack.c.bf16 %v3840_v0, %v3840_v0  ;;  %v3845_v16 = vmax.f32 %v3621_v54, 0.0  ;;  %v3613_v40 = vadd.f32 %v3612_v12, %v7052_v9 }
 0x2d5   :  { %v7270_v20 = vpop.f32.mrf.mxu1  ;;  %v4780_v47 = vpop.f32.mrf.mxu0 }
 0x2d6   :  { %4161 = vst.msk [vmem:[%s7611_s3 + $0x14] sm:$0xf] %vm4155_vm0, %v4654_v26  ;;  %v4659_v42 = vpack.c.bf16 %v3845_v16, %v3845_v16  ;;  %v3843_v44 = vmax.f32 %v3613_v40, 0.0  ;;  %v3624_v38 = vadd.f32 %v4780_v47, %v7088_v59 }
 0x2d7   :  { %v3440_v2 = vpop.f32.mrf.mxu1  ;;  %v3615_v4 = vpop.f32.mrf.mxu0 }
 0x2d8   :  { %4166 = vst.msk [vmem:[%s7611_s3 + $0x28] sm:$0xf] %vm4155_vm0, %v4659_v42  ;;  %v4657_v9 = vpack.c.bf16 %v3843_v44, %v3843_v44  ;;  %v3846_v46 = vmax.f32 %v3624_v38, 0.0  ;;  %v3616_v11 = vadd.f32 %v3615_v4, %v7064_v61 }
 0x2d9   :  { %v7282_v8 = vpop.f32.mrf.mxu1  ;;  %v4783_v39 = vpop.f32.mrf.mxu0 }
 0x2da   :  { %4164 = vst.msk [vmem:[%s7611_s3 + $0x20] sm:$0xf] %vm4155_vm0, %v4657_v9  ;;  %v4660_v59 = vpack.c.bf16 %v3846_v46, %v3846_v46  ;;  %v3844_v51 = vmax.f32 %v3616_v11, 0.0  ;;  %v3637_v19 = vadd.f32 %v4783_v39, %v7118_v56 }
 0x2db   :  { %v3445_v53 = vpop.f32.mrf.mxu1  ;;  %v3628_v0 = vpop.f32.mrf.mxu0 }
 0x2dc   :  { %4167 = vst.msk [vmem:[%s7611_s3 + $0x2c] sm:$0xf] %vm4155_vm0, %v4660_v59  ;;  %v4658_v61 = vpack.c.bf16 %v3844_v51, %v3844_v51  ;;  %v3849_v54 = vmax.f32 %v3637_v19, 0.0  ;;  %v3629_v36 = vadd.f32 %v3628_v0, %v7100_v27 }
 0x2dd   :  { %v7294_v12 = vpop.f32.mrf.mxu1  ;;  %v4784_v26 = vpop.f32.mrf.mxu0 }
 0x2de   :  { %4165 = vst.msk [vmem:[%s7611_s3 + $0x24] sm:$0xf] %vm4155_vm0, %v4658_v61  ;;  %v4663_v56 = vpack.c.bf16 %v3849_v54, %v3849_v54  ;;  %v3847_v16 = vmax.f32 %v3629_v36, 0.0  ;;  %v3640_v40 = vadd.f32 %v4784_v26, %v7124_v5 }
 0x2df   :  { %v3448_v47 = vpop.f32.mrf.mxu1  ;;  %v3631_v42 = vpop.f32.mrf.mxu0 }
 0x2e0   :  { %4170 = vst.msk [vmem:[%s7611_s3 + $0x38] sm:$0xf] %vm4155_vm0, %v4663_v56  ;;  %v4661_v27 = vpack.c.bf16 %v3847_v16, %v3847_v16  ;;  %v3850_v44 = vmax.f32 %v3640_v40, 0.0  ;;  %v3632_v38 = vadd.f32 %v3631_v42, %v7112_v50 }
 0x2e1   :  { %v7306_v2 = vpop.f32.mrf.mxu1  ;;  %v4787_v4 = vpop.f32.mrf.mxu0 }
 0x2e2   :  { %4168 = vst.msk [vmem:[%s7611_s3 + $0x30] sm:$0xf] %vm4155_vm0, %v4661_v27  ;;  %v4664_v5 = vpack.c.bf16 %v3850_v44, %v3850_v44  ;;  %v3848_v9 = vmax.f32 %v3632_v38, 0.0  ;;  %v3653_v46 = vadd.f32 %v4787_v4, %v7142_v18 }
 0x2e3   :  { %v3453_v11 = vpop.f32.mrf.mxu1  ;;  %v3644_v39 = vpop.f32.mrf.mxu0 }
 0x2e4   :  { %4171 = vst.msk [vmem:[%s7611_s3 + $0x3c] sm:$0xf] %vm4155_vm0, %v4664_v5  ;;  %v4662_v50 = vpack.c.bf16 %v3848_v9, %v3848_v9  ;;  %v3853_v59 = vmax.f32 %v3653_v46, 0.0  ;;  %v3645_v51 = vadd.f32 %v3644_v39, %v7130_v22 }
 0x2e5   :  { %v7318_v19 = vpop.f32.mrf.mxu1  ;;  %v4788_v53 = vpop.f32.mrf.mxu0 }
 0x2e6   :  { %4169 = vst.msk [vmem:[%s7611_s3 + $0x34] sm:$0xf] %vm4155_vm0, %v4662_v50  ;;  %v4667_v18 = vpack.c.bf16 %v3853_v59, %v3853_v59  ;;  %v3851_v0 = vmax.f32 %v3645_v51, 0.0  ;;  %v3656_v61 = vadd.f32 %v4788_v53, %v7148_v33 }
 0x2e7   :  { %v3456_v54 = vpop.f32.mrf.mxu1  ;;  %v3647_v36 = vpop.f32.mrf.mxu0 }
 0x2e8   :  { %4174 = vst.msk [vmem:[%s7611_s3 + $0x48] sm:$0xf] %vm4155_vm0, %v4667_v18  ;;  %v4665_v22 = vpack.c.bf16 %v3851_v0, %v3851_v0  ;;  %v3854_v26 = vmax.f32 %v3656_v61, 0.0  ;;  %v3648_v56 = vadd.f32 %v3647_v36, %v7136_v52 }
 0x2e9   :  { %v7330_v16 = vpop.f32.mrf.mxu1  ;;  %v4791_v40 = vpop.f32.mrf.mxu0 }
 0x2ea   :  { %4172 = vst.msk [vmem:[%s7611_s3 + $0x40] sm:$0xf] %vm4155_vm0, %v4665_v22  ;;  %v4668_v33 = vpack.c.bf16 %v3854_v26, %v3854_v26  ;;  %v3852_v47 = vmax.f32 %v3648_v56, 0.0  ;;  %v3669_v42 = vadd.f32 %v4791_v40, %v7166_v15 }
 0x2eb   :  { %v3461_v27 = vpop.f32.mrf.mxu1  ;;  %v3660_v44 = vpop.f32.mrf.mxu0 }
 0x2ec   :  { %4175 = vst.msk [vmem:[%s7611_s3 + $0x4c] sm:$0xf] %vm4155_vm0, %v4668_v33  ;;  %v4666_v52 = vpack.c.bf16 %v3852_v47, %v3852_v47  ;;  %v3857_v38 = vmax.f32 %v3669_v42, 0.0  ;;  %v3661_v4 = vadd.f32 %v3660_v44, %v7154_v13  ;;  %v3412_v44 = vadd.f32 %v7210_v24, %v6931_v62 }
 0x2ed   :  { %v7342_v5 = vpop.f32.mrf.mxu1  ;;  %v4792_v9 = vpop.f32.mrf.mxu0 }
 0x2ee   :  { %4173 = vst.msk [vmem:[%s7611_s3 + $0x44] sm:$0xf] %vm4155_vm0, %v4666_v52  ;;  %v4671_v15 = vpack.c.bf16 %v3857_v38, %v3857_v38  ;;  %v3855_v46 = vmax.f32 %v3661_v4, 0.0  ;;  %v3672_v11 = vadd.f32 %v4792_v9, %v7172_v10 }
 0x2ef   :  { %v3464_v39 = vpop.f32.mrf.mxu1  ;;  %v3663_v50 = vpop.f32.mrf.mxu0 }
 0x2f0   :  { %4178 = vst.msk [vmem:[%s7611_s3 + $0x58] sm:$0xf] %vm4155_vm0, %v4671_v15  ;;  %v4669_v13 = vpack.c.bf16 %v3855_v46, %v3855_v46  ;;  %v3858_v59 = vmax.f32 %v3672_v11, 0.0  ;;  %v3664_v51 = vadd.f32 %v3663_v50, %v7160_v32  ;;  %v3415_v11 = vadd.f32 %v7215_v30, %v6944_v23 }
 0x2f1   :  { %v7354_v53 = vpop.f32.mrf.mxu1  ;;  %v4795_v18 = vpop.f32.mrf.mxu0 }
 0x2f2   :  { %4176 = vst.msk [vmem:[%s7611_s3 + $0x50] sm:$0xf] %vm4155_vm0, %v4669_v13  ;;  %v4672_v10 = vpack.c.bf16 %v3858_v59, %v3858_v59  ;;  %v3856_v0 = vmax.f32 %v3664_v51, 0.0  ;;  %v3685_v61 = vadd.f32 %v4795_v18, %v7190_v41 }
 0x2f3   :  { %v3469_v54 = vpop.f32.mrf.mxu1  ;;  %v3676_v36 = vpop.f32.mrf.mxu0 }
 0x2f4   :  { %4179 = vst.msk [vmem:[%s7611_s3 + $0x5c] sm:$0xf] %vm4155_vm0, %v4672_v10  ;;  %v4670_v32 = vpack.c.bf16 %v3856_v0, %v3856_v0  ;;  %v3861_v22 = vmax.f32 %v3685_v61, 0.0  ;;  %v3677_v26 = vadd.f32 %v3676_v36, %v7178_v37  ;;  %v3428_v0 = vadd.f32 %v7234_v63, %v6977_v48 }
 0x2f5   :  { %v7366_v56 = vpop.f32.mrf.mxu1  ;;  %v4796_v40 = vpop.f32.mrf.mxu0 }
 0x2f6   :  { %4177 = vst.msk [vmem:[%s7611_s3 + $0x54] sm:$0xf] %vm4155_vm0, %v4670_v32  ;;  %v4675_v41 = vpack.c.bf16 %v3861_v22, %v3861_v22  ;;  %v3859_v33 = vmax.f32 %v3677_v26, 0.0  ;;  %v3688_v47 = vadd.f32 %v4796_v40, %v7196_v21 }
 0x2f7   :  { %v3472_v42 = vpop.f32.mrf.mxu1  ;;  %v3679_v27 = vpop.f32.mrf.mxu0 }
 0x2f8   :  { %4182 = vst.msk [vmem:[%s7611_s3 + $0x68] sm:$0xf] %vm4155_vm0, %v4675_v41  ;;  %v4673_v37 = vpack.c.bf16 %v3859_v33, %v3859_v33  ;;  %v3862_v52 = vmax.f32 %v3688_v47, 0.0  ;;  %v3680_v38 = vadd.f32 %v3679_v27, %v7184_v7  ;;  %v3431_v41 = vadd.f32 %v7246_v55, %v6989_v31 }
 0x2f9   :  { %v7380_v4 = vpop.f32.mrf.mxu1  ;;  %v4799_v9 = vpop.f32.mrf.mxu0 }
 0x2fa   :  { %4180 = vst.msk [vmem:[%s7611_s3 + $0x60] sm:$0xf] %vm4155_vm0, %v4673_v37  ;;  %v4676_v21 = vpack.c.bf16 %v3862_v52, %v3862_v52  ;;  %v3860_v15 = vmax.f32 %v3680_v38, 0.0  ;;  %v3701_v62 = vadd.f32 %v4799_v9, %v3412_v44  ;;  %v3444_v38 = vadd.f32 %v7282_v8, %v7025_v34 }
 0x2fb   :  { %v3477_v24 = vpop.f32.mrf.mxu1  ;;  %v3692_v46 = vpop.f32.mrf.mxu0 }
 0x2fc   :  { %4183 = vst.msk [vmem:[%s7611_s3 + $0x6c] sm:$0xf] %vm4155_vm0, %v4676_v21  ;;  %v4674_v7 = vpack.c.bf16 %v3860_v15, %v3860_v15  ;;  %v3865_v39 = vmax.f32 %v3701_v62, 0.0  ;;  %v3693_v50 = vadd.f32 %v3692_v46, %v7202_v43  ;;  %v3436_v24 = vadd.f32 %v7258_v14, %v7001_v6 }
 0x2fd   :  { %v7393_v13 = vpop.f32.mrf.mxu1  ;;  %v4800_v59 = vpop.f32.mrf.mxu0 }
 0x2fe   :  { %4181 = vst.msk [vmem:[%s7611_s3 + $0x64] sm:$0xf] %vm4155_vm0, %v4674_v7  ;;  %v4679_v51 = vpack.c.bf16 %v3865_v39, %v3865_v39  ;;  %v3863_v18 = vmax.f32 %v3693_v50, 0.0  ;;  %v3704_v23 = vadd.f32 %v4800_v59, %v3415_v11  ;;  %v3447_v39 = vadd.f32 %v7294_v12, %v7037_v60 }
 0x2ff   :  { %v3480_v30 = vpop.f32.mrf.mxu1  ;;  %v3695_v10 = vpop.f32.mrf.mxu0 }
 0x300   :  { %4186 = vst.msk [vmem:[%s7611_s3 + $0x78] sm:$0xf] %vm4155_vm0, %v4679_v51  ;;  %v4677_v43 = vpack.c.bf16 %v3863_v18, %v3863_v18  ;;  %v3866_v61 = vmax.f32 %v3704_v23, 0.0  ;;  %v3696_v54 = vadd.f32 %v3695_v10, %v7208_v29  ;;  %v3439_v51 = vadd.f32 %v7270_v20, %v7013_v17 }
 0x301   :  { %v7406_v36 = vpop.f32.mrf.mxu1  ;;  %v4803_v32 = vpop.f32.mrf.mxu0  ;;  %v3460_v10 = vadd.f32 %v7330_v16, %v7073_v45 }
 0x302   :  { %4184 = vst.msk [vmem:[%s7611_s3 + $0x70] sm:$0xf] %vm4155_vm0, %v4677_v43  ;;  %v4680_v22 = vpack.c.bf16 %v3866_v61, %v3866_v61  ;;  %v3864_v26 = vmax.f32 %v3696_v54, 0.0  ;;  %v3717_v48 = vadd.f32 %v4803_v32, %v3428_v0  ;;  %v3452_v54 = vadd.f32 %v7306_v2, %v7049_v3 }
 0x303   :  { %v3485_v63 = vpop.f32.mrf.mxu1  ;;  %v3708_v40 = vpop.f32.mrf.mxu0 }
 0x304   :  { %4187 = vst.msk [vmem:[%s7611_s3 + $0x7c] sm:$0xf] %vm4155_vm0, %v4680_v22  ;;  %v4678_v29 = vpack.c.bf16 %v3864_v26, %v3864_v26  ;;  %v3869_v33 = vmax.f32 %v3717_v48, 0.0  ;;  %v3709_v47 = vadd.f32 %v3708_v40, %v7221_v28  ;;  %v3463_v48 = vadd.f32 %v7342_v5, %v7085_v25 }
 0x305   :  { %v7419_v42 = vpop.f32.mrf.mxu1  ;;  %v4804_v27 = vpop.f32.mrf.mxu0 }
 0x306   :  { %4185 = vst.msk [vmem:[%s7611_s3 + $0x74] sm:$0xf] %vm4155_vm0, %v4678_v29  ;;  %v4683_v44 = vpack.c.bf16 %v3869_v33, %v3869_v33  ;;  %v3867_v37 = vmax.f32 %v3709_v47, 0.0  ;;  %v3720_v31 = vadd.f32 %v4804_v27, %v3431_v41  ;;  %v3455_v29 = vadd.f32 %v7318_v19, %v7061_v58 }
 0x307   :  { %v3488_v55 = vpop.f32.mrf.mxu1  ;;  %v3711_v52 = vpop.f32.mrf.mxu0 }
 0x308   :  { %4190 = vst.msk [vmem:[%s7611_s3 + $0x88] sm:$0xf] %vm4155_vm0, %v4683_v44  ;;  %v4681_v28 = vpack.c.bf16 %v3867_v37, %v3867_v37  ;;  %v3870_v9 = vmax.f32 %v3720_v31, 0.0  ;;  %v3712_v21 = vadd.f32 %v3711_v52, %v7226_v35  ;;  %v3476_v44 = vadd.f32 %v7380_v4, %v7115_v49  ;;  %v7687_v52 = vld [vmem:[#allocation7_spill] sm:$0xff] }
 0x309   :  { %v7432_v15 = vpop.f32.mrf.mxu1  ;;  %v4807_v62 = vpop.f32.mrf.mxu0 }
 0x30a   :  { %4188 = vst.msk [vmem:[%s7611_s3 + $0x80] sm:$0xf] %vm4155_vm0, %v4681_v28  ;;  %v4684_v34 = vpack.c.bf16 %v3870_v9, %v3870_v9  ;;  %v3868_v8 = vmax.f32 %v3712_v21, 0.0  ;;  %v3733_v46 = vadd.f32 %v4807_v62, %v3444_v38  ;;  %v3468_v38 = vadd.f32 %v7354_v53, %v7687_v52 }
 0x30b   :  { %v3493_v11 = vpop.f32.mrf.mxu1  ;;  %v3724_v7 = vpop.f32.mrf.mxu0  ;;  %v3479_v62 = vadd.f32 %v7393_v13, %v7121_v57 }
 0x30c   :  { %4191 = vst.msk [vmem:[%s7611_s3 + $0x8c] sm:$0xf] %vm4155_vm0, %v4684_v34  ;;  %v4682_v35 = vpack.c.bf16 %v3868_v8, %v3868_v8  ;;  %v3873_v6 = vmax.f32 %v3733_v46, 0.0  ;;  %v3725_v14 = vadd.f32 %v3724_v7, %v3436_v24  ;;  %v7688_v11 = vld [vmem:[#allocation15_spill] sm:$0xff] }
 0x30d   :  { %v7446_v50 = vpop.f32.mrf.mxu1  ;;  %v4808_v59 = vpop.f32.mrf.mxu0  ;;  %v3471_v7 = vadd.f32 %v7366_v56, %v7688_v11 }
 0x30e   :  { %4189 = vst.msk [vmem:[%s7611_s3 + $0x84] sm:$0xf] %vm4155_vm0, %v4682_v35  ;;  %v4687_v60 = vpack.c.bf16 %v3873_v6, %v3873_v6  ;;  %v3871_v12 = vmax.f32 %v3725_v14, 0.0  ;;  %v3736_v18 = vadd.f32 %v4808_v59, %v3447_v39  ;;  %v7689_v14 = vld [vmem:[#allocation20_spill] sm:$0xff] }
 0x30f   :  { %v3496_v23 = vpop.f32.mrf.mxu1  ;;  %v3727_v30 = vpop.f32.mrf.mxu0  ;;  %v3492_v59 = vadd.f32 %v7432_v15, %v7689_v14  ;;  %v7698_v14 = vld [vmem:[#allocation18_spill] sm:$0xff] }
 0x310   :  { %4194 = vst.msk [vmem:[%s7611_s3 + $0x98] sm:$0xf] %vm4155_vm0, %v4687_v60  ;;  %v4685_v0 = vpack.c.bf16 %v3871_v12, %v3871_v12  ;;  %v3874_v17 = vmax.f32 %v3736_v18, 0.0  ;;  %v3728_v20 = vadd.f32 %v3727_v30, %v3439_v51  ;;  %v7690_v23 = vld [vmem:[#allocation8_spill] sm:$0xff] }
 0x311   :  { %v7460_v43 = vpop.f32.mrf.mxu1  ;;  %v4811_v61 = vpop.f32.mrf.mxu0  ;;  %v3484_v30 = vadd.f32 %v7406_v36, %v7690_v23 }
 0x312   :  { %4192 = vst.msk [vmem:[%s7611_s3 + $0x90] sm:$0xf] %vm4155_vm0, %v4685_v0  ;;  %v4688_v45 = vpack.c.bf16 %v3874_v17, %v3874_v17  ;;  %v3872_v16 = vmax.f32 %v3728_v20, 0.0  ;;  %v3749_v32 = vadd.f32 %v4811_v61, %v3460_v10  ;;  %v7691_v61 = vld [vmem:[#allocation21_spill] sm:$0xff] }
 0x313   :  { %v3501_v22 = vpop.f32.mrf.mxu1  ;;  %v3740_v26 = vpop.f32.mrf.mxu0 }
 0x314   :  { %4195 = vst.msk [vmem:[%s7611_s3 + $0x9c] sm:$0xf] %vm4155_vm0, %v4688_v45  ;;  %v4686_v63 = vpack.c.bf16 %v3872_v16, %v3872_v16  ;;  %v3877_v3 = vmax.f32 %v3749_v32, 0.0  ;;  %v3741_v2 = vadd.f32 %v3740_v26, %v3452_v54  ;;  %v3495_v54 = vadd.f32 %v7446_v50, %v7691_v61  ;;  %v7692_v26 = vld [vmem:[#allocation16_spill] sm:$0xff]  ;;  %v7700_v61 = vld [vmem:[#allocation19_spill] sm:$0xff] }
 0x315   :  { %v7474_v40 = vpop.f32.mrf.mxu1  ;;  %v4812_v41 = vpop.f32.mrf.mxu0 }
 0x316   :  { %4193 = vst.msk [vmem:[%s7611_s3 + $0x94] sm:$0xf] %vm4155_vm0, %v4686_v63  ;;  %v4691_v25 = vpack.c.bf16 %v3877_v3, %v3877_v3  ;;  %v3875_v5 = vmax.f32 %v3741_v2, 0.0  ;;  %v3752_v33 = vadd.f32 %v4812_v41, %v3463_v48  ;;  %v3487_v48 = vadd.f32 %v7419_v42, %v7692_v26 }
 0x317   :  { %v3504_v47 = vpop.f32.mrf.mxu1  ;;  %v3743_v27 = vpop.f32.mrf.mxu0 }
 0x318   :  { %4198 = vst.msk [vmem:[%s7611_s3 + $0xa8] sm:$0xf] %vm4155_vm0, %v4691_v25  ;;  %v4689_v37 = vpack.c.bf16 %v3875_v5, %v3875_v5  ;;  %v3878_v58 = vmax.f32 %v3752_v33, 0.0  ;;  %v3744_v19 = vadd.f32 %v3743_v27, %v3455_v29  ;;  %v7693_v29 = vld [vmem:[#allocation24_spill] sm:$0xff] }
 0x319   :  { %v3507_v31 = vpop.f32.mrf.mxu1  ;;  %v4815_v55 = vpop.f32.mrf.mxu0 }
 0x31a   :  { %4196 = vst.msk [vmem:[%s7611_s3 + $0xa0] sm:$0xf] %vm4155_vm0, %v4689_v37  ;;  %v4692_v28 = vpack.c.bf16 %v3878_v58, %v3878_v58  ;;  %v3876_v49 = vmax.f32 %v3744_v19, 0.0  ;;  %v3765_v4 = vadd.f32 %v4815_v55, %v3476_v44  ;;  %v3508_v25 = vadd.f32 %v3507_v31, %v7693_v29  ;;  %v7694_v44 = vld [vmem:[#allocation22_spill] sm:$0xff] }
 0x31b   :  { %v3509_v9 = vpop.f32.mrf.mxu1  ;;  %v3756_v21 = vpop.f32.mrf.mxu0  ;;  %v3500_v37 = vadd.f32 %v7460_v43, %v7694_v44 }
 0x31c   :  { %4199 = vst.msk [vmem:[%s7611_s3 + $0xac] sm:$0xf] %vm4155_vm0, %v4692_v28  ;;  %v4690_v24 = vpack.c.bf16 %v3876_v49, %v3876_v49  ;;  %v3881_v53 = vmax.f32 %v3765_v4, 0.0  ;;  %v3757_v34 = vadd.f32 %v3756_v21, %v3468_v38  ;;  %v7695_v38 = vld [vmem:[#allocation17_spill] sm:$0xff] }
 0x31d   :  { %v3510_v8 = vpop.f32.mrf.mxu1  ;;  %v4816_v46 = vpop.f32.mrf.mxu0 }
 0x31e   :  { %4197 = vst.msk [vmem:[%s7611_s3 + $0xa4] sm:$0xf] %vm4155_vm0, %v4690_v24  ;;  %v4695_v39 = vpack.c.bf16 %v3881_v53, %v3881_v53  ;;  %v3879_v57 = vmax.f32 %v3757_v34, 0.0  ;;  %v3768_v13 = vadd.f32 %v4816_v46, %v3479_v62  ;;  %v3511_v28 = vadd.f32 %v3510_v8, %v7695_v38  ;;  %v7696_v62 = vld [vmem:[#allocation23_spill] sm:$0xff] }
 0x31f   :  { %v3512_v35 = vpop.f32.mrf.mxu1  ;;  %v3759_v6 = vpop.f32.mrf.mxu0  ;;  %v3503_v24 = vadd.f32 %v7474_v40, %v7696_v62 }
 0x320   :  { %4202 = vst.msk [vmem:[%s7611_s3 + $0xb8] sm:$0xf] %vm4155_vm0, %v4695_v39  ;;  %v4693_v51 = vpack.c.bf16 %v3879_v57, %v3879_v57  ;;  %v3882_v56 = vmax.f32 %v3768_v13, 0.0  ;;  %v3760_v60 = vadd.f32 %v3759_v6, %v3471_v7  ;;  %v7697_v7 = vld [vmem:[#allocation9_spill] sm:$0xff] }
 0x321   :  { %v3515_v12 = vpop.f32.mrf.mxu1  ;;  %v4819_v18 = vpop.f32.mrf.mxu0 }
 0x322   :  { %4200 = vst.msk [vmem:[%s7611_s3 + $0xb0] sm:$0xf] %vm4155_vm0, %v4693_v51  ;;  %v4696_v10 = vpack.c.bf16 %v3882_v56, %v3882_v56  ;;  %v3880_v15 = vmax.f32 %v3760_v60, 0.0  ;;  %v3781_v0 = vadd.f32 %v4819_v18, %v3492_v59  ;;  %v3516_v59 = vadd.f32 %v3515_v12, %v7698_v14 }
 0x323   :  { %v3517_v17 = vpop.f32.mrf.mxu1  ;;  %v3772_v20 = vpop.f32.mrf.mxu0 }
 0x324   :  { %4203 = vst.msk [vmem:[%s7611_s3 + $0xbc] sm:$0xf] %vm4155_vm0, %v4696_v10  ;;  %v4694_v45 = vpack.c.bf16 %v3880_v15, %v3880_v15  ;;  %v3885_v36 = vmax.f32 %v3781_v0, 0.0  ;;  %v3773_v16 = vadd.f32 %v3772_v20, %v3484_v30  ;;  %v7699_v30 = vld [vmem:[#allocation2_spill] sm:$0xff] }
 0x325   :  { %v3518_v32 = vpop.f32.mrf.mxu1  ;;  %v4820_v22 = vpop.f32.mrf.mxu0 }
 0x326   :  { %4201 = vst.msk [vmem:[%s7611_s3 + $0xb4] sm:$0xf] %vm4155_vm0, %v4694_v45  ;;  %v4699_v63 = vpack.c.bf16 %v3885_v36, %v3885_v36  ;;  %v3883_v50 = vmax.f32 %v3773_v16, 0.0  ;;  %v3784_v3 = vadd.f32 %v4820_v22, %v3495_v54  ;;  %v3519_v54 = vadd.f32 %v3518_v32, %v7700_v61 }
 0x327   :  { %v3520_v2 = vpop.f32.mrf.mxu1  ;;  %v3775_v41 = vpop.f32.mrf.mxu0 }
 0x328   :  { %4206 = vst.msk [vmem:[%s7611_s3 + $0xc8] sm:$0xf] %vm4155_vm0, %v4699_v63  ;;  %v4697_v5 = vpack.c.bf16 %v3883_v50, %v3883_v50  ;;  %v3886_v33 = vmax.f32 %v3784_v3, 0.0  ;;  %v3776_v42 = vadd.f32 %v3775_v41, %v3487_v48  ;;  %v7701_v2 = vld [vmem:[#allocation10_spill] sm:$0xff] }
 0x329   :  { %v3523_v47 = vpop.f32.mrf.mxu1  ;;  %v4823_v27 = vpop.f32.mrf.mxu0 }
 0x32a   :  { %4204 = vst.msk [vmem:[%s7611_s3 + $0xc0] sm:$0xf] %vm4155_vm0, %v4697_v5  ;;  %v4700_v58 = vpack.c.bf16 %v3886_v33, %v3886_v33  ;;  %v3884_v19 = vmax.f32 %v3776_v42, 0.0  ;;  %v3797_v31 = vadd.f32 %v4823_v27, %v3508_v25  ;;  %v3524_v39 = vadd.f32 %v3523_v47, %v7697_v7  ;;  %v7702_v5 = vld [vmem:[#allocation11_spill] sm:$0xff] }
 0x32b   :  { %v3525_v55 = vpop.f32.mrf.mxu1  ;;  %v3788_v52 = vpop.f32.mrf.mxu0 }
 0x32c   :  { %4207 = vst.msk [vmem:[%s7611_s3 + $0xcc] sm:$0xf] %vm4155_vm0, %v4700_v58  ;;  %v4698_v49 = vpack.c.bf16 %v3884_v19, %v3884_v19  ;;  %v3889_v4 = vmax.f32 %v3797_v31, 0.0  ;;  %v3789_v43 = vadd.f32 %v3788_v52, %v3500_v37  ;;  %v7703_v31 = vld [vmem:[#allocation3_spill] sm:$0xff] }
 0x32d   :  { %v3526_v9 = vpop.f32.mrf.mxu1  ;;  %v4824_v21 = vpop.f32.mrf.mxu0 }
 0x32e   :  { %4205 = vst.msk [vmem:[%s7611_s3 + $0xc4] sm:$0xf] %vm4155_vm0, %v4698_v49  ;;  %v4703_v53 = vpack.c.bf16 %v3889_v4, %v3889_v4  ;;  %v3887_v34 = vmax.f32 %v3789_v43, 0.0  ;;  %v3800_v8 = vadd.f32 %v4824_v21, %v3511_v28  ;;  %v3527_v10 = vadd.f32 %v3526_v9, %v7699_v30 }
 0x32f   :  { %v3528_v46 = vpop.f32.mrf.mxu1  ;;  %v3791_v11 = vpop.f32.mrf.mxu0 }
 0x330   :  { %4210 = vst.msk [vmem:[%s7611_s3 + $0xd8] sm:$0xf] %vm4155_vm0, %v4703_v53  ;;  %v4701_v57 = vpack.c.bf16 %v3887_v34, %v3887_v34  ;;  %v3890_v13 = vmax.f32 %v3800_v8, 0.0  ;;  %v3792_v40 = vadd.f32 %v3791_v11, %v3503_v24 }
 0x331   :  { %v3531_v35 = vpop.f32.mrf.mxu1  ;;  %v4827_v6 = vpop.f32.mrf.mxu0 }
 0x332   :  { %4208 = vst.msk [vmem:[%s7611_s3 + $0xd0] sm:$0xf] %vm4155_vm0, %v4701_v57  ;;  %v4704_v51 = vpack.c.bf16 %v3890_v13, %v3890_v13  ;;  %v3888_v56 = vmax.f32 %v3792_v40, 0.0  ;;  %v3813_v60 = vadd.f32 %v4827_v6, %v3524_v39  ;;  %v3532_v41 = vadd.f32 %v3531_v35, %v7701_v2 }
 0x333   :  { %v3533_v18 = vpop.f32.mrf.mxu1  ;;  %v3804_v23 = vpop.f32.mrf.mxu0 }
 0x334   :  { %4211 = vst.msk [vmem:[%s7611_s3 + $0xdc] sm:$0xf] %vm4155_vm0, %v4704_v51  ;;  %v4702_v15 = vpack.c.bf16 %v3888_v56, %v3888_v56  ;;  %v3893_v0 = vmax.f32 %v3813_v60, 0.0  ;;  %v3805_v12 = vadd.f32 %v3804_v23, %v3516_v59 }
 0x335   :  { %v3534_v17 = vpop.f32.mrf.mxu1  ;;  %v4828_v20 = vpop.f32.mrf.mxu0 }
 0x336   :  { %4209 = vst.msk [vmem:[%s7611_s3 + $0xd4] sm:$0xf] %vm4155_vm0, %v4702_v15  ;;  %v4707_v45 = vpack.c.bf16 %v3893_v0, %v3893_v0  ;;  %v3891_v36 = vmax.f32 %v3805_v12, 0.0  ;;  %v3816_v16 = vadd.f32 %v4828_v20, %v3527_v10  ;;  %v3535_v55 = vadd.f32 %v3534_v17, %v7703_v31 }
 0x337   :  { %v3536_v22 = vpop.f32.mrf.mxu1  ;;  %v3807_v26 = vpop.f32.mrf.mxu0 }
 0x338   :  { %4214 = vst.msk [vmem:[%s7611_s3 + $0xe8] sm:$0xf] %vm4155_vm0, %v4707_v45  ;;  %v4705_v48 = vpack.c.bf16 %v3891_v36, %v3891_v36  ;;  %v3894_v63 = vmax.f32 %v3816_v16, 0.0  ;;  %v3808_v50 = vadd.f32 %v3807_v26, %v3519_v54 }
 0x339   :  { %v3539_v3 = vpop.f32.mrf.mxu1  ;;  %v4831_v32 = vpop.f32.mrf.mxu0 }
 0x33a   :  { %4212 = vst.msk [vmem:[%s7611_s3 + $0xe0] sm:$0xf] %vm4155_vm0, %v4705_v48  ;;  %v4708_v29 = vpack.c.bf16 %v3894_v63, %v3894_v63  ;;  %v3892_v25 = vmax.f32 %v3808_v50, 0.0  ;;  %v3540_v33 = vadd.f32 %v3539_v3, %v7702_v5 }
 0x33b   :  { %v3541_v42 = vpop.f32.mrf.mxu1  ;;  %v3820_v47 = vpop.f32.mrf.mxu0 }
 0x33c   :  { %4215 = vst.msk [vmem:[%s7611_s3 + $0xec] sm:$0xf] %vm4155_vm0, %v4708_v29  ;;  %v4706_v27 = vpack.c.bf16 %v3892_v25, %v3892_v25  ;;  %v3829_v44 = vadd.f32 %v4831_v32, %v3540_v33  ;;  %v3821_v37 = vadd.f32 %v3820_v47, %v3532_v41 }
 0x33d   :  { %v3542_v58 = vpop.f32.mrf.mxu1  ;;  %v4832_v19 = vpop.f32.mrf.mxu0 }
 0x33e   :  { %4213 = vst.msk [vmem:[%s7611_s3 + $0xe4] sm:$0xf] %vm4155_vm0, %v4706_v27  ;;  %v3897_v52 = vmax.f32 %v3829_v44, 0.0  ;;  %v3895_v38 = vmax.f32 %v3821_v37, 0.0  ;;  %v3543_v28 = vadd.f32 %v3542_v58, %v7218_v1 }
 0x33f   :  { %v3544_v49 = vpop.f32.mrf.mxu1  ;;  %v3823_v4 = vpop.f32.mrf.mxu0 }
 0x340   :  { %v4711_v43 = vpack.c.bf16 %v3897_v52, %v3897_v52  ;;  %v4709_v9 = vpack.c.bf16 %v3895_v38, %v3895_v38  ;;  %v3832_v21 = vadd.f32 %v4832_v19, %v3543_v28  ;;  %v3824_v62 = vadd.f32 %v3823_v4, %v3535_v55 }
 0x342   :  { %4218 = vst.msk [vmem:[%s7611_s3 + $0xf8] sm:$0xf] %vm4155_vm0, %v4711_v43  ;;  %4216 = vst.msk [vmem:[%s7611_s3 + $0xf0] sm:$0xf] %vm4155_vm0, %v4709_v9  ;;  %v3898_v24 = vmax.f32 %v3832_v21, 0.0  ;;  %v3896_v53 = vmax.f32 %v3824_v62, 0.0 }
 0x344   :  { %v4712_v34 = vpack.c.bf16 %v3898_v24, %v3898_v24  ;;  %v4710_v1 = vpack.c.bf16 %v3896_v53, %v3896_v53 }
 0x346   :  { %4219 = vst.msk [vmem:[%s7611_s3 + $0xfc] sm:$0xf] %vm4155_vm0, %v4712_v34  ;;  %4217 = vst.msk [vmem:[%s7611_s3 + $0xf4] sm:$0xf] %vm4155_vm0, %v4710_v1 }

// kernel: autoencoder_forward.14
= control target key start
LH: loop header
LB: loop body
LE: loop exit
PB: predicated region body
PF: predicated region fallthrough
CT: control target
= control target key end

     0   :  { %s3678_s12 = smov 0   ;;  %s4613_s0 = inlined_call_operand.vmem [shape: bf16[2048,576], index: 0, kind: input, shape index: {}]   ;;  %s4614_s1 = inlined_call_operand.vmem [shape: bf16[576,32], index: 1, kind: input, shape index: {}]   ;;  %s4615_s2 = inlined_call_operand.vmem [shape: f32[1,32], index: 2, kind: input, shape index: {}]   ;;  %s4616_s3 = inlined_call_operand.vmem [shape: bf16[2048,32], index: 3, kind: output, shape index: {}]  }
   0x1 LB: > { %s2870_s13 = sadd.s32 4294967295, %s3655_s12   ;;  %p2874_p0 = scmp.ge.s32.totalorder %s3655_s12, 1  ;;  %s3655_s12 = sphi %s3678_s12, %s13_s12  }
   0x2   : > { %p139_p1 = scmp.lt.s32.totalorder %s3655_s12, 5 }
   0x4   : > { %p140_p2 = pnand %p2874_p0, %p139_p1 }
   0x6   : > { %143 = sbr.rel (%p140_p2) target bundleno = 594 (0x252), region = 32 }
   0xb   : > { %v3388_v0 = vld [vmem:[%s4614_s1 + $0x38] sm:$0xff]   ;;  %v3657_v1 = vmov 0   ;;  %s2875_s16 = sshll.u32 %s2870_s13, 6  ;;  %v3389_v2 = vld [vmem:[%s4614_s1 + $0x30] sm:$0xff]   ;;  %v3390_v3 = vld [vmem:[%s4614_s1 + $0x28] sm:$0xff]   ;;  %vm1465_vm0 = vcmask 523264  }
   0xc   : > { %1562 = vmatprep.subr.bf16.mxu0 %v3657_v1  ;;  %3346 = vmatprep.subr.bf16.mxu1 %v3657_v1  ;;  %p165_p3 = scmp.lt.s32.totalorder %s2875_s16, 255  ;;  %v3391_v4 = vld [vmem:[%s4614_s1 + $0x20] sm:$0xff]   ;;  %v3392_v5 = vld [vmem:[%s4614_s1 + $0x18] sm:$0xff]   ;;  %v3393_v7 = vld [vmem:[%s4614_s1 + $0x10] sm:$0xff]   ;;  %vm2749_vm1 = vcmask 257024  }
   0xd   : > { %1563 = vmatpush1.bf16.msra.mxu0 %v3388_v0  ;;  %3362 = vmatpush1.bf16.msra.mxu1 %v3388_v0  ;;  %v3394_v9 = vld [vmem:[%s4614_s1 + $0x8] sm:$0xff]   ;;  %v3395_v10 = vld [vmem:[%s4614_s1] sm:$0xff]   ;;  %v3396_v11 = vld [vmem:[%s4614_s1 + $0x78] sm:$0xff]  }
   0xe   : > { %1564 = vmatprep.subr.bf16.mxu0 %v3657_v1  ;;  %3347 = vmatprep.subr.bf16.mxu1 %v3657_v1  ;;  %s4650_s16 = smov (!%p165_p3, %s2875_s16), 255  ;;  %v3397_v12 = vld [vmem:[%s4614_s1 + $0x70] sm:$0xff]   ;;  %v3398_v13 = vld [vmem:[%s4614_s1 + $0x68] sm:$0xff]   ;;  %v3399_v14 = vld [vmem:[%s4614_s1 + $0x60] sm:$0xff]  }
   0xf   : > { %s3378_s23 = smul.u32 20, %s4650_s16  ;;  %v3400_v15 = vld [vmem:[%s4614_s1 + $0x58] sm:$0xff]   ;;  %v3401_v16 = vld [vmem:[%s4614_s1 + $0x50] sm:$0xff]   ;;  %v3402_v17 = vld [vmem:[%s4614_s1 + $0x48] sm:$0xff]  }
  0x10   : > { %v3403_v18 = vld [vmem:[%s4614_s1 + $0x40] sm:$0xff]   ;;  %v3410_v19 = vld [vmem:[%s4614_s1 + $0x118] sm:$0xff]   ;;  %v3459_v25 = vld [vmem:[%s4614_s1 + $0x110] sm:$0xff]  }
  0x11   : > { %1565 = vmatpush1.bf16.msra.mxu0 %v3389_v2  ;;  %3363 = vmatpush1.bf16.msra.mxu1 %v3389_v2  ;;  %s3715_s28 = scalar_lea.vmem %s4613_s0, %s3378_s23  ;;  %v3411_v22 = vld [vmem:[%s4614_s1 + $0xb8] sm:$0xff]   ;;  %v3412_v26 = vld [vmem:[%s4614_s1 + $0xb0] sm:$0xff]   ;;  %v3419_v29 = vld [vmem:[%s4614_s1 + $0xa8] sm:$0xff]  }
  0x12   : > { %1566 = vmatprep.subr.bf16.mxu0 %v3657_v1  ;;  %3348 = vmatprep.subr.bf16.mxu1 %v3657_v1  ;;  %v3406_v6 = vld [vmem:[%s3715_s28 + $0x4] ss:$20 sps:$4 sm:$0xff]   ;;  %v3404_v20 = vld [vmem:[%s3715_s28] ss:$20 sps:$4 sm:$0xff]   ;;  %v3417_v27 = vld [vmem:[%s3715_s28 + $0x28] ss:$20 sps:$4 sm:$0xff]  }
  0x13   : > { %v3409_v8 = vld [vmem:[%s3715_s28 + $0x3c4] ss:$20 sps:$4 sm:$0xff]   ;;  %1594 = vmatprep.mubr.bf16.mxu0 %v3406_v6  ;;  %v3407_v21 = vld [vmem:[%s3715_s28 + $0x3c0] ss:$20 sps:$4 sm:$0xff]   ;;  %v3418_v28 = vld [vmem:[%s3715_s28 + $0x3e8] ss:$20 sps:$4 sm:$0xff]  }
  0x14   : > { %1786 = vmatprep.mubr.bf16.mxu1 %v3409_v8  ;;  %v3413_v23 = vld [vmem:[%s3715_s28 + $0x2c] ss:$20 sps:$4 sm:$0xff]   ;;  %v3421_v31 = vld [vmem:[%s3715_s28 + $0x54] ss:$20 sps:$4 sm:$0xff]   ;;  %v3425_v34 = vld [vmem:[%s3715_s28 + $0x50] ss:$20 sps:$4 sm:$0xff]  }
  0x15   : > { %1567 = vmatpush1.bf16.msra.mxu0 %v3390_v3  ;;  %3364 = vmatpush1.bf16.msra.mxu1 %v3390_v3  ;;  %v3415_v24 = vld [vmem:[%s3715_s28 + $0x3ec] ss:$20 sps:$4 sm:$0xff]   ;;  %v3423_v32 = vld [vmem:[%s3715_s28 + $0x414] ss:$20 sps:$4 sm:$0xff]   ;;  %v3426_v35 = vld [vmem:[%s3715_s28 + $0x410] ss:$20 sps:$4 sm:$0xff]  }
  0x16   : > { %1568 = vmatprep.subr.bf16.mxu0 %v3657_v1  ;;  %3349 = vmatprep.subr.bf16.mxu1 %v3657_v1  ;;  %v3500_v30 = vld [vmem:[%s4614_s1 + $0x108] sm:$0xff]   ;;  %v3420_v33 = vld [vmem:[%s4614_s1 + $0xa0] sm:$0xff]   ;;  %v3427_v36 = vld [vmem:[%s4614_s1 + $0x98] sm:$0xff]  }
  0x17   : > { %v3429_v37 = vld [vmem:[%s3715_s28 + $0x7c] ss:$20 sps:$4 sm:$0xff]   ;;  %v3433_v40 = vld [vmem:[%s3715_s28 + $0x78] ss:$20 sps:$4 sm:$0xff]   ;;  %v3537_v44 = vld [vmem:[%s4614_s1 + $0x100] sm:$0xff]  }
  0x18   : > { %v3431_v38 = vld [vmem:[%s3715_s28 + $0x43c] ss:$20 sps:$4 sm:$0xff]   ;;  %v3434_v41 = vld [vmem:[%s3715_s28 + $0x438] ss:$20 sps:$4 sm:$0xff]   ;;  %v3436_v46 = vld [vmem:[%s4614_s1 + $0x80] sm:$0xff]  }
  0x19   : > { %1569 = vmatpush1.bf16.msra.mxu0 %v3391_v4  ;;  %3365 = vmatpush1.bf16.msra.mxu1 %v3391_v4  ;;  %v3428_v39 = vld [vmem:[%s4614_s1 + $0x90] sm:$0xff]   ;;  %v3435_v42 = vld [vmem:[%s4614_s1 + $0x88] sm:$0xff]   ;;  %v3437_v43 = vld [vmem:[%s3715_s28 + $0xa4] ss:$20 sps:$4 sm:$0xff]  }
  0x1a   : > { %1570 = vmatprep.subr.bf16.mxu0 %v3657_v1  ;;  %3350 = vmatprep.subr.bf16.mxu1 %v3657_v1  ;;  %v3439_v45 = vld [vmem:[%s3715_s28 + $0x464] ss:$20 sps:$4 sm:$0xff]   ;;  %v3441_v47 = vld [vmem:[%s3715_s28 + $0xa0] ss:$20 sps:$4 sm:$0xff]   ;;  %v3449_v53 = vld [vmem:[%s3715_s28 + $0xc8] ss:$20 sps:$4 sm:$0xff]  }
  0x1b   : > { %v3442_v48 = vld [vmem:[%s3715_s28 + $0x460] ss:$20 sps:$4 sm:$0xff]   ;;  %v3443_v49 = vld [vmem:[%s4614_s1 + $0xf8] sm:$0xff]   ;;  %v3451_v55 = vld [vmem:[%s4614_s1 + $0xe8] sm:$0xff]  }
  0x1c   : > { %v3445_v50 = vld [vmem:[%s3715_s28 + $0xcc] ss:$20 sps:$4 sm:$0xff]   ;;  %v3444_v52 = vld [vmem:[%s4614_s1 + $0xf0] sm:$0xff]   ;;  %v3450_v54 = vld [vmem:[%s3715_s28 + $0x488] ss:$20 sps:$4 sm:$0xff]  }
  0x1d   : > { %1571 = vmatpush1.bf16.msra.mxu0 %v3392_v5  ;;  %3366 = vmatpush1.bf16.msra.mxu1 %v3392_v5  ;;  %v3447_v51 = vld [vmem:[%s3715_s28 + $0x48c] ss:$20 sps:$4 sm:$0xff]   ;;  %v3453_v56 = vld [vmem:[%s3715_s28 + $0xf4] ss:$20 sps:$4 sm:$0xff]   ;;  %v3457_v59 = vld [vmem:[%s3715_s28 + $0xf0] ss:$20 sps:$4 sm:$0xff]  }
  0x1e   : > { %1572 = vmatprep.subr.bf16.mxu0 %v3657_v1  ;;  %3351 = vmatprep.subr.bf16.mxu1 %v3657_v1  ;;  %v3455_v57 = vld [vmem:[%s3715_s28 + $0x4b4] ss:$20 sps:$4 sm:$0xff]   ;;  %v3452_v58 = vld [vmem:[%s4614_s1 + $0xe0] sm:$0xff]   ;;  %v3460_v61 = vld [vmem:[%s4614_s1 + $0xd8] sm:$0xff]  }
  0x1f   : > { %v3458_v60 = vld [vmem:[%s3715_s28 + $0x4b0] ss:$20 sps:$4 sm:$0xff]   ;;  %v3466_v2 = vld [vmem:[%s3715_s28 + $0x118] ss:$20 sps:$4 sm:$0xff]   ;;  %v3472_v8 = vld [vmem:[%s3715_s28 + $0x8] ss:$20 sps:$4 sm:$0xff]  }
  0x20   : > { %v3462_v62 = vld [vmem:[%s3715_s28 + $0x11c] ss:$20 sps:$4 sm:$0xff]   ;;  %v3467_v3 = vld [vmem:[%s3715_s28 + $0x4d8] ss:$20 sps:$4 sm:$0xff]  }
  0x21   : > { %1573 = vmatpush1.bf16.msra.mxu0 %v3393_v7  ;;  %3367 = vmatpush1.bf16.msra.mxu1 %v3393_v7  ;;  %v3464_v63 = vld [vmem:[%s3715_s28 + $0x4dc] ss:$20 sps:$4 sm:$0xff]   ;;  %v3468_v4 = vld [vmem:[%s4614_s1 + $0xc8] sm:$0xff]   ;;  %v3470_v5 = vld [vmem:[%s3715_s28 + $0x144] ss:$20 sps:$4 sm:$0xff]  }
  0x22   : > { %1574 = vmatprep.subr.bf16.mxu0 %v3657_v1  ;;  %3352 = vmatprep.subr.bf16.mxu1 %v3657_v1  ;;  %v3461_v0 = vld [vmem:[%s4614_s1 + $0xd0] sm:$0xff]   ;;  %v3474_v6 = vld [vmem:[%s3715_s28 + $0xc] ss:$20 sps:$4 sm:$0xff]  }
  0x23   : > { %v3469_v7 = vld [vmem:[%s4614_s1 + $0xc0] sm:$0xff]  }
  0x25   : > { %1575 = vmatpush1.bf16.msra.mxu0 %v3394_v9  ;;  %3368 = vmatpush1.bf16.msra.mxu1 %v3394_v9  ;;  %v3475_v9 = vld [vmem:[%s3715_s28 + $0x140] ss:$20 sps:$4 sm:$0xff]  }
  0x26   : > { %1576 = vmatprep.subr.bf16.mxu0 %v3657_v1  ;;  %3353 = vmatprep.subr.bf16.mxu1 %v3657_v1 }
  0x29   : > { %1577 = vmatpush1.bf16.msra.mxu0 %v3395_v10  ;;  %3369 = vmatpush1.bf16.msra.mxu1 %v3395_v10  ;;  %v3476_v10 = vld [vmem:[%s3715_s28 + $0x16c] ss:$20 sps:$4 sm:$0xff]  }
  0x2a   : > { %1578 = vmatprep.subr.bf16.mxu0 %v3657_v1  ;;  %3354 = vmatprep.subr.bf16.mxu1 %v3657_v1 }
  0x2d   : > { %1579 = vmatpush2.bf16.msra.mxu0 %v3396_v11  ;;  %3370 = vmatpush2.bf16.msra.mxu1 %v3396_v11  ;;  %v3478_v11 = vld [vmem:[%s3715_s28 + $0x34] ss:$20 sps:$4 sm:$0xff]  }
  0x2e   : > { %1580 = vmatprep.subr.bf16.mxu0 %v3657_v1  ;;  %3355 = vmatprep.subr.bf16.mxu1 %v3657_v1 }
  0x31   : > { %1581 = vmatpush2.bf16.msra.mxu0 %v3397_v12  ;;  %3371 = vmatpush2.bf16.msra.mxu1 %v3397_v12  ;;  %v3480_v12 = vld [vmem:[%s3715_s28 + $0x168] ss:$20 sps:$4 sm:$0xff]  }
  0x32   : > { %1582 = vmatprep.subr.bf16.mxu0 %v3657_v1  ;;  %3356 = vmatprep.subr.bf16.mxu1 %v3657_v1 }
  0x35   : > { %1583 = vmatpush2.bf16.msra.mxu0 %v3398_v13  ;;  %3372 = vmatpush2.bf16.msra.mxu1 %v3398_v13  ;;  %v3481_v13 = vld [vmem:[%s3715_s28 + $0x30] ss:$20 sps:$4 sm:$0xff]  }
  0x36   : > { %1584 = vmatprep.subr.bf16.mxu0 %v3657_v1  ;;  %3357 = vmatprep.subr.bf16.mxu1 %v3657_v1 }
  0x39   : > { %1585 = vmatpush2.bf16.msra.mxu0 %v3399_v14  ;;  %3373 = vmatpush2.bf16.msra.mxu1 %v3399_v14  ;;  %v3482_v14 = vld [vmem:[%s3715_s28 + $0x194] ss:$20 sps:$4 sm:$0xff]  }
  0x3a   : > { %1586 = vmatprep.subr.bf16.mxu0 %v3657_v1  ;;  %3358 = vmatprep.subr.bf16.mxu1 %v3657_v1 }
  0x3d   : > { %1587 = vmatpush2.bf16.msra.mxu0 %v3400_v15  ;;  %3374 = vmatpush2.bf16.msra.mxu1 %v3400_v15  ;;  %v3486_v15 = vld [vmem:[%s3715_s28 + $0x190] ss:$20 sps:$4 sm:$0xff]  }
  0x3e   : > { %1588 = vmatprep.subr.bf16.mxu0 %v3657_v1  ;;  %3359 = vmatprep.subr.bf16.mxu1 %v3657_v1 }
  0x41   : > { %1589 = vmatpush2.bf16.msra.mxu0 %v3401_v16  ;;  %3375 = vmatpush2.bf16.msra.mxu1 %v3401_v16  ;;  %v3487_v16 = vld [vmem:[%s3715_s28 + $0x58] ss:$20 sps:$4 sm:$0xff]  }
  0x42   : > { %1590 = vmatprep.subr.bf16.mxu0 %v3657_v1  ;;  %3360 = vmatprep.subr.bf16.mxu1 %v3657_v1 }
  0x45   : > { %1591 = vmatpush2.bf16.msra.mxu0 %v3402_v17  ;;  %3376 = vmatpush2.bf16.msra.mxu1 %v3402_v17  ;;  %v3488_v17 = vld [vmem:[%s3715_s28 + $0x1bc] ss:$20 sps:$4 sm:$0xff]  }
  0x46   : > { %1592 = vmatprep.subr.bf16.mxu0 %v3657_v1  ;;  %3361 = vmatprep.subr.bf16.mxu1 %v3657_v1 }
  0x49   : > { %1593 = vmatpush2.bf16.msra.mxu0 %v3403_v18  ;;  %3377 = vmatpush2.bf16.msra.mxu1 %v3403_v18  ;;  %v3490_v18 = vld [vmem:[%s3715_s28 + $0x84] ss:$20 sps:$4 sm:$0xff]  }
  0x4a   : > { %1851 = vmatprep.subr.bf16.mxu1 %v3657_v1  ;;  %3274 = vmatprep.subr.bf16.mxu0 %v3410_v19 }
  0x4c   : > { %1595 = vmatmul.mubr.bf16.vlgmr.msra.gmra.mxu0 %v3404_v20  ;;  %1787 = vmatmul.mubr.bf16.vlgmr.msra.gmra.mxu1 %v3407_v21  ;;  %v3493_v20 = vld [vmem:[%s3715_s28 + $0x80] ss:$20 sps:$4 sm:$0xff]   ;;  %v3494_v21 = vld [vmem:[%s3715_s28 + $0x1e4] ss:$20 sps:$4 sm:$0xff]  }
  0x4d   : > { %1852 = vmatpush1.bf16.msra.mxu1 %v3411_v22  ;;  %3275 = vmatpush3.bf16.msra.mxu0 %v3410_v19  ;;  %v3492_v19 = vld [vmem:[%s3715_s28 + $0x1b8] ss:$20 sps:$4 sm:$0xff]  }
  0x4e   : > { %1853 = vmatprep.subr.bf16.mxu1 %v3657_v1  ;;  %1602 = vmatprep.mubr.bf16.mxu0 %v3413_v23  ;;  %v3496_v22 = vld [vmem:[%s3715_s28 + $0xac] ss:$20 sps:$4 sm:$0xff]  }
  0x4f   : > { %1794 = vmatprep.mubr.bf16.mxu1 %v3415_v24  ;;  %3276 = vmatprep.subr.bf16.mxu0 %v3459_v25  ;;  %v3498_v23 = vld [vmem:[%s3715_s28 + $0x1e0] ss:$20 sps:$4 sm:$0xff]   ;;  %v3499_v24 = vld [vmem:[%s3715_s28 + $0xa8] ss:$20 sps:$4 sm:$0xff]  }
  0x51   : > { %1854 = vmatpush1.bf16.msra.mxu1 %v3412_v26  ;;  %3277 = vmatpush3.bf16.msra.mxu0 %v3459_v25  ;;  %v3501_v25 = vld [vmem:[%s3715_s28 + $0x20c] ss:$20 sps:$4 sm:$0xff]   ;;  %v3503_v26 = vld [vmem:[%s3715_s28 + $0xd4] ss:$20 sps:$4 sm:$0xff]  }
  0x52   : > { %1855 = vmatprep.subr.bf16.mxu1 %v3657_v1  ;;  %3278 = vmatprep.subr.bf16.mxu0 %v3500_v30 }
  0x54   : > { %1603 = vmatmul.mubr.bf16.gmra.mxu0 %v3417_v27  ;;  %1795 = vmatmul.mubr.bf16.gmra.mxu1 %v3418_v28  ;;  %v3505_v27 = vld [vmem:[%s3715_s28 + $0x208] ss:$20 sps:$4 sm:$0xff]   ;;  %v3506_v28 = vld [vmem:[%s3715_s28 + $0xd0] ss:$20 sps:$4 sm:$0xff]  }
  0x55   : > { %1856 = vmatpush1.bf16.msra.mxu1 %v3419_v29  ;;  %1610 = vmatprep.mubr.bf16.mxu0 %v3421_v31  ;;  %v3507_v29 = vld [vmem:[%s3715_s28 + $0x234] ss:$20 sps:$4 sm:$0xff]   ;;  %v3511_v31 = vld [vmem:[%s3715_s28 + $0x230] ss:$20 sps:$4 sm:$0xff]  }
  0x56   : > { %1857 = vmatprep.subr.bf16.mxu1 %v3657_v1  ;;  %1802 = vmatprep.mubr.bf16.mxu1 %v3423_v32  ;;  %v3512_v32 = vld [vmem:[%s3715_s28 + $0xf8] ss:$20 sps:$4 sm:$0xff]  }
  0x57   : > { %3279 = vmatpush3.bf16.msra.mxu0 %v3500_v30  ;;  %v3509_v30 = vld [vmem:[%s3715_s28 + $0xfc] ss:$20 sps:$4 sm:$0xff]  }
  0x58   : > { %3280 = vmatprep.subr.bf16.mxu0 %v3537_v44 }
  0x59   : > { %1858 = vmatpush1.bf16.msra.mxu1 %v3420_v33  ;;  %v3513_v33 = vld [vmem:[%s3715_s28 + $0x25c] ss:$20 sps:$4 sm:$0xff]  }
  0x5a   : > { %1859 = vmatprep.subr.bf16.mxu1 %v3657_v1 }
  0x5b   : > { %3281 = vmatpush3.bf16.msra.mxu0 %v3537_v44  ;;  %v3530_v44 = vld [vmem:[%s3715_s28 + $0x170] ss:$20 sps:$4 sm:$0xff]  }
  0x5c   : > { %1611 = vmatmul.mubr.bf16.gmra.mxu0 %v3425_v34  ;;  %1803 = vmatmul.mubr.bf16.gmra.mxu1 %v3426_v35  ;;  %v3515_v34 = vld [vmem:[%s3715_s28 + $0x124] ss:$20 sps:$4 sm:$0xff]  }
  0x5d   : > { %1860 = vmatpush1.bf16.msra.mxu1 %v3427_v36  ;;  %1618 = vmatprep.mubr.bf16.mxu0 %v3429_v37  ;;  %v3517_v35 = vld [vmem:[%s3715_s28 + $0x258] ss:$20 sps:$4 sm:$0xff]   ;;  %v3518_v36 = vld [vmem:[%s3715_s28 + $0x120] ss:$20 sps:$4 sm:$0xff]  }
  0x5e   : > { %1861 = vmatprep.subr.bf16.mxu1 %v3657_v1  ;;  %1810 = vmatprep.mubr.bf16.mxu1 %v3431_v38  ;;  %v3519_v37 = vld [vmem:[%s3715_s28 + $0x284] ss:$20 sps:$4 sm:$0xff]   ;;  %v3521_v38 = vld [vmem:[%s3715_s28 + $0x14c] ss:$20 sps:$4 sm:$0xff]  }
  0x61   : > { %1862 = vmatpush1.bf16.msra.mxu1 %v3428_v39  ;;  %v3523_v39 = vld [vmem:[%s3715_s28 + $0x280] ss:$20 sps:$4 sm:$0xff]  }
  0x62   : > { %1863 = vmatprep.subr.bf16.mxu1 %v3657_v1 }
  0x64   : > { %1619 = vmatmul.mubr.bf16.gmra.mxu0 %v3433_v40  ;;  %1811 = vmatmul.mubr.bf16.gmra.mxu1 %v3434_v41  ;;  %v3524_v40 = vld [vmem:[%s3715_s28 + $0x148] ss:$20 sps:$4 sm:$0xff]   ;;  %v3525_v41 = vld [vmem:[%s3715_s28 + $0x2ac] ss:$20 sps:$4 sm:$0xff]  }
  0x65   : > { %1864 = vmatpush1.bf16.msra.mxu1 %v3435_v42  ;;  %1626 = vmatprep.mubr.bf16.mxu0 %v3437_v43  ;;  %v3527_v42 = vld [vmem:[%s3715_s28 + $0x174] ss:$20 sps:$4 sm:$0xff]  }
  0x66   : > { %1865 = vmatprep.subr.bf16.mxu1 %v3657_v1  ;;  %1818 = vmatprep.mubr.bf16.mxu1 %v3439_v45  ;;  %v3529_v43 = vld [vmem:[%s3715_s28 + $0x2a8] ss:$20 sps:$4 sm:$0xff]  }
  0x67   : > { %v3531_v45 = vld [vmem:[%s3715_s28 + $0x2d4] ss:$20 sps:$4 sm:$0xff]  }
  0x69   : > { %1866 = vmatpush1.bf16.msra.mxu1 %v3436_v46  ;;  %v3533_v46 = vld [vmem:[%s3715_s28 + $0x19c] ss:$20 sps:$4 sm:$0xff]  }
  0x6a   : > { %1867 = vmatprep.subr.bf16.mxu1 %v3657_v1 }
  0x6c   : > { %1627 = vmatmul.mubr.bf16.gmra.mxu0 %v3441_v47  ;;  %1819 = vmatmul.mubr.bf16.gmra.mxu1 %v3442_v48  ;;  %v3535_v47 = vld [vmem:[%s3715_s28 + $0x2d0] ss:$20 sps:$4 sm:$0xff]   ;;  %v3536_v48 = vld [vmem:[%s3715_s28 + $0x198] ss:$20 sps:$4 sm:$0xff]  }
  0x6d   : > { %1868 = vmatpush2.bf16.msra.mxu1 %v3443_v49  ;;  %1634 = vmatprep.mubr.bf16.mxu0 %v3445_v50  ;;  %v3538_v49 = vld [vmem:[%s3715_s28 + $0x2fc] ss:$20 sps:$4 sm:$0xff]   ;;  %v3540_v50 = vld [vmem:[%s3715_s28 + $0x1c4] ss:$20 sps:$4 sm:$0xff]  }
  0x6e   : > { %1869 = vmatprep.subr.bf16.mxu1 %v3657_v1  ;;  %1826 = vmatprep.mubr.bf16.mxu1 %v3447_v51  ;;  %v3542_v51 = vld [vmem:[%s3715_s28 + $0x2f8] ss:$20 sps:$4 sm:$0xff]  }
  0x71   : > { %1870 = vmatpush2.bf16.msra.mxu1 %v3444_v52  ;;  %v3543_v52 = vld [vmem:[%s3715_s28 + $0x1c0] ss:$20 sps:$4 sm:$0xff]  }
  0x72   : > { %1871 = vmatprep.subr.bf16.mxu1 %v3657_v1 }
  0x74   : > { %1635 = vmatmul.mubr.bf16.gmra.mxu0 %v3449_v53  ;;  %1827 = vmatmul.mubr.bf16.gmra.mxu1 %v3450_v54  ;;  %v3544_v53 = vld [vmem:[%s3715_s28 + $0x324] ss:$20 sps:$4 sm:$0xff]   ;;  %v3546_v54 = vld [vmem:[%s3715_s28 + $0x1ec] ss:$20 sps:$4 sm:$0xff]  }
  0x75   : > { %1872 = vmatpush2.bf16.msra.mxu1 %v3451_v55  ;;  %1642 = vmatprep.mubr.bf16.mxu0 %v3453_v56  ;;  %v3548_v55 = vld [vmem:[%s3715_s28 + $0x320] ss:$20 sps:$4 sm:$0xff]   ;;  %v3549_v56 = vld [vmem:[%s3715_s28 + $0x1e8] ss:$20 sps:$4 sm:$0xff]  }
  0x76   : > { %1873 = vmatprep.subr.bf16.mxu1 %v3657_v1  ;;  %1834 = vmatprep.mubr.bf16.mxu1 %v3455_v57  ;;  %v3550_v57 = vld [vmem:[%s3715_s28 + $0x34c] ss:$20 sps:$4 sm:$0xff]  }
  0x79   : > { %1874 = vmatpush2.bf16.msra.mxu1 %v3452_v58  ;;  %v3552_v58 = vld [vmem:[%s3715_s28 + $0x214] ss:$20 sps:$4 sm:$0xff]  }
  0x7a   : > { %1875 = vmatprep.subr.bf16.mxu1 %v3657_v1 }
  0x7c   : > { %1643 = vmatmul.mubr.bf16.gmra.mxu0 %v3457_v59  ;;  %1835 = vmatmul.mubr.bf16.gmra.mxu1 %v3458_v60  ;;  %v3554_v59 = vld [vmem:[%s3715_s28 + $0x348] ss:$20 sps:$4 sm:$0xff]   ;;  %v3555_v60 = vld [vmem:[%s3715_s28 + $0x210] ss:$20 sps:$4 sm:$0xff]  }
  0x7d   : > { %1876 = vmatpush2.bf16.msra.mxu1 %v3460_v61  ;;  %1650 = vmatprep.mubr.bf16.mxu0 %v3462_v62  ;;  %v3556_v61 = vld [vmem:[%s3715_s28 + $0x374] ss:$20 sps:$4 sm:$0xff]   ;;  %v3558_v62 = vld [vmem:[%s3715_s28 + $0x23c] ss:$20 sps:$4 sm:$0xff]  }
  0x7e   : > { %1877 = vmatprep.subr.bf16.mxu1 %v3657_v1  ;;  %1842 = vmatprep.mubr.bf16.mxu1 %v3464_v63  ;;  %v3560_v63 = vld [vmem:[%s3715_s28 + $0x370] ss:$20 sps:$4 sm:$0xff]  }
  0x81   : > { %1878 = vmatpush2.bf16.msra.mxu1 %v3461_v0  ;;  %v3561_v0 = vld [vmem:[%s3715_s28 + $0x238] ss:$20 sps:$4 sm:$0xff]  }
  0x82   : > { %1879 = vmatprep.subr.bf16.mxu1 %v3657_v1 }
  0x84   : > { %1651 = vmatmul.mubr.bf16.gmra.mxu0 %v3466_v2  ;;  %1843 = vmatmul.mubr.bf16.gmra.mxu1 %v3467_v3  ;;  %v3562_v2 = vld [vmem:[%s3715_s28 + $0x39c] ss:$20 sps:$4 sm:$0xff]   ;;  %v3564_v3 = vld [vmem:[%s3715_s28 + $0x264] ss:$20 sps:$4 sm:$0xff]  }
  0x85   : > { %1880 = vmatpush2.bf16.msra.mxu1 %v3468_v4  ;;  %1658 = vmatprep.mubr.bf16.mxu0 %v3470_v5  ;;  %v3566_v4 = vld [vmem:[%s3715_s28 + $0x398] ss:$20 sps:$4 sm:$0xff]   ;;  %v3567_v5 = vld [vmem:[%s3715_s28 + $0x260] ss:$20 sps:$4 sm:$0xff]  }
  0x86   : > { %1881 = vmatprep.subr.bf16.mxu1 %v3657_v1  ;;  %1883 = vmatprep.mubr.bf16.mxu1 %v3474_v6  ;;  %v3484_v1 = vld [vmem:[%s3715_s28 + $0x5c] ss:$20 sps:$4 sm:$0xff]   ;;  %v3568_v6 = vld [vmem:[%s3715_s28 + $0x28c] ss:$20 sps:$4 sm:$0xff]  }
  0x89   : > { %1882 = vmatpush2.bf16.msra.mxu1 %v3469_v7  ;;  %v3570_v7 = vld [vmem:[%s3715_s28 + $0x10] ss:$20 sps:$4 sm:$0xff]  }
  0x8c   : > { %1659 = vmatmul.mubr.bf16.gmra.mxu0 %v3475_v9  ;;  %1884 = vmatmul.mubr.bf16.vlgmr.msra.gmra.mxu1 %v3472_v8  ;;  %v3571_v8 = vld [vmem:[%s3715_s28 + $0x288] ss:$20 sps:$4 sm:$0xff]   ;;  %v3572_v9 = vld [vmem:[%s3715_s28 + $0x38] ss:$20 sps:$4 sm:$0xff]  }
  0x8d   : > { %1666 = vmatprep.mubr.bf16.mxu0 %v3476_v10  ;;  %1891 = vmatprep.mubr.bf16.mxu1 %v3478_v11  ;;  %v3573_v10 = vld [vmem:[%s3715_s28 + $0x2b4] ss:$20 sps:$4 sm:$0xff]  }
  0x8e   : > { %v3575_v11 = vld [vmem:[%s3715_s28 + $0x60] ss:$20 sps:$4 sm:$0xff]  }
  0x94   : > { %1667 = vmatmul.mubr.bf16.gmra.mxu0 %v3480_v12  ;;  %1892 = vmatmul.mubr.bf16.gmra.mxu1 %v3481_v13 }
  0x95   : > { %1674 = vmatprep.mubr.bf16.mxu0 %v3482_v14  ;;  %1899 = vmatprep.mubr.bf16.mxu1 %v3484_v1 }
  0x9c   : > { %1675 = vmatmul.mubr.bf16.gmra.mxu0 %v3486_v15  ;;  %1900 = vmatmul.mubr.bf16.gmra.mxu1 %v3487_v16 }
  0x9d   : > { %1682 = vmatprep.mubr.bf16.mxu0 %v3488_v17  ;;  %1907 = vmatprep.mubr.bf16.mxu1 %v3490_v18  ;;  %v3576_v17 = vld [vmem:[%s3715_s28 + $0x2b0] ss:$20 sps:$4 sm:$0xff]   ;;  %v3577_v18 = vld [vmem:[%s3715_s28 + $0x88] ss:$20 sps:$4 sm:$0xff]  }
  0xa4   : > { %1683 = vmatmul.mubr.bf16.gmra.mxu0 %v3492_v19  ;;  %1908 = vmatmul.mubr.bf16.gmra.mxu1 %v3493_v20  ;;  %v3578_v19 = vld [vmem:[%s3715_s28 + $0x2dc] ss:$20 sps:$4 sm:$0xff]  }
  0xa5   : > { %1690 = vmatprep.mubr.bf16.mxu0 %v3494_v21  ;;  %1915 = vmatprep.mubr.bf16.mxu1 %v3496_v22  ;;  %v3580_v20 = vld [vmem:[%s3715_s28 + $0xb0] ss:$20 sps:$4 sm:$0xff]  }
  0xac   : > { %1691 = vmatmul.mubr.bf16.gmra.mxu0 %v3498_v23  ;;  %1916 = vmatmul.mubr.bf16.gmra.mxu1 %v3499_v24 }
  0xad   : > { %1698 = vmatprep.mubr.bf16.mxu0 %v3501_v25  ;;  %1923 = vmatprep.mubr.bf16.mxu1 %v3503_v26 }
  0xb4   : > { %1699 = vmatmul.mubr.bf16.gmra.mxu0 %v3505_v27  ;;  %1924 = vmatmul.mubr.bf16.gmra.mxu1 %v3506_v28 }
  0xb5   : > { %1706 = vmatprep.mubr.bf16.mxu0 %v3507_v29  ;;  %1931 = vmatprep.mubr.bf16.mxu1 %v3509_v30  ;;  %v3581_v29 = vld [vmem:[%s3715_s28 + $0x2d8] ss:$20 sps:$4 sm:$0xff]  }
  0xb6   : > { %v3582_v30 = vld [vmem:[%s3715_s28 + $0xd8] ss:$20 sps:$4 sm:$0xff]  }
  0xbc   : > { %1707 = vmatmul.mubr.bf16.gmra.mxu0 %v3511_v31  ;;  %1932 = vmatmul.mubr.bf16.gmra.mxu1 %v3512_v32  ;;  %v3583_v31 = vld [vmem:[%s3715_s28 + $0x304] ss:$20 sps:$4 sm:$0xff]   ;;  %v3585_v32 = vld [vmem:[%s3715_s28 + $0x100] ss:$20 sps:$4 sm:$0xff]  }
  0xbd   : > { %1714 = vmatprep.mubr.bf16.mxu0 %v3513_v33  ;;  %1939 = vmatprep.mubr.bf16.mxu1 %v3515_v34 }
  0xc4   : > { %1715 = vmatmul.mubr.bf16.gmra.mxu0 %v3517_v35  ;;  %1940 = vmatmul.mubr.bf16.gmra.mxu1 %v3518_v36 }
  0xc5   : > { %1722 = vmatprep.mubr.bf16.mxu0 %v3519_v37  ;;  %1947 = vmatprep.mubr.bf16.mxu1 %v3521_v38 }
  0xcc   : > { %1723 = vmatmul.mubr.bf16.gmra.mxu0 %v3523_v39  ;;  %1948 = vmatmul.mubr.bf16.gmra.mxu1 %v3524_v40 }
  0xcd   : > { %1730 = vmatprep.mubr.bf16.mxu0 %v3525_v41  ;;  %1955 = vmatprep.mubr.bf16.mxu1 %v3527_v42  ;;  %v3586_v41 = vld [vmem:[%s3715_s28 + $0x300] ss:$20 sps:$4 sm:$0xff]   ;;  %v3587_v42 = vld [vmem:[%s3715_s28 + $0x128] ss:$20 sps:$4 sm:$0xff]  }
  0xd4   : > { %1731 = vmatmul.mubr.bf16.gmra.mxu0 %v3529_v43  ;;  %1956 = vmatmul.mubr.bf16.gmra.mxu1 %v3530_v44  ;;  %v3590_v43 = vld [vmem:[%s3715_s28 + $0x32c] ss:$20 sps:$4 sm:$0xff]   ;;  %v3591_v44 = vld [vmem:[%s3715_s28 + $0x150] ss:$20 sps:$4 sm:$0xff]  }
  0xd5   : > { %1738 = vmatprep.mubr.bf16.mxu0 %v3531_v45  ;;  %1963 = vmatprep.mubr.bf16.mxu1 %v3533_v46 }
  0xdc   : > { %1739 = vmatmul.mubr.bf16.gmra.mxu0 %v3535_v47  ;;  %1964 = vmatmul.mubr.bf16.gmra.mxu1 %v3536_v48 }
  0xdd   : > { %1746 = vmatprep.mubr.bf16.mxu0 %v3538_v49  ;;  %1971 = vmatprep.mubr.bf16.mxu1 %v3540_v50 }
  0xe4   : > { %1747 = vmatmul.mubr.bf16.gmra.mxu0 %v3542_v51  ;;  %1972 = vmatmul.mubr.bf16.gmra.mxu1 %v3543_v52 }
  0xe5   : > { %1754 = vmatprep.mubr.bf16.mxu0 %v3544_v53  ;;  %1979 = vmatprep.mubr.bf16.mxu1 %v3546_v54  ;;  %v3588_v53 = vld [vmem:[%s3715_s28 + $0x328] ss:$20 sps:$4 sm:$0xff]   ;;  %v3592_v54 = vld [vmem:[%s3715_s28 + $0x178] ss:$20 sps:$4 sm:$0xff]  }
  0xec   : > { %1755 = vmatmul.mubr.bf16.gmra.mxu0 %v3548_v55  ;;  %1980 = vmatmul.mubr.bf16.gmra.mxu1 %v3549_v56  ;;  %v3595_v55 = vld [vmem:[%s3715_s28 + $0x354] ss:$20 sps:$4 sm:$0xff]  }
  0xed   : > { %1762 = vmatprep.mubr.bf16.mxu0 %v3550_v57  ;;  %1987 = vmatprep.mubr.bf16.mxu1 %v3552_v58  ;;  %v3596_v56 = vld [vmem:[%s3715_s28 + $0x1a0] ss:$20 sps:$4 sm:$0xff]  }
  0xf4   : > { %1763 = vmatmul.mubr.bf16.gmra.mxu0 %v3554_v59  ;;  %1988 = vmatmul.mubr.bf16.gmra.mxu1 %v3555_v60 }
  0xf5   : > { %1770 = vmatprep.mubr.bf16.mxu0 %v3556_v61  ;;  %1995 = vmatprep.mubr.bf16.mxu1 %v3558_v62 }
  0xfc   : > { %1771 = vmatmul.mubr.bf16.gmra.mxu0 %v3560_v63  ;;  %1996 = vmatmul.mubr.bf16.gmra.mxu1 %v3561_v0 }
  0xfd   : > { %1778 = vmatprep.mubr.bf16.mxu0 %v3562_v2  ;;  %2003 = vmatprep.mubr.bf16.mxu1 %v3564_v3  ;;  %v3593_v2 = vld [vmem:[%s3715_s28 + $0x350] ss:$20 sps:$4 sm:$0xff]   ;;  %v3597_v3 = vld [vmem:[%s3715_s28 + $0x1c8] ss:$20 sps:$4 sm:$0xff]  }
 0x104   : > { %1779 = vmatmul.mubr.bf16.gmra.mxu0 %v3566_v4  ;;  %2004 = vmatmul.mubr.bf16.gmra.mxu1 %v3567_v5  ;;  %v3600_v4 = vld [vmem:[%s3715_s28 + $0x37c] ss:$20 sps:$4 sm:$0xff]  }
 0x105   : > { %2011 = vmatprep.mubr.bf16.mxu1 %v3568_v6  ;;  %3282 = vmatprep.mubr.msk.bf16.mxu0 %vm1465_vm0, %v3570_v7  ;;  %v3601_v5 = vld [vmem:[%s3715_s28 + $0x1f0] ss:$20 sps:$4 sm:$0xff]  }
 0x10c   : > { %v3953_v12 = vpop.f32.mrf.mxu0  ;;  %v3955_v13 = vpop.f32.mrf.mxu1  ;;  %2012 = vmatmul.mubr.bf16.gmra.mxu1 %v3571_v8  ;;  %3283 = vmatmul.mubr.msk.bf16.vlgmr.msra.gmra.mxu0 %vm1465_vm0, %v3572_v9 }
 0x10d   : > { %4617 = vst [vmem:[#allocation2_spill] sm:$0xff] %v3955_v13  ;;  %2019 = vmatprep.mubr.bf16.mxu1 %v3573_v10  ;;  %3286 = vmatprep.mubr.msk.bf16.mxu0 %vm1465_vm0, %v3575_v11 }
 0x10e   : > { %v1598_v14 = vpop.f32.mrf.mxu0  ;;  %v1790_v1 = vpop.f32.mrf.mxu1 }
 0x110   : > { %v3959_v15 = vpop.f32.mrf.mxu0  ;;  %v3961_v16 = vpop.f32.mrf.mxu1 }
 0x111   : > { %4618 = vst [vmem:[#allocation3_spill] sm:$0xff] %v3961_v16 }
 0x112   : > { %v1601_v21 = vpop.f32.mrf.mxu0  ;;  %v1793_v22 = vpop.f32.mrf.mxu1 }
 0x114   : > { %v3967_v23 = vpop.f32.mrf.mxu0  ;;  %v3969_v24 = vpop.f32.mrf.mxu1  ;;  %2020 = vmatmul.mubr.bf16.gmra.mxu1 %v3576_v17  ;;  %3287 = vmatmul.mubr.msk.bf16.gmra.mxu0 %vm1465_vm0, %v3577_v18  ;;  %v3598_v17 = vld [vmem:[%s3715_s28 + $0x378] ss:$20 sps:$4 sm:$0xff]  }
 0x115   : > { %4619 = vst [vmem:[#allocation4_spill] sm:$0xff] %v3969_v24  ;;  %2027 = vmatprep.mubr.bf16.mxu1 %v3578_v19  ;;  %3290 = vmatprep.mubr.msk.bf16.mxu0 %vm1465_vm0, %v3580_v20  ;;  %v3602_v18 = vld [vmem:[%s3715_s28 + $0x218] ss:$20 sps:$4 sm:$0xff]   ;;  %v3606_v20 = vld [vmem:[%s3715_s28 + $0x240] ss:$20 sps:$4 sm:$0xff]  }
 0x116   : > { %v1606_v25 = vpop.f32.mrf.mxu0  ;;  %v1798_v26 = vpop.f32.mrf.mxu1  ;;  %v3605_v19 = vld [vmem:[%s3715_s28 + $0x3a4] ss:$20 sps:$4 sm:$0xff]  }
 0x118   : > { %v3973_v27 = vpop.f32.mrf.mxu0  ;;  %v3975_v28 = vpop.f32.mrf.mxu1 }
 0x119   : > { %4620 = vst [vmem:[#allocation5_spill] sm:$0xff] %v3975_v28 }
 0x11a   : > { %v1609_v33 = vpop.f32.mrf.mxu0  ;;  %v1801_v34 = vpop.f32.mrf.mxu1 }
 0x11b   : > { %v3603_v33 = vld [vmem:[%s3715_s28 + $0x3a0] ss:$20 sps:$4 sm:$0xff]   ;;  %v3607_v34 = vld [vmem:[%s3715_s28 + $0x268] ss:$20 sps:$4 sm:$0xff]  }
 0x11c   : > { %v3981_v35 = vpop.f32.mrf.mxu0  ;;  %v3983_v36 = vpop.f32.mrf.mxu1  ;;  %2028 = vmatmul.mubr.bf16.gmra.mxu1 %v3581_v29  ;;  %3291 = vmatmul.mubr.msk.bf16.gmra.mxu0 %vm1465_vm0, %v3582_v30 }
 0x11d   : > { %4621 = vst [vmem:[#allocation6_spill] sm:$0xff] %v3983_v36  ;;  %2035 = vmatprep.mubr.bf16.mxu1 %v3583_v31  ;;  %3294 = vmatprep.mubr.msk.bf16.mxu0 %vm1465_vm0, %v3585_v32 }
 0x11e   : > { %v1614_v37 = vpop.f32.mrf.mxu0  ;;  %v1806_v38 = vpop.f32.mrf.mxu1 }
 0x11f   : > { %v3610_v37 = vld [vmem:[%s3715_s28 + $0x3cc] ss:$20 sps:$4 sm:$0xff]   ;;  %v3611_v38 = vld [vmem:[%s3715_s28 + $0x290] ss:$20 sps:$4 sm:$0xff]  }
 0x120   : > { %v3987_v39 = vpop.f32.mrf.mxu0  ;;  %v3989_v40 = vpop.f32.mrf.mxu1 }
 0x121   : > { %4622 = vst [vmem:[#allocation7_spill] sm:$0xff] %v3989_v40 }
 0x122   : > { %v1617_v45 = vpop.f32.mrf.mxu0  ;;  %v1809_v46 = vpop.f32.mrf.mxu1 }
 0x124   : > { %v3995_v47 = vpop.f32.mrf.mxu0  ;;  %v3997_v48 = vpop.f32.mrf.mxu1  ;;  %2036 = vmatmul.mubr.bf16.gmra.mxu1 %v3586_v41  ;;  %3295 = vmatmul.mubr.msk.bf16.gmra.mxu0 %vm1465_vm0, %v3587_v42 }
 0x125   : > { %4623 = vst [vmem:[#allocation8_spill] sm:$0xff] %v3997_v48  ;;  %2043 = vmatprep.mubr.bf16.mxu1 %v3590_v43  ;;  %3298 = vmatprep.mubr.msk.bf16.mxu0 %vm1465_vm0, %v3591_v44 }
 0x126   : > { %v1622_v49 = vpop.f32.mrf.mxu0  ;;  %v1814_v50 = vpop.f32.mrf.mxu1 }
 0x127   : > { %v4060_v49 = vld [vmem:[%s4615_s2] ss:$0 sm:$0xff] }
 0x128   : > { %v4001_v51 = vpop.f32.mrf.mxu0  ;;  %v4003_v52 = vpop.f32.mrf.mxu1 }
 0x129   : > { %4624 = vst [vmem:[#allocation9_spill] sm:$0xff] %v4003_v52 }
 0x12a   : > { %v1625_v57 = vpop.f32.mrf.mxu0  ;;  %v1817_v58 = vpop.f32.mrf.mxu1 }
 0x12b   : > { %v3616_v57 = vld [vmem:[%s3715_s28 + $0x2e0] ss:$20 sps:$4 sm:$0xff]  }
 0x12c   : > { %v4009_v59 = vpop.f32.mrf.mxu0  ;;  %v4011_v60 = vpop.f32.mrf.mxu1  ;;  %2044 = vmatmul.mubr.bf16.gmra.mxu1 %v3588_v53  ;;  %3299 = vmatmul.mubr.msk.bf16.gmra.mxu0 %vm1465_vm0, %v3592_v54  ;;  %v3608_v54 = vld [vmem:[%s3715_s28 + $0x3c8] ss:$20 sps:$4 sm:$0xff]  }
 0x12d   : > { %4625 = vst [vmem:[#allocation10_spill] sm:$0xff] %v4011_v60  ;;  %2051 = vmatprep.mubr.bf16.mxu1 %v3595_v55  ;;  %3302 = vmatprep.mubr.msk.bf16.mxu0 %vm1465_vm0, %v3596_v56  ;;  %v3612_v55 = vld [vmem:[%s3715_s28 + $0x2b8] ss:$20 sps:$4 sm:$0xff]   ;;  %v3615_v56 = vld [vmem:[%s3715_s28 + $0x3f4] ss:$20 sps:$4 sm:$0xff]  }
 0x12e   : > { %v1630_v61 = vpop.f32.mrf.mxu0  ;;  %v1822_v62 = vpop.f32.mrf.mxu1 }
 0x12f   : > { %v1597_v62 = vadd.f32 %v4060_v49, %v3953_v12 }
 0x130   : > { %v4015_v63 = vpop.f32.mrf.mxu0  ;;  %v4017_v0 = vpop.f32.mrf.mxu1 }
 0x131   : > { %4626 = vst [vmem:[#allocation11_spill] sm:$0xff] %v4017_v0 }
 0x132   : > { %v1633_v6 = vpop.f32.mrf.mxu0  ;;  %v1825_v7 = vpop.f32.mrf.mxu1 }
 0x133   : > { %v1600_v7 = vadd.f32 %v4060_v49, %v3959_v15 }
 0x134   : > { %v4023_v8 = vpop.f32.mrf.mxu0  ;;  %v4025_v9 = vpop.f32.mrf.mxu1  ;;  %2052 = vmatmul.mubr.bf16.gmra.mxu1 %v3593_v2  ;;  %3303 = vmatmul.mubr.msk.bf16.gmra.mxu0 %vm1465_vm0, %v3597_v3 }
 0x135   : > { %4627 = vst [vmem:[#allocation12_spill] sm:$0xff] %v4025_v9  ;;  %2059 = vmatprep.mubr.bf16.mxu1 %v3600_v4  ;;  %3306 = vmatprep.mubr.msk.bf16.mxu0 %vm1465_vm0, %v3601_v5 }
 0x136   : > { %v1638_v10 = vpop.f32.mrf.mxu0  ;;  %v1830_v11 = vpop.f32.mrf.mxu1 }
 0x137   : > { %v3613_v11 = vld [vmem:[%s3715_s28 + $0x3f0] ss:$20 sps:$4 sm:$0xff]  }
 0x138   : > { %v4029_v14 = vpop.f32.mrf.mxu0  ;;  %v4031_v1 = vpop.f32.mrf.mxu1 }
 0x139   : > { %4628 = vst [vmem:[#allocation13_spill] sm:$0xff] %v4031_v1 }
 0x13a   : > { %v1641_v21 = vpop.f32.mrf.mxu0  ;;  %v1833_v22 = vpop.f32.mrf.mxu1 }
 0x13c   : > { %v4037_v25 = vpop.f32.mrf.mxu0  ;;  %v4039_v26 = vpop.f32.mrf.mxu1  ;;  %2060 = vmatmul.mubr.bf16.gmra.mxu1 %v3598_v17  ;;  %3307 = vmatmul.mubr.msk.bf16.gmra.mxu0 %vm1465_vm0, %v3602_v18  ;;  %v3617_v17 = vld [vmem:[%s3715_s28 + $0x308] ss:$20 sps:$4 sm:$0xff]  }
 0x13d   : > { %4629 = vst [vmem:[#allocation14_spill] sm:$0xff] %v4039_v26  ;;  %2067 = vmatprep.mubr.bf16.mxu1 %v3605_v19  ;;  %3310 = vmatprep.mubr.msk.bf16.mxu0 %vm1465_vm0, %v3606_v20  ;;  %v3620_v19 = vld [vmem:[%s3715_s28 + $0x41c] ss:$20 sps:$4 sm:$0xff]  }
 0x13e   : > { %v1646_v29 = vpop.f32.mrf.mxu0  ;;  %v1838_v30 = vpop.f32.mrf.mxu1  ;;  %v3621_v20 = vld [vmem:[%s3715_s28 + $0x330] ss:$20 sps:$4 sm:$0xff]  }
 0x13f   : > { %v1605_v29 = vadd.f32 %v4060_v49, %v3967_v23 }
 0x140   : > { %v4043_v31 = vpop.f32.mrf.mxu0  ;;  %v4045_v32 = vpop.f32.mrf.mxu1 }
 0x141   : > { %4630 = vst [vmem:[#allocation15_spill] sm:$0xff] %v4045_v32 }
 0x142   : > { %v1649_v41 = vpop.f32.mrf.mxu0  ;;  %v1841_v42 = vpop.f32.mrf.mxu1 }
 0x143   : > { %v3618_v42 = vld [vmem:[%s3715_s28 + $0x418] ss:$20 sps:$4 sm:$0xff]  }
 0x144   : > { %v4051_v43 = vpop.f32.mrf.mxu0  ;;  %v4053_v44 = vpop.f32.mrf.mxu1  ;;  %2068 = vmatmul.mubr.bf16.gmra.mxu1 %v3603_v33  ;;  %3311 = vmatmul.mubr.msk.bf16.gmra.mxu0 %vm1465_vm0, %v3607_v34 }
 0x145   : > { %4631 = vst [vmem:[#allocation16_spill] sm:$0xff] %v4053_v44  ;;  %2075 = vmatprep.mubr.bf16.mxu1 %v3610_v37  ;;  %3314 = vmatprep.mubr.msk.bf16.mxu0 %vm1465_vm0, %v3611_v38  ;;  %v1608_v38 = vadd.f32 %v4060_v49, %v3973_v27 }
 0x146   : > { %v1654_v45 = vpop.f32.mrf.mxu0  ;;  %v1846_v46 = vpop.f32.mrf.mxu1 }
 0x147   : > { %v3622_v45 = vld [vmem:[%s3715_s28 + $0x358] ss:$20 sps:$4 sm:$0xff]  }
 0x148   : > { %v4062_v50 = vpop.f32.mrf.mxu0  ;;  %v4064_v53 = vpop.f32.mrf.mxu1 }
 0x149   : > { %4632 = vst [vmem:[#allocation17_spill] sm:$0xff] %v4064_v53 }
 0x14a   : > { %v1657_v58 = vpop.f32.mrf.mxu0  ;;  %v1849_v61 = vpop.f32.mrf.mxu1 }
 0x14b   : > { %v1613_v58 = vadd.f32 %v4060_v49, %v3981_v35 }
 0x14c   : > { %v4072_v2 = vpop.f32.mrf.mxu0  ;;  %v1885_v3 = vpop.f32.mrf.mxu1  ;;  %2076 = vmatmul.mubr.bf16.gmra.mxu1 %v3608_v54  ;;  %3315 = vmatmul.mubr.msk.bf16.gmra.mxu0 %vm1465_vm0, %v3612_v55  ;;  %v3625_v54 = vld [vmem:[%s3715_s28 + $0x444] ss:$20 sps:$4 sm:$0xff]   ;;  %v3626_v55 = vld [vmem:[%s3715_s28 + $0x380] ss:$20 sps:$4 sm:$0xff]  }
 0x14d   : > { %v4075_v4 = vadd.f32 %v1885_v3, %v1597_v62  ;;  %2083 = vmatprep.mubr.bf16.mxu1 %v3615_v56  ;;  %3318 = vmatprep.mubr.msk.bf16.mxu0 %vm1465_vm0, %v3616_v57 }
 0x14e   : > { %v1662_v5 = vpop.f32.mrf.mxu0  ;;  %v1887_v6 = vpop.f32.mrf.mxu1 }
 0x14f   : > { %v1616_v6 = vadd.f32 %v4060_v49, %v3987_v39 }
 0x150   : > { %v4080_v10 = vpop.f32.mrf.mxu0  ;;  %v1888_v12 = vpop.f32.mrf.mxu1 }
 0x151   : > { %v4084_v18 = vadd.f32 %v1888_v12, %v1600_v7  ;;  %v3623_v12 = vld [vmem:[%s3715_s28 + $0x440] ss:$20 sps:$4 sm:$0xff]  }
 0x152   : > { %v1665_v21 = vpop.f32.mrf.mxu0  ;;  %v1890_v22 = vpop.f32.mrf.mxu1 }
 0x154   : > { %v4090_v30 = vpop.f32.mrf.mxu0  ;;  %v1893_v15 = vpop.f32.mrf.mxu1  ;;  %2084 = vmatmul.mubr.bf16.gmra.mxu1 %v3613_v11  ;;  %3319 = vmatmul.mubr.msk.bf16.gmra.mxu0 %vm1465_vm0, %v3617_v17  ;;  %v3627_v11 = vld [vmem:[%s3715_s28 + $0x3a8] ss:$20 sps:$4 sm:$0xff]  }
 0x155   : > { %v4093_v33 = vadd.f32 %v1893_v15, %v1605_v29  ;;  %2091 = vmatprep.mubr.bf16.mxu1 %v3620_v19  ;;  %3322 = vmatprep.mubr.msk.bf16.mxu0 %vm1465_vm0, %v3621_v20  ;;  %v3630_v19 = vld [vmem:[%s3715_s28 + $0x46c] ss:$20 sps:$4 sm:$0xff]   ;;  %v3631_v20 = vld [vmem:[%s3715_s28 + $0x3d0] ss:$20 sps:$4 sm:$0xff]   ;;  %v1621_v29 = vadd.f32 %v4060_v49, %v3995_v47 }
 0x156   : > { %v1670_v34 = vpop.f32.mrf.mxu0  ;;  %v1895_v37 = vpop.f32.mrf.mxu1 }
 0x158   : > { %v4098_v41 = vpop.f32.mrf.mxu0  ;;  %v1896_v23 = vpop.f32.mrf.mxu1 }
 0x159   : > { %v4102_v46 = vadd.f32 %v1896_v23, %v1608_v38  ;;  %v1624_v23 = vadd.f32 %v4060_v49, %v4001_v51 }
 0x15a   : > { %v1673_v56 = vpop.f32.mrf.mxu0  ;;  %v1898_v57 = vpop.f32.mrf.mxu1 }
 0x15b   : > { %v3635_v56 = vld [vmem:[%s3715_s28 + $0x494] ss:$20 sps:$4 sm:$0xff]  }
 0x15c   : > { %v4108_v61 = vpop.f32.mrf.mxu0  ;;  %v1901_v27 = vpop.f32.mrf.mxu1  ;;  %2092 = vmatmul.mubr.bf16.gmra.mxu1 %v3618_v42  ;;  %3323 = vmatmul.mubr.msk.bf16.gmra.mxu0 %vm1465_vm0, %v3622_v45  ;;  %v3628_v45 = vld [vmem:[%s3715_s28 + $0x468] ss:$20 sps:$4 sm:$0xff]   ;;  %v3636_v57 = vld [vmem:[%s3715_s28 + $0x420] ss:$20 sps:$4 sm:$0xff]  }
 0x15d   : > { %v4111_v62 = vadd.f32 %v1901_v27, %v1613_v58  ;;  %2099 = vmatprep.mubr.bf16.mxu1 %v3625_v54  ;;  %3326 = vmatprep.mubr.msk.bf16.mxu0 %vm1465_vm0, %v3626_v55  ;;  %v3632_v54 = vld [vmem:[%s3715_s28 + $0x3f8] ss:$20 sps:$4 sm:$0xff]  }
 0x15e   : > { %v1678_v3 = vpop.f32.mrf.mxu0  ;;  %v1903_v5 = vpop.f32.mrf.mxu1 }
 0x15f   : > { %v1629_v3 = vadd.f32 %v4060_v49, %v4009_v59 }
 0x160   : > { %v4116_v7 = vpop.f32.mrf.mxu0  ;;  %v1904_v35 = vpop.f32.mrf.mxu1 }
 0x161   : > { %v4120_v17 = vadd.f32 %v1904_v35, %v1616_v6 }
 0x162   : > { %v1681_v21 = vpop.f32.mrf.mxu0  ;;  %v1906_v22 = vpop.f32.mrf.mxu1 }
 0x163   : > { %v3637_v21 = vld [vmem:[%s3715_s28 + $0x448] ss:$20 sps:$4 sm:$0xff]  }
 0x164   : > { %v4126_v15 = vpop.f32.mrf.mxu0  ;;  %v1909_v39 = vpop.f32.mrf.mxu1  ;;  %2100 = vmatmul.mubr.bf16.gmra.mxu1 %v3623_v12  ;;  %3327 = vmatmul.mubr.msk.bf16.gmra.mxu0 %vm1465_vm0, %v3627_v11  ;;  %v1632_v11 = vadd.f32 %v4060_v49, %v4015_v63 }
 0x165   : > { %v4129_v34 = vadd.f32 %v1909_v39, %v1621_v29  ;;  %2107 = vmatprep.mubr.bf16.mxu1 %v3630_v19  ;;  %3330 = vmatprep.mubr.msk.bf16.mxu0 %vm1465_vm0, %v3631_v20  ;;  %v3633_v20 = vld [vmem:[%s3715_s28 + $0x490] ss:$20 sps:$4 sm:$0xff]  }
 0x166   : > { %v1686_v37 = vpop.f32.mrf.mxu0  ;;  %v1911_v38 = vpop.f32.mrf.mxu1  ;;  %v3640_v29 = vld [vmem:[%s3715_s28 + $0x4bc] ss:$20 sps:$4 sm:$0xff]  }
 0x167   : > { %v3641_v39 = vld [vmem:[%s3715_s28 + $0x470] ss:$20 sps:$4 sm:$0xff]  }
 0x168   : > { %v4134_v42 = vpop.f32.mrf.mxu0  ;;  %v1912_v47 = vpop.f32.mrf.mxu1 }
 0x169   : > { %v4138_v55 = vadd.f32 %v1912_v47, %v1624_v23  ;;  %v1637_v23 = vadd.f32 %v4060_v49, %v4023_v8 }
 0x16a   : > { %v1689_v58 = vpop.f32.mrf.mxu0  ;;  %v1914_v27 = vpop.f32.mrf.mxu1 }
 0x16b   : > { %v3638_v27 = vld [vmem:[%s3715_s28 + $0x4b8] ss:$20 sps:$4 sm:$0xff]  }
 0x16c   : > { %v4144_v5 = vpop.f32.mrf.mxu0  ;;  %v1917_v51 = vpop.f32.mrf.mxu1  ;;  %2108 = vmatmul.mubr.bf16.gmra.mxu1 %v3628_v45  ;;  %3331 = vmatmul.mubr.msk.bf16.gmra.mxu0 %vm1465_vm0, %v3632_v54 }
 0x16d   : > { %v4147_v6 = vadd.f32 %v1917_v51, %v1629_v3  ;;  %2115 = vmatprep.mubr.bf16.mxu1 %v3635_v56  ;;  %3334 = vmatprep.mubr.msk.bf16.mxu0 %vm1465_vm0, %v3636_v57  ;;  %v1640_v57 = vadd.f32 %v4060_v49, %v4029_v14  ;;  %v3642_v3 = vld [vmem:[%s3715_s28 + $0x498] ss:$20 sps:$4 sm:$0xff]  }
 0x16e   : > { %v1694_v35 = vpop.f32.mrf.mxu0  ;;  %v1919_v12 = vpop.f32.mrf.mxu1 }
 0x16f   : > { %v3645_v35 = vld [vmem:[%s3715_s28 + $0x4e4] ss:$20 sps:$4 sm:$0xff]   ;;  %v3646_v12 = vld [vmem:[%s3715_s28 + $0x4c0] ss:$20 sps:$4 sm:$0xff]  }
 0x170   : > { %v4152_v19 = vpop.f32.mrf.mxu0  ;;  %v1920_v59 = vpop.f32.mrf.mxu1 }
 0x171   : > { %v4156_v22 = vadd.f32 %v1920_v59, %v1632_v11 }
 0x172   : > { %v1697_v37 = vpop.f32.mrf.mxu0  ;;  %v1922_v38 = vpop.f32.mrf.mxu1 }
 0x173   : > { %v1648_v38 = vadd.f32 %v4060_v49, %v4043_v31 }
 0x174   : > { %v4162_v47 = vpop.f32.mrf.mxu0  ;;  %v1925_v63 = vpop.f32.mrf.mxu1  ;;  %2116 = vmatmul.mubr.bf16.gmra.mxu1 %v3633_v20  ;;  %3335 = vmatmul.mubr.msk.bf16.gmra.mxu0 %vm1465_vm0, %v3637_v21  ;;  %v1645_v20 = vadd.f32 %v4060_v49, %v4037_v25  ;;  %v3643_v25 = vld [vmem:[%s3715_s28 + $0x4e0] ss:$20 sps:$4 sm:$0xff]  }
 0x175   : > { %v4165_v45 = vadd.f32 %v1925_v63, %v1637_v23  ;;  %2123 = vmatprep.mubr.bf16.mxu1 %v3640_v29  ;;  %3338 = vmatprep.mubr.msk.bf16.mxu0 %vm1465_vm0, %v3641_v39 }
 0x176   : > { %v1702_v54 = vpop.f32.mrf.mxu0  ;;  %v1927_v56 = vpop.f32.mrf.mxu1 }
 0x177   : > { %v3647_v54 = vld [vmem:[%s3715_s28 + $0x4e8] ss:$20 sps:$4 sm:$0xff]   ;;  %s2878_s28 = sshll.u32 %s4650_s16, 2 }
 0x178   : > { %v4170_v58 = vpop.f32.mrf.mxu0  ;;  %v1928_v8 = vpop.f32.mrf.mxu1  ;;  %s4311_s22 = scalar_lea.vmem %s4616_s3, %s2878_s28 }
 0x179   : > { %v4174_v51 = vadd.f32 %v1928_v8, %v1640_v57 }
 0x17a   : > { %v1705_v11 = vpop.f32.mrf.mxu0  ;;  %v1930_v59 = vpop.f32.mrf.mxu1 }
 0x17b   : > { %v1656_v59 = vadd.f32 %v4060_v49, %v4062_v50  ;;  %v1664_v50 = vadd.f32 %v4060_v49, %v4080_v10  ;;  %v1672_v10 = vadd.f32 %v4060_v49, %v4098_v41  ;;  %v1680_v41 = vadd.f32 %v4060_v49, %v4116_v7 }
 0x17c   : > { %v4180_v21 = vpop.f32.mrf.mxu0  ;;  %v1933_v29 = vpop.f32.mrf.mxu1  ;;  %2124 = vmatmul.mubr.bf16.gmra.mxu1 %v3638_v27  ;;  %3339 = vmatmul.mubr.msk.bf16.gmra.mxu0 %vm1465_vm0, %v3642_v3  ;;  %v1653_v27 = vadd.f32 %v4060_v49, %v4051_v43  ;;  %v1688_v7 = vadd.f32 %v4060_v49, %v4134_v42  ;;  %v1696_v42 = vadd.f32 %v4060_v49, %v4152_v19 }
 0x17d   : > { %v4183_v14 = vadd.f32 %v1933_v29, %v1645_v20  ;;  %2131 = vmatprep.mubr.bf16.mxu1 %v3645_v35  ;;  %3342 = vmatprep.mubr.msk.bf16.mxu0 %vm1465_vm0, %v3646_v12  ;;  %v1704_v19 = vadd.f32 %v4060_v49, %v4170_v58 }
 0x17e   : > { %v1710_v39 = vpop.f32.mrf.mxu0  ;;  %v1935_v37 = vpop.f32.mrf.mxu1 }
 0x180   : > { %v4188_v23 = vpop.f32.mrf.mxu0  ;;  %v1936_v63 = vpop.f32.mrf.mxu1 }
 0x181   : > { %v4192_v56 = vadd.f32 %v1936_v63, %v1648_v38  ;;  %v1661_v38 = vadd.f32 %v4060_v49, %v4072_v2  ;;  %v1669_v2 = vadd.f32 %v4060_v49, %v4090_v30  ;;  %v1677_v30 = vadd.f32 %v4060_v49, %v4108_v61 }
 0x182   : > { %v1713_v57 = vpop.f32.mrf.mxu0  ;;  %v1938_v8 = vpop.f32.mrf.mxu1  ;;  %v1685_v61 = vadd.f32 %v4060_v49, %v4126_v15  ;;  %v1693_v15 = vadd.f32 %v4060_v49, %v4144_v5  ;;  %v1701_v5 = vadd.f32 %v4060_v49, %v4162_v47  ;;  %v1709_v47 = vadd.f32 %v4060_v49, %v4180_v21 }
 0x183   : > { %v1712_v58 = vadd.f32 %v4060_v49, %v4188_v23 }
 0x184   : > { %v4196_v3 = vpop.f32.mrf.mxu0  ;;  %v1941_v35 = vpop.f32.mrf.mxu1  ;;  %2132 = vmatmul.mubr.bf16.gmra.mxu1 %v3643_v25  ;;  %3343 = vmatmul.mubr.msk.bf16.gmra.mxu0 %vm1465_vm0, %v3647_v54 }
 0x185   : > { %v4199_v12 = vadd.f32 %v1941_v35, %v1653_v27 }
 0x186   : > { %v1718_v31 = vpop.f32.mrf.mxu0  ;;  %v1943_v11 = vpop.f32.mrf.mxu1 }
 0x188   : > { %v4203_v20 = vpop.f32.mrf.mxu0  ;;  %v1944_v29 = vpop.f32.mrf.mxu1 }
 0x189   : > { %v4205_v39 = vadd.f32 %v1944_v29, %v1656_v59 }
 0x18a   : > { %v1721_v37 = vpop.f32.mrf.mxu0  ;;  %v1946_v43 = vpop.f32.mrf.mxu1 }
 0x18c   : > { %v4209_v63 = vpop.f32.mrf.mxu0  ;;  %v1949_v25 = vpop.f32.mrf.mxu1 }
 0x18d   : > { %v4211_v54 = vadd.f32 %v1949_v25, %v1661_v38  ;;  %v1725_v48 = vadd.f32 %v4060_v49, %v4209_v63 }
 0x18e   : > { %v1726_v57 = vpop.f32.mrf.mxu0  ;;  %v1951_v8 = vpop.f32.mrf.mxu1 }
 0x190   : > { %v4215_v27 = vpop.f32.mrf.mxu0  ;;  %v1952_v35 = vpop.f32.mrf.mxu1 }
 0x191   : > { %v4217_v31 = vadd.f32 %v1952_v35, %v1664_v50 }
 0x192   : > { %v1729_v11 = vpop.f32.mrf.mxu0  ;;  %v1954_v59 = vpop.f32.mrf.mxu1 }
 0x194   : > { %v4221_v29 = vpop.f32.mrf.mxu0  ;;  %v1957_v37 = vpop.f32.mrf.mxu1 }
 0x195   : > { %v4223_v43 = vadd.f32 %v1957_v37, %v1669_v2 }
 0x196   : > { %v1734_v38 = vpop.f32.mrf.mxu0  ;;  %v1959_v25 = vpop.f32.mrf.mxu1 }
 0x198   : > { %v4227_v57 = vpop.f32.mrf.mxu0  ;;  %v1960_v8 = vpop.f32.mrf.mxu1 }
 0x199   : > { %v4229_v50 = vadd.f32 %v1960_v8, %v1672_v10 }
 0x19a   : > { %v1737_v35 = vpop.f32.mrf.mxu0  ;;  %v1962_v11 = vpop.f32.mrf.mxu1 }
 0x19c   : > { %v4233_v59 = vpop.f32.mrf.mxu0  ;;  %v1965_v53 = vpop.f32.mrf.mxu1 }
 0x19d   : > { %v4235_v2 = vadd.f32 %v1965_v53, %v1677_v30 }
 0x19e   : > { %v1742_v37 = vpop.f32.mrf.mxu0  ;;  %v1967_v38 = vpop.f32.mrf.mxu1 }
 0x1a0   : > { %v4239_v25 = vpop.f32.mrf.mxu0  ;;  %v1968_v32 = vpop.f32.mrf.mxu1 }
 0x1a1   : > { %v4241_v10 = vadd.f32 %v1968_v32, %v1680_v41 }
 0x1a2   : > { %v1745_v8 = vpop.f32.mrf.mxu0  ;;  %v1970_v35 = vpop.f32.mrf.mxu1 }
 0x1a4   : > { %v4245_v11 = vpop.f32.mrf.mxu0  ;;  %v1973_v44 = vpop.f32.mrf.mxu1 }
 0x1a5   : > { %v4247_v53 = vadd.f32 %v1973_v44, %v1685_v61 }
 0x1a6   : > { %v1750_v30 = vpop.f32.mrf.mxu0  ;;  %v1975_v37 = vpop.f32.mrf.mxu1 }
 0x1a8   : > { %v4251_v38 = vpop.f32.mrf.mxu0  ;;  %v1976_v26 = vpop.f32.mrf.mxu1 }
 0x1a9   : > { %v4253_v32 = vadd.f32 %v1976_v26, %v1688_v7 }
 0x1aa   : > { %v1753_v41 = vpop.f32.mrf.mxu0  ;;  %v1978_v8 = vpop.f32.mrf.mxu1 }
 0x1ac   : > { %v4257_v35 = vpop.f32.mrf.mxu0  ;;  %v1981_v0 = vpop.f32.mrf.mxu1 }
 0x1ad   : > { %v4259_v44 = vadd.f32 %v1981_v0, %v1693_v15 }
 0x1ae   : > { %v1758_v61 = vpop.f32.mrf.mxu0  ;;  %v1983_v30 = vpop.f32.mrf.mxu1 }
 0x1b0   : > { %v4263_v37 = vpop.f32.mrf.mxu0  ;;  %v1984_v1 = vpop.f32.mrf.mxu1 }
 0x1b1   : > { %v4265_v26 = vadd.f32 %v1984_v1, %v1696_v42 }
 0x1b2   : > { %v1761_v7 = vpop.f32.mrf.mxu0  ;;  %v1986_v41 = vpop.f32.mrf.mxu1 }
 0x1b4   : > { %v4269_v8 = vpop.f32.mrf.mxu0  ;;  %v1989_v60 = vpop.f32.mrf.mxu1 }
 0x1b5   : > { %v4271_v0 = vadd.f32 %v1989_v60, %v1701_v5 }
 0x1b6   : > { %v1766_v15 = vpop.f32.mrf.mxu0  ;;  %v1991_v61 = vpop.f32.mrf.mxu1 }
 0x1b8   : > { %v4275_v30 = vpop.f32.mrf.mxu0  ;;  %v1992_v9 = vpop.f32.mrf.mxu1 }
 0x1b9   : > { %v4277_v1 = vadd.f32 %v1992_v9, %v1704_v19 }
 0x1ba   : > { %v1769_v42 = vpop.f32.mrf.mxu0  ;;  %v1994_v7 = vpop.f32.mrf.mxu1 }
 0x1bc   : > { %v4281_v41 = vpop.f32.mrf.mxu0  ;;  %v1997_v40 = vpop.f32.mrf.mxu1 }
 0x1bd   : > { %v4283_v60 = vadd.f32 %v1997_v40, %v1709_v47 }
 0x1be   : > { %v1774_v5 = vpop.f32.mrf.mxu0  ;;  %v1999_v15 = vpop.f32.mrf.mxu1 }
 0x1c0   : > { %v4287_v61 = vpop.f32.mrf.mxu0  ;;  %v2000_v52 = vpop.f32.mrf.mxu1 }
 0x1c1   : > { %v4289_v9 = vadd.f32 %v2000_v52, %v1712_v58 }
 0x1c2   : > { %v1777_v19 = vpop.f32.mrf.mxu0  ;;  %v2002_v42 = vpop.f32.mrf.mxu1 }
 0x1c4   : > { %v4291_v7 = vpop.f32.mrf.mxu0  ;;  %v4293_v21 = vpop.f32.mrf.mxu1 }
 0x1c6   : > { %v1782_v36 = vpop.f32.mrf.mxu0  ;;  %v2007_v40 = vpop.f32.mrf.mxu1 }
 0x1c7   : > { %v1728_v36 = vadd.f32 %v4060_v49, %v4215_v27 }
 0x1c8   : > { %v4295_v47 = vpop.f32.mrf.mxu0  ;;  %v4297_v5 = vpop.f32.mrf.mxu1 }
 0x1ca   : > { %v1785_v15 = vpop.f32.mrf.mxu0  ;;  %v2010_v23 = vpop.f32.mrf.mxu1 }
 0x1cc   : > { %v2013_v16 = vpop.f32.mrf.mxu1  ;;  %v3284_v52 = vpop.f32.mrf.mxu0 }
 0x1cd   : > { %v4301_v58 = vadd.f32 %v2013_v16, %v1725_v48  ;;  %v2183_v19 = vadd.f32 %v3284_v52, %v4093_v33 }
 0x1ce   : > { %v2015_v42 = vpop.f32.mrf.mxu1  ;;  %v2174_v28 = vpop.f32.mrf.mxu0 }
 0x1cf   : > { %v2431_v40 = vmax.f32 %v2183_v19, 0.0  ;;  %v2175_v13 = vadd.f32 %v2174_v28, %v4075_v4 }
 0x1d0   : > { %v2016_v16 = vpop.f32.mrf.mxu1  ;;  %v3285_v48 = vpop.f32.mrf.mxu0 }
 0x1d1   : > { %v3176_v63 = vpack.c.bf16 %v2431_v40, %v2431_v40  ;;  %v2429_v33 = vmax.f32 %v2175_v13, 0.0  ;;  %v4313_v15 = vadd.f32 %v2016_v16, %v1728_v36  ;;  %v2186_v27 = vadd.f32 %v3285_v48, %v4102_v46 }
 0x1d2   : > { %v2018_v23 = vpop.f32.mrf.mxu1  ;;  %v2177_v52 = vpop.f32.mrf.mxu0 }
 0x1d3   : > { %2752 = vst.msk [vmem:[%s4311_s22 + $0x8] sm:$0xf] %vm2749_vm1, %v3176_v63  ;;  %v3174_v28 = vpack.c.bf16 %v2429_v33, %v2429_v33  ;;  %v2432_v4 = vmax.f32 %v2186_v27, 0.0  ;;  %v2178_v19 = vadd.f32 %v2177_v52, %v4084_v18 }
 0x1d4   : > { %v4319_v42 = vpop.f32.mrf.mxu1  ;;  %v3288_v24 = vpop.f32.mrf.mxu0 }
 0x1d5   : > { %2750 = vst.msk [vmem:[%s4311_s22] sm:$0xf] %vm2749_vm1, %v3174_v28  ;;  %v3177_v13 = vpack.c.bf16 %v2432_v4, %v2432_v4  ;;  %v2430_v36 = vmax.f32 %v2178_v19, 0.0  ;;  %v2199_v40 = vadd.f32 %v3288_v24, %v4129_v34 }
 0x1d6   : > { %v2023_v46 = vpop.f32.mrf.mxu1  ;;  %v2190_v16 = vpop.f32.mrf.mxu0 }
 0x1d7   : > { %2753 = vst.msk [vmem:[%s4311_s22 + $0xc] sm:$0xf] %vm2749_vm1, %v3177_v13  ;;  %v3175_v48 = vpack.c.bf16 %v2430_v36, %v2430_v36  ;;  %v2435_v63 = vmax.f32 %v2199_v40, 0.0  ;;  %v2191_v33 = vadd.f32 %v2190_v16, %v4111_v62 }
 0x1d8   : > { %v4327_v18 = vpop.f32.mrf.mxu1  ;;  %v3289_v27 = vpop.f32.mrf.mxu0 }
 0x1d9   : > { %2751 = vst.msk [vmem:[%s4311_s22 + $0x4] sm:$0xf] %vm2749_vm1, %v3175_v48  ;;  %v3180_v23 = vpack.c.bf16 %v2435_v63, %v2435_v63  ;;  %v2433_v52 = vmax.f32 %v2191_v33, 0.0  ;;  %v2202_v28 = vadd.f32 %v3289_v27, %v4138_v55 }
 0x1da   : > { %v2026_v24 = vpop.f32.mrf.mxu1  ;;  %v2193_v34 = vpop.f32.mrf.mxu0 }
 0x1db   : > { %2756 = vst.msk [vmem:[%s4311_s22 + $0x18] sm:$0xf] %vm2749_vm1, %v3180_v23  ;;  %v3178_v4 = vpack.c.bf16 %v2433_v52, %v2433_v52  ;;  %v2436_v19 = vmax.f32 %v2202_v28, 0.0  ;;  %v2194_v13 = vadd.f32 %v2193_v34, %v4120_v17 }
 0x1dc   : > { %v4335_v62 = vpop.f32.mrf.mxu1  ;;  %v3292_v36 = vpop.f32.mrf.mxu0 }
 0x1dd   : > { %2754 = vst.msk [vmem:[%s4311_s22 + $0x10] sm:$0xf] %vm2749_vm1, %v3178_v4  ;;  %v3181_v40 = vpack.c.bf16 %v2436_v19, %v2436_v19  ;;  %v2434_v46 = vmax.f32 %v2194_v13, 0.0  ;;  %v2215_v16 = vadd.f32 %v3292_v36, %v4165_v45 }
 0x1de   : > { %v2031_v55 = vpop.f32.mrf.mxu1  ;;  %v2206_v48 = vpop.f32.mrf.mxu0 }
 0x1df   : > { %2757 = vst.msk [vmem:[%s4311_s22 + $0x1c] sm:$0xf] %vm2749_vm1, %v3181_v40  ;;  %v3179_v63 = vpack.c.bf16 %v2434_v46, %v2434_v46  ;;  %v2439_v33 = vmax.f32 %v2215_v16, 0.0  ;;  %v2207_v27 = vadd.f32 %v2206_v48, %v4147_v6 }
 0x1e0   : > { %v4343_v17 = vpop.f32.mrf.mxu1  ;;  %v3293_v23 = vpop.f32.mrf.mxu0 }
 0x1e1   : > { %2755 = vst.msk [vmem:[%s4311_s22 + $0x14] sm:$0xf] %vm2749_vm1, %v3179_v63  ;;  %v3184_v52 = vpack.c.bf16 %v2439_v33, %v2439_v33  ;;  %v2437_v28 = vmax.f32 %v2207_v27, 0.0  ;;  %v2218_v24 = vadd.f32 %v3293_v23, %v4174_v51 }
 0x1e2   : > { %v2034_v45 = vpop.f32.mrf.mxu1  ;;  %v2209_v34 = vpop.f32.mrf.mxu0 }
 0x1e3   : > { %2760 = vst.msk [vmem:[%s4311_s22 + $0x28] sm:$0xf] %vm2749_vm1, %v3184_v52  ;;  %v3182_v4 = vpack.c.bf16 %v2437_v28, %v2437_v28  ;;  %v2440_v19 = vmax.f32 %v2218_v24, 0.0  ;;  %v2210_v13 = vadd.f32 %v2209_v34, %v4156_v22 }
 0x1e4   : > { %v4351_v6 = vpop.f32.mrf.mxu1  ;;  %v3296_v36 = vpop.f32.mrf.mxu0 }
 0x1e5   : > { %2758 = vst.msk [vmem:[%s4311_s22 + $0x20] sm:$0xf] %vm2749_vm1, %v3182_v4  ;;  %v3185_v40 = vpack.c.bf16 %v2440_v19, %v2440_v19  ;;  %v2438_v46 = vmax.f32 %v2210_v13, 0.0  ;;  %v2231_v16 = vadd.f32 %v3296_v36, %v4199_v12 }
 0x1e6   : > { %v2039_v51 = vpop.f32.mrf.mxu1  ;;  %v2222_v55 = vpop.f32.mrf.mxu0 }
 0x1e7   : > { %2761 = vst.msk [vmem:[%s4311_s22 + $0x2c] sm:$0xf] %vm2749_vm1, %v3185_v40  ;;  %v3183_v48 = vpack.c.bf16 %v2438_v46, %v2438_v46  ;;  %v2443_v63 = vmax.f32 %v2231_v16, 0.0  ;;  %v2223_v33 = vadd.f32 %v2222_v55, %v4183_v14 }
 0x1e8   : > { %v4359_v22 = vpop.f32.mrf.mxu1  ;;  %v3297_v27 = vpop.f32.mrf.mxu0 }
 0x1e9   : > { %2759 = vst.msk [vmem:[%s4311_s22 + $0x24] sm:$0xf] %vm2749_vm1, %v3183_v48  ;;  %v3188_v23 = vpack.c.bf16 %v2443_v63, %v2443_v63  ;;  %v2441_v52 = vmax.f32 %v2223_v33, 0.0  ;;  %v2234_v28 = vadd.f32 %v3297_v27, %v4205_v39 }
 0x1ea   : > { %v2042_v12 = vpop.f32.mrf.mxu1  ;;  %v2225_v24 = vpop.f32.mrf.mxu0 }
 0x1eb   : > { %2764 = vst.msk [vmem:[%s4311_s22 + $0x38] sm:$0xf] %vm2749_vm1, %v3188_v23  ;;  %v3186_v45 = vpack.c.bf16 %v2441_v52, %v2441_v52  ;;  %v2444_v34 = vmax.f32 %v2234_v28, 0.0  ;;  %v2226_v4 = vadd.f32 %v2225_v24, %v4192_v56 }
 0x1ec   : > { %v4367_v14 = vpop.f32.mrf.mxu1  ;;  %v3300_v19 = vpop.f32.mrf.mxu0 }
 0x1ed   : > { %2762 = vst.msk [vmem:[%s4311_s22 + $0x30] sm:$0xf] %vm2749_vm1, %v3186_v45  ;;  %v3189_v13 = vpack.c.bf16 %v2444_v34, %v2444_v34  ;;  %v2442_v36 = vmax.f32 %v2226_v4, 0.0  ;;  %v2247_v40 = vadd.f32 %v3300_v19, %v4223_v43 }
 0x1ee   : > { %v2047_v39 = vpop.f32.mrf.mxu1  ;;  %v2238_v46 = vpop.f32.mrf.mxu0 }
 0x1ef   : > { %2765 = vst.msk [vmem:[%s4311_s22 + $0x3c] sm:$0xf] %vm2749_vm1, %v3189_v13  ;;  %v3187_v16 = vpack.c.bf16 %v2442_v36, %v2442_v36  ;;  %v2447_v51 = vmax.f32 %v2247_v40, 0.0  ;;  %v2239_v55 = vadd.f32 %v2238_v46, %v4211_v54 }
 0x1f0   : > { %v4375_v56 = vpop.f32.mrf.mxu1  ;;  %v3301_v48 = vpop.f32.mrf.mxu0 }
 0x1f1   : > { %2763 = vst.msk [vmem:[%s4311_s22 + $0x34] sm:$0xf] %vm2749_vm1, %v3187_v16  ;;  %v3192_v63 = vpack.c.bf16 %v2447_v51, %v2447_v51  ;;  %v2445_v33 = vmax.f32 %v2239_v55, 0.0  ;;  %v2250_v27 = vadd.f32 %v3301_v48, %v4229_v50 }
 0x1f2   : > { %v2050_v43 = vpop.f32.mrf.mxu1  ;;  %v2241_v23 = vpop.f32.mrf.mxu0 }
 0x1f3   : > { %2768 = vst.msk [vmem:[%s4311_s22 + $0x48] sm:$0xf] %vm2749_vm1, %v3192_v63  ;;  %v3190_v52 = vpack.c.bf16 %v2445_v33, %v2445_v33  ;;  %v2448_v28 = vmax.f32 %v2250_v27, 0.0  ;;  %v2242_v12 = vadd.f32 %v2241_v23, %v4217_v31 }
 0x1f4   : > { %v4383_v54 = vpop.f32.mrf.mxu1  ;;  %v3304_v24 = vpop.f32.mrf.mxu0 }
 0x1f5   : > { %2766 = vst.msk [vmem:[%s4311_s22 + $0x40] sm:$0xf] %vm2749_vm1, %v3190_v52  ;;  %v3193_v45 = vpack.c.bf16 %v2448_v28, %v2448_v28  ;;  %v2446_v34 = vmax.f32 %v2242_v12, 0.0  ;;  %v2263_v4 = vadd.f32 %v3304_v24, %v4247_v53 }
 0x1f6   : > { %v2055_v50 = vpop.f32.mrf.mxu1  ;;  %v2254_v19 = vpop.f32.mrf.mxu0 }
 0x1f7   : > { %2769 = vst.msk [vmem:[%s4311_s22 + $0x4c] sm:$0xf] %vm2749_vm1, %v3193_v45  ;;  %v3191_v13 = vpack.c.bf16 %v2446_v34, %v2446_v34  ;;  %v2451_v36 = vmax.f32 %v2263_v4, 0.0  ;;  %v2255_v40 = vadd.f32 %v2254_v19, %v4235_v2  ;;  %v1717_v4 = vadd.f32 %v4060_v49, %v4196_v3 }
 0x1f8   : > { %v4391_v31 = vpop.f32.mrf.mxu1  ;;  %v3305_v39 = vpop.f32.mrf.mxu0 }
 0x1f9   : > { %2767 = vst.msk [vmem:[%s4311_s22 + $0x44] sm:$0xf] %vm2749_vm1, %v3191_v13  ;;  %v3196_v46 = vpack.c.bf16 %v2451_v36, %v2451_v36  ;;  %v2449_v16 = vmax.f32 %v2255_v40, 0.0  ;;  %v2266_v51 = vadd.f32 %v3305_v39, %v4253_v32  ;;  %v2006_v40 = vadd.f32 %v4293_v21, %v1717_v4 }
 0x1fa   : > { %v2058_v53 = vpop.f32.mrf.mxu1  ;;  %v2257_v55 = vpop.f32.mrf.mxu0 }
 0x1fb   : > { %2772 = vst.msk [vmem:[%s4311_s22 + $0x58] sm:$0xf] %vm2749_vm1, %v3196_v46  ;;  %v3194_v48 = vpack.c.bf16 %v2449_v16, %v2449_v16  ;;  %v2452_v63 = vmax.f32 %v2266_v51, 0.0  ;;  %v2258_v33 = vadd.f32 %v2257_v55, %v4241_v10  ;;  %v1720_v51 = vadd.f32 %v4060_v49, %v4203_v20 }
 0x1fc   : > { %v4399_v2 = vpop.f32.mrf.mxu1  ;;  %v3308_v27 = vpop.f32.mrf.mxu0  ;;  %v1733_v20 = vadd.f32 %v4060_v49, %v4221_v29  ;;  %v1736_v29 = vadd.f32 %v4060_v49, %v4227_v57  ;;  %v1749_v57 = vadd.f32 %v4060_v49, %v4245_v11 }
 0x1fd   : > { %2770 = vst.msk [vmem:[%s4311_s22 + $0x50] sm:$0xf] %vm2749_vm1, %v3194_v48  ;;  %v3197_v43 = vpack.c.bf16 %v2452_v63, %v2452_v63  ;;  %v2450_v23 = vmax.f32 %v2258_v33, 0.0  ;;  %v2279_v52 = vadd.f32 %v3308_v27, %v4271_v0  ;;  %v2009_v63 = vadd.f32 %v4297_v5, %v1720_v51 }
 0x1fe   : > { %v2063_v28 = vpop.f32.mrf.mxu1  ;;  %v2270_v32 = vpop.f32.mrf.mxu0 }
 0x1ff   : > { %2773 = vst.msk [vmem:[%s4311_s22 + $0x5c] sm:$0xf] %vm2749_vm1, %v3197_v43  ;;  %v3195_v12 = vpack.c.bf16 %v2450_v23, %v2450_v23  ;;  %v2455_v24 = vmax.f32 %v2279_v52, 0.0  ;;  %v2271_v45 = vadd.f32 %v2270_v32, %v4259_v44 }
 0x200   : > { %v4407_v10 = vpop.f32.mrf.mxu1  ;;  %v3309_v34 = vpop.f32.mrf.mxu0 }
 0x201   : > { %2771 = vst.msk [vmem:[%s4311_s22 + $0x54] sm:$0xf] %vm2749_vm1, %v3195_v12  ;;  %v3200_v50 = vpack.c.bf16 %v2455_v24, %v2455_v24  ;;  %v2453_v0 = vmax.f32 %v2271_v45, 0.0  ;;  %v2282_v19 = vadd.f32 %v3309_v34, %v4277_v1  ;;  %v2022_v24 = vadd.f32 %v4319_v42, %v1733_v20 }
 0x202   : > { %v2066_v13 = vpop.f32.mrf.mxu1  ;;  %v2273_v36 = vpop.f32.mrf.mxu0 }
 0x203   : > { %2776 = vst.msk [vmem:[%s4311_s22 + $0x68] sm:$0xf] %vm2749_vm1, %v3200_v50  ;;  %v3198_v44 = vpack.c.bf16 %v2453_v0, %v2453_v0  ;;  %v2456_v39 = vmax.f32 %v2282_v19, 0.0  ;;  %v2274_v46 = vadd.f32 %v2273_v36, %v4265_v26 }
 0x204   : > { %v4418_v16 = vpop.f32.mrf.mxu1  ;;  %v3312_v3 = vpop.f32.mrf.mxu0 }
 0x205   : > { %2774 = vst.msk [vmem:[%s4311_s22 + $0x60] sm:$0xf] %vm2749_vm1, %v3198_v44  ;;  %v3201_v1 = vpack.c.bf16 %v2456_v39, %v2456_v39  ;;  %v2454_v53 = vmax.f32 %v2274_v46, 0.0  ;;  %v2295_v55 = vadd.f32 %v3312_v3, %v2006_v40  ;;  %v2025_v40 = vadd.f32 %v4327_v18, %v1736_v29 }
 0x206   : > { %v2071_v48 = vpop.f32.mrf.mxu1  ;;  %v2286_v21 = vpop.f32.mrf.mxu0  ;;  %v1741_v18 = vadd.f32 %v4060_v49, %v4233_v59 }
 0x207   : > { %2777 = vst.msk [vmem:[%s4311_s22 + $0x6c] sm:$0xf] %vm2749_vm1, %v3201_v1  ;;  %v3199_v26 = vpack.c.bf16 %v2454_v53, %v2454_v53  ;;  %v2459_v33 = vmax.f32 %v2295_v55, 0.0  ;;  %v2287_v27 = vadd.f32 %v2286_v21, %v4283_v60  ;;  %v2038_v21 = vadd.f32 %v4351_v6, %v1749_v57 }
 0x208   : > { %v4428_v43 = vpop.f32.mrf.mxu1  ;;  %v3313_v23 = vpop.f32.mrf.mxu0 }
 0x209   : > { %2775 = vst.msk [vmem:[%s4311_s22 + $0x64] sm:$0xf] %vm2749_vm1, %v3199_v26  ;;  %v3204_v52 = vpack.c.bf16 %v2459_v33, %v2459_v33  ;;  %v2457_v28 = vmax.f32 %v2287_v27, 0.0  ;;  %v2298_v32 = vadd.f32 %v3313_v23, %v2009_v63  ;;  %v1752_v26 = vadd.f32 %v4060_v49, %v4251_v38 }
 0x20a   : > { %v2074_v12 = vpop.f32.mrf.mxu1  ;;  %v2289_v5 = vpop.f32.mrf.mxu0  ;;  %v2030_v23 = vadd.f32 %v4335_v62, %v1741_v18  ;;  %v1765_v62 = vadd.f32 %v4060_v49, %v4269_v8 }
 0x20b   : > { %2780 = vst.msk [vmem:[%s4311_s22 + $0x78] sm:$0xf] %vm2749_vm1, %v3204_v52  ;;  %v3202_v60 = vpack.c.bf16 %v2457_v28, %v2457_v28  ;;  %v2460_v45 = vmax.f32 %v2298_v32, 0.0  ;;  %v2290_v34 = vadd.f32 %v2289_v5, %v4289_v9  ;;  %v1744_v52 = vadd.f32 %v4060_v49, %v4239_v25 }
 0x20c   : > { %v4438_v4 = vpop.f32.mrf.mxu1  ;;  %v3316_v50 = vpop.f32.mrf.mxu0 }
 0x20d   : > { %2778 = vst.msk [vmem:[%s4311_s22 + $0x70] sm:$0xf] %vm2749_vm1, %v3202_v60  ;;  %v3205_v0 = vpack.c.bf16 %v2460_v45, %v2460_v45  ;;  %v2458_v19 = vmax.f32 %v2290_v34, 0.0  ;;  %v2311_v13 = vadd.f32 %v3316_v50, %v2022_v24  ;;  %v2033_v45 = vadd.f32 %v4343_v17, %v1744_v52  ;;  %v4487_v17 = vld [vmem:[%s4615_s2] ss:$0 sm:$0xff] }
 0x20e   : > { %v2079_v36 = vpop.f32.mrf.mxu1  ;;  %v2302_v42 = vpop.f32.mrf.mxu0  ;;  %v1757_v50 = vadd.f32 %v4060_v49, %v4257_v35 }
 0x20f   : > { %2781 = vst.msk [vmem:[%s4311_s22 + $0x7c] sm:$0xf] %vm2749_vm1, %v3205_v0  ;;  %v3203_v9 = vpack.c.bf16 %v2458_v19, %v2458_v19  ;;  %v2463_v44 = vmax.f32 %v2311_v13, 0.0  ;;  %v2303_v39 = vadd.f32 %v2302_v42, %v4301_v58  ;;  %v2054_v19 = vadd.f32 %v4383_v54, %v1765_v62 }
 0x210   : > { %v4448_v46 = vpop.f32.mrf.mxu1  ;;  %v3317_v3 = vpop.f32.mrf.mxu0  ;;  %v1768_v42 = vadd.f32 %v4487_v17, %v4275_v30  ;;  %v2046_v35 = vadd.f32 %v4367_v14, %v1757_v50  ;;  %v1781_v14 = vadd.f32 %v4487_v17, %v4291_v7 }
 0x211   : > { %2779 = vst.msk [vmem:[%s4311_s22 + $0x74] sm:$0xf] %vm2749_vm1, %v3203_v9  ;;  %v3208_v51 = vpack.c.bf16 %v2463_v44, %v2463_v44  ;;  %v2461_v1 = vmax.f32 %v2303_v39, 0.0  ;;  %v2314_v53 = vadd.f32 %v3317_v3, %v2025_v40  ;;  %v1760_v39 = vadd.f32 %v4487_v17, %v4263_v37 }
 0x212   : > { %v2082_v55 = vpop.f32.mrf.mxu1  ;;  %v2305_v48 = vpop.f32.mrf.mxu0 }
 0x213   : > { %2784 = vst.msk [vmem:[%s4311_s22 + $0x88] sm:$0xf] %vm2749_vm1, %v3208_v51  ;;  %v3206_v58 = vpack.c.bf16 %v2461_v1, %v2461_v1  ;;  %v2464_v63 = vmax.f32 %v2314_v53, 0.0  ;;  %v2306_v11 = vadd.f32 %v2305_v48, %v4313_v15  ;;  %v2041_v15 = vadd.f32 %v4359_v22, %v1752_v26 }
 0x214   : > { %v4462_v33 = vpop.f32.mrf.mxu1  ;;  %v3320_v27 = vpop.f32.mrf.mxu0  ;;  %v2057_v51 = vadd.f32 %v4391_v31, %v1768_v42  ;;  %v2049_v48 = vadd.f32 %v4375_v56, %v1760_v39  ;;  %v2070_v26 = vadd.f32 %v4418_v16, %v1781_v14  ;;  %v1784_v56 = vadd.f32 %v4487_v17, %v4295_v47  ;;  %v4636_v39 = vld [vmem:[#allocation3_spill] sm:$0xff] }
 0x215   : > { %2782 = vst.msk [vmem:[%s4311_s22 + $0x80] sm:$0xf] %vm2749_vm1, %v3206_v58  ;;  %v3209_v59 = vpack.c.bf16 %v2464_v63, %v2464_v63  ;;  %v2462_v6 = vmax.f32 %v2306_v11, 0.0  ;;  %v2327_v20 = vadd.f32 %v3320_v27, %v2038_v21  ;;  %v1773_v58 = vadd.f32 %v4487_v17, %v4281_v41 }
 0x216   : > { %v2087_v28 = vpop.f32.mrf.mxu1  ;;  %v2318_v32 = vpop.f32.mrf.mxu0  ;;  %v1776_v16 = vadd.f32 %v4487_v17, %v4287_v61 }
 0x217   : > { %2785 = vst.msk [vmem:[%s4311_s22 + $0x8c] sm:$0xf] %vm2749_vm1, %v3209_v59  ;;  %v3207_v38 = vpack.c.bf16 %v2462_v6, %v2462_v6  ;;  %v2467_v12 = vmax.f32 %v2327_v20, 0.0  ;;  %v2319_v5 = vadd.f32 %v2318_v32, %v2030_v23  ;;  %v2062_v20 = vadd.f32 %v4399_v2, %v1773_v58  ;;  %v4633_v2 = vld [vmem:[#allocation4_spill] sm:$0xff] }
 0x218   : > { %v4474_v24 = vpop.f32.mrf.mxu1  ;;  %v3321_v60 = vpop.f32.mrf.mxu0  ;;  %v1797_v62 = vadd.f32 %v4487_v17, %v4633_v2 }
 0x219   : > { %2783 = vst.msk [vmem:[%s4311_s22 + $0x84] sm:$0xf] %vm2749_vm1, %v3207_v38  ;;  %v3212_v25 = vpack.c.bf16 %v2467_v12, %v2467_v12  ;;  %v2465_v34 = vmax.f32 %v2319_v5, 0.0  ;;  %v2330_v22 = vadd.f32 %v3321_v60, %v2041_v15  ;;  %v2073_v38 = vadd.f32 %v4428_v43, %v1784_v56  ;;  %v4634_v43 = vld [vmem:[#allocation2_spill] sm:$0xff] }
 0x21a   : > { %v2090_v29 = vpop.f32.mrf.mxu1  ;;  %v2321_v0 = vpop.f32.mrf.mxu0  ;;  %v1789_v50 = vadd.f32 %v4487_v17, %v4634_v43 }
 0x21b   : > { %2788 = vst.msk [vmem:[%s4311_s22 + $0x98] sm:$0xf] %vm2749_vm1, %v3212_v25  ;;  %v3210_v8 = vpack.c.bf16 %v2465_v34, %v2465_v34  ;;  %v2468_v13 = vmax.f32 %v2330_v22, 0.0  ;;  %v2322_v36 = vadd.f32 %v2321_v0, %v2033_v45  ;;  %v2065_v25 = vadd.f32 %v4407_v10, %v1776_v16  ;;  %v4635_v10 = vld [vmem:[#allocation5_spill] sm:$0xff] }
 0x21c   : > { %v4491_v40 = vpop.f32.mrf.mxu1  ;;  %v3324_v49 = vpop.f32.mrf.mxu0  ;;  %v1800_v42 = vadd.f32 %v4487_v17, %v4635_v10 }
 0x21d   : > { %2786 = vst.msk [vmem:[%s4311_s22 + $0x90] sm:$0xf] %vm2749_vm1, %v3210_v8  ;;  %v3213_v54 = vpack.c.bf16 %v2468_v13, %v2468_v13  ;;  %v2466_v9 = vmax.f32 %v2322_v36, 0.0  ;;  %v2343_v44 = vadd.f32 %v3324_v49, %v2054_v19  ;;  %v2086_v19 = vadd.f32 %v4462_v33, %v1797_v62 }
 0x21e   : > { %v2095_v3 = vpop.f32.mrf.mxu1  ;;  %v2334_v57 = vpop.f32.mrf.mxu0 }
 0x21f   : > { %2789 = vst.msk [vmem:[%s4311_s22 + $0x9c] sm:$0xf] %vm2749_vm1, %v3213_v54  ;;  %v3211_v30 = vpack.c.bf16 %v2466_v9, %v2466_v9  ;;  %v2471_v1 = vmax.f32 %v2343_v44, 0.0  ;;  %v2335_v53 = vadd.f32 %v2334_v57, %v2046_v35  ;;  %v2078_v54 = vadd.f32 %v4438_v4, %v1789_v50  ;;  %v4637_v4 = vld [vmem:[#allocation8_spill] sm:$0xff] }
 0x220   : > { %v4503_v18 = vpop.f32.mrf.mxu1  ;;  %v3325_v55 = vpop.f32.mrf.mxu0  ;;  %v1792_v3 = vadd.f32 %v4487_v17, %v4636_v39 }
 0x221   : > { %2787 = vst.msk [vmem:[%s4311_s22 + $0x94] sm:$0xf] %vm2749_vm1, %v3211_v30  ;;  %v3216_v37 = vpack.c.bf16 %v2471_v1, %v2471_v1  ;;  %v2469_v21 = vmax.f32 %v2335_v53, 0.0  ;;  %v2346_v31 = vadd.f32 %v3325_v55, %v2057_v51  ;;  %v2089_v30 = vadd.f32 %v4474_v24, %v1800_v42 }
 0x222   : > { %v2098_v63 = vpop.f32.mrf.mxu1  ;;  %v2337_v11 = vpop.f32.mrf.mxu0  ;;  %v1813_v55 = vadd.f32 %v4487_v17, %v4637_v4 }
 0x223   : > { %2792 = vst.msk [vmem:[%s4311_s22 + $0xa8] sm:$0xf] %vm2749_vm1, %v3216_v37  ;;  %v3214_v7 = vpack.c.bf16 %v2469_v21, %v2469_v21  ;;  %v2472_v27 = vmax.f32 %v2346_v31, 0.0  ;;  %v2338_v23 = vadd.f32 %v2337_v11, %v2049_v48  ;;  %v2081_v21 = vadd.f32 %v4448_v46, %v1792_v3  ;;  %v4638_v63 = vld [vmem:[#allocation6_spill] sm:$0xff] }
 0x224   : > { %v2101_v59 = vpop.f32.mrf.mxu1  ;;  %v3328_v6 = vpop.f32.mrf.mxu0  ;;  %v1805_v11 = vadd.f32 %v4487_v17, %v4638_v63  ;;  %v4645_v63 = vld [vmem:[#allocation14_spill] sm:$0xff] }
 0x225   : > { %2790 = vst.msk [vmem:[%s4311_s22 + $0xa0] sm:$0xf] %vm2749_vm1, %v3214_v7  ;;  %v3217_v41 = vpack.c.bf16 %v2472_v27, %v2472_v27  ;;  %v2470_v52 = vmax.f32 %v2338_v23, 0.0  ;;  %v2359_v28 = vadd.f32 %v3328_v6, %v2070_v26  ;;  %v2102_v27 = vadd.f32 %v2101_v59, %v1813_v55  ;;  %v4640_v59 = vld [vmem:[#allocation7_spill] sm:$0xff] }
 0x226   : > { %v2103_v32 = vpop.f32.mrf.mxu1  ;;  %v2350_v15 = vpop.f32.mrf.mxu0 }
 0x227   : > { %2793 = vst.msk [vmem:[%s4311_s22 + $0xac] sm:$0xf] %vm2749_vm1, %v3217_v41  ;;  %v3215_v47 = vpack.c.bf16 %v2470_v52, %v2470_v52  ;;  %v2475_v12 = vmax.f32 %v2359_v28, 0.0  ;;  %v2351_v5 = vadd.f32 %v2350_v15, %v2062_v20  ;;  %v4639_v20 = vld [vmem:[#allocation9_spill] sm:$0xff]  ;;  %v2094_v28 = vadd.f32 %v4491_v40, %v1805_v11 }
 0x228   : > { %v2104_v60 = vpop.f32.mrf.mxu1  ;;  %v3329_v45 = vpop.f32.mrf.mxu0  ;;  %v1816_v46 = vadd.f32 %v4487_v17, %v4639_v20  ;;  %v1837_v11 = vadd.f32 %v4487_v17, %v4645_v63 }
 0x229   : > { %2791 = vst.msk [vmem:[%s4311_s22 + $0xa4] sm:$0xf] %vm2749_vm1, %v3215_v47  ;;  %v3220_v61 = vpack.c.bf16 %v2475_v12, %v2475_v12  ;;  %v2473_v34 = vmax.f32 %v2351_v5, 0.0  ;;  %v2362_v22 = vadd.f32 %v3329_v45, %v2073_v38  ;;  %v1808_v38 = vadd.f32 %v4487_v17, %v4640_v59 }
 0x22a   : > { %v2106_v29 = vpop.f32.mrf.mxu1  ;;  %v2353_v0 = vpop.f32.mrf.mxu0  ;;  %v2105_v5 = vadd.f32 %v2104_v60, %v1816_v46  ;;  %v4642_v60 = vld [vmem:[#allocation10_spill] sm:$0xff] }
 0x22b   : > { %2796 = vst.msk [vmem:[%s4311_s22 + $0xb8] sm:$0xf] %vm2749_vm1, %v3220_v61  ;;  %v3218_v8 = vpack.c.bf16 %v2473_v34, %v2473_v34  ;;  %v2476_v13 = vmax.f32 %v2362_v22, 0.0  ;;  %v2354_v36 = vadd.f32 %v2353_v0, %v2065_v25  ;;  %v4641_v25 = vld [vmem:[#allocation12_spill] sm:$0xff]  ;;  %v2097_v22 = vadd.f32 %v4503_v18, %v1808_v38 }
 0x22c   : > { %v4535_v49 = vpop.f32.mrf.mxu1  ;;  %v3332_v35 = vpop.f32.mrf.mxu0  ;;  %v1829_v40 = vadd.f32 %v4487_v17, %v4641_v25  ;;  %v1821_v0 = vadd.f32 %v4487_v17, %v4642_v60 }
 0x22d   : > { %2794 = vst.msk [vmem:[%s4311_s22 + $0xb0] sm:$0xf] %vm2749_vm1, %v3218_v8  ;;  %v3221_v9 = vpack.c.bf16 %v2476_v13, %v2476_v13  ;;  %v2474_v44 = vmax.f32 %v2354_v36, 0.0  ;;  %v2375_v33 = vadd.f32 %v3332_v35, %v2086_v19  ;;  %v4643_v35 = vld [vmem:[#allocation13_spill] sm:$0xff] }
 0x22e   : > { %v2111_v57 = vpop.f32.mrf.mxu1  ;;  %v2366_v51 = vpop.f32.mrf.mxu0  ;;  %v1832_v18 = vadd.f32 %v4487_v17, %v4643_v35 }
 0x22f   : > { %2797 = vst.msk [vmem:[%s4311_s22 + $0xbc] sm:$0xf] %vm2749_vm1, %v3221_v9  ;;  %v3219_v1 = vpack.c.bf16 %v2474_v44, %v2474_v44  ;;  %v2479_v53 = vmax.f32 %v2375_v33, 0.0  ;;  %v2367_v14 = vadd.f32 %v2366_v51, %v2078_v54  ;;  %v2110_v44 = vadd.f32 %v4535_v49, %v1821_v0  ;;  %v4644_v57 = vld [vmem:[#allocation11_spill] sm:$0xff] }
 0x230   : > { %v4547_v48 = vpop.f32.mrf.mxu1  ;;  %v3333_v37 = vpop.f32.mrf.mxu0  ;;  %v1824_v51 = vadd.f32 %v4487_v17, %v4644_v57 }
 0x231   : > { %2795 = vst.msk [vmem:[%s4311_s22 + $0xb4] sm:$0xf] %vm2749_vm1, %v3219_v1  ;;  %v3224_v31 = vpack.c.bf16 %v2479_v53, %v2479_v53  ;;  %v2477_v58 = vmax.f32 %v2367_v14, 0.0  ;;  %v2378_v24 = vadd.f32 %v3333_v37, %v2089_v30 }
 0x232   : > { %v2114_v26 = vpop.f32.mrf.mxu1  ;;  %v2369_v7 = vpop.f32.mrf.mxu0 }
 0x233   : > { %2800 = vst.msk [vmem:[%s4311_s22 + $0xc8] sm:$0xf] %vm2749_vm1, %v3224_v31  ;;  %v3222_v23 = vpack.c.bf16 %v2477_v58, %v2477_v58  ;;  %v2480_v56 = vmax.f32 %v2378_v24, 0.0  ;;  %v2370_v6 = vadd.f32 %v2369_v7, %v2081_v21  ;;  %v2113_v21 = vadd.f32 %v4547_v48, %v1824_v51 }
 0x234   : > { %v2117_v41 = vpop.f32.mrf.mxu1  ;;  %v3336_v52 = vpop.f32.mrf.mxu0 }
 0x235   : > { %2798 = vst.msk [vmem:[%s4311_s22 + $0xc0] sm:$0xf] %vm2749_vm1, %v3222_v23  ;;  %v3225_v16 = vpack.c.bf16 %v2480_v56, %v2480_v56  ;;  %v2478_v32 = vmax.f32 %v2370_v6, 0.0  ;;  %v2391_v15 = vadd.f32 %v3336_v52, %v2102_v27  ;;  %v2118_v13 = vadd.f32 %v2117_v41, %v1829_v40  ;;  %v4646_v27 = vld [vmem:[#allocation16_spill] sm:$0xff] }
 0x236   : > { %v2119_v47 = vpop.f32.mrf.mxu1  ;;  %v2382_v12 = vpop.f32.mrf.mxu0  ;;  %v1845_v23 = vadd.f32 %v4487_v17, %v4646_v27 }
 0x237   : > { %2801 = vst.msk [vmem:[%s4311_s22 + $0xcc] sm:$0xf] %vm2749_vm1, %v3225_v16  ;;  %v3223_v2 = vpack.c.bf16 %v2478_v32, %v2478_v32  ;;  %v2483_v62 = vmax.f32 %v2391_v15, 0.0  ;;  %v2383_v45 = vadd.f32 %v2382_v12, %v2094_v28  ;;  %v4647_v32 = vld [vmem:[#allocation15_spill] sm:$0xff]  ;;  %v4648_v47 = vld [vmem:[#allocation17_spill] sm:$0xff] }
 0x238   : > { %v2120_v61 = vpop.f32.mrf.mxu1  ;;  %v3337_v34 = vpop.f32.mrf.mxu0  ;;  %v1840_v15 = vadd.f32 %v4487_v17, %v4647_v32  ;;  %v1848_v12 = vadd.f32 %v4487_v17, %v4648_v47 }
 0x239   : > { %2799 = vst.msk [vmem:[%s4311_s22 + $0xc4] sm:$0xf] %vm2749_vm1, %v3223_v2  ;;  %v3228_v43 = vpack.c.bf16 %v2483_v62, %v2483_v62  ;;  %v2481_v50 = vmax.f32 %v2383_v45, 0.0  ;;  %v2394_v29 = vadd.f32 %v3337_v34, %v2105_v5  ;;  %v2121_v53 = vadd.f32 %v2120_v61, %v1832_v18 }
 0x23a   : > { %v2122_v19 = vpop.f32.mrf.mxu1  ;;  %v2385_v8 = vpop.f32.mrf.mxu0 }
 0x23b   : > { %2804 = vst.msk [vmem:[%s4311_s22 + $0xd8] sm:$0xf] %vm2749_vm1, %v3228_v43  ;;  %v3226_v36 = vpack.c.bf16 %v2481_v50, %v2481_v50  ;;  %v2484_v10 = vmax.f32 %v2394_v29, 0.0  ;;  %v2386_v42 = vadd.f32 %v2385_v8, %v2097_v22 }
 0x23c   : > { %v2125_v54 = vpop.f32.mrf.mxu1  ;;  %v3340_v9 = vpop.f32.mrf.mxu0 }
 0x23d   : > { %2802 = vst.msk [vmem:[%s4311_s22 + $0xd0] sm:$0xf] %vm2749_vm1, %v3226_v36  ;;  %v3229_v33 = vpack.c.bf16 %v2484_v10, %v2484_v10  ;;  %v2482_v39 = vmax.f32 %v2386_v42, 0.0  ;;  %v2407_v3 = vadd.f32 %v3340_v9, %v2118_v13  ;;  %v2126_v41 = vadd.f32 %v2125_v54, %v1837_v11 }
 0x23e   : > { %v2127_v30 = vpop.f32.mrf.mxu1  ;;  %v2398_v1 = vpop.f32.mrf.mxu0 }
 0x23f   : > { %2805 = vst.msk [vmem:[%s4311_s22 + $0xdc] sm:$0xf] %vm2749_vm1, %v3229_v33  ;;  %v3227_v14 = vpack.c.bf16 %v2482_v39, %v2482_v39  ;;  %v2487_v4 = vmax.f32 %v2407_v3, 0.0  ;;  %v2399_v55 = vadd.f32 %v2398_v1, %v2110_v44 }
 0x240   : > { %v2128_v37 = vpop.f32.mrf.mxu1  ;;  %v3341_v49 = vpop.f32.mrf.mxu0 }
 0x241   : > { %2803 = vst.msk [vmem:[%s4311_s22 + $0xd4] sm:$0xf] %vm2749_vm1, %v3227_v14  ;;  %v3232_v31 = vpack.c.bf16 %v2487_v4, %v2487_v4  ;;  %v2485_v58 = vmax.f32 %v2399_v55, 0.0  ;;  %v2410_v24 = vadd.f32 %v3341_v49, %v2121_v53  ;;  %v2129_v40 = vadd.f32 %v2128_v37, %v1840_v15 }
 0x242   : > { %v2130_v26 = vpop.f32.mrf.mxu1  ;;  %v2401_v7 = vpop.f32.mrf.mxu0 }
 0x243   : > { %2808 = vst.msk [vmem:[%s4311_s22 + $0xe8] sm:$0xf] %vm2749_vm1, %v3232_v31  ;;  %v3230_v56 = vpack.c.bf16 %v2485_v58, %v2485_v58  ;;  %v2488_v6 = vmax.f32 %v2410_v24, 0.0  ;;  %v2402_v48 = vadd.f32 %v2401_v7, %v2113_v21 }
 0x244   : > { %v2133_v20 = vpop.f32.mrf.mxu1  ;;  %v3344_v46 = vpop.f32.mrf.mxu0 }
 0x245   : > { %2806 = vst.msk [vmem:[%s4311_s22 + $0xe0] sm:$0xf] %vm2749_vm1, %v3230_v56  ;;  %v3233_v52 = vpack.c.bf16 %v2488_v6, %v2488_v6  ;;  %v2486_v28 = vmax.f32 %v2402_v48, 0.0  ;;  %v2134_v16 = vadd.f32 %v2133_v20, %v1845_v23 }
 0x246   : > { %v2135_v59 = vpop.f32.mrf.mxu1  ;;  %v2414_v38 = vpop.f32.mrf.mxu0 }
 0x247   : > { %2809 = vst.msk [vmem:[%s4311_s22 + $0xec] sm:$0xf] %vm2749_vm1, %v3233_v52  ;;  %v3231_v5 = vpack.c.bf16 %v2486_v28, %v2486_v28  ;;  %v2423_v2 = vadd.f32 %v3344_v46, %v2134_v16  ;;  %v2415_v62 = vadd.f32 %v2414_v38, %v2126_v41 }
 0x248   : > { %v2136_v45 = vpop.f32.mrf.mxu1  ;;  %v3345_v25 = vpop.f32.mrf.mxu0 }
 0x249   : > { %2807 = vst.msk [vmem:[%s4311_s22 + $0xe4] sm:$0xf] %vm2749_vm1, %v3231_v5  ;;  %v2491_v61 = vmax.f32 %v2423_v2, 0.0  ;;  %v2489_v34 = vmax.f32 %v2415_v62, 0.0  ;;  %v2137_v22 = vadd.f32 %v2136_v45, %v1848_v12 }
 0x24a   : > { %v2138_v43 = vpop.f32.mrf.mxu1  ;;  %v2417_v50 = vpop.f32.mrf.mxu0 }
 0x24b   : > { %v3236_v17 = vpack.c.bf16 %v2491_v61, %v2491_v61  ;;  %v3234_v29 = vpack.c.bf16 %v2489_v34, %v2489_v34  ;;  %v2426_v60 = vadd.f32 %v3345_v25, %v2137_v22  ;;  %v2418_v0 = vadd.f32 %v2417_v50, %v2129_v40 }
 0x24d   : > { %2812 = vst.msk [vmem:[%s4311_s22 + $0xf8] sm:$0xf] %vm2749_vm1, %v3236_v17  ;;  %2810 = vst.msk [vmem:[%s4311_s22 + $0xf0] sm:$0xf] %vm2749_vm1, %v3234_v29  ;;  %v2492_v19 = vmax.f32 %v2426_v60, 0.0  ;;  %v2490_v8 = vmax.f32 %v2418_v0, 0.0 }
 0x24f   : > { %v3237_v13 = vpack.c.bf16 %v2492_v19, %v2492_v19  ;;  %v3235_v36 = vpack.c.bf16 %v2490_v8, %v2490_v8 }
 0x251   : > { %2813 = vst.msk [vmem:[%s4311_s22 + $0xfc] sm:$0xf] %vm2749_vm1, %v3237_v13  ;;  %2811 = vst.msk [vmem:[%s4311_s22 + $0xf4] sm:$0xf] %vm2749_vm1, %v3235_v36 }
 0x252 PF: > { %s13_s12 = sadd.s32 1, %s3655_s12  }
 0x253   : > { %p10_p4 = scmp.ge.s32.totalorder %s13_s12, 6  }
 0x255   :  { %12 = sbr.rel (!%p10_p4) target bundleno = 1 (0x1), region = 62 }

// kernel: autoencoder_forward.15
= control target key start
LH: loop header
LB: loop body
LE: loop exit
PB: predicated region body
PF: predicated region fallthrough
CT: control target
= control target key end

     0   :  { %s2920_s14 = smov 0   ;;  %s3502_s0 = inlined_call_operand.vmem [shape: bf16[2048,288], index: 0, kind: input, shape index: {}]   ;;  %s3503_s1 = inlined_call_operand.vmem [shape: bf16[288,1], index: 1, kind: input, shape index: {}]   ;;  %s3504_s2 = inlined_call_operand.<no memory space> [shape: f32[1,1], index: 2, kind: input, shape index: {}]   ;;  %s3505_s3 = inlined_call_operand.vmem [shape: f32[2048,1], index: 3, kind: output, shape index: {}]  }
   0x1   :  { %v8_v0 = vstv %s3504_s2 }
   0x2   :  { %9 = vst [vmem:[#allocation2] sm:$0x1] %v8_v0 }
   0x3 LB: > { %s2119_s15 = sadd.s32 4294967295, %s2894_s14   ;;  %p2123_p0 = scmp.ge.s32.totalorder %s2894_s14, 1  ;;  %s2894_s14 = sphi %s2920_s14, %s15_s14  }
   0x4   : > { %p141_p1 = scmp.lt.s32.totalorder %s2894_s14, 5 }
   0x6   : > { %p142_p2 = pnand %p2123_p0, %p141_p1 }
   0x7   : > { %s2124_s2 = sshll.u32 (!%p142_p2), %s2119_s15, 6 }
   0x8   : > { %145 = sbr.rel (%p142_p2) target bundleno = 509 (0x1fd), region = 32  ;;  %p167_p3 = scmp.lt.s32.totalorder (!%p142_p2), %s2124_s2, 255 }
   0xd   : > { %v2485_v1 = vld [vmem:[%s3503_s1 + $0x38] sm:$0xff]   ;;  %v2896_v2 = vmov 0   ;;  %v2486_v3 = vld [vmem:[%s3503_s1 + $0x30] sm:$0xff]   ;;  %v2487_v4 = vld [vmem:[%s3503_s1 + $0x28] sm:$0xff]   ;;  %s3507_s2 = smov (!%p167_p3, %s2124_s2), 255  ;;  %vm939_vm0 = vcmask 261120  }
   0xe   : > { %1036 = vmatprep.subr.bf16.mxu0 %v2896_v2  ;;  %2443 = vmatprep.subr.bf16.mxu1 %v2896_v2  ;;  %v2488_v5 = vld [vmem:[%s3503_s1 + $0x20] sm:$0xff]   ;;  %s2475_s24 = smul.u32 12, %s3507_s2  ;;  %v2489_v6 = vld [vmem:[%s3503_s1 + $0x18] sm:$0xff]   ;;  %v2490_v8 = vld [vmem:[%s3503_s1 + $0x10] sm:$0xff]   ;;  %vm1998_vm1 = vcmask 7168  }
   0xf   : > { %1037 = vmatpush1.bf16.msra.mxu0 %v2485_v1  ;;  %2459 = vmatpush1.bf16.msra.mxu1 %v2485_v1  ;;  %v2491_v10 = vld [vmem:[%s3503_s1 + $0x8] sm:$0xff]   ;;  %v2492_v11 = vld [vmem:[%s3503_s1] sm:$0xff]   ;;  %v2493_v12 = vld [vmem:[%s3503_s1 + $0x78] sm:$0xff]  }
  0x10   : > { %1038 = vmatprep.subr.bf16.mxu0 %v2896_v2  ;;  %2444 = vmatprep.subr.bf16.mxu1 %v2896_v2  ;;  %s2957_s29 = scalar_lea.vmem %s3502_s0, %s2475_s24  ;;  %v2494_v13 = vld [vmem:[%s3503_s1 + $0x70] sm:$0xff]   ;;  %v2495_v14 = vld [vmem:[%s3503_s1 + $0x68] sm:$0xff]   ;;  %v2496_v15 = vld [vmem:[%s3503_s1 + $0x60] sm:$0xff]  }
  0x11   : > { %v2503_v7 = vld [vmem:[%s2957_s29 + $0x4] ss:$12 sps:$4 sm:$0xff]   ;;  %v2497_v16 = vld [vmem:[%s3503_s1 + $0x58] sm:$0xff]   ;;  %v2499_v18 = vld [vmem:[%s3503_s1 + $0x48] sm:$0xff]  }
  0x12   : > { %v2506_v9 = vld [vmem:[%s2957_s29 + $0x244] ss:$12 sps:$4 sm:$0xff]   ;;  %1068 = vmatprep.mubr.bf16.mxu0 %v2503_v7  ;;  %v2507_v20 = vld [vmem:[%s3503_s1 + $0x88] sm:$0xff]   ;;  %v2514_v28 = vld [vmem:[%s2957_s29 + $0x34] ss:$12 sps:$4 sm:$0xff]  }
  0x13   : > { %1039 = vmatpush1.bf16.msra.mxu0 %v2486_v3  ;;  %2460 = vmatpush1.bf16.msra.mxu1 %v2486_v3  ;;  %v2498_v17 = vld [vmem:[%s3503_s1 + $0x50] sm:$0xff]   ;;  %v2500_v19 = vld [vmem:[%s3503_s1 + $0x40] sm:$0xff]   ;;  %v2508_v23 = vld [vmem:[%s2957_s29 + $0x1c] ss:$12 sps:$4 sm:$0xff]  }
  0x14   : > { %1040 = vmatprep.subr.bf16.mxu0 %v2896_v2  ;;  %2445 = vmatprep.subr.bf16.mxu1 %v2896_v2  ;;  %v2501_v21 = vld [vmem:[%s2957_s29] ss:$12 sps:$4 sm:$0xff]   ;;  %v2510_v24 = vld [vmem:[%s2957_s29 + $0x25c] ss:$12 sps:$4 sm:$0xff]   ;;  %v2512_v26 = vld [vmem:[%s2957_s29 + $0x18] ss:$12 sps:$4 sm:$0xff]  }
  0x15   : > { %1260 = vmatprep.mubr.bf16.mxu1 %v2506_v9  ;;  %v2504_v22 = vld [vmem:[%s2957_s29 + $0x240] ss:$12 sps:$4 sm:$0xff]   ;;  %v2513_v27 = vld [vmem:[%s2957_s29 + $0x258] ss:$12 sps:$4 sm:$0xff]   ;;  %v2518_v30 = vld [vmem:[%s2957_s29 + $0x30] ss:$12 sps:$4 sm:$0xff]  }
  0x16   : > { %v2532_v25 = vld [vmem:[%s3503_s1 + $0x80] sm:$0xff]   ;;  %v2519_v31 = vld [vmem:[%s2957_s29 + $0x270] ss:$12 sps:$4 sm:$0xff]   ;;  %v2520_v32 = vld [vmem:[%s2957_s29 + $0x4c] ss:$12 sps:$4 sm:$0xff]  }
  0x17   : > { %1041 = vmatpush1.bf16.msra.mxu0 %v2487_v4  ;;  %2461 = vmatpush1.bf16.msra.mxu1 %v2487_v4  ;;  %v2516_v29 = vld [vmem:[%s2957_s29 + $0x274] ss:$12 sps:$4 sm:$0xff]   ;;  %v2522_v33 = vld [vmem:[%s2957_s29 + $0x28c] ss:$12 sps:$4 sm:$0xff]   ;;  %v2526_v36 = vld [vmem:[%s2957_s29 + $0x64] ss:$12 sps:$4 sm:$0xff]  }
  0x18   : > { %1042 = vmatprep.subr.bf16.mxu0 %v2896_v2  ;;  %2446 = vmatprep.subr.bf16.mxu1 %v2896_v2  ;;  %v2524_v34 = vld [vmem:[%s2957_s29 + $0x48] ss:$12 sps:$4 sm:$0xff]   ;;  %v2528_v37 = vld [vmem:[%s2957_s29 + $0x2a4] ss:$12 sps:$4 sm:$0xff]   ;;  %v2530_v38 = vld [vmem:[%s2957_s29 + $0x60] ss:$12 sps:$4 sm:$0xff]  }
  0x19   : > { %v2525_v35 = vld [vmem:[%s2957_s29 + $0x288] ss:$12 sps:$4 sm:$0xff]   ;;  %v2531_v39 = vld [vmem:[%s2957_s29 + $0x2a0] ss:$12 sps:$4 sm:$0xff]   ;;  %v2537_v42 = vld [vmem:[%s2957_s29 + $0x78] ss:$12 sps:$4 sm:$0xff]  }
  0x1a   : > { %v2533_v40 = vld [vmem:[%s2957_s29 + $0x7c] ss:$12 sps:$4 sm:$0xff]   ;;  %v2538_v43 = vld [vmem:[%s2957_s29 + $0x2b8] ss:$12 sps:$4 sm:$0xff]   ;;  %v2539_v44 = vld [vmem:[%s2957_s29 + $0x94] ss:$12 sps:$4 sm:$0xff]  }
  0x1b   : > { %1043 = vmatpush1.bf16.msra.mxu0 %v2488_v5  ;;  %2462 = vmatpush1.bf16.msra.mxu1 %v2488_v5  ;;  %v2535_v41 = vld [vmem:[%s2957_s29 + $0x2bc] ss:$12 sps:$4 sm:$0xff]   ;;  %v2541_v45 = vld [vmem:[%s2957_s29 + $0x2d4] ss:$12 sps:$4 sm:$0xff]   ;;  %v2545_v48 = vld [vmem:[%s2957_s29 + $0xac] ss:$12 sps:$4 sm:$0xff]  }
  0x1c   : > { %1044 = vmatprep.subr.bf16.mxu0 %v2896_v2  ;;  %2447 = vmatprep.subr.bf16.mxu1 %v2896_v2  ;;  %v2543_v46 = vld [vmem:[%s2957_s29 + $0x90] ss:$12 sps:$4 sm:$0xff]   ;;  %v2547_v49 = vld [vmem:[%s2957_s29 + $0x2ec] ss:$12 sps:$4 sm:$0xff]   ;;  %v2549_v50 = vld [vmem:[%s2957_s29 + $0xa8] ss:$12 sps:$4 sm:$0xff]  }
  0x1d   : > { %v2544_v47 = vld [vmem:[%s2957_s29 + $0x2d0] ss:$12 sps:$4 sm:$0xff]   ;;  %v2550_v51 = vld [vmem:[%s2957_s29 + $0x2e8] ss:$12 sps:$4 sm:$0xff]   ;;  %v2554_v54 = vld [vmem:[%s2957_s29 + $0xc0] ss:$12 sps:$4 sm:$0xff]  }
  0x1e   : > { %v2551_v52 = vld [vmem:[%s2957_s29 + $0xc4] ss:$12 sps:$4 sm:$0xff]   ;;  %v2553_v53 = vld [vmem:[%s2957_s29 + $0x8] ss:$12 sps:$4 sm:$0xff]   ;;  %v2555_v55 = vld [vmem:[%s2957_s29 + $0x20] ss:$12 sps:$4 sm:$0xff]  }
  0x1f   : > { %1045 = vmatpush1.bf16.msra.mxu0 %v2489_v6  ;;  %2463 = vmatpush1.bf16.msra.mxu1 %v2489_v6  ;;  %v2556_v56 = vld [vmem:[%s2957_s29 + $0xdc] ss:$12 sps:$4 sm:$0xff]   ;;  %v2558_v57 = vld [vmem:[%s2957_s29 + $0x38] ss:$12 sps:$4 sm:$0xff]   ;;  %v2561_v60 = vld [vmem:[%s2957_s29 + $0xf4] ss:$12 sps:$4 sm:$0xff]  }
  0x20   : > { %1046 = vmatprep.subr.bf16.mxu0 %v2896_v2  ;;  %2448 = vmatprep.subr.bf16.mxu1 %v2896_v2  ;;  %v2559_v58 = vld [vmem:[%s2957_s29 + $0xd8] ss:$12 sps:$4 sm:$0xff]   ;;  %v2560_v59 = vld [vmem:[%s2957_s29 + $0x50] ss:$12 sps:$4 sm:$0xff]   ;;  %v2563_v61 = vld [vmem:[%s2957_s29 + $0x68] ss:$12 sps:$4 sm:$0xff]  }
  0x21   : > { %v2564_v62 = vld [vmem:[%s2957_s29 + $0xf0] ss:$12 sps:$4 sm:$0xff]   ;;  %v2565_v63 = vld [vmem:[%s2957_s29 + $0x80] ss:$12 sps:$4 sm:$0xff]   ;;  %v2568_v1 = vld [vmem:[%s2957_s29 + $0x98] ss:$12 sps:$4 sm:$0xff]  }
  0x22   : > { %v2566_v0 = vld [vmem:[%s2957_s29 + $0x10c] ss:$12 sps:$4 sm:$0xff]   ;;  %v2570_v3 = vld [vmem:[%s2957_s29 + $0xb0] ss:$12 sps:$4 sm:$0xff]   ;;  %v2573_v5 = vld [vmem:[%s2957_s29 + $0xc8] ss:$12 sps:$4 sm:$0xff]  }
  0x23   : > { %1047 = vmatpush1.bf16.msra.mxu0 %v2490_v8  ;;  %2464 = vmatpush1.bf16.msra.mxu1 %v2490_v8  ;;  %v2571_v4 = vld [vmem:[%s2957_s29 + $0x124] ss:$12 sps:$4 sm:$0xff]   ;;  %v2574_v6 = vld [vmem:[%s2957_s29 + $0x120] ss:$12 sps:$4 sm:$0xff]   ;;  %v2576_v8 = vld [vmem:[%s2957_s29 + $0x13c] ss:$12 sps:$4 sm:$0xff]  }
  0x24   : > { %1048 = vmatprep.subr.bf16.mxu0 %v2896_v2  ;;  %2449 = vmatprep.subr.bf16.mxu1 %v2896_v2  ;;  %v2575_v7 = vld [vmem:[%s2957_s29 + $0xe0] ss:$12 sps:$4 sm:$0xff]   ;;  %v2578_v9 = vld [vmem:[%s2957_s29 + $0xf8] ss:$12 sps:$4 sm:$0xff]  }
  0x27   : > { %1049 = vmatpush1.bf16.msra.mxu0 %v2491_v10  ;;  %2465 = vmatpush1.bf16.msra.mxu1 %v2491_v10  ;;  %v2579_v10 = vld [vmem:[%s2957_s29 + $0x138] ss:$12 sps:$4 sm:$0xff]  }
  0x28   : > { %1050 = vmatprep.subr.bf16.mxu0 %v2896_v2  ;;  %2450 = vmatprep.subr.bf16.mxu1 %v2896_v2 }
  0x2b   : > { %1051 = vmatpush1.bf16.msra.mxu0 %v2492_v11  ;;  %2466 = vmatpush1.bf16.msra.mxu1 %v2492_v11  ;;  %v2580_v11 = vld [vmem:[%s2957_s29 + $0x110] ss:$12 sps:$4 sm:$0xff]  }
  0x2c   : > { %1052 = vmatprep.subr.bf16.mxu0 %v2896_v2  ;;  %2451 = vmatprep.subr.bf16.mxu1 %v2896_v2 }
  0x2f   : > { %1053 = vmatpush2.bf16.msra.mxu0 %v2493_v12  ;;  %2467 = vmatpush2.bf16.msra.mxu1 %v2493_v12  ;;  %v2581_v12 = vld [vmem:[%s2957_s29 + $0x154] ss:$12 sps:$4 sm:$0xff]  }
  0x30   : > { %1054 = vmatprep.subr.bf16.mxu0 %v2896_v2  ;;  %2452 = vmatprep.subr.bf16.mxu1 %v2896_v2 }
  0x33   : > { %1055 = vmatpush2.bf16.msra.mxu0 %v2494_v13  ;;  %2468 = vmatpush2.bf16.msra.mxu1 %v2494_v13  ;;  %v2583_v13 = vld [vmem:[%s2957_s29 + $0x128] ss:$12 sps:$4 sm:$0xff]  }
  0x34   : > { %1056 = vmatprep.subr.bf16.mxu0 %v2896_v2  ;;  %2453 = vmatprep.subr.bf16.mxu1 %v2896_v2 }
  0x37   : > { %1057 = vmatpush2.bf16.msra.mxu0 %v2495_v14  ;;  %2469 = vmatpush2.bf16.msra.mxu1 %v2495_v14  ;;  %v2584_v14 = vld [vmem:[%s2957_s29 + $0x150] ss:$12 sps:$4 sm:$0xff]  }
  0x38   : > { %1058 = vmatprep.subr.bf16.mxu0 %v2896_v2  ;;  %2454 = vmatprep.subr.bf16.mxu1 %v2896_v2 }
  0x3b   : > { %1059 = vmatpush2.bf16.msra.mxu0 %v2496_v15  ;;  %2470 = vmatpush2.bf16.msra.mxu1 %v2496_v15  ;;  %v2585_v15 = vld [vmem:[%s2957_s29 + $0x140] ss:$12 sps:$4 sm:$0xff]  }
  0x3c   : > { %1060 = vmatprep.subr.bf16.mxu0 %v2896_v2  ;;  %2455 = vmatprep.subr.bf16.mxu1 %v2896_v2 }
  0x3f   : > { %1061 = vmatpush2.bf16.msra.mxu0 %v2497_v16  ;;  %2471 = vmatpush2.bf16.msra.mxu1 %v2497_v16  ;;  %v2586_v16 = vld [vmem:[%s2957_s29 + $0x16c] ss:$12 sps:$4 sm:$0xff]  }
  0x40   : > { %1062 = vmatprep.subr.bf16.mxu0 %v2896_v2  ;;  %2456 = vmatprep.subr.bf16.mxu1 %v2896_v2 }
  0x43   : > { %1063 = vmatpush2.bf16.msra.mxu0 %v2498_v17  ;;  %2472 = vmatpush2.bf16.msra.mxu1 %v2498_v17  ;;  %v2588_v17 = vld [vmem:[%s2957_s29 + $0x158] ss:$12 sps:$4 sm:$0xff]  }
  0x44   : > { %1064 = vmatprep.subr.bf16.mxu0 %v2896_v2  ;;  %2457 = vmatprep.subr.bf16.mxu1 %v2896_v2 }
  0x47   : > { %1065 = vmatpush2.bf16.msra.mxu0 %v2499_v18  ;;  %2473 = vmatpush2.bf16.msra.mxu1 %v2499_v18  ;;  %v2589_v18 = vld [vmem:[%s2957_s29 + $0x168] ss:$12 sps:$4 sm:$0xff]  }
  0x48   : > { %1066 = vmatprep.subr.bf16.mxu0 %v2896_v2  ;;  %2458 = vmatprep.subr.bf16.mxu1 %v2896_v2  ;;  %v2569_v2 = vld [vmem:[%s2957_s29 + $0x108] ss:$12 sps:$4 sm:$0xff]  }
  0x4b   : > { %1067 = vmatpush2.bf16.msra.mxu0 %v2500_v19  ;;  %2474 = vmatpush2.bf16.msra.mxu1 %v2500_v19  ;;  %v2590_v19 = vld [vmem:[%s2957_s29 + $0x170] ss:$12 sps:$4 sm:$0xff]  }
  0x4c   : > { %2375 = vmatprep.subr.bf16.mxu1 %v2507_v20 }
  0x4e   : > { %1069 = vmatmul.mubr.bf16.vlgmr.msra.gmra.mxu0 %v2501_v21  ;;  %1261 = vmatmul.mubr.bf16.vlgmr.msra.gmra.mxu1 %v2504_v22  ;;  %v2593_v21 = vld [vmem:[%s2957_s29 + $0x188] ss:$12 sps:$4 sm:$0xff]   ;;  %v2594_v22 = vld [vmem:[%s2957_s29 + $0x180] ss:$12 sps:$4 sm:$0xff]  }
  0x4f   : > { %2376 = vmatpush3.bf16.msra.mxu1 %v2507_v20  ;;  %1076 = vmatprep.mubr.bf16.mxu0 %v2508_v23  ;;  %v2591_v20 = vld [vmem:[%s2957_s29 + $0x184] ss:$12 sps:$4 sm:$0xff]   ;;  %v2595_v23 = vld [vmem:[%s2957_s29 + $0x1a0] ss:$12 sps:$4 sm:$0xff]  }
  0x50   : > { %1268 = vmatprep.mubr.bf16.mxu1 %v2510_v24  ;;  %2377 = vmatprep.subr.bf16.mxu1 %v2532_v25  ;;  %v2596_v24 = vld [vmem:[%s2957_s29 + $0x19c] ss:$12 sps:$4 sm:$0xff]  }
  0x53   : > { %2378 = vmatpush3.bf16.msra.mxu1 %v2532_v25  ;;  %v2598_v25 = vld [vmem:[%s2957_s29 + $0x1b8] ss:$12 sps:$4 sm:$0xff]  }
  0x56   : > { %1077 = vmatmul.mubr.bf16.gmra.mxu0 %v2512_v26  ;;  %1269 = vmatmul.mubr.bf16.gmra.mxu1 %v2513_v27  ;;  %v2599_v26 = vld [vmem:[%s2957_s29 + $0x198] ss:$12 sps:$4 sm:$0xff]   ;;  %v2600_v27 = vld [vmem:[%s2957_s29 + $0x1d0] ss:$12 sps:$4 sm:$0xff]  }
  0x57   : > { %1084 = vmatprep.mubr.bf16.mxu0 %v2514_v28  ;;  %1276 = vmatprep.mubr.bf16.mxu1 %v2516_v29  ;;  %v2601_v28 = vld [vmem:[%s2957_s29 + $0x1b4] ss:$12 sps:$4 sm:$0xff]  }
  0x58   : > { %v2603_v29 = vld [vmem:[%s2957_s29 + $0x1e8] ss:$12 sps:$4 sm:$0xff]  }
  0x5e   : > { %1085 = vmatmul.mubr.bf16.gmra.mxu0 %v2518_v30  ;;  %1277 = vmatmul.mubr.bf16.gmra.mxu1 %v2519_v31  ;;  %v2604_v30 = vld [vmem:[%s2957_s29 + $0x1b0] ss:$12 sps:$4 sm:$0xff]   ;;  %v2605_v31 = vld [vmem:[%s2957_s29 + $0x200] ss:$12 sps:$4 sm:$0xff]  }
  0x5f   : > { %1092 = vmatprep.mubr.bf16.mxu0 %v2520_v32  ;;  %1284 = vmatprep.mubr.bf16.mxu1 %v2522_v33  ;;  %v2606_v32 = vld [vmem:[%s2957_s29 + $0x1cc] ss:$12 sps:$4 sm:$0xff]  }
  0x60   : > { %v2608_v33 = vld [vmem:[%s2957_s29 + $0x218] ss:$12 sps:$4 sm:$0xff]  }
  0x66   : > { %1093 = vmatmul.mubr.bf16.gmra.mxu0 %v2524_v34  ;;  %1285 = vmatmul.mubr.bf16.gmra.mxu1 %v2525_v35  ;;  %v2609_v34 = vld [vmem:[%s2957_s29 + $0x1c8] ss:$12 sps:$4 sm:$0xff]   ;;  %v2610_v35 = vld [vmem:[%s2957_s29 + $0x230] ss:$12 sps:$4 sm:$0xff]  }
  0x67   : > { %1100 = vmatprep.mubr.bf16.mxu0 %v2526_v36  ;;  %1292 = vmatprep.mubr.bf16.mxu1 %v2528_v37  ;;  %v2611_v36 = vld [vmem:[%s2957_s29 + $0x1e4] ss:$12 sps:$4 sm:$0xff]   ;;  %v2613_v37 = vld [vmem:[%s2957_s29 + $0x248] ss:$12 sps:$4 sm:$0xff]  }
  0x6e   : > { %1101 = vmatmul.mubr.bf16.gmra.mxu0 %v2530_v38  ;;  %1293 = vmatmul.mubr.bf16.gmra.mxu1 %v2531_v39  ;;  %v2614_v38 = vld [vmem:[%s2957_s29 + $0x1e0] ss:$12 sps:$4 sm:$0xff]  }
  0x6f   : > { %1108 = vmatprep.mubr.bf16.mxu0 %v2533_v40  ;;  %1300 = vmatprep.mubr.bf16.mxu1 %v2535_v41  ;;  %v2615_v39 = vld [vmem:[%s2957_s29 + $0x260] ss:$12 sps:$4 sm:$0xff]   ;;  %v2616_v40 = vld [vmem:[%s2957_s29 + $0x1fc] ss:$12 sps:$4 sm:$0xff]   ;;  %v2618_v41 = vld [vmem:[%s2957_s29 + $0x278] ss:$12 sps:$4 sm:$0xff]  }
  0x76   : > { %1109 = vmatmul.mubr.bf16.gmra.mxu0 %v2537_v42  ;;  %1301 = vmatmul.mubr.bf16.gmra.mxu1 %v2538_v43  ;;  %v2619_v42 = vld [vmem:[%s2957_s29 + $0x1f8] ss:$12 sps:$4 sm:$0xff]   ;;  %v2620_v43 = vld [vmem:[%s2957_s29 + $0x290] ss:$12 sps:$4 sm:$0xff]  }
  0x77   : > { %1116 = vmatprep.mubr.bf16.mxu0 %v2539_v44  ;;  %1308 = vmatprep.mubr.bf16.mxu1 %v2541_v45  ;;  %v2621_v44 = vld [vmem:[%s2957_s29 + $0x214] ss:$12 sps:$4 sm:$0xff]  }
  0x78   : > { %v2623_v45 = vld [vmem:[%s2957_s29 + $0x2a8] ss:$12 sps:$4 sm:$0xff]  }
  0x7e   : > { %1117 = vmatmul.mubr.bf16.gmra.mxu0 %v2543_v46  ;;  %1309 = vmatmul.mubr.bf16.gmra.mxu1 %v2544_v47  ;;  %v2624_v46 = vld [vmem:[%s2957_s29 + $0x210] ss:$12 sps:$4 sm:$0xff]   ;;  %v2625_v47 = vld [vmem:[%s2957_s29 + $0x2c0] ss:$12 sps:$4 sm:$0xff]  }
  0x7f   : > { %1124 = vmatprep.mubr.bf16.mxu0 %v2545_v48  ;;  %1316 = vmatprep.mubr.bf16.mxu1 %v2547_v49  ;;  %v2626_v48 = vld [vmem:[%s2957_s29 + $0x22c] ss:$12 sps:$4 sm:$0xff]  }
  0x80   : > { %v2628_v49 = vld [vmem:[%s2957_s29 + $0x2d8] ss:$12 sps:$4 sm:$0xff]  }
  0x86   : > { %1125 = vmatmul.mubr.bf16.gmra.mxu0 %v2549_v50  ;;  %1317 = vmatmul.mubr.bf16.gmra.mxu1 %v2550_v51  ;;  %v2629_v50 = vld [vmem:[%s2957_s29 + $0x228] ss:$12 sps:$4 sm:$0xff]   ;;  %v2630_v51 = vld [vmem:[%s2957_s29 + $0x2f0] ss:$12 sps:$4 sm:$0xff]   ;;  %s2127_s29 = sshll.u32 %s3507_s2, 3 }
  0x87   : > { %1132 = vmatprep.mubr.bf16.mxu0 %v2551_v52  ;;  %2379 = vmatprep.mubr.msk.bf16.mxu1 %vm939_vm0, %v2553_v53  ;;  %s3259_s6 = scalar_lea.vmem %s3505_s3, %s2127_s29 }
  0x8e   : > { %1133 = vmatmul.mubr.bf16.gmra.mxu0 %v2554_v54  ;;  %2380 = vmatmul.mubr.msk.bf16.vlgmr.msra.gmra.mxu1 %vm939_vm0, %v2555_v55 }
  0x8f   : > { %1140 = vmatprep.mubr.bf16.mxu0 %v2556_v56  ;;  %2383 = vmatprep.mubr.msk.bf16.mxu1 %vm939_vm0, %v2558_v57 }
  0x96   : > { %1141 = vmatmul.mubr.bf16.gmra.mxu0 %v2559_v58  ;;  %2384 = vmatmul.mubr.msk.bf16.gmra.mxu1 %vm939_vm0, %v2560_v59 }
  0x97   : > { %1148 = vmatprep.mubr.bf16.mxu0 %v2561_v60  ;;  %2387 = vmatprep.mubr.msk.bf16.mxu1 %vm939_vm0, %v2563_v61 }
  0x9e   : > { %1149 = vmatmul.mubr.bf16.gmra.mxu0 %v2564_v62  ;;  %2388 = vmatmul.mubr.msk.bf16.gmra.mxu1 %vm939_vm0, %v2565_v63 }
  0x9f   : > { %1156 = vmatprep.mubr.bf16.mxu0 %v2566_v0  ;;  %2391 = vmatprep.mubr.msk.bf16.mxu1 %vm939_vm0, %v2568_v1 }
  0xa6   : > { %1157 = vmatmul.mubr.bf16.gmra.mxu0 %v2569_v2  ;;  %2392 = vmatmul.mubr.msk.bf16.gmra.mxu1 %vm939_vm0, %v2570_v3 }
  0xa7   : > { %1164 = vmatprep.mubr.bf16.mxu0 %v2571_v4  ;;  %2395 = vmatprep.mubr.msk.bf16.mxu1 %vm939_vm0, %v2573_v5 }
  0xae   : > { %1165 = vmatmul.mubr.bf16.gmra.mxu0 %v2574_v6  ;;  %2396 = vmatmul.mubr.msk.bf16.gmra.mxu1 %vm939_vm0, %v2575_v7 }
  0xaf   : > { %1172 = vmatprep.mubr.bf16.mxu0 %v2576_v8  ;;  %2399 = vmatprep.mubr.msk.bf16.mxu1 %vm939_vm0, %v2578_v9 }
  0xb6   : > { %1173 = vmatmul.mubr.bf16.gmra.mxu0 %v2579_v10  ;;  %2400 = vmatmul.mubr.msk.bf16.gmra.mxu1 %vm939_vm0, %v2580_v11 }
  0xb7   : > { %1180 = vmatprep.mubr.bf16.mxu0 %v2581_v12  ;;  %2403 = vmatprep.mubr.msk.bf16.mxu1 %vm939_vm0, %v2583_v13 }
  0xbe   : > { %1181 = vmatmul.mubr.bf16.gmra.mxu0 %v2584_v14  ;;  %2404 = vmatmul.mubr.msk.bf16.gmra.mxu1 %vm939_vm0, %v2585_v15 }
  0xbf   : > { %1188 = vmatprep.mubr.bf16.mxu0 %v2586_v16  ;;  %2407 = vmatprep.mubr.msk.bf16.mxu1 %vm939_vm0, %v2588_v17 }
  0xc6   : > { %1189 = vmatmul.mubr.bf16.gmra.mxu0 %v2589_v18  ;;  %2408 = vmatmul.mubr.msk.bf16.gmra.mxu1 %vm939_vm0, %v2590_v19 }
  0xc7   : > { %1196 = vmatprep.mubr.bf16.mxu0 %v2591_v20  ;;  %2411 = vmatprep.mubr.msk.bf16.mxu1 %vm939_vm0, %v2593_v21 }
  0xce   : > { %1197 = vmatmul.mubr.bf16.gmra.mxu0 %v2594_v22  ;;  %2412 = vmatmul.mubr.msk.bf16.gmra.mxu1 %vm939_vm0, %v2595_v23 }
  0xcf   : > { %1204 = vmatprep.mubr.bf16.mxu0 %v2596_v24  ;;  %2415 = vmatprep.mubr.msk.bf16.mxu1 %vm939_vm0, %v2598_v25 }
  0xd6   : > { %1205 = vmatmul.mubr.bf16.gmra.mxu0 %v2599_v26  ;;  %2416 = vmatmul.mubr.msk.bf16.gmra.mxu1 %vm939_vm0, %v2600_v27 }
  0xd7   : > { %1212 = vmatprep.mubr.bf16.mxu0 %v2601_v28  ;;  %2419 = vmatprep.mubr.msk.bf16.mxu1 %vm939_vm0, %v2603_v29 }
  0xde   : > { %1213 = vmatmul.mubr.bf16.gmra.mxu0 %v2604_v30  ;;  %2420 = vmatmul.mubr.msk.bf16.gmra.mxu1 %vm939_vm0, %v2605_v31 }
  0xdf   : > { %1220 = vmatprep.mubr.bf16.mxu0 %v2606_v32  ;;  %2423 = vmatprep.mubr.msk.bf16.mxu1 %vm939_vm0, %v2608_v33 }
  0xe6   : > { %1221 = vmatmul.mubr.bf16.gmra.mxu0 %v2609_v34  ;;  %2424 = vmatmul.mubr.msk.bf16.gmra.mxu1 %vm939_vm0, %v2610_v35 }
  0xe7   : > { %1228 = vmatprep.mubr.bf16.mxu0 %v2611_v36  ;;  %2427 = vmatprep.mubr.msk.bf16.mxu1 %vm939_vm0, %v2613_v37 }
  0xee   : > { %1229 = vmatmul.mubr.bf16.gmra.mxu0 %v2614_v38  ;;  %2428 = vmatmul.mubr.msk.bf16.gmra.mxu1 %vm939_vm0, %v2615_v39 }
  0xef   : > { %1236 = vmatprep.mubr.bf16.mxu0 %v2616_v40  ;;  %2431 = vmatprep.mubr.msk.bf16.mxu1 %vm939_vm0, %v2618_v41 }
  0xf6   : > { %1237 = vmatmul.mubr.bf16.gmra.mxu0 %v2619_v42  ;;  %2432 = vmatmul.mubr.msk.bf16.gmra.mxu1 %vm939_vm0, %v2620_v43 }
  0xf7   : > { %1244 = vmatprep.mubr.bf16.mxu0 %v2621_v44  ;;  %2435 = vmatprep.mubr.msk.bf16.mxu1 %vm939_vm0, %v2623_v45 }
  0xfe   : > { %1245 = vmatmul.mubr.bf16.gmra.mxu0 %v2624_v46  ;;  %2436 = vmatmul.mubr.msk.bf16.gmra.mxu1 %vm939_vm0, %v2625_v47 }
  0xff   : > { %1252 = vmatprep.mubr.bf16.mxu0 %v2626_v48  ;;  %2439 = vmatprep.mubr.msk.bf16.mxu1 %vm939_vm0, %v2628_v49 }
 0x106   : > { %1253 = vmatmul.mubr.bf16.gmra.mxu0 %v2629_v50  ;;  %2440 = vmatmul.mubr.msk.bf16.gmra.mxu1 %vm939_vm0, %v2630_v51  ;;  %v3208_v50 = vld [vmem:[#allocation2] ss:$0 sm:$0xff] }
 0x10e   : > { %v3150_v52 = vpop.f32.mrf.mxu0  ;;  %v3152_v53 = vpop.f32.mrf.mxu1 }
 0x110   : > { %v1072_v54 = vpop.f32.mrf.mxu0  ;;  %v1264_v55 = vpop.f32.mrf.mxu1 }
 0x112   : > { %v3154_v56 = vpop.f32.mrf.mxu0  ;;  %v3156_v57 = vpop.f32.mrf.mxu1 }
 0x114   : > { %v1075_v58 = vpop.f32.mrf.mxu0  ;;  %v1267_v59 = vpop.f32.mrf.mxu1 }
 0x116   : > { %v1078_v60 = vpop.f32.mrf.mxu0  ;;  %v3158_v61 = vpop.f32.mrf.mxu1 }
 0x117   : > { %v1079_v55 = vadd.f32 %v3208_v50, %v1078_v60 }
 0x118   : > { %v1080_v62 = vpop.f32.mrf.mxu0  ;;  %v1272_v63 = vpop.f32.mrf.mxu1 }
 0x119   : > { %v1071_v62 = vadd.f32 %v3208_v50, %v3150_v52 }
 0x11a   : > { %v1081_v0 = vpop.f32.mrf.mxu0  ;;  %v3160_v1 = vpop.f32.mrf.mxu1 }
 0x11c   : > { %v1083_v2 = vpop.f32.mrf.mxu0  ;;  %v1275_v3 = vpop.f32.mrf.mxu1 }
 0x11e   : > { %v3162_v4 = vpop.f32.mrf.mxu0  ;;  %v3164_v5 = vpop.f32.mrf.mxu1 }
 0x120   : > { %v1088_v6 = vpop.f32.mrf.mxu0  ;;  %v1280_v7 = vpop.f32.mrf.mxu1 }
 0x121   : > { %v1082_v6 = vadd.f32 %v3208_v50, %v1081_v0 }
 0x122   : > { %v3166_v8 = vpop.f32.mrf.mxu0  ;;  %v3168_v9 = vpop.f32.mrf.mxu1 }
 0x124   : > { %v1091_v10 = vpop.f32.mrf.mxu0  ;;  %v1283_v11 = vpop.f32.mrf.mxu1 }
 0x126   : > { %v1094_v12 = vpop.f32.mrf.mxu0  ;;  %v3170_v13 = vpop.f32.mrf.mxu1 }
 0x127   : > { %v1095_v52 = vadd.f32 %v3208_v50, %v1094_v12 }
 0x128   : > { %v1096_v14 = vpop.f32.mrf.mxu0  ;;  %v1288_v15 = vpop.f32.mrf.mxu1 }
 0x129   : > { %v1074_v15 = vadd.f32 %v3208_v50, %v3154_v56 }
 0x12a   : > { %v3172_v16 = vpop.f32.mrf.mxu0  ;;  %v3174_v17 = vpop.f32.mrf.mxu1 }
 0x12c   : > { %v1099_v18 = vpop.f32.mrf.mxu0  ;;  %v1291_v19 = vpop.f32.mrf.mxu1 }
 0x12e   : > { %v3176_v20 = vpop.f32.mrf.mxu0  ;;  %v3178_v21 = vpop.f32.mrf.mxu1 }
 0x130   : > { %v1104_v22 = vpop.f32.mrf.mxu0  ;;  %v1296_v23 = vpop.f32.mrf.mxu1 }
 0x132   : > { %v3180_v24 = vpop.f32.mrf.mxu0  ;;  %v3182_v25 = vpop.f32.mrf.mxu1 }
 0x134   : > { %v1107_v26 = vpop.f32.mrf.mxu0  ;;  %v1299_v27 = vpop.f32.mrf.mxu1 }
 0x136   : > { %v3184_v28 = vpop.f32.mrf.mxu0  ;;  %v3186_v29 = vpop.f32.mrf.mxu1 }
 0x138   : > { %v1112_v30 = vpop.f32.mrf.mxu0  ;;  %v1304_v31 = vpop.f32.mrf.mxu1 }
 0x139   : > { %v1087_v30 = vadd.f32 %v3208_v50, %v3162_v4 }
 0x13a   : > { %v3188_v32 = vpop.f32.mrf.mxu0  ;;  %v3190_v33 = vpop.f32.mrf.mxu1 }
 0x13c   : > { %v1115_v34 = vpop.f32.mrf.mxu0  ;;  %v1307_v35 = vpop.f32.mrf.mxu1 }
 0x13e   : > { %v3192_v36 = vpop.f32.mrf.mxu0  ;;  %v3194_v37 = vpop.f32.mrf.mxu1 }
 0x140   : > { %v1120_v38 = vpop.f32.mrf.mxu0  ;;  %v1312_v39 = vpop.f32.mrf.mxu1 }
 0x141   : > { %v1098_v38 = vadd.f32 %v3208_v50, %v3172_v16 }
 0x142   : > { %v3196_v40 = vpop.f32.mrf.mxu0  ;;  %v3198_v41 = vpop.f32.mrf.mxu1 }
 0x144   : > { %v1123_v42 = vpop.f32.mrf.mxu0  ;;  %v1315_v43 = vpop.f32.mrf.mxu1 }
 0x146   : > { %v3200_v44 = vpop.f32.mrf.mxu0  ;;  %v3202_v45 = vpop.f32.mrf.mxu1 }
 0x148   : > { %v1128_v46 = vpop.f32.mrf.mxu0  ;;  %v1320_v47 = vpop.f32.mrf.mxu1 }
 0x149   : > { %v1090_v46 = vadd.f32 %v3208_v50, %v3166_v8 }
 0x14a   : > { %v3204_v48 = vpop.f32.mrf.mxu0  ;;  %v3206_v49 = vpop.f32.mrf.mxu1 }
 0x14c   : > { %v1131_v51 = vpop.f32.mrf.mxu0  ;;  %v1323_v54 = vpop.f32.mrf.mxu1 }
 0x14e   : > { %v3211_v58 = vpop.f32.mrf.mxu0  ;;  %v2381_v59 = vpop.f32.mrf.mxu1 }
 0x14f   : > { %v1368_v63 = vadd.f32 %v2381_v59, %v1079_v55  ;;  %v1111_v55 = vadd.f32 %v3208_v50, %v3184_v28 }
 0x150   : > { %v1136_v2 = vpop.f32.mrf.mxu0  ;;  %v1359_v3 = vpop.f32.mrf.mxu1 }
 0x151   : > { %v2277_v7 = vmul.f32 -1.442695, %v1368_v63  ;;  %v1360_v10 = vadd.f32 %v1359_v3, %v1071_v62  ;;  %v1103_v2 = vadd.f32 %v3208_v50, %v3176_v20  ;;  %v1106_v20 = vadd.f32 %v3208_v50, %v3180_v24 }
 0x152   : > { %v3216_v11 = vpop.f32.mrf.mxu0  ;;  %v2382_v14 = vpop.f32.mrf.mxu1 }
 0x153   : > { %2631 = vpow2.f32 %v2277_v7  ;;  %v2275_v60 = vmul.f32 -1.442695, %v1360_v10  ;;  %v1371_v18 = vadd.f32 %v2382_v14, %v1082_v6 }
 0x154   : > { %v1139_v19 = vpop.f32.mrf.mxu0  ;;  %v1362_v22 = vpop.f32.mrf.mxu1 }
 0x155   : > { %2633 = vpow2.f32 %v2275_v60  ;;  %v2278_v23 = vmul.f32 -1.442695, %v1371_v18  ;;  %v1363_v26 = vadd.f32 %v1362_v22, %v1074_v15  ;;  %v1114_v18 = vadd.f32 %v3208_v50, %v3188_v32 }
 0x156   : > { %v3221_v27 = vpop.f32.mrf.mxu0  ;;  %v2385_v0 = vpop.f32.mrf.mxu1  ;;  %v1127_v32 = vadd.f32 %v3208_v50, %v3200_v44 }
 0x157   : > { %2635 = vpow2.f32 %v2278_v23  ;;  %v2276_v31 = vmul.f32 -1.442695, %v1363_v26  ;;  %v1384_v34 = vadd.f32 %v2385_v0, %v1095_v52 }
 0x158   : > { %v1144_v56 = vpop.f32.mrf.mxu0  ;;  %v1375_v35 = vpop.f32.mrf.mxu1 }
 0x159   : > { %2637 = vpow2.f32 %v2276_v31  ;;  %v2281_v39 = vmul.f32 -1.442695, %v1384_v34  ;;  %v1376_v12 = vadd.f32 %v1375_v35, %v1087_v30 }
 0x15a   : > { %v3227_v42 = vpop.f32.mrf.mxu0  ;;  %v2386_v43 = vpop.f32.mrf.mxu1 }
 0x15b   : > { %2639 = vpow2.f32 %v2281_v39  ;;  %v2279_v47 = vmul.f32 -1.442695, %v1376_v12  ;;  %v1387_v4 = vadd.f32 %v2386_v43, %v1098_v38  ;;  %v1119_v12 = vadd.f32 %v3208_v50, %v3192_v36 }
 0x15c   : > { %v1147_v51 = vpop.f32.mrf.mxu0  ;;  %v1378_v54 = vpop.f32.mrf.mxu1 }
 0x15d   : > { %2641 = vpow2.f32 %v2279_v47  ;;  %v2282_v59 = vmul.f32 -1.442695, %v1387_v4  ;;  %v1379_v16 = vadd.f32 %v1378_v54, %v1090_v46 }
 0x15e   : > { %v3233_v62 = vpop.f32.mrf.mxu0  ;;  %v2389_v63 = vpop.f32.mrf.mxu1 }
 0x15f   : > { %2643 = vpow2.f32 %v2282_v59  ;;  %v2280_v3 = vmul.f32 -1.442695, %v1379_v16  ;;  %v1400_v8 = vadd.f32 %v2389_v63, %v1111_v55  ;;  %v1130_v16 = vadd.f32 %v3208_v50, %v3204_v48 }
 0x160   : > { %v2632_v6 = vpop.eup %2631  ;;  %v1152_v7 = vpop.f32.mrf.mxu0 }
 0x161   : > { %v1391_v10 = vpop.f32.mrf.mxu1  ;;  %v1808_v14 = vadd.f32 1.0, %v2632_v6  ;;  %2645 = vpow2.f32 %v2280_v3  ;;  %v2285_v15 = vmul.f32 -1.442695, %v1400_v8  ;;  %v1122_v3 = vadd.f32 %v3208_v50, %v3196_v40 }
 0x162   : > { %v1392_v60 = vadd.f32 %v1391_v10, %v1103_v2  ;;  %v2634_v28 = vpop.eup %2633  ;;  %v3239_v19 = vpop.f32.mrf.mxu0  ;;  %v1143_v40 = vadd.f32 %v3208_v50, %v3221_v27  ;;  %v1146_v27 = vadd.f32 %v3208_v50, %v3227_v42 }
 0x163   : > { %v2390_v22 = vpop.f32.mrf.mxu1  ;;  %2647 = vrcp.f32 %v1808_v14  ;;  %v1806_v52 = vadd.f32 1.0, %v2634_v28 }
 0x164   : > { %v2283_v23 = vmul.f32 -1.442695, %v1392_v60  ;;  %v2636_v26 = vpop.eup %2635  ;;  %2649 = vpow2.f32 %v2285_v15  ;;  %v1403_v0 = vadd.f32 %v2390_v22, %v1114_v18  ;;  %v1155_v30 = vpop.f32.mrf.mxu0 }
 0x165   : > { %v1394_v31 = vpop.f32.mrf.mxu1  ;;  %2651 = vrcp.f32 %v1806_v52  ;;  %v1809_v34 = vadd.f32 1.0, %v2636_v26  ;;  %v1135_v52 = vadd.f32 %v3208_v50, %v3211_v58 }
 0x166   : > { %v1395_v56 = vadd.f32 %v1394_v31, %v1106_v20  ;;  %v2638_v35 = vpop.eup %2637  ;;  %2653 = vpow2.f32 %v2283_v23  ;;  %v2286_v38 = vmul.f32 -1.442695, %v1403_v0  ;;  %v3245_v39 = vpop.f32.mrf.mxu0 }
 0x167   : > { %v2393_v24 = vpop.f32.mrf.mxu1  ;;  %2655 = vrcp.f32 %v1809_v34  ;;  %v1807_v43 = vadd.f32 1.0, %v2638_v35 }
 0x168   : > { %v2284_v46 = vmul.f32 -1.442695, %v1395_v56  ;;  %v2640_v47 = vpop.eup %2639  ;;  %2657 = vpow2.f32 %v2286_v38  ;;  %v1416_v4 = vadd.f32 %v2393_v24, %v1127_v32  ;;  %v1160_v51 = vpop.f32.mrf.mxu0 }
 0x169   : > { %v1407_v54 = vpop.f32.mrf.mxu1  ;;  %2659 = vrcp.f32 %v1807_v43  ;;  %v1812_v55 = vadd.f32 1.0, %v2640_v47 }
 0x16a   : > { %v1408_v44 = vadd.f32 %v1407_v54, %v1119_v12  ;;  %v2642_v59 = vpop.eup %2641  ;;  %2661 = vpow2.f32 %v2284_v46  ;;  %v2289_v63 = vmul.f32 -1.442695, %v1416_v4  ;;  %v3251_v2 = vpop.f32.mrf.mxu0  ;;  %v1138_v46 = vadd.f32 %v3208_v50, %v3216_v11 }
 0x16b   : > { %v2394_v36 = vpop.f32.mrf.mxu1  ;;  %2663 = vrcp.f32 %v1812_v55  ;;  %v1810_v8 = vadd.f32 1.0, %v2642_v59  ;;  %v1159_v59 = vadd.f32 %v3208_v50, %v3245_v39 }
 0x16c   : > { %v2287_v6 = vmul.f32 -1.442695, %v1408_v44  ;;  %v2644_v7 = vpop.eup %2643  ;;  %2665 = vpow2.f32 %v2289_v63  ;;  %v1419_v10 = vadd.f32 %v2394_v36, %v1130_v16  ;;  %v1163_v14 = vpop.f32.mrf.mxu0 }
 0x16d   : > { %v1410_v15 = vpop.f32.mrf.mxu1  ;;  %2667 = vrcp.f32 %v1810_v8  ;;  %v1813_v60 = vadd.f32 1.0, %v2644_v7  ;;  %v1151_v7 = vadd.f32 %v3208_v50, %v3233_v62 }
 0x16e   : > { %v1411_v48 = vadd.f32 %v1410_v15, %v1122_v3  ;;  %v2646_v28 = vpop.eup %2645  ;;  %2669 = vpow2.f32 %v2287_v6  ;;  %v2290_v18 = vmul.f32 -1.442695, %v1419_v10  ;;  %v3263_v22 = vpop.f32.mrf.mxu0 }
 0x16f   : > { %v2397_v20 = vpop.f32.mrf.mxu1  ;;  %2671 = vrcp.f32 %v1813_v60  ;;  %v1811_v23 = vadd.f32 1.0, %v2646_v28 }
 0x170   : > { %v2288_v26 = vmul.f32 -1.442695, %v1411_v48  ;;  %v2648_v0 = vpop.eup %2647  ;;  %2673 = vpow2.f32 %v2290_v18  ;;  %v1432_v30 = vadd.f32 %v2397_v20, %v1143_v40  ;;  %v1168_v31 = vpop.f32.mrf.mxu0  ;;  %v1162_v40 = vadd.f32 %v3208_v50, %v3251_v2 }
 0x171   : > { %v1423_v34 = vpop.f32.mrf.mxu1  ;;  %v2650_v56 = vpop.eup %2649  ;;  %2001 = vst.msk [vmem:[%s3259_s6 + $0x10] sm:$0xff] %vm1998_vm1, %v2648_v0  ;;  %2675 = vrcp.f32 %v1811_v23 }
 0x172   : > { %v1424_v35 = vadd.f32 %v1423_v34, %v1135_v52  ;;  %v2652_v32 = vpop.eup %2651  ;;  %v1816_v38 = vadd.f32 1.0, %v2650_v56  ;;  %2677 = vpow2.f32 %v2288_v26  ;;  %v2293_v58 = vmul.f32 -1.442695, %v1432_v30  ;;  %v3271_v24 = vpop.f32.mrf.mxu0 }
 0x173   : > { %v2398_v12 = vpop.f32.mrf.mxu1  ;;  %v2654_v43 = vpop.eup %2653  ;;  %1999 = vst.msk [vmem:[%s3259_s6] sm:$0xff] %vm1998_vm1, %v2652_v32  ;;  %v1154_v30 = vadd.f32 %v3208_v50, %v3239_v19 }
 0x174   : > { %v2291_v47 = vmul.f32 -1.442695, %v1424_v35  ;;  %v1435_v4 = vadd.f32 %v2398_v12, %v1146_v27  ;;  %v2656_v51 = vpop.eup %2655  ;;  %2679 = vrcp.f32 %v1816_v38  ;;  %v1814_v42 = vadd.f32 1.0, %v2654_v43  ;;  %v1171_v54 = vpop.f32.mrf.mxu0 }
 0x175   : > { %v1426_v55 = vpop.f32.mrf.mxu1  ;;  %v2658_v44 = vpop.eup %2657  ;;  %2002 = vst.msk [vmem:[%s3259_s6 + $0x18] sm:$0xff] %vm1998_vm1, %v2656_v51  ;;  %2681 = vpow2.f32 %v2293_v58  ;;  %v1167_v51 = vadd.f32 %v3208_v50, %v3263_v22 }
 0x176   : > { %v2294_v16 = vmul.f32 -1.442695, %v1435_v4  ;;  %v1427_v63 = vadd.f32 %v1426_v55, %v1138_v46  ;;  %v2660_v36 = vpop.eup %2659  ;;  %2683 = vrcp.f32 %v1814_v42  ;;  %v1817_v11 = vadd.f32 1.0, %v2658_v44  ;;  %v1174_v3 = vpop.f32.mrf.mxu0 }
 0x177   : > { %v2401_v8 = vpop.f32.mrf.mxu1  ;;  %v2662_v6 = vpop.eup %2661  ;;  %2000 = vst.msk [vmem:[%s3259_s6 + $0x8] sm:$0xff] %vm1998_vm1, %v2660_v36  ;;  %2685 = vpow2.f32 %v2291_v47  ;;  %v1175_v38 = vadd.f32 %v3208_v50, %v1174_v3 }
 0x178   : > { %v2292_v10 = vmul.f32 -1.442695, %v1427_v63  ;;  %v1448_v14 = vadd.f32 %v2401_v8, %v1159_v59  ;;  %v2664_v15 = vpop.eup %2663  ;;  %2687 = vrcp.f32 %v1817_v11  ;;  %v1815_v39 = vadd.f32 1.0, %v2662_v6  ;;  %v1176_v60 = vpop.f32.mrf.mxu0 }
 0x179   : > { %v1439_v48 = vpop.f32.mrf.mxu1  ;;  %v2666_v28 = vpop.eup %2665  ;;  %2005 = vst.msk [vmem:[%s3259_s6 + $0x30] sm:$0xff] %vm1998_vm1, %v2664_v15  ;;  %2689 = vpow2.f32 %v2294_v16 }
 0x17a   : > { %v2297_v18 = vmul.f32 -1.442695, %v1448_v14  ;;  %v1440_v20 = vadd.f32 %v1439_v48, %v1151_v7  ;;  %v2668_v52 = vpop.eup %2667  ;;  %2691 = vrcp.f32 %v1815_v39  ;;  %v1820_v62 = vadd.f32 1.0, %v2666_v28  ;;  %v1177_v23 = vpop.f32.mrf.mxu0 }
 0x17b   : > { %v2402_v26 = vpop.f32.mrf.mxu1  ;;  %v2670_v0 = vpop.eup %2669  ;;  %2003 = vst.msk [vmem:[%s3259_s6 + $0x20] sm:$0xff] %vm1998_vm1, %v2668_v52  ;;  %2693 = vpow2.f32 %v2292_v10  ;;  %v1178_v3 = vadd.f32 %v3208_v50, %v1177_v23  ;;  %v1170_v10 = vadd.f32 %v3208_v50, %v3271_v24 }
 0x17c   : > { %v2295_v31 = vmul.f32 -1.442695, %v1440_v20  ;;  %v1451_v34 = vadd.f32 %v2402_v26, %v1162_v40  ;;  %v2672_v56 = vpop.eup %2671  ;;  %2695 = vrcp.f32 %v1820_v62  ;;  %v1818_v2 = vadd.f32 1.0, %v2670_v0  ;;  %v1179_v27 = vpop.f32.mrf.mxu0 }
 0x17d   : > { %v1442_v35 = vpop.f32.mrf.mxu1  ;;  %v2674_v32 = vpop.eup %2673  ;;  %2006 = vst.msk [vmem:[%s3259_s6 + $0x38] sm:$0xff] %vm1998_vm1, %v2672_v56  ;;  %2697 = vpow2.f32 %v2297_v18 }
 0x17e   : > { %v2298_v58 = vmul.f32 -1.442695, %v1451_v34  ;;  %v1443_v12 = vadd.f32 %v1442_v35, %v1154_v30  ;;  %v2676_v43 = vpop.eup %2675  ;;  %2699 = vrcp.f32 %v1818_v2  ;;  %v1821_v19 = vadd.f32 1.0, %v2674_v32  ;;  %v1182_v46 = vpop.f32.mrf.mxu0 }
 0x17f   : > { %v2405_v47 = vpop.f32.mrf.mxu1  ;;  %v2678_v4 = vpop.eup %2677  ;;  %2004 = vst.msk [vmem:[%s3259_s6 + $0x28] sm:$0xff] %vm1998_vm1, %v2676_v43  ;;  %2701 = vpow2.f32 %v2295_v31  ;;  %v1183_v52 = vadd.f32 %v3208_v50, %v1182_v46 }
 0x180   : > { %v2296_v42 = vmul.f32 -1.442695, %v1443_v12  ;;  %v1464_v54 = vadd.f32 %v2405_v47, %v1175_v38  ;;  %2703 = vrcp.f32 %v1821_v19  ;;  %v1819_v55 = vadd.f32 1.0, %v2678_v4  ;;  %v1184_v44 = vpop.f32.mrf.mxu0 }
 0x181   : > { %v1455_v59 = vpop.f32.mrf.mxu1  ;;  %v2680_v16 = vpop.eup %2679  ;;  %2705 = vpow2.f32 %v2298_v58 }
 0x182   : > { %v2301_v63 = vmul.f32 -1.442695, %v1464_v54  ;;  %v1456_v36 = vadd.f32 %v1455_v59, %v1167_v51  ;;  %v2682_v11 = vpop.eup %2681  ;;  %2009 = vst.msk [vmem:[%s3259_s6 + $0x50] sm:$0xff] %vm1998_vm1, %v2680_v16  ;;  %2707 = vrcp.f32 %v1819_v55  ;;  %v1185_v8 = vpop.f32.mrf.mxu0 }
 0x183   : > { %v2406_v22 = vpop.f32.mrf.mxu1  ;;  %v2684_v6 = vpop.eup %2683  ;;  %v1824_v7 = vadd.f32 1.0, %v2682_v11  ;;  %2709 = vpow2.f32 %v2296_v42  ;;  %v1186_v47 = vadd.f32 %v3208_v50, %v1185_v8 }
 0x184   : > { %v2299_v14 = vmul.f32 -1.442695, %v1456_v36  ;;  %v2686_v15 = vpop.eup %2685  ;;  %2007 = vst.msk [vmem:[%s3259_s6 + $0x40] sm:$0xff] %vm1998_vm1, %v2684_v6  ;;  %2711 = vpow2.f32 %v2301_v63  ;;  %v1467_v39 = vadd.f32 %v2406_v22, %v1178_v3  ;;  %v1187_v60 = vpop.f32.mrf.mxu0 }
 0x185   : > { %v1458_v48 = vpop.f32.mrf.mxu1  ;;  %v2688_v28 = vpop.eup %2687  ;;  %2713 = vrcp.f32 %v1824_v7  ;;  %v1822_v40 = vadd.f32 1.0, %v2686_v15 }
 0x186   : > { %v1459_v18 = vadd.f32 %v1458_v48, %v1170_v10  ;;  %v2690_v20 = vpop.eup %2689  ;;  %2010 = vst.msk [vmem:[%s3259_s6 + $0x58] sm:$0xff] %vm1998_vm1, %v2688_v28  ;;  %2715 = vpow2.f32 %v2299_v14  ;;  %v2302_v24 = vmul.f32 -1.442695, %v1467_v39  ;;  %v1190_v62 = vpop.f32.mrf.mxu0 }
 0x187   : > { %v2409_v23 = vpop.f32.mrf.mxu1  ;;  %v2692_v26 = vpop.eup %2691  ;;  %2717 = vrcp.f32 %v1822_v40  ;;  %v1825_v0 = vadd.f32 1.0, %v2690_v20  ;;  %v1191_v31 = vadd.f32 %v3208_v50, %v1190_v62 }
 0x188   : > { %v2300_v30 = vmul.f32 -1.442695, %v1459_v18  ;;  %v2694_v34 = vpop.eup %2693  ;;  %2008 = vst.msk [vmem:[%s3259_s6 + $0x48] sm:$0xff] %vm1998_vm1, %v2692_v26  ;;  %2719 = vpow2.f32 %v2302_v24  ;;  %v1192_v56 = vpop.f32.mrf.mxu0 }
 0x189   : > { %v1471_v2 = vpop.f32.mrf.mxu1  ;;  %v2696_v27 = vpop.eup %2695  ;;  %2721 = vrcp.f32 %v1825_v0  ;;  %v1823_v35 = vadd.f32 1.0, %v2694_v34  ;;  %v1480_v32 = vadd.f32 %v2409_v23, %v1191_v31 }
 0x18a   : > { %v1472_v38 = vadd.f32 %v1471_v2, %v1183_v52  ;;  %v2698_v58 = vpop.eup %2697  ;;  %2013 = vst.msk [vmem:[%s3259_s6 + $0x70] sm:$0xff] %vm1998_vm1, %v2696_v27  ;;  %2723 = vpow2.f32 %v2300_v30  ;;  %v1193_v12 = vpop.f32.mrf.mxu0 }
 0x18b   : > { %v2410_v43 = vpop.f32.mrf.mxu1  ;;  %v2700_v19 = vpop.eup %2699  ;;  %2725 = vrcp.f32 %v1823_v35  ;;  %v1828_v46 = vadd.f32 1.0, %v2698_v58  ;;  %v2305_v4 = vmul.f32 -1.442695, %v1480_v32  ;;  %v1194_v54 = vadd.f32 %v3208_v50, %v1193_v12 }
 0x18c   : > { %v2702_v51 = vpop.eup %2701  ;;  %2011 = vst.msk [vmem:[%s3259_s6 + $0x60] sm:$0xff] %vm1998_vm1, %v2700_v19  ;;  %v2303_v42 = vmul.f32 -1.442695, %v1472_v38  ;;  %v1195_v55 = vpop.f32.mrf.mxu0 }
 0x18d   : > { %v1474_v44 = vpop.f32.mrf.mxu1  ;;  %v2704_v59 = vpop.eup %2703  ;;  %2727 = vrcp.f32 %v1828_v46  ;;  %v1826_v16 = vadd.f32 1.0, %v2702_v51  ;;  %v1483_v11 = vadd.f32 %v2410_v43, %v1194_v54 }
 0x18e   : > { %v1475_v63 = vadd.f32 %v1474_v44, %v1186_v47  ;;  %v2706_v36 = vpop.eup %2705  ;;  %2014 = vst.msk [vmem:[%s3259_s6 + $0x78] sm:$0xff] %vm1998_vm1, %v2704_v59  ;;  %2729 = vpow2.f32 %v2305_v4  ;;  %v1198_v3 = vpop.f32.mrf.mxu0 }
 0x18f   : > { %v2413_v8 = vpop.f32.mrf.mxu1  ;;  %v2708_v22 = vpop.eup %2707  ;;  %2731 = vrcp.f32 %v1826_v16  ;;  %v1829_v6 = vadd.f32 1.0, %v2706_v36  ;;  %v1199_v7 = vadd.f32 %v3208_v50, %v1198_v3  ;;  %v2306_v14 = vmul.f32 -1.442695, %v1483_v11 }
 0x190   : > { %v2710_v10 = vpop.eup %2709  ;;  %2012 = vst.msk [vmem:[%s3259_s6 + $0x68] sm:$0xff] %vm1998_vm1, %v2708_v22  ;;  %2733 = vpow2.f32 %v2303_v42  ;;  %v1200_v15 = vpop.f32.mrf.mxu0  ;;  %v2304_v28 = vmul.f32 -1.442695, %v1475_v63 }
 0x191   : > { %v1487_v39 = vpop.f32.mrf.mxu1  ;;  %v2712_v60 = vpop.eup %2711  ;;  %2735 = vrcp.f32 %v1829_v6  ;;  %v1827_v48 = vadd.f32 1.0, %v2710_v10 }
 0x192   : > { %v1488_v40 = vadd.f32 %v1487_v39, %v1199_v7  ;;  %v2714_v18 = vpop.eup %2713  ;;  %v1832_v20 = vadd.f32 1.0, %v2712_v60  ;;  %2737 = vpow2.f32 %v2306_v14  ;;  %v1201_v52 = vpop.f32.mrf.mxu0 }
 0x193   : > { %v2414_v24 = vpop.f32.mrf.mxu1  ;;  %v2716_v62 = vpop.eup %2715  ;;  %2017 = vst.msk [vmem:[%s3259_s6 + $0x90] sm:$0xff] %vm1998_vm1, %v2714_v18  ;;  %2739 = vrcp.f32 %v1827_v48  ;;  %v1202_v26 = vadd.f32 %v3208_v50, %v1201_v52 }
 0x194   : > { %v2307_v23 = vmul.f32 -1.442695, %v1488_v40  ;;  %v2718_v0 = vpop.eup %2717  ;;  %2741 = vrcp.f32 %v1832_v20  ;;  %v1830_v30 = vadd.f32 1.0, %v2716_v62  ;;  %v1203_v31 = vpop.f32.mrf.mxu0 }
 0x195   : > { %v1490_v34 = vpop.f32.mrf.mxu1  ;;  %v2720_v56 = vpop.eup %2719  ;;  %2015 = vst.msk [vmem:[%s3259_s6 + $0x80] sm:$0xff] %vm1998_vm1, %v2718_v0  ;;  %2743 = vpow2.f32 %v2304_v28 }
 0x196   : > { %v1491_v2 = vadd.f32 %v1490_v34, %v1202_v26  ;;  %v2722_v27 = vpop.eup %2721  ;;  %2745 = vrcp.f32 %v1830_v30  ;;  %v1833_v35 = vadd.f32 1.0, %v2720_v56  ;;  %v1206_v32 = vpop.f32.mrf.mxu0 }
 0x197   : > { %v3329_v38 = vpop.f32.mrf.mxu1  ;;  %v2724_v58 = vpop.eup %2723  ;;  %2018 = vst.msk [vmem:[%s3259_s6 + $0x98] sm:$0xff] %vm1998_vm1, %v2722_v27  ;;  %2747 = vpow2.f32 %v2307_v23  ;;  %v1207_v43 = vadd.f32 %v3208_v50, %v1206_v32 }
 0x198   : > { %v2308_v12 = vmul.f32 -1.442695, %v1491_v2  ;;  %v2726_v19 = vpop.eup %2725  ;;  %2749 = vrcp.f32 %v1833_v35  ;;  %v1831_v46 = vadd.f32 1.0, %v2724_v58  ;;  %v1208_v47 = vpop.f32.mrf.mxu0 }
 0x199   : > { %v1503_v4 = vpop.f32.mrf.mxu1  ;;  %2016 = vst.msk [vmem:[%s3259_s6 + $0x88] sm:$0xff] %vm1998_vm1, %v2726_v19  ;;  %v1496_v51 = vadd.f32 %v2413_v8, %v1207_v43 }
 0x19a   : > { %2751 = vpow2.f32 %v2308_v12  ;;  %v2728_v42 = vpop.eup %2727  ;;  %v1209_v54 = vpop.f32.mrf.mxu0 }
 0x19b   : > { %2753 = vrcp.f32 %v1831_v46  ;;  %v3336_v55 = vpop.f32.mrf.mxu1  ;;  %v2730_v44 = vpop.eup %2729  ;;  %2021 = vst.msk [vmem:[%s3259_s6 + $0xb0] sm:$0xff] %vm1998_vm1, %v2728_v42  ;;  %v2309_v59 = vmul.f32 -1.442695, %v1496_v51  ;;  %v1210_v16 = vadd.f32 %v3208_v50, %v1209_v54 }
 0x19c   : > { %v2732_v63 = vpop.eup %2731  ;;  %v1836_v36 = vadd.f32 1.0, %v2730_v44  ;;  %v1211_v11 = vpop.f32.mrf.mxu0 }
 0x19d   : > { %v1506_v3 = vpop.f32.mrf.mxu1  ;;  %v2734_v22 = vpop.eup %2733  ;;  %2019 = vst.msk [vmem:[%s3259_s6 + $0xa0] sm:$0xff] %vm1998_vm1, %v2732_v63  ;;  %2755 = vpow2.f32 %v2309_v59  ;;  %v1499_v8 = vadd.f32 %v2414_v24, %v1210_v16 }
 0x19e   : > { %v2736_v6 = vpop.eup %2735  ;;  %2757 = vrcp.f32 %v1836_v36  ;;  %v1834_v7 = vadd.f32 1.0, %v2734_v22  ;;  %v1214_v10 = vpop.f32.mrf.mxu0 }
 0x19f   : > { %v3343_v14 = vpop.f32.mrf.mxu1  ;;  %v2738_v15 = vpop.eup %2737  ;;  %2022 = vst.msk [vmem:[%s3259_s6 + $0xb8] sm:$0xff] %vm1998_vm1, %v2736_v6  ;;  %v2310_v39 = vmul.f32 -1.442695, %v1499_v8  ;;  %v1215_v60 = vadd.f32 %v3208_v50, %v1214_v10 }
 0x1a0   : > { %v2740_v48 = vpop.eup %2739  ;;  %2759 = vrcp.f32 %v1834_v7  ;;  %v1837_v28 = vadd.f32 1.0, %v2738_v15  ;;  %v1216_v40 = vpop.f32.mrf.mxu0  ;;  %v1263_v15 = vadd.f32 %v3208_v50, %v3152_v53 }
 0x1a1   : > { %v3348_v18 = vpop.f32.mrf.mxu1  ;;  %v2742_v20 = vpop.eup %2741  ;;  %2020 = vst.msk [vmem:[%s3259_s6 + $0xa8] sm:$0xff] %vm1998_vm1, %v2740_v48  ;;  %2761 = vpow2.f32 %v2310_v39  ;;  %v1504_v52 = vadd.f32 %v1503_v4, %v1215_v60 }
 0x1a2   : > { %v2744_v24 = vpop.eup %2743  ;;  %2025 = vst.msk [vmem:[%s3259_s6 + $0xd0] sm:$0xff] %vm1998_vm1, %v2742_v20  ;;  %2763 = vrcp.f32 %v1837_v28  ;;  %v1217_v62 = vpop.f32.mrf.mxu0 }
 0x1a3   : > { %v3354_v23 = vpop.f32.mrf.mxu1  ;;  %v2746_v26 = vpop.eup %2745  ;;  %v1835_v0 = vadd.f32 1.0, %v2744_v24  ;;  %v2311_v30 = vmul.f32 -1.442695, %v1504_v52  ;;  %v1218_v31 = vadd.f32 %v3208_v50, %v1217_v62 }
 0x1a4   : > { %v2748_v34 = vpop.eup %2747  ;;  %2023 = vst.msk [vmem:[%s3259_s6 + $0xc0] sm:$0xff] %vm1998_vm1, %v2746_v26  ;;  %v1219_v56 = vpop.f32.mrf.mxu0 }
 0x1a5   : > { %v3359_v2 = vpop.f32.mrf.mxu1  ;;  %v2750_v27 = vpop.eup %2749  ;;  %2765 = vrcp.f32 %v1835_v0  ;;  %v1838_v35 = vadd.f32 1.0, %v2748_v34  ;;  %v1507_v32 = vadd.f32 %v1506_v3, %v1218_v31  ;;  %v1266_v0 = vadd.f32 %v3208_v50, %v3156_v57 }
 0x1a6   : > { %2026 = vst.msk [vmem:[%s3259_s6 + $0xd8] sm:$0xff] %vm1998_vm1, %v2750_v27  ;;  %2767 = vpow2.f32 %v2311_v30  ;;  %v1222_v12 = vpop.f32.mrf.mxu0  ;;  %v1274_v30 = vadd.f32 %v3208_v50, %v3160_v1 }
 0x1a7   : > { %v2752_v58 = vpop.eup %2751  ;;  %v3363_v43 = vpop.f32.mrf.mxu1  ;;  %2769 = vrcp.f32 %v1838_v35  ;;  %v2312_v47 = vmul.f32 -1.442695, %v1507_v32  ;;  %v1223_v4 = vadd.f32 %v3208_v50, %v1222_v12 }
 0x1a8   : > { %v2754_v19 = vpop.eup %2753  ;;  %v1839_v46 = vadd.f32 1.0, %v2752_v58  ;;  %v1224_v51 = vpop.f32.mrf.mxu0 }
 0x1a9   : > { %2024 = vst.msk [vmem:[%s3259_s6 + $0xc8] sm:$0xff] %vm1998_vm1, %v2754_v19  ;;  %v3368_v42 = vpop.f32.mrf.mxu1  ;;  %v1512_v54 = vadd.f32 %v3329_v38, %v1223_v4  ;;  %v1271_v38 = vadd.f32 %v3208_v50, %v3158_v61  ;;  %v1279_v4 = vadd.f32 %v3208_v50, %v3164_v5  ;;  %v1287_v51 = vadd.f32 %v3208_v50, %v3170_v13 }
 0x1aa   : > { %2771 = vrcp.f32 %v1839_v46  ;;  %v2756_v44 = vpop.eup %2755  ;;  %v1225_v59 = vpop.f32.mrf.mxu0 }
 0x1ab   : > { %2773 = vpow2.f32 %v2312_v47  ;;  %v3371_v16 = vpop.f32.mrf.mxu1  ;;  %v2758_v63 = vpop.eup %2757  ;;  %v1840_v36 = vadd.f32 1.0, %v2756_v44  ;;  %v2313_v11 = vmul.f32 -1.442695, %v1512_v54  ;;  %v1226_v3 = vadd.f32 %v3208_v50, %v1225_v59 }
 0x1ac   : > { %2029 = vst.msk [vmem:[%s3259_s6 + $0xf0] sm:$0xff] %vm1998_vm1, %v2758_v63  ;;  %v1227_v22 = vpop.f32.mrf.mxu0 }
 0x1ad   : > { %v3376_v8 = vpop.f32.mrf.mxu1  ;;  %v2760_v6 = vpop.eup %2759  ;;  %2775 = vrcp.f32 %v1840_v36  ;;  %v1515_v7 = vadd.f32 %v3336_v55, %v1226_v3 }
 0x1ae   : > { %v2762_v10 = vpop.eup %2761  ;;  %2027 = vst.msk [vmem:[%s3259_s6 + $0xe0] sm:$0xff] %vm1998_vm1, %v2760_v6  ;;  %2777 = vpow2.f32 %v2313_v11  ;;  %v1230_v39 = vpop.f32.mrf.mxu0 }
 0x1af   : > { %v2429_v60 = vpop.f32.mrf.mxu1  ;;  %v2764_v48 = vpop.eup %2763  ;;  %v1841_v28 = vadd.f32 1.0, %v2762_v10  ;;  %v2314_v40 = vmul.f32 -1.442695, %v1515_v7  ;;  %v1231_v20 = vadd.f32 %v3208_v50, %v1230_v39  ;;  %v1282_v10 = vadd.f32 %v3208_v50, %v3168_v9 }
 0x1b0   : > { %v1560_v52 = vadd.f32 %v2429_v60, %v1271_v38  ;;  %2030 = vst.msk [vmem:[%s3259_s6 + $0xf8] sm:$0xff] %vm1998_vm1, %v2764_v48  ;;  %v1232_v61 = vpop.f32.mrf.mxu0 }
 0x1b1   : > { %v1551_v55 = vpop.f32.mrf.mxu1  ;;  %2779 = vrcp.f32 %v1841_v28  ;;  %v1520_v24 = vadd.f32 %v3348_v18, %v1231_v20 }
 0x1b2   : > { %v2325_v53 = vmul.f32 -1.442695, %v1560_v52  ;;  %v1552_v62 = vadd.f32 %v1551_v55, %v1263_v15  ;;  %v2766_v26 = vpop.eup %2765  ;;  %2781 = vpow2.f32 %v2314_v40  ;;  %v1233_v31 = vpop.f32.mrf.mxu0  ;;  %v1290_v15 = vadd.f32 %v3208_v50, %v3174_v17 }
 0x1b3   : > { %v2430_v34 = vpop.f32.mrf.mxu1  ;;  %v2768_v56 = vpop.eup %2767  ;;  %2028 = vst.msk [vmem:[%s3259_s6 + $0xe8] sm:$0xff] %vm1998_vm1, %v2766_v26  ;;  %v2315_v27 = vmul.f32 -1.442695, %v1520_v24  ;;  %v1234_v18 = vadd.f32 %v3208_v50, %v1233_v31 }
 0x1b4   : > { %2783 = vpow2.f32 %v2325_v53  ;;  %v2323_v35 = vmul.f32 -1.442695, %v1552_v62  ;;  %v2770_v32 = vpop.eup %2769  ;;  %v1842_v58 = vadd.f32 1.0, %v2768_v56  ;;  %v1563_v12 = vadd.f32 %v2430_v34, %v1274_v30  ;;  %v1235_v57 = vpop.f32.mrf.mxu0 }
 0x1b5   : > { %v1554_v19 = vpop.f32.mrf.mxu1  ;;  %2031 = vst.msk [vmem:[%s3259_s6 + $0x100] sm:$0xff] %vm1998_vm1, %v2770_v32  ;;  %2785 = vpow2.f32 %v2315_v27  ;;  %v1523_v1 = vadd.f32 %v3359_v2, %v1234_v18 }
 0x1b6   : > { %v1555_v46 = vadd.f32 %v1554_v19, %v1266_v0  ;;  %2787 = vrcp.f32 %v1842_v58  ;;  %v2326_v54 = vmul.f32 -1.442695, %v1563_v12  ;;  %v1238_v44 = vpop.f32.mrf.mxu0 }
 0x1b7   : > { %v2772_v47 = vpop.eup %2771  ;;  %v2433_v59 = vpop.f32.mrf.mxu1  ;;  %2789 = vpow2.f32 %v2323_v35  ;;  %v2316_v36 = vmul.f32 -1.442695, %v1523_v1  ;;  %v1239_v2 = vadd.f32 %v3208_v50, %v1238_v44 }
 0x1b8   : > { %v2774_v63 = vpop.eup %2773  ;;  %2032 = vst.msk [vmem:[%s3259_s6 + $0x108] sm:$0xff] %vm1998_vm1, %v2772_v47  ;;  %v2324_v11 = vmul.f32 -1.442695, %v1555_v46  ;;  %2791 = vpow2.f32 %v2326_v54  ;;  %v1576_v22 = vadd.f32 %v2433_v59, %v1287_v51  ;;  %v1240_v5 = vpop.f32.mrf.mxu0 }
 0x1b9   : > { %v1843_v3 = vadd.f32 1.0, %v2774_v63  ;;  %v1567_v6 = vpop.f32.mrf.mxu1  ;;  %2793 = vpow2.f32 %v2316_v36  ;;  %v1528_v13 = vadd.f32 %v3343_v14, %v1239_v2 }
 0x1ba   : > { %v1568_v38 = vadd.f32 %v1567_v6, %v1279_v4  ;;  %v2776_v7 = vpop.eup %2775  ;;  %v2329_v39 = vmul.f32 -1.442695, %v1576_v22  ;;  %v1241_v60 = vpop.f32.mrf.mxu0 }
 0x1bb   : > { %2795 = vrcp.f32 %v1843_v3  ;;  %v2434_v48 = vpop.f32.mrf.mxu1  ;;  %v2778_v28 = vpop.eup %2777  ;;  %2033 = vst.msk [vmem:[%s3259_s6 + $0x110] sm:$0xff] %vm1998_vm1, %v2776_v7  ;;  %v2317_v40 = vmul.f32 -1.442695, %v1528_v13  ;;  %v1242_v14 = vadd.f32 %v3208_v50, %v1241_v60  ;;  %v3417_v50 = vld [vmem:[#allocation2] ss:$0 sm:$0xff] }
 0x1bc   : > { %2797 = vpow2.f32 %v2324_v11  ;;  %v2327_v20 = vmul.f32 -1.442695, %v1568_v38  ;;  %v1844_v52 = vadd.f32 1.0, %v2778_v28  ;;  %v1579_v61 = vadd.f32 %v2434_v48, %v1290_v15  ;;  %v1243_v9 = vpop.f32.mrf.mxu0 }
 0x1bd   : > { %2799 = vpow2.f32 %v2329_v39  ;;  %v1570_v55 = vpop.f32.mrf.mxu1  ;;  %v1531_v17 = vadd.f32 %v3354_v23, %v1242_v14  ;;  %v1303_v27 = vadd.f32 %v3417_v50, %v3186_v29  ;;  %v1295_v4 = vadd.f32 %v3417_v50, %v3178_v21 }
 0x1be   : > { %2801 = vpow2.f32 %v2317_v40  ;;  %v1571_v24 = vadd.f32 %v1570_v55, %v1282_v10  ;;  %v2780_v53 = vpop.eup %2779  ;;  %v2330_v62 = vmul.f32 -1.442695, %v1579_v61  ;;  %v1246_v26 = vpop.f32.mrf.mxu0  ;;  %v1306_v7 = vadd.f32 %v3417_v50, %v3190_v33 }
 0x1bf   : > { %2803 = vrcp.f32 %v1844_v52  ;;  %v2437_v0 = vpop.f32.mrf.mxu1  ;;  %v2782_v30 = vpop.eup %2781  ;;  %2034 = vst.msk [vmem:[%s3259_s6 + $0x118] sm:$0xff] %vm1998_vm1, %v2780_v53  ;;  %v2318_v31 = vmul.f32 -1.442695, %v1531_v17  ;;  %v1247_v34 = vadd.f32 %v3417_v50, %v1246_v26  ;;  %v1298_v33 = vadd.f32 %v3417_v50, %v3182_v25 }
 0x1c0   : > { %2805 = vpow2.f32 %v2327_v20  ;;  %v1845_v23 = vadd.f32 1.0, %v2782_v30  ;;  %v2328_v35 = vmul.f32 -1.442695, %v1571_v24  ;;  %v1248_v18 = vpop.f32.mrf.mxu0  ;;  %v1592_v19 = vadd.f32 %v2437_v0, %v1303_v27 }
 0x1c1   : > { %v2784_v56 = vpop.eup %2783  ;;  %2807 = vpow2.f32 %v2330_v62  ;;  %v1583_v32 = vpop.f32.mrf.mxu1  ;;  %v1536_v12 = vadd.f32 %v3368_v42, %v1247_v34  ;;  %v1311_v24 = vadd.f32 %v3417_v50, %v3194_v37  ;;  %v1319_v62 = vadd.f32 %v3417_v50, %v3202_v45 }
 0x1c2   : > { %v1856_v58 = vadd.f32 1.0, %v2784_v56  ;;  %2809 = vpow2.f32 %v2318_v31  ;;  %v2786_v57 = vpop.eup %2785  ;;  %v1249_v1 = vpop.f32.mrf.mxu0  ;;  %v1584_v36 = vadd.f32 %v1583_v32, %v1295_v4  ;;  %v2333_v3 = vmul.f32 -1.442695, %v1592_v19 }
 0x1c3   : > { %2811 = vrcp.f32 %v1845_v23  ;;  %v2438_v46 = vpop.f32.mrf.mxu1  ;;  %v2788_v47 = vpop.eup %2787  ;;  %v1846_v29 = vadd.f32 1.0, %v2786_v57  ;;  %v2319_v51 = vmul.f32 -1.442695, %v1536_v12  ;;  %v1250_v21 = vadd.f32 %v3417_v50, %v1249_v1 }
 0x1c4   : > { %2813 = vrcp.f32 %v1856_v58  ;;  %v2790_v54 = vpop.eup %2789  ;;  %2035 = vst.msk [vmem:[%s3259_s6 + $0x120] sm:$0xff] %vm1998_vm1, %v2788_v47  ;;  %v1251_v44 = vpop.f32.mrf.mxu0  ;;  %v2331_v60 = vmul.f32 -1.442695, %v1584_v36  ;;  %v1595_v20 = vadd.f32 %v2438_v46, %v1306_v7  ;;  %v1322_v19 = vadd.f32 %v3417_v50, %v3206_v49 }
 0x1c5   : > { %2815 = vpow2.f32 %v2328_v35  ;;  %v1586_v59 = vpop.f32.mrf.mxu1  ;;  %v2792_v63 = vpop.eup %2791  ;;  %v1854_v42 = vadd.f32 1.0, %v2790_v54  ;;  %v1539_v40 = vadd.f32 %v3376_v8, %v1250_v21  ;;  %v1314_v47 = vadd.f32 %v3417_v50, %v3198_v41 }
 0x1c6   : > { %2817 = vrcp.f32 %v1846_v29  ;;  %v2794_v11 = vpop.eup %2793  ;;  %v1857_v2 = vadd.f32 1.0, %v2792_v63  ;;  %v1254_v22 = vpop.f32.mrf.mxu0  ;;  %v1587_v25 = vadd.f32 %v1586_v59, %v1298_v33  ;;  %v2334_v34 = vmul.f32 -1.442695, %v1595_v20 }
 0x1c7   : > { %2819 = vpow2.f32 %v2319_v51  ;;  %v2441_v5 = vpop.f32.mrf.mxu1  ;;  %v1847_v13 = vadd.f32 1.0, %v2794_v11  ;;  %v1255_v55 = vadd.f32 %v3417_v50, %v1254_v22  ;;  %v2320_v31 = vmul.f32 -1.442695, %v1539_v40 }
 0x1c8   : > { %v2796_v6 = vpop.eup %2795  ;;  %2821 = vrcp.f32 %v1854_v42  ;;  %v1256_v10 = vpop.f32.mrf.mxu0  ;;  %v1608_v45 = vadd.f32 %v2441_v5, %v1319_v62  ;;  %v2332_v58 = vmul.f32 -1.442695, %v1587_v25 }
 0x1c9   : > { %v2798_v38 = vpop.eup %2797  ;;  %2036 = vst.msk [vmem:[%s3259_s6 + $0x128] sm:$0xff] %vm1998_vm1, %v2796_v6  ;;  %2823 = vrcp.f32 %v1857_v2  ;;  %v1599_v14 = vpop.f32.mrf.mxu1  ;;  %v1544_v23 = vadd.f32 %v3363_v43, %v1255_v55 }
 0x1ca   : > { %v2800_v15 = vpop.eup %2799  ;;  %2825 = vrcp.f32 %v1847_v13  ;;  %v1855_v39 = vadd.f32 1.0, %v2798_v38  ;;  %v1257_v52 = vpop.f32.mrf.mxu0  ;;  %v1600_v12 = vadd.f32 %v1599_v14, %v1311_v24  ;;  %v2337_v49 = vmul.f32 -1.442695, %v1608_v45 }
 0x1cb   : > { %v2802_v48 = vpop.eup %2801  ;;  %v1860_v28 = vadd.f32 1.0, %v2800_v15  ;;  %2827 = vpow2.f32 %v2333_v3  ;;  %v2442_v56 = vpop.f32.mrf.mxu1  ;;  %v1258_v35 = vadd.f32 %v3417_v50, %v1257_v52  ;;  %v2321_v4 = vmul.f32 -1.442695, %v1544_v23 }
 0x1cc   : > { %v2804_v61 = vpop.eup %2803  ;;  %2829 = vrcp.f32 %v1855_v39  ;;  %v1848_v9 = vadd.f32 1.0, %v2802_v48  ;;  %v1259_v53 = vpop.f32.mrf.mxu0  ;;  %v1611_v44 = vadd.f32 %v2442_v56, %v1322_v19  ;;  %v2335_v63 = vmul.f32 -1.442695, %v1600_v12 }
 0x1cd   : > { %v2806_v17 = vpop.eup %2805  ;;  %2037 = vst.msk [vmem:[%s3259_s6 + $0x130] sm:$0xff] %vm1998_vm1, %v2804_v61  ;;  %2831 = vrcp.f32 %v1860_v28  ;;  %v1602_v1 = vpop.f32.mrf.mxu1  ;;  %v1547_v29 = vadd.f32 %v3371_v16, %v1258_v35 }
 0x1ce   : > { %v2808_v8 = vpop.eup %2807  ;;  %2833 = vrcp.f32 %v1848_v9  ;;  %v1858_v26 = vadd.f32 1.0, %v2806_v17  ;;  %v1603_v41 = vadd.f32 %v1602_v1, %v1314_v47  ;;  %v2338_v2 = vmul.f32 -1.442695, %v1611_v44 }
 0x1cf   : > { %v2810_v0 = vpop.eup %2809  ;;  %v1861_v30 = vadd.f32 1.0, %v2808_v8  ;;  %2835 = vpow2.f32 %v2331_v60  ;;  %v2322_v16 = vmul.f32 -1.442695, %v1547_v29 }
 0x1d0   : > { %v2812_v37 = vpop.eup %2811  ;;  %2837 = vrcp.f32 %v1858_v26  ;;  %v1849_v27 = vadd.f32 1.0, %v2810_v0  ;;  %v2336_v21 = vmul.f32 -1.442695, %v1603_v41 }
 0x1d1   : > { %v2814_v18 = vpop.eup %2813  ;;  %2038 = vst.msk [vmem:[%s3259_s6 + $0x138] sm:$0xff] %vm1998_vm1, %v2812_v37  ;;  %2839 = vrcp.f32 %v1861_v30 }
 0x1d2   : > { %v2816_v32 = vpop.eup %2815  ;;  %2049 = vst.msk [vmem:[%s3259_s6 + $0x190] sm:$0xff] %vm1998_vm1, %v2814_v18  ;;  %2841 = vrcp.f32 %v1849_v27 }
 0x1d3   : > { %v2818_v57 = vpop.eup %2817  ;;  %v1859_v43 = vadd.f32 1.0, %v2816_v32  ;;  %2843 = vpow2.f32 %v2320_v31 }
 0x1d4   : > { %v2820_v46 = vpop.eup %2819  ;;  %2039 = vst.msk [vmem:[%s3259_s6 + $0x140] sm:$0xff] %vm1998_vm1, %v2818_v57  ;;  %2845 = vpow2.f32 %v2334_v34 }
 0x1d5   : > { %v2822_v51 = vpop.eup %2821  ;;  %2847 = vrcp.f32 %v1859_v43  ;;  %v1850_v54 = vadd.f32 1.0, %v2820_v46 }
 0x1d6   : > { %v2824_v59 = vpop.eup %2823  ;;  %2047 = vst.msk [vmem:[%s3259_s6 + $0x180] sm:$0xff] %vm1998_vm1, %v2822_v51  ;;  %2849 = vpow2.f32 %v2332_v58 }
 0x1d7   : > { %v2826_v50 = vpop.eup %2825  ;;  %2050 = vst.msk [vmem:[%s3259_s6 + $0x198] sm:$0xff] %vm1998_vm1, %v2824_v59  ;;  %2851 = vrcp.f32 %v1850_v54 }
 0x1d8   : > { %v2828_v42 = vpop.eup %2827  ;;  %2040 = vst.msk [vmem:[%s3259_s6 + $0x148] sm:$0xff] %vm1998_vm1, %v2826_v50  ;;  %2853 = vpow2.f32 %v2321_v4 }
 0x1d9   : > { %v2830_v36 = vpop.eup %2829  ;;  %v1864_v11 = vadd.f32 1.0, %v2828_v42  ;;  %2855 = vpow2.f32 %v2337_v49 }
 0x1da   : > { %v2832_v3 = vpop.eup %2831  ;;  %2048 = vst.msk [vmem:[%s3259_s6 + $0x188] sm:$0xff] %vm1998_vm1, %v2830_v36  ;;  %2857 = vpow2.f32 %v2335_v63 }
 0x1db   : > { %v2834_v22 = vpop.eup %2833  ;;  %2053 = vst.msk [vmem:[%s3259_s6 + $0x1b0] sm:$0xff] %vm1998_vm1, %v2832_v3  ;;  %2859 = vrcp.f32 %v1864_v11 }
 0x1dc   : > { %v2836_v5 = vpop.eup %2835  ;;  %2041 = vst.msk [vmem:[%s3259_s6 + $0x150] sm:$0xff] %vm1998_vm1, %v2834_v22  ;;  %2861 = vpow2.f32 %v2322_v16 }
 0x1dd   : > { %v2838_v6 = vpop.eup %2837  ;;  %v1862_v13 = vadd.f32 1.0, %v2836_v5  ;;  %2863 = vpow2.f32 %v2338_v2 }
 0x1de   : > { %v2840_v38 = vpop.eup %2839  ;;  %2051 = vst.msk [vmem:[%s3259_s6 + $0x1a0] sm:$0xff] %vm1998_vm1, %v2838_v6  ;;  %2865 = vpow2.f32 %v2336_v21 }
 0x1df   : > { %v2842_v7 = vpop.eup %2841  ;;  %2054 = vst.msk [vmem:[%s3259_s6 + $0x1b8] sm:$0xff] %vm1998_vm1, %v2840_v38  ;;  %2867 = vrcp.f32 %v1862_v13 }
 0x1e0   : > { %v2844_v10 = vpop.eup %2843  ;;  %2042 = vst.msk [vmem:[%s3259_s6 + $0x158] sm:$0xff] %vm1998_vm1, %v2842_v7 }
 0x1e1   : > { %v2846_v15 = vpop.eup %2845  ;;  %v1851_v39 = vadd.f32 1.0, %v2844_v10 }
 0x1e2   : > { %v2848_v60 = vpop.eup %2847  ;;  %v1865_v48 = vadd.f32 1.0, %v2846_v15 }
 0x1e3   : > { %v2850_v28 = vpop.eup %2849  ;;  %2052 = vst.msk [vmem:[%s3259_s6 + $0x1a8] sm:$0xff] %vm1998_vm1, %v2848_v60  ;;  %2869 = vrcp.f32 %v1851_v39 }
 0x1e4   : > { %v2852_v40 = vpop.eup %2851  ;;  %2871 = vrcp.f32 %v1865_v48  ;;  %v1863_v20 = vadd.f32 1.0, %v2850_v28 }
 0x1e5   : > { %v2854_v14 = vpop.eup %2853  ;;  %2043 = vst.msk [vmem:[%s3259_s6 + $0x160] sm:$0xff] %vm1998_vm1, %v2852_v40 }
 0x1e6   : > { %v2856_v52 = vpop.eup %2855  ;;  %2873 = vrcp.f32 %v1863_v20  ;;  %v1852_v61 = vadd.f32 1.0, %v2854_v14 }
 0x1e7   : > { %v2858_v33 = vpop.eup %2857  ;;  %v1868_v9 = vadd.f32 1.0, %v2856_v52 }
 0x1e8   : > { %v2860_v55 = vpop.eup %2859  ;;  %2875 = vrcp.f32 %v1852_v61  ;;  %v1866_v17 = vadd.f32 1.0, %v2858_v33 }
 0x1e9   : > { %v2862_v24 = vpop.eup %2861  ;;  %2057 = vst.msk [vmem:[%s3259_s6 + $0x1d0] sm:$0xff] %vm1998_vm1, %v2860_v55  ;;  %2877 = vrcp.f32 %v1868_v9 }
 0x1ea   : > { %v2864_v53 = vpop.eup %2863  ;;  %2879 = vrcp.f32 %v1866_v17  ;;  %v1853_v8 = vadd.f32 1.0, %v2862_v24 }
 0x1eb   : > { %v2866_v62 = vpop.eup %2865  ;;  %v1869_v26 = vadd.f32 1.0, %v2864_v53 }
 0x1ec   : > { %v2868_v25 = vpop.eup %2867  ;;  %2881 = vrcp.f32 %v1853_v8  ;;  %v1867_v0 = vadd.f32 1.0, %v2866_v62 }
 0x1ed   : > { %2055 = vst.msk [vmem:[%s3259_s6 + $0x1c0] sm:$0xff] %vm1998_vm1, %v2868_v25  ;;  %2883 = vrcp.f32 %v1869_v26 }
 0x1ee   : > { %2885 = vrcp.f32 %v1867_v0 }
 0x1f0   : > { %v2870_v30 = vpop.eup %2869 }
 0x1f1   : > { %v2872_v31 = vpop.eup %2871  ;;  %2044 = vst.msk [vmem:[%s3259_s6 + $0x168] sm:$0xff] %vm1998_vm1, %v2870_v30 }
 0x1f2   : > { %2058 = vst.msk [vmem:[%s3259_s6 + $0x1d8] sm:$0xff] %vm1998_vm1, %v2872_v31 }
 0x1f3   : > { %v2874_v34 = vpop.eup %2873 }
 0x1f4   : > { %2056 = vst.msk [vmem:[%s3259_s6 + $0x1c8] sm:$0xff] %vm1998_vm1, %v2874_v34 }
 0x1f5   : > { %v2876_v56 = vpop.eup %2875 }
 0x1f6   : > { %v2878_v37 = vpop.eup %2877  ;;  %2045 = vst.msk [vmem:[%s3259_s6 + $0x170] sm:$0xff] %vm1998_vm1, %v2876_v56 }
 0x1f7   : > { %v2880_v27 = vpop.eup %2879  ;;  %2061 = vst.msk [vmem:[%s3259_s6 + $0x1f0] sm:$0xff] %vm1998_vm1, %v2878_v37 }
 0x1f8   : > { %2059 = vst.msk [vmem:[%s3259_s6 + $0x1e0] sm:$0xff] %vm1998_vm1, %v2880_v27 }
 0x1f9   : > { %v2882_v23 = vpop.eup %2881 }
 0x1fa   : > { %v2884_v35 = vpop.eup %2883  ;;  %2046 = vst.msk [vmem:[%s3259_s6 + $0x178] sm:$0xff] %vm1998_vm1, %v2882_v23 }
 0x1fb   : > { %v2886_v18 = vpop.eup %2885  ;;  %2062 = vst.msk [vmem:[%s3259_s6 + $0x1f8] sm:$0xff] %vm1998_vm1, %v2884_v35 }
 0x1fc   : > { %2060 = vst.msk [vmem:[%s3259_s6 + $0x1e8] sm:$0xff] %vm1998_vm1, %v2886_v18 }
 0x1fd PF: > { %s15_s14 = sadd.s32 1, %s2894_s14  }
 0x1fe   : > { %p12_p4 = scmp.ge.s32.totalorder %s15_s14, 6  }
 0x200   :  { %14 = sbr.rel (!%p12_p4) target bundleno = 3 (0x3), region = 62 }

</bundles_post_ra>
